<compile_context>
chip_gen: v7x
topology: tpu7x:2x2x1
jax: 0.10.0
libtpu: 0.0.40
codegen_flags: <defaults>
</compile_context>

<pallas_src>
import functools

import jax
import jax.numpy as jnp
from jax.experimental import pallas as pl
from jax.experimental.pallas import tpu as pltpu


# ---------------------------------------------------------------------------
# Pallas kernel 1: tiled matmul, bf16 operands, f32 accumulator
# ---------------------------------------------------------------------------
def _matmul_kernel(a_ref, b_ref, o_ref, acc_ref):
    @pl.when(pl.program_id(2) == 0)
    def _():
        acc_ref[...] = jnp.zeros_like(acc_ref)

    acc_ref[...] += jnp.dot(a_ref[...], b_ref[...],
                            preferred_element_type=jnp.float32)

    @pl.when(pl.program_id(2) == pl.num_programs(2) - 1)
    def _():
        o_ref[...] = acc_ref[...].astype(o_ref.dtype)


def _largest_tile(dim, max_tile, mult):
    t = min(max_tile, dim)
    t -= t % mult
    while t >= mult:
        if dim % t == 0:
            return t
        t -= mult
    return None


def _pad_axis(arr, axis, mult):
    size = arr.shape[axis]
    pad = (-size) % mult
    if pad == 0:
        return arr                      # no HBM copy when shapes already divide
    widths = [(0, 0)] * arr.ndim
    widths[axis] = (0, pad)
    return jnp.pad(arr, widths)


def pallas_matmul(a, b, *, tm=128, tn=128, tk_max=2048):
    """a: [M, K], b: [K, N] -> a @ b as f32 (bf16 MXU operands)."""
    M, K = a.shape
    K2, N = b.shape
    assert K == K2
    a = a.astype(jnp.bfloat16)
    b = b.astype(jnp.bfloat16)

    tk = _largest_tile(K, tk_max, 128)
    if tk is None:                      # ragged K: fall back to padded K-blocks
        tk = min(tk_max, 512)

    a_p = _pad_axis(_pad_axis(a, 0, tm), 1, tk)
    b_p = _pad_axis(_pad_axis(b, 0, tk), 1, tn)
    Mp, Kp = a_p.shape
    _, Np = b_p.shape

    grid = (Mp // tm, Np // tn, Kp // tk)
    out = pl.pallas_call(
        _matmul_kernel,
        out_shape=jax.ShapeDtypeStruct((Mp, Np), jnp.float32),
        grid_spec=pltpu.PrefetchScalarGridSpec(
            num_scalar_prefetch=0,
            grid=grid,
            in_specs=[
                pl.BlockSpec((tm, tk), lambda i, j, k: (i, k)),
                pl.BlockSpec((tk, tn), lambda i, j, k: (k, j)),
            ],
            out_specs=pl.BlockSpec((tm, tn), lambda i, j, k: (i, j)),
            scratch_shapes=[pltpu.VMEM((tm, tn), jnp.float32)],
        ),
        compiler_params=pltpu.CompilerParams(
            dimension_semantics=("parallel", "parallel", "arbitrary")),
    )(a_p, b_p)
    if (Mp, Np) != (M, N):
        out = out[:M, :N]
    return out


# ---------------------------------------------------------------------------
# Pallas kernel 2: fused GroupNorm + ReLU (per-sample parallel grid)
# ---------------------------------------------------------------------------
def _gn_relu_kernel(x_ref, gmat_ref, gmat_t_ref, gamma_ref, beta_ref, o_ref,
                    *, n_per_group, eps):
    x = x_ref[0]                                   # [HW, C] f32
    gmat = gmat_ref[...]                           # [C, Gp] one-hot group map
    gmat_t = gmat_t_ref[...]                       # [Gp, C]

    s = jnp.sum(x, axis=0, keepdims=True)          # [1, C]
    ss = jnp.sum(x * x, axis=0, keepdims=True)     # [1, C]
    gsum = jnp.dot(s, gmat, preferred_element_type=jnp.float32)   # [1, Gp]
    gss = jnp.dot(ss, gmat, preferred_element_type=jnp.float32)   # [1, Gp]

    mean_g = gsum / n_per_group
    var_g = jnp.maximum(gss / n_per_group - mean_g * mean_g, 0.0)  # clamp
    inv_g = jax.lax.rsqrt(var_g + eps)

    mean_c = jnp.dot(mean_g, gmat_t, preferred_element_type=jnp.float32)  # [1, C]
    inv_c = jnp.dot(inv_g, gmat_t, preferred_element_type=jnp.float32)    # [1, C]

    y = (x - mean_c) * inv_c * gamma_ref[...] + beta_ref[...]
    o_ref[0] = jnp.maximum(y, 0.0).astype(o_ref.dtype)


def pallas_groupnorm_relu(x, gamma, beta, num_groups, eps=1e-5,
                          out_dtype=jnp.bfloat16):
    """x: [B, HW, C] f32 -> GroupNorm(num_groups) + ReLU, output in out_dtype."""
    B, HW, C = x.shape
    cs = C // num_groups
    Gp = 128  # lane-padded group axis; extra columns are all-zero
    ch = jnp.arange(C)
    gmat = (ch[:, None] // cs == jnp.arange(Gp)[None, :]).astype(jnp.float32)
    gmat_t = gmat.T
    gamma2 = gamma.reshape(1, C).astype(jnp.float32)
    beta2 = beta.reshape(1, C).astype(jnp.float32)

    kernel = functools.partial(_gn_relu_kernel,
                               n_per_group=float(HW * cs), eps=float(eps))
    return pl.pallas_call(
        kernel,
        out_shape=jax.ShapeDtypeStruct((B, HW, C), out_dtype),
        grid_spec=pltpu.PrefetchScalarGridSpec(
            num_scalar_prefetch=0,
            grid=(B,),
            in_specs=[
                pl.BlockSpec((1, HW, C), lambda b: (b, 0, 0)),
                pl.BlockSpec((C, Gp), lambda b: (0, 0)),
                pl.BlockSpec((Gp, C), lambda b: (0, 0)),
                pl.BlockSpec((1, C), lambda b: (0, 0)),
                pl.BlockSpec((1, C), lambda b: (0, 0)),
            ],
            out_specs=pl.BlockSpec((1, HW, C), lambda b: (b, 0, 0)),
        ),
        compiler_params=pltpu.CompilerParams(
            dimension_semantics=("parallel",)),
    )(x.astype(jnp.float32), gmat, gmat_t, gamma2, beta2)


# ---------------------------------------------------------------------------
# Pallas kernel 3: fused concat + final 1x1 conv (+ pool branch + bias)
# out[b, :, :] = sum_i y_i[b] @ wf_i  +  (pool(b) @ wf_pool + bias)
# ---------------------------------------------------------------------------
def _final_conv_kernel(y1_ref, y2_ref, y3_ref, y4_ref, w_ref, pb_ref, o_ref):
    acc = jnp.dot(y1_ref[0], w_ref[0], preferred_element_type=jnp.float32)
    acc = acc + jnp.dot(y2_ref[0], w_ref[1], preferred_element_type=jnp.float32)
    acc = acc + jnp.dot(y3_ref[0], w_ref[2], preferred_element_type=jnp.float32)
    acc = acc + jnp.dot(y4_ref[0], w_ref[3], preferred_element_type=jnp.float32)
    o_ref[0] = acc + pb_ref[0]


def pallas_final_conv(branch_outs, wf_spatial, pool_bias, *, tn=128):
    """branch_outs: 4x [B, HW, 256] bf16, wf_spatial: [4, 256, N] bf16,
    pool_bias: [B, 1, N] f32 (pool-branch contribution + conv bias)."""
    B, HW, Cb = branch_outs[0].shape
    _, _, N = wf_spatial.shape
    assert N % tn == 0
    grid = (B, N // tn)
    in_specs = [pl.BlockSpec((1, HW, Cb), lambda b, j: (b, 0, 0))
                for _ in range(4)]
    in_specs += [
        pl.BlockSpec((4, Cb, tn), lambda b, j: (0, 0, j)),
        pl.BlockSpec((1, 1, tn), lambda b, j: (b, 0, j)),
    ]
    return pl.pallas_call(
        _final_conv_kernel,
        out_shape=jax.ShapeDtypeStruct((B, HW, N), jnp.float32),
        grid_spec=pltpu.PrefetchScalarGridSpec(
            num_scalar_prefetch=0,
            grid=grid,
            in_specs=in_specs,
            out_specs=pl.BlockSpec((1, HW, tn), lambda b, j: (b, 0, j)),
        ),
        compiler_params=pltpu.CompilerParams(
            dimension_semantics=("parallel", "parallel")),
    )(*branch_outs, wf_spatial, pool_bias)


# ---------------------------------------------------------------------------
# MSEncoder forward (ASPP + final 1x1 conv)
# ---------------------------------------------------------------------------
def ms_encoder_forward(x_nchw, params, output_stride=16):
    B, Cin, H, W = x_nchw.shape
    HW = H * W
    rates = [0, 6, 12, 18] if output_stride == 16 else [0, 12, 24, 36]

    x_nhwc = jnp.transpose(x_nchw, (0, 2, 3, 1)).astype(jnp.float32)  # NHWC
    x_flat_bf16 = x_nhwc.astype(jnp.bfloat16).reshape(B * HW, Cin)

    # branch 1: 1x1 conv -> GN(8) -> ReLU
    w1 = params["w1"].reshape(256, Cin).T                             # [Cin,256]
    y1 = pallas_matmul(x_flat_bf16, w1)                               # [M,256] f32
    y1 = pallas_groupnorm_relu(y1.reshape(B, HW, 256),
                               params["gn1_g"], params["gn1_b"], 8)
    branch_outs = [y1]

    # branches 2-4: dilated 3x3 conv -> GN(8) -> ReLU
    # Only taps whose offset stays inside the feature map can contribute;
    # the rest hit pure zero-padding and are pruned at trace time.
    for idx, d in zip((2, 3, 4), rates[1:4]):
        w = params[f"w{idx}"]                                         # [256,Cin,3,3]
        taps = [(ky, kx, (ky - 1) * d, (kx - 1) * d)
                for ky in range(3) for kx in range(3)
                if abs((ky - 1) * d) < H and abs((kx - 1) * d) < W]
        T = len(taps)
        wmat = jnp.concatenate([w[:, :, ky, kx].T for (ky, kx, _, _) in taps],
                               axis=1)                                # [Cin, T*256]
        z = pallas_matmul(x_flat_bf16, wmat)                          # [M, T*256] f32
        z = z.reshape(B, H, W, T, 256)

        # Shift-sum over taps (tiny elementwise work; kept in plain JAX).
        if T == 1 and taps[0][2] == 0 and taps[0][3] == 0:
            conv = z[:, :, :, 0, :]
        else:
            conv = jnp.zeros((B, H, W, 256), jnp.float32)
            for t, (_, _, oy, ox) in enumerate(taps):
                ys0, ys1 = max(0, -oy), min(H, H - oy)
                xs0, xs1 = max(0, -ox), min(W, W - ox)
                conv = conv.at[:, ys0:ys1, xs0:xs1, :].add(
                    z[:, ys0 + oy:ys1 + oy, xs0 + ox:xs1 + ox, t, :])

        yb = pallas_groupnorm_relu(conv.reshape(B, HW, 256),
                                   params[f"gn{idx}_g"], params[f"gn{idx}_b"], 8)
        branch_outs.append(yb)

    # branch 5: global avg pool -> 1x1 conv -> GN(32) -> ReLU.
    # Tiny ([B, 256] of work) -> plain JAX; its bilinear upsample from a 1x1
    # map (align_corners=True) is a broadcast, folded into the final-conv bias.
    pooled = jnp.mean(x_nhwc, axis=(1, 2))                            # [B, Cin]
    wp = params["wp"].reshape(256, Cin).T                             # [Cin, 256]
    yp = pooled @ wp                                                  # [B, 256]
    gp, cs = 32, 256 // 32
    ypg = yp.reshape(B, gp, cs)
    mu = ypg.mean(-1, keepdims=True)
    var = jnp.maximum(((ypg - mu) ** 2).mean(-1, keepdims=True), 0.0)
    ypn = (ypg - mu) * jax.lax.rsqrt(var + 1e-5)
    ypn = ypn.reshape(B, 256) * params["gnp_g"] + params["gnp_b"]
    ypr = jnp.maximum(ypn, 0.0)                                       # [B, 256]

    # final 1x1 conv (1280 -> 384), fused with the channel concat.
    wf = params["wf"].reshape(384, 1280).T                            # [1280, 384]
    wf_spatial = wf[:1024].reshape(4, 256, 384).astype(jnp.bfloat16)
    wf_pool = wf[1024:]                                               # [256, 384]
    pool_bias = (ypr @ wf_pool + params["bf"]).reshape(B, 1, 384)
    pool_bias = pool_bias.astype(jnp.float32)

    out = pallas_final_conv(branch_outs, wf_spatial, pool_bias)       # [B,HW,384]
    out = out.reshape(B, H, W, 384)
    return jnp.transpose(out, (0, 3, 1, 2))                           # NCHW


# ---------------------------------------------------------------------------
# Deterministic parameter init (shapes dictated by the PyTorch __init__)
# ---------------------------------------------------------------------------
def init_params(key, cin=2048):
    ks = jax.random.split(key, 7)

    def w(k, shape, fan_in):
        return jax.random.normal(k, shape, jnp.float32) / jnp.sqrt(fan_in)

    p = {
        "w1": w(ks[0], (256, cin, 1, 1), cin),
        "w2": w(ks[1], (256, cin, 3, 3), cin * 9),
        "w3": w(ks[2], (256, cin, 3, 3), cin * 9),
        "w4": w(ks[3], (256, cin, 3, 3), cin * 9),
        "wp": w(ks[4], (256, cin, 1, 1), cin),
        "wf": w(ks[5], (384, 1280, 1, 1), 1280),
        "bf": jax.random.normal(ks[6], (384,), jnp.float32) * 0.01,
    }
    for name in ("gn1", "gn2", "gn3", "gn4", "gnp"):
        p[name + "_g"] = jnp.ones((256,), jnp.float32)   # PyTorch GN default
        p[name + "_b"] = jnp.zeros((256,), jnp.float32)
    return p


if __name__ == "__main__":
    key = jax.random.PRNGKey(0)
    kp, kx = jax.random.split(key)

    # Small spatial size; channel count (2048) is fixed by the module weights.
    B, Cin, H, W = 2, 2048, 8, 8
    params = init_params(kp, Cin)
    x = jax.random.normal(kx, (B, Cin, H, W), jnp.float32)

    out = jax.jit(ms_encoder_forward)(x, params)
    out = jax.block_until_ready(out)
    assert out.shape == (B, 384, H, W), out.shape
    assert bool(jnp.all(jnp.isfinite(out)))
    print("KERNEL_OK")
</pallas_src>

<mosaic_0001>
module attributes {stable_mosaic.version = 11 : i64} {
  func.func @_matmul_kernel(%arg0: i32, %arg1: i32, %arg2: i32, %arg3: memref<128x2048xbf16, #tpu.memory_space<vmem>>, %arg4: memref<2048x128xbf16, #tpu.memory_space<vmem>>, %arg5: memref<128x128xf32, #tpu.memory_space<vmem>>, %arg6: memref<128x128xf32, #tpu.memory_space<vmem>>) attributes {dimension_semantics = [#tpu.dimension_semantics<parallel>, #tpu.dimension_semantics<parallel>, #tpu.dimension_semantics<arbitrary>], iteration_bounds = array<i64: 1, 18, 1>, scalar_prefetch = 0 : i64, scratch_operands = 1 : i64, tpu.core_type = #tpu.core_type<tc>, window_params = [{transform_indices = @transform_0, window_bounds = array<i64: 128, 2048>}, {transform_indices = @transform_1, window_bounds = array<i64: 2048, 128>}, {transform_indices = @transform_2, window_bounds = array<i64: 128, 128>}]} {
    %c0_i32 = arith.constant 0 : i32
    %0 = arith.cmpi eq, %arg2, %c0_i32 : i32
    %1 = arith.extui %0 : i1 to i32
    %c0_i32_0 = arith.constant 0 : i32
    %2 = arith.cmpi ne, %1, %c0_i32_0 : i32
    scf.if %2 {
      %cst_10 = arith.constant 0.000000e+00 : f32
      %12 = vector.broadcast %cst_10 : f32 to vector<128x128xf32>
      %c0_11 = arith.constant 0 : index
      %c0_12 = arith.constant 0 : index
      %13 = vector.load %arg6[%c0_11, %c0_12] : memref<128x128xf32, #tpu.memory_space<vmem>>, vector<128x128xf32>
      tpu.vector_store %arg6[%c0_11, %c0_12], %12 {strides = array<i32>} : memref<128x128xf32, #tpu.memory_space<vmem>>, vector<128x128xf32>,
    } else {
    }
    %c0 = arith.constant 0 : index
    %c0_1 = arith.constant 0 : index
    %3 = vector.load %arg6[%c0, %c0_1] : memref<128x128xf32, #tpu.memory_space<vmem>>, vector<128x128xf32>
    %c0_2 = arith.constant 0 : index
    %c0_3 = arith.constant 0 : index
    %4 = vector.load %arg3[%c0_2, %c0_3] : memref<128x2048xbf16, #tpu.memory_space<vmem>>, vector<128x2048xbf16>
    %c0_4 = arith.constant 0 : index
    %c0_5 = arith.constant 0 : index
    %5 = vector.load %arg4[%c0_4, %c0_5] : memref<2048x128xbf16, #tpu.memory_space<vmem>>, vector<2048x128xbf16>
    %cst = arith.constant dense<0.000000e+00> : vector<128x128xf32>
    %6 = tpu.matmul %4, %5, %cst {dimension_numbers = #tpu.dot_dimension_numbers<[1], [0], [0], [1], [0, 0, 1, 1], [], []>} : vector<128x2048xbf16>, vector<2048x128xbf16>, vector<128x128xf32> -> vector<128x128xf32>
    %7 = arith.addf %3, %6 : vector<128x128xf32>
    %c0_6 = arith.constant 0 : index
    %c0_7 = arith.constant 0 : index
    %8 = vector.load %arg6[%c0_6, %c0_7] : memref<128x128xf32, #tpu.memory_space<vmem>>, vector<128x128xf32>
    tpu.vector_store %arg6[%c0_6, %c0_7], %7 {strides = array<i32>} : memref<128x128xf32, #tpu.memory_space<vmem>>, vector<128x128xf32>,
    %c0_i32_8 = arith.constant 0 : i32
    %9 = arith.cmpi eq, %arg2, %c0_i32_8 : i32
    %10 = arith.extui %9 : i1 to i32
    %c0_i32_9 = arith.constant 0 : i32
    %11 = arith.cmpi ne, %10, %c0_i32_9 : i32
    scf.if %11 {
      %c0_10 = arith.constant 0 : index
      %c0_11 = arith.constant 0 : index
      %12 = vector.load %arg6[%c0_10, %c0_11] : memref<128x128xf32, #tpu.memory_space<vmem>>, vector<128x128xf32>
      %c0_12 = arith.constant 0 : index
      %c0_13 = arith.constant 0 : index
      %13 = vector.load %arg5[%c0_12, %c0_13] : memref<128x128xf32, #tpu.memory_space<vmem>>, vector<128x128xf32>
      tpu.vector_store %arg5[%c0_12, %c0_13], %12 {strides = array<i32>} : memref<128x128xf32, #tpu.memory_space<vmem>>, vector<128x128xf32>,
    } else {
    }
    return
  }
  func.func @transform_0(%arg0: i32, %arg1: i32, %arg2: i32) -> (i32, i32) {
    %c0_i32 = arith.constant 0 : i32
    return %arg0, %arg2 : i32, i32
  }
  func.func @transform_1(%arg0: i32, %arg1: i32, %arg2: i32) -> (i32, i32) {
    %c0_i32 = arith.constant 0 : i32
    return %arg2, %arg1 : i32, i32
  }
  func.func @transform_2(%arg0: i32, %arg1: i32, %arg2: i32) -> (i32, i32) {
    %c0_i32 = arith.constant 0 : i32
    return %arg0, %arg1 : i32, i32
  }
}

module attributes {stable_mosaic.version = 11 : i64} {
  func.func @_gn_relu_kernel(%arg0: i32, %arg1: memref<1x64x256xf32, #tpu.memory_space<vmem>>, %arg2: memref<256x128xf32, #tpu.memory_space<vmem>>, %arg3: memref<128x256xf32, #tpu.memory_space<vmem>>, %arg4: memref<1x256xf32, #tpu.memory_space<vmem>>, %arg5: memref<1x256xf32, #tpu.memory_space<vmem>>, %arg6: memref<1x64x256xbf16, #tpu.memory_space<vmem>>) attributes {dimension_semantics = [#tpu.dimension_semantics<parallel>], iteration_bounds = array<i64: 2>, scalar_prefetch = 0 : i64, scratch_operands = 0 : i64, tpu.core_type = #tpu.core_type<tc>, window_params = [{transform_indices = @transform_0, window_bounds = array<i64: 1, 64, 256>}, {pipeline_mode = #tpu.pipeline_mode<synchronous>, transform_indices = @transform_1, window_bounds = array<i64: 256, 128>}, {pipeline_mode = #tpu.pipeline_mode<synchronous>, transform_indices = @transform_2, window_bounds = array<i64: 128, 256>}, {pipeline_mode = #tpu.pipeline_mode<synchronous>, transform_indices = @transform_3, window_bounds = array<i64: 1, 256>}, {pipeline_mode = #tpu.pipeline_mode<synchronous>, transform_indices = @transform_4, window_bounds = array<i64: 1, 256>}, {transform_indices = @transform_5, window_bounds = array<i64: 1, 64, 256>}]} {
    %c0 = arith.constant 0 : index
    %c0_0 = arith.constant 0 : index
    %c0_1 = arith.constant 0 : index
    %0 = vector.load %arg1[%c0, %c0_0, %c0_1] : memref<1x64x256xf32, #tpu.memory_space<vmem>>, vector<1x64x256xf32>
    %1 = vector.shape_cast %0 : vector<1x64x256xf32> to vector<64x256xf32>
    %c0_2 = arith.constant 0 : index
    %c0_3 = arith.constant 0 : index
    %2 = vector.load %arg2[%c0_2, %c0_3] : memref<256x128xf32, #tpu.memory_space<vmem>>, vector<256x128xf32>
    %c0_4 = arith.constant 0 : index
    %c0_5 = arith.constant 0 : index
    %3 = vector.load %arg3[%c0_4, %c0_5] : memref<128x256xf32, #tpu.memory_space<vmem>>, vector<128x256xf32>
    %cst = arith.constant dense<0.000000e+00> : vector<256xf32>
    %4 = vector.multi_reduction <add>, %1, %cst [0] : vector<64x256xf32> to vector<256xf32>
    %5 = vector.shape_cast %4 : vector<256xf32> to vector<1x256xf32>
    %6 = arith.mulf %1, %1 : vector<64x256xf32>
    %cst_6 = arith.constant dense<0.000000e+00> : vector<256xf32>
    %7 = vector.multi_reduction <add>, %6, %cst_6 [0] : vector<64x256xf32> to vector<256xf32>
    %8 = vector.shape_cast %7 : vector<256xf32> to vector<1x256xf32>
    %cst_7 = arith.constant dense<0.000000e+00> : vector<1x128xf32>
    %9 = tpu.matmul %5, %2, %cst_7 {dimension_numbers = #tpu.dot_dimension_numbers<[1], [0], [0], [1], [0, 0, 1, 1], [], []>} : vector<1x256xf32>, vector<256x128xf32>, vector<1x128xf32> -> vector<1x128xf32>
    %cst_8 = arith.constant dense<0.000000e+00> : vector<1x128xf32>
    %10 = tpu.matmul %8, %2, %cst_8 {dimension_numbers = #tpu.dot_dimension_numbers<[1], [0], [0], [1], [0, 0, 1, 1], [], []>} : vector<1x256xf32>, vector<256x128xf32>, vector<1x128xf32> -> vector<1x128xf32>
    %cst_9 = arith.constant 2.048000e+03 : f32
    %11 = vector.broadcast %cst_9 : f32 to vector<1x128xf32>
    %12 = arith.divf %9, %11 : vector<1x128xf32>
    %cst_10 = arith.constant 2.048000e+03 : f32
    %13 = vector.broadcast %cst_10 : f32 to vector<1x128xf32>
    %14 = arith.divf %10, %13 : vector<1x128xf32>
    %15 = arith.mulf %12, %12 : vector<1x128xf32>
    %16 = arith.subf %14, %15 : vector<1x128xf32>
    %cst_11 = arith.constant 0.000000e+00 : f32
    %17 = vector.broadcast %cst_11 : f32 to vector<1x128xf32>
    %18 = arith.maximumf %16, %17 : vector<1x128xf32>
    %cst_12 = arith.constant 9.99999974E-6 : f32
    %19 = vector.broadcast %cst_12 : f32 to vector<1x128xf32>
    %20 = arith.addf %18, %19 : vector<1x128xf32>
    %21 = math.rsqrt %20 : vector<1x128xf32>
    %cst_13 = arith.constant dense<0.000000e+00> : vector<1x256xf32>
    %22 = tpu.matmul %12, %3, %cst_13 {dimension_numbers = #tpu.dot_dimension_numbers<[1], [0], [0], [1], [0, 0, 1, 1], [], []>} : vector<1x128xf32>, vector<128x256xf32>, vector<1x256xf32> -> vector<1x256xf32>
    %cst_14 = arith.constant dense<0.000000e+00> : vector<1x256xf32>
    %23 = tpu.matmul %21, %3, %cst_14 {dimension_numbers = #tpu.dot_dimension_numbers<[1], [0], [0], [1], [0, 0, 1, 1], [], []>} : vector<1x128xf32>, vector<128x256xf32>, vector<1x256xf32> -> vector<1x256xf32>
    %24 = vector.broadcast %22 : vector<1x256xf32> to vector<64x256xf32>
    %25 = arith.subf %1, %24 : vector<64x256xf32>
    %26 = vector.broadcast %23 : vector<1x256xf32> to vector<64x256xf32>
    %27 = arith.mulf %25, %26 : vector<64x256xf32>
    %c0_15 = arith.constant 0 : index
    %c0_16 = arith.constant 0 : index
    %28 = vector.load %arg4[%c0_15, %c0_16] : memref<1x256xf32, #tpu.memory_space<vmem>>, vector<1x256xf32>
    %29 = vector.broadcast %28 : vector<1x256xf32> to vector<64x256xf32>
    %30 = arith.mulf %27, %29 : vector<64x256xf32>
    %c0_17 = arith.constant 0 : index
    %c0_18 = arith.constant 0 : index
    %31 = vector.load %arg5[%c0_17, %c0_18] : memref<1x256xf32, #tpu.memory_space<vmem>>, vector<1x256xf32>
    %32 = vector.broadcast %31 : vector<1x256xf32> to vector<64x256xf32>
    %33 = arith.addf %30, %32 : vector<64x256xf32>
    %cst_19 = arith.constant 0.000000e+00 : f32
    %34 = vector.broadcast %cst_19 : f32 to vector<64x256xf32>
    %35 = arith.maximumf %33, %34 : vector<64x256xf32>
    %36 = arith.truncf %35 : vector<64x256xf32> to vector<64x256xbf16>
    %c0_20 = arith.constant 0 : index
    %c0_21 = arith.constant 0 : index
    %c0_22 = arith.constant 0 : index
    %37 = vector.load %arg6[%c0_20, %c0_21, %c0_22] : memref<1x64x256xbf16, #tpu.memory_space<vmem>>, vector<1x64x256xbf16>
    %38 = vector.shape_cast %37 : vector<1x64x256xbf16> to vector<64x256xbf16>
    %39 = vector.shape_cast %36 : vector<64x256xbf16> to vector<1x64x256xbf16>
    tpu.vector_store %arg6[%c0_20, %c0_21, %c0_22], %39 {strides = array<i32>} : memref<1x64x256xbf16, #tpu.memory_space<vmem>>, vector<1x64x256xbf16>,
    return
  }
  func.func @transform_0(%arg0: i32) -> (i32, i32, i32) {
    %c0_i32 = arith.constant 0 : i32
    %c0_i32_0 = arith.constant 0 : i32
    %c0_i32_1 = arith.constant 0 : i32
    return %arg0, %c0_i32, %c0_i32_0 : i32, i32, i32
  }
  func.func @transform_1(%arg0: i32) -> (i32, i32) {
    %c0_i32 = arith.constant 0 : i32
    %c0_i32_0 = arith.constant 0 : i32
    %c0_i32_1 = arith.constant 0 : i32
    return %c0_i32, %c0_i32_0 : i32, i32
  }
  func.func @transform_2(%arg0: i32) -> (i32, i32) {
    %c0_i32 = arith.constant 0 : i32
    %c0_i32_0 = arith.constant 0 : i32
    %c0_i32_1 = arith.constant 0 : i32
    return %c0_i32, %c0_i32_0 : i32, i32
  }
  func.func @transform_3(%arg0: i32) -> (i32, i32) {
    %c0_i32 = arith.constant 0 : i32
    %c0_i32_0 = arith.constant 0 : i32
    %c0_i32_1 = arith.constant 0 : i32
    return %c0_i32, %c0_i32_0 : i32, i32
  }
  func.func @transform_4(%arg0: i32) -> (i32, i32) {
    %c0_i32 = arith.constant 0 : i32
    %c0_i32_0 = arith.constant 0 : i32
    %c0_i32_1 = arith.constant 0 : i32
    return %c0_i32, %c0_i32_0 : i32, i32
  }
  func.func @transform_5(%arg0: i32) -> (i32, i32, i32) {
    %c0_i32 = arith.constant 0 : i32
    %c0_i32_0 = arith.constant 0 : i32
    %c0_i32_1 = arith.constant 0 : i32
    return %arg0, %c0_i32, %c0_i32_0 : i32, i32, i32
  }
}

module attributes {stable_mosaic.version = 11 : i64} {
  func.func @_matmul_kernel(%arg0: i32, %arg1: i32, %arg2: i32, %arg3: memref<128x2048xbf16, #tpu.memory_space<vmem>>, %arg4: memref<2048x128xbf16, #tpu.memory_space<vmem>>, %arg5: memref<128x128xf32, #tpu.memory_space<vmem>>, %arg6: memref<128x128xf32, #tpu.memory_space<vmem>>) attributes {dimension_semantics = [#tpu.dimension_semantics<parallel>, #tpu.dimension_semantics<parallel>, #tpu.dimension_semantics<arbitrary>], iteration_bounds = array<i64: 1, 2, 1>, scalar_prefetch = 0 : i64, scratch_operands = 1 : i64, tpu.core_type = #tpu.core_type<tc>, window_params = [{transform_indices = @transform_0, window_bounds = array<i64: 128, 2048>}, {transform_indices = @transform_1, window_bounds = array<i64: 2048, 128>}, {transform_indices = @transform_2, window_bounds = array<i64: 128, 128>}]} {
    %c0_i32 = arith.constant 0 : i32
    %0 = arith.cmpi eq, %arg2, %c0_i32 : i32
    %1 = arith.extui %0 : i1 to i32
    %c0_i32_0 = arith.constant 0 : i32
    %2 = arith.cmpi ne, %1, %c0_i32_0 : i32
    scf.if %2 {
      %cst_10 = arith.constant 0.000000e+00 : f32
      %12 = vector.broadcast %cst_10 : f32 to vector<128x128xf32>
      %c0_11 = arith.constant 0 : index
      %c0_12 = arith.constant 0 : index
      %13 = vector.load %arg6[%c0_11, %c0_12] : memref<128x128xf32, #tpu.memory_space<vmem>>, vector<128x128xf32>
      tpu.vector_store %arg6[%c0_11, %c0_12], %12 {strides = array<i32>} : memref<128x128xf32, #tpu.memory_space<vmem>>, vector<128x128xf32>,
    } else {
    }
    %c0 = arith.constant 0 : index
    %c0_1 = arith.constant 0 : index
    %3 = vector.load %arg6[%c0, %c0_1] : memref<128x128xf32, #tpu.memory_space<vmem>>, vector<128x128xf32>
    %c0_2 = arith.constant 0 : index
    %c0_3 = arith.constant 0 : index
    %4 = vector.load %arg3[%c0_2, %c0_3] : memref<128x2048xbf16, #tpu.memory_space<vmem>>, vector<128x2048xbf16>
    %c0_4 = arith.constant 0 : index
    %c0_5 = arith.constant 0 : index
    %5 = vector.load %arg4[%c0_4, %c0_5] : memref<2048x128xbf16, #tpu.memory_space<vmem>>, vector<2048x128xbf16>
    %cst = arith.constant dense<0.000000e+00> : vector<128x128xf32>
    %6 = tpu.matmul %4, %5, %cst {dimension_numbers = #tpu.dot_dimension_numbers<[1], [0], [0], [1], [0, 0, 1, 1], [], []>} : vector<128x2048xbf16>, vector<2048x128xbf16>, vector<128x128xf32> -> vector<128x128xf32>
    %7 = arith.addf %3, %6 : vector<128x128xf32>
    %c0_6 = arith.constant 0 : index
    %c0_7 = arith.constant 0 : index
    %8 = vector.load %arg6[%c0_6, %c0_7] : memref<128x128xf32, #tpu.memory_space<vmem>>, vector<128x128xf32>
    tpu.vector_store %arg6[%c0_6, %c0_7], %7 {strides = array<i32>} : memref<128x128xf32, #tpu.memory_space<vmem>>, vector<128x128xf32>,
    %c0_i32_8 = arith.constant 0 : i32
    %9 = arith.cmpi eq, %arg2, %c0_i32_8 : i32
    %10 = arith.extui %9 : i1 to i32
    %c0_i32_9 = arith.constant 0 : i32
    %11 = arith.cmpi ne, %10, %c0_i32_9 : i32
    scf.if %11 {
      %c0_10 = arith.constant 0 : index
      %c0_11 = arith.constant 0 : index
      %12 = vector.load %arg6[%c0_10, %c0_11] : memref<128x128xf32, #tpu.memory_space<vmem>>, vector<128x128xf32>
      %c0_12 = arith.constant 0 : index
      %c0_13 = arith.constant 0 : index
      %13 = vector.load %arg5[%c0_12, %c0_13] : memref<128x128xf32, #tpu.memory_space<vmem>>, vector<128x128xf32>
      tpu.vector_store %arg5[%c0_12, %c0_13], %12 {strides = array<i32>} : memref<128x128xf32, #tpu.memory_space<vmem>>, vector<128x128xf32>,
    } else {
    }
    return
  }
  func.func @transform_0(%arg0: i32, %arg1: i32, %arg2: i32) -> (i32, i32) {
    %c0_i32 = arith.constant 0 : i32
    return %arg0, %arg2 : i32, i32
  }
  func.func @transform_1(%arg0: i32, %arg1: i32, %arg2: i32) -> (i32, i32) {
    %c0_i32 = arith.constant 0 : i32
    return %arg2, %arg1 : i32, i32
  }
  func.func @transform_2(%arg0: i32, %arg1: i32, %arg2: i32) -> (i32, i32) {
    %c0_i32 = arith.constant 0 : i32
    return %arg0, %arg1 : i32, i32
  }
}

module attributes {stable_mosaic.version = 11 : i64} {
  func.func @_final_conv_kernel(%arg0: i32, %arg1: i32, %arg2: memref<1x64x256xbf16, #tpu.memory_space<vmem>>, %arg3: memref<1x64x256xbf16, #tpu.memory_space<vmem>>, %arg4: memref<1x64x256xbf16, #tpu.memory_space<vmem>>, %arg5: memref<1x64x256xbf16, #tpu.memory_space<vmem>>, %arg6: memref<4x256x128xbf16, #tpu.memory_space<vmem>>, %arg7: memref<1x1x128xf32, #tpu.memory_space<vmem>>, %arg8: memref<1x64x128xf32, #tpu.memory_space<vmem>>) attributes {dimension_semantics = [#tpu.dimension_semantics<parallel>, #tpu.dimension_semantics<parallel>], iteration_bounds = array<i64: 2, 3>, scalar_prefetch = 0 : i64, scratch_operands = 0 : i64, tpu.core_type = #tpu.core_type<tc>, window_params = [{transform_indices = @transform_0, window_bounds = array<i64: 1, 64, 256>}, {transform_indices = @transform_1, window_bounds = array<i64: 1, 64, 256>}, {transform_indices = @transform_2, window_bounds = array<i64: 1, 64, 256>}, {transform_indices = @transform_3, window_bounds = array<i64: 1, 64, 256>}, {transform_indices = @transform_4, window_bounds = array<i64: 4, 256, 128>}, {transform_indices = @transform_5, window_bounds = array<i64: 1, 1, 128>}, {transform_indices = @transform_6, window_bounds = array<i64: 1, 64, 128>}]} {
    %c0 = arith.constant 0 : index
    %c0_0 = arith.constant 0 : index
    %c0_1 = arith.constant 0 : index
    %0 = vector.load %arg2[%c0, %c0_0, %c0_1] : memref<1x64x256xbf16, #tpu.memory_space<vmem>>, vector<1x64x256xbf16>
    %1 = vector.shape_cast %0 : vector<1x64x256xbf16> to vector<64x256xbf16>
    %c0_2 = arith.constant 0 : index
    %c0_3 = arith.constant 0 : index
    %c0_4 = arith.constant 0 : index
    %2 = vector.load %arg6[%c0_2, %c0_3, %c0_4] : memref<4x256x128xbf16, #tpu.memory_space<vmem>>, vector<1x256x128xbf16>
    %3 = vector.shape_cast %2 : vector<1x256x128xbf16> to vector<256x128xbf16>
    %cst = arith.constant dense<0.000000e+00> : vector<64x128xf32>
    %4 = tpu.matmul %1, %3, %cst {dimension_numbers = #tpu.dot_dimension_numbers<[1], [0], [0], [1], [0, 0, 1, 1], [], []>} : vector<64x256xbf16>, vector<256x128xbf16>, vector<64x128xf32> -> vector<64x128xf32>
    %c0_5 = arith.constant 0 : index
    %c0_6 = arith.constant 0 : index
    %c0_7 = arith.constant 0 : index
    %5 = vector.load %arg3[%c0_5, %c0_6, %c0_7] : memref<1x64x256xbf16, #tpu.memory_space<vmem>>, vector<1x64x256xbf16>
    %6 = vector.shape_cast %5 : vector<1x64x256xbf16> to vector<64x256xbf16>
    %c1 = arith.constant 1 : index
    %c0_8 = arith.constant 0 : index
    %c0_9 = arith.constant 0 : index
    %7 = vector.load %arg6[%c1, %c0_8, %c0_9] : memref<4x256x128xbf16, #tpu.memory_space<vmem>>, vector<1x256x128xbf16>
    %8 = vector.shape_cast %7 : vector<1x256x128xbf16> to vector<256x128xbf16>
    %cst_10 = arith.constant dense<0.000000e+00> : vector<64x128xf32>
    %9 = tpu.matmul %6, %8, %cst_10 {dimension_numbers = #tpu.dot_dimension_numbers<[1], [0], [0], [1], [0, 0, 1, 1], [], []>} : vector<64x256xbf16>, vector<256x128xbf16>, vector<64x128xf32> -> vector<64x128xf32>
    %10 = arith.addf %4, %9 : vector<64x128xf32>
    %c0_11 = arith.constant 0 : index
    %c0_12 = arith.constant 0 : index
    %c0_13 = arith.constant 0 : index
    %11 = vector.load %arg4[%c0_11, %c0_12, %c0_13] : memref<1x64x256xbf16, #tpu.memory_space<vmem>>, vector<1x64x256xbf16>
    %12 = vector.shape_cast %11 : vector<1x64x256xbf16> to vector<64x256xbf16>
    %c2 = arith.constant 2 : index
    %c0_14 = arith.constant 0 : index
    %c0_15 = arith.constant 0 : index
    %13 = vector.load %arg6[%c2, %c0_14, %c0_15] : memref<4x256x128xbf16, #tpu.memory_space<vmem>>, vector<1x256x128xbf16>
    %14 = vector.shape_cast %13 : vector<1x256x128xbf16> to vector<256x128xbf16>
    %cst_16 = arith.constant dense<0.000000e+00> : vector<64x128xf32>
    %15 = tpu.matmul %12, %14, %cst_16 {dimension_numbers = #tpu.dot_dimension_numbers<[1], [0], [0], [1], [0, 0, 1, 1], [], []>} : vector<64x256xbf16>, vector<256x128xbf16>, vector<64x128xf32> -> vector<64x128xf32>
    %16 = arith.addf %10, %15 : vector<64x128xf32>
    %c0_17 = arith.constant 0 : index
    %c0_18 = arith.constant 0 : index
    %c0_19 = arith.constant 0 : index
    %17 = vector.load %arg5[%c0_17, %c0_18, %c0_19] : memref<1x64x256xbf16, #tpu.memory_space<vmem>>, vector<1x64x256xbf16>
    %18 = vector.shape_cast %17 : vector<1x64x256xbf16> to vector<64x256xbf16>
    %c3 = arith.constant 3 : index
    %c0_20 = arith.constant 0 : index
    %c0_21 = arith.constant 0 : index
    %19 = vector.load %arg6[%c3, %c0_20, %c0_21] : memref<4x256x128xbf16, #tpu.memory_space<vmem>>, vector<1x256x128xbf16>
    %20 = vector.shape_cast %19 : vector<1x256x128xbf16> to vector<256x128xbf16>
    %cst_22 = arith.constant dense<0.000000e+00> : vector<64x128xf32>
    %21 = tpu.matmul %18, %20, %cst_22 {dimension_numbers = #tpu.dot_dimension_numbers<[1], [0], [0], [1], [0, 0, 1, 1], [], []>} : vector<64x256xbf16>, vector<256x128xbf16>, vector<64x128xf32> -> vector<64x128xf32>
    %22 = arith.addf %16, %21 : vector<64x128xf32>
    %c0_23 = arith.constant 0 : index
    %c0_24 = arith.constant 0 : index
    %c0_25 = arith.constant 0 : index
    %23 = vector.load %arg7[%c0_23, %c0_24, %c0_25] : memref<1x1x128xf32, #tpu.memory_space<vmem>>, vector<1x1x128xf32>
    %24 = vector.shape_cast %23 : vector<1x1x128xf32> to vector<1x128xf32>
    %25 = vector.broadcast %24 : vector<1x128xf32> to vector<64x128xf32>
    %26 = arith.addf %22, %25 : vector<64x128xf32>
    %c0_26 = arith.constant 0 : index
    %c0_27 = arith.constant 0 : index
    %c0_28 = arith.constant 0 : index
    %27 = vector.load %arg8[%c0_26, %c0_27, %c0_28] : memref<1x64x128xf32, #tpu.memory_space<vmem>>, vector<1x64x128xf32>
    %28 = vector.shape_cast %27 : vector<1x64x128xf32> to vector<64x128xf32>
    %29 = vector.shape_cast %26 : vector<64x128xf32> to vector<1x64x128xf32>
    tpu.vector_store %arg8[%c0_26, %c0_27, %c0_28], %29 {strides = array<i32>} : memref<1x64x128xf32, #tpu.memory_space<vmem>>, vector<1x64x128xf32>,
    return
  }
  func.func @transform_0(%arg0: i32, %arg1: i32) -> (i32, i32, i32) {
    %c0_i32 = arith.constant 0 : i32
    %c0_i32_0 = arith.constant 0 : i32
    %c0_i32_1 = arith.constant 0 : i32
    return %arg0, %c0_i32, %c0_i32_0 : i32, i32, i32
  }
  func.func @transform_1(%arg0: i32, %arg1: i32) -> (i32, i32, i32) {
    %c0_i32 = arith.constant 0 : i32
    %c0_i32_0 = arith.constant 0 : i32
    %c0_i32_1 = arith.constant 0 : i32
    return %arg0, %c0_i32, %c0_i32_0 : i32, i32, i32
  }
  func.func @transform_2(%arg0: i32, %arg1: i32) -> (i32, i32, i32) {
    %c0_i32 = arith.constant 0 : i32
    %c0_i32_0 = arith.constant 0 : i32
    %c0_i32_1 = arith.constant 0 : i32
    return %arg0, %c0_i32, %c0_i32_0 : i32, i32, i32
  }
  func.func @transform_3(%arg0: i32, %arg1: i32) -> (i32, i32, i32) {
    %c0_i32 = arith.constant 0 : i32
    %c0_i32_0 = arith.constant 0 : i32
    %c0_i32_1 = arith.constant 0 : i32
    return %arg0, %c0_i32, %c0_i32_0 : i32, i32, i32
  }
  func.func @transform_4(%arg0: i32, %arg1: i32) -> (i32, i32, i32) {
    %c0_i32 = arith.constant 0 : i32
    %c0_i32_0 = arith.constant 0 : i32
    %c0_i32_1 = arith.constant 0 : i32
    return %c0_i32, %c0_i32_0, %arg1 : i32, i32, i32
  }
  func.func @transform_5(%arg0: i32, %arg1: i32) -> (i32, i32, i32) {
    %c0_i32 = arith.constant 0 : i32
    %c0_i32_0 = arith.constant 0 : i32
    return %arg0, %c0_i32, %arg1 : i32, i32, i32
  }
  func.func @transform_6(%arg0: i32, %arg1: i32) -> (i32, i32, i32) {
    %c0_i32 = arith.constant 0 : i32
    %c0_i32_0 = arith.constant 0 : i32
    return %arg0, %c0_i32, %arg1 : i32, i32, i32
  }
}

</mosaic_0001>

<bundles_post_ra>
// kernel: ms_encoder_forward.11
= control target key start
LH: loop header
LB: loop body
LE: loop exit
PB: predicated region body
PF: predicated region fallthrough
CT: control target
= control target key end

     0   :  { %s5142_s9 = smov 0   ;;  %s5144_s10 = smov 0   ;;  %s6442_s0 = inlined_call_operand.vmem [shape: bf16[128,2048], index: 0, kind: input, shape index: {}]   ;;  %s6443_s1 = inlined_call_operand.vmem [shape: bf16[2048,2304], index: 1, kind: input, shape index: {}]   ;;  %s6444_s2 = inlined_call_operand.vmem [shape: f32[128,2304], index: 2, kind: output, shape index: {}]  }
   0x1   :  { %s5146_s11 = smov 0   ;;  %s5148_s12 = smov 0  }
   0x2   :  { %s5150_s13 = smov 0  }
   0x3 LB: > { %s27_s14 = sadd.s32 1, %s5121_s12  ;;  %s4137_s15 = sadd.s32 4294967295, %s5125_s13   ;;  %s5125_s13 = sphi %s5150_s13, %s12_s13   ;;  %s5121_s12 = sphi %s5148_s12, %s6449_s12   ;;  %s5117_s11 = sphi %s5146_s11, %s6448_s11   ;;  %s5113_s10 = sphi %s5144_s10, %s6447_s10   ;;  %s5109_s9 = sphi %s5142_s9, %s6446_s9  }
   0x4   : > { %p29_p0 = scmp.ge.s32.totalorder %s27_s14, 18  ;;  %p75_p1 = scmp.ne.s32.totalorder %s5113_s10, %s5109_s9 }
   0x5   : > { %p76_p2 = scmp.eq.s32.totalorder %s5125_s13, 0  ;;  %p107_p4 = scmp.eq.s32.totalorder %s4137_s15, 17 }
   0x6   : > { %s6451_s14 = smov (%p29_p0, %s27_s14), 0  ;;  %s68_s17 = sadd.s32 1, %s5113_s10 }
   0x7   : > { %p77_p3 = por %p76_p2, %p75_p1  ;;  %s64_s16 = ssub.s32 %s5121_s12, %s6451_s14 }
   0x8   : > { %p66_p5 = scmp.eq.s32.totalorder %s64_s16, 0  ;;  %p5177_p6 = por %p107_p4, %p75_p1 }
   0x9   : > { %p4141_p7 = scmp.ge.s32.totalorder %s5125_s13, 18 }
   0xa   : > { %s5182_s19 = scalar_select %p66_p5, %s5113_s10, %s68_s17  }
   0xb   : > { %144 = sbr.rel (%p4141_p7) target bundleno = 192 (0xc0), region = 20 }
  0x12   : > { %147 = sbr.rel (!%p77_p3) target bundleno = 192 (0xc0), region = 24  ;;  %s149_s20 = sand.u32 (%p77_p3), 1, %s5113_s10  }
  0x13   : > { %s4143_s21 = sshll.u32 (%p77_p3), %s5121_s12, 2  ;;  %s4142_s22 = sshll.u32 (%p77_p3), %s149_s20, 10 }
  0x14   : > { %s5190_s25 = scalar_lea.vmem (%p77_p3), %s6443_s1, %s4143_s21  ;;  %s5194_s26 = scalar_lea.vmem (%p77_p3), [#allocation3], %s4142_s22 }
  0x15   : > { %v172_v0 = vld [vmem:[%s5190_s25] sm:$0xf] (%p77_p3)  ;;  %v174_v1 = vld [vmem:[%s5190_s25 + $0x48] sm:$0xf] (%p77_p3)  ;;  %v176_v2 = vld [vmem:[%s5190_s25 + $0x90] sm:$0xf] (%p77_p3) }
  0x16   : > { %173 = vst [vmem:[%s5194_s26] sm:$0xf] (%p77_p3), %v172_v0  ;;  %175 = vst [vmem:[%s5194_s26 + $0x4] sm:$0xf] (%p77_p3), %v174_v1  ;;  %v178_v3 = vld [vmem:[%s5190_s25 + $0xd8] sm:$0xf] (%p77_p3) }
  0x17   : > { %v180_v4 = vld [vmem:[%s5190_s25 + $0x120] sm:$0xf] (%p77_p3)  ;;  %177 = vst [vmem:[%s5194_s26 + $0x8] sm:$0xf] (%p77_p3), %v176_v2  ;;  %179 = vst [vmem:[%s5194_s26 + $0xc] sm:$0xf] (%p77_p3), %v178_v3 }
  0x18   : > { %181 = vst [vmem:[%s5194_s26 + $0x10] sm:$0xf] (%p77_p3), %v180_v4  ;;  %v182_v5 = vld [vmem:[%s5190_s25 + $0x168] sm:$0xf] (%p77_p3)  ;;  %v184_v6 = vld [vmem:[%s5190_s25 + $0x1b0] sm:$0xf] (%p77_p3) }
  0x19   : > { %v186_v7 = vld [vmem:[%s5190_s25 + $0x1f8] sm:$0xf]  ;;  %183 = vst [vmem:[%s5194_s26 + $0x14] sm:$0xf] %v182_v5  ;;  %185 = vst [vmem:[%s5194_s26 + $0x18] sm:$0xf] %v184_v6 }
  0x1a   : > { %187 = vst [vmem:[%s5194_s26 + $0x1c] sm:$0xf] %v186_v7  ;;  %v188_v8 = vld [vmem:[%s5190_s25 + $0x240] sm:$0xf]  ;;  %v190_v9 = vld [vmem:[%s5190_s25 + $0x288] sm:$0xf] }
  0x1b   : > { %v192_v10 = vld [vmem:[%s5190_s25 + $0x2d0] sm:$0xf]  ;;  %189 = vst [vmem:[%s5194_s26 + $0x20] sm:$0xf] %v188_v8  ;;  %191 = vst [vmem:[%s5194_s26 + $0x24] sm:$0xf] %v190_v9 }
  0x1c   : > { %193 = vst [vmem:[%s5194_s26 + $0x28] sm:$0xf] %v192_v10  ;;  %v194_v11 = vld [vmem:[%s5190_s25 + $0x318] sm:$0xf]  ;;  %v196_v12 = vld [vmem:[%s5190_s25 + $0x360] sm:$0xf] }
  0x1d   : > { %v198_v13 = vld [vmem:[%s5190_s25 + $0x3a8] sm:$0xf]  ;;  %195 = vst [vmem:[%s5194_s26 + $0x2c] sm:$0xf] %v194_v11  ;;  %197 = vst [vmem:[%s5194_s26 + $0x30] sm:$0xf] %v196_v12 }
  0x1e   : > { %199 = vst [vmem:[%s5194_s26 + $0x34] sm:$0xf] %v198_v13  ;;  %v200_v14 = vld [vmem:[%s5190_s25 + $0x3f0] sm:$0xf]  ;;  %v202_v15 = vld [vmem:[%s5190_s25 + $0x438] sm:$0xf] }
  0x1f   : > { %v204_v16 = vld [vmem:[%s5190_s25 + $0x480] sm:$0xf]  ;;  %201 = vst [vmem:[%s5194_s26 + $0x38] sm:$0xf] %v200_v14  ;;  %203 = vst [vmem:[%s5194_s26 + $0x3c] sm:$0xf] %v202_v15 }
  0x20   : > { %205 = vst [vmem:[%s5194_s26 + $0x40] sm:$0xf] %v204_v16  ;;  %v206_v17 = vld [vmem:[%s5190_s25 + $0x4c8] sm:$0xf]  ;;  %v208_v18 = vld [vmem:[%s5190_s25 + $0x510] sm:$0xf] }
  0x21   : > { %v210_v19 = vld [vmem:[%s5190_s25 + $0x558] sm:$0xf]  ;;  %207 = vst [vmem:[%s5194_s26 + $0x44] sm:$0xf] %v206_v17  ;;  %209 = vst [vmem:[%s5194_s26 + $0x48] sm:$0xf] %v208_v18 }
  0x22   : > { %211 = vst [vmem:[%s5194_s26 + $0x4c] sm:$0xf] %v210_v19  ;;  %v212_v20 = vld [vmem:[%s5190_s25 + $0x5a0] sm:$0xf]  ;;  %v214_v21 = vld [vmem:[%s5190_s25 + $0x5e8] sm:$0xf] }
  0x23   : > { %v216_v22 = vld [vmem:[%s5190_s25 + $0x630] sm:$0xf]  ;;  %213 = vst [vmem:[%s5194_s26 + $0x50] sm:$0xf] %v212_v20  ;;  %215 = vst [vmem:[%s5194_s26 + $0x54] sm:$0xf] %v214_v21 }
  0x24   : > { %217 = vst [vmem:[%s5194_s26 + $0x58] sm:$0xf] %v216_v22  ;;  %v218_v23 = vld [vmem:[%s5190_s25 + $0x678] sm:$0xf]  ;;  %v220_v24 = vld [vmem:[%s5190_s25 + $0x6c0] sm:$0xf] }
  0x25   : > { %v222_v25 = vld [vmem:[%s5190_s25 + $0x708] sm:$0xf]  ;;  %219 = vst [vmem:[%s5194_s26 + $0x5c] sm:$0xf] %v218_v23  ;;  %221 = vst [vmem:[%s5194_s26 + $0x60] sm:$0xf] %v220_v24 }
  0x26   : > { %223 = vst [vmem:[%s5194_s26 + $0x64] sm:$0xf] %v222_v25  ;;  %v224_v26 = vld [vmem:[%s5190_s25 + $0x750] sm:$0xf]  ;;  %v226_v27 = vld [vmem:[%s5190_s25 + $0x798] sm:$0xf] }
  0x27   : > { %v228_v28 = vld [vmem:[%s5190_s25 + $0x7e0] sm:$0xf]  ;;  %225 = vst [vmem:[%s5194_s26 + $0x68] sm:$0xf] %v224_v26  ;;  %227 = vst [vmem:[%s5194_s26 + $0x6c] sm:$0xf] %v226_v27 }
  0x28   : > { %229 = vst [vmem:[%s5194_s26 + $0x70] sm:$0xf] %v228_v28  ;;  %v230_v29 = vld [vmem:[%s5190_s25 + $0x828] sm:$0xf]  ;;  %v232_v30 = vld [vmem:[%s5190_s25 + $0x870] sm:$0xf] }
  0x29   : > { %v234_v31 = vld [vmem:[%s5190_s25 + $0x8b8] sm:$0xf]  ;;  %231 = vst [vmem:[%s5194_s26 + $0x74] sm:$0xf] %v230_v29  ;;  %233 = vst [vmem:[%s5194_s26 + $0x78] sm:$0xf] %v232_v30 }
  0x2a   : > { %235 = vst [vmem:[%s5194_s26 + $0x7c] sm:$0xf] %v234_v31  ;;  %v236_v32 = vld [vmem:[%s5190_s25 + $0x900] sm:$0xf]  ;;  %v238_v33 = vld [vmem:[%s5190_s25 + $0x948] sm:$0xf] }
  0x2b   : > { %v240_v34 = vld [vmem:[%s5190_s25 + $0x990] sm:$0xf]  ;;  %237 = vst [vmem:[%s5194_s26 + $0x80] sm:$0xf] %v236_v32  ;;  %239 = vst [vmem:[%s5194_s26 + $0x84] sm:$0xf] %v238_v33 }
  0x2c   : > { %241 = vst [vmem:[%s5194_s26 + $0x88] sm:$0xf] %v240_v34  ;;  %v242_v35 = vld [vmem:[%s5190_s25 + $0x9d8] sm:$0xf]  ;;  %v244_v36 = vld [vmem:[%s5190_s25 + $0xa20] sm:$0xf] }
  0x2d   : > { %v246_v37 = vld [vmem:[%s5190_s25 + $0xa68] sm:$0xf]  ;;  %243 = vst [vmem:[%s5194_s26 + $0x8c] sm:$0xf] %v242_v35  ;;  %245 = vst [vmem:[%s5194_s26 + $0x90] sm:$0xf] %v244_v36 }
  0x2e   : > { %247 = vst [vmem:[%s5194_s26 + $0x94] sm:$0xf] %v246_v37  ;;  %v248_v38 = vld [vmem:[%s5190_s25 + $0xab0] sm:$0xf]  ;;  %v250_v39 = vld [vmem:[%s5190_s25 + $0xaf8] sm:$0xf] }
  0x2f   : > { %v252_v40 = vld [vmem:[%s5190_s25 + $0xb40] sm:$0xf]  ;;  %249 = vst [vmem:[%s5194_s26 + $0x98] sm:$0xf] %v248_v38  ;;  %251 = vst [vmem:[%s5194_s26 + $0x9c] sm:$0xf] %v250_v39 }
  0x30   : > { %253 = vst [vmem:[%s5194_s26 + $0xa0] sm:$0xf] %v252_v40  ;;  %v254_v41 = vld [vmem:[%s5190_s25 + $0xb88] sm:$0xf]  ;;  %v256_v42 = vld [vmem:[%s5190_s25 + $0xbd0] sm:$0xf] }
  0x31   : > { %v258_v43 = vld [vmem:[%s5190_s25 + $0xc18] sm:$0xf]  ;;  %255 = vst [vmem:[%s5194_s26 + $0xa4] sm:$0xf] %v254_v41  ;;  %257 = vst [vmem:[%s5194_s26 + $0xa8] sm:$0xf] %v256_v42 }
  0x32   : > { %259 = vst [vmem:[%s5194_s26 + $0xac] sm:$0xf] %v258_v43  ;;  %v260_v44 = vld [vmem:[%s5190_s25 + $0xc60] sm:$0xf]  ;;  %v262_v45 = vld [vmem:[%s5190_s25 + $0xca8] sm:$0xf] }
  0x33   : > { %v264_v46 = vld [vmem:[%s5190_s25 + $0xcf0] sm:$0xf]  ;;  %261 = vst [vmem:[%s5194_s26 + $0xb0] sm:$0xf] %v260_v44  ;;  %263 = vst [vmem:[%s5194_s26 + $0xb4] sm:$0xf] %v262_v45 }
  0x34   : > { %265 = vst [vmem:[%s5194_s26 + $0xb8] sm:$0xf] %v264_v46  ;;  %v266_v47 = vld [vmem:[%s5190_s25 + $0xd38] sm:$0xf]  ;;  %v268_v48 = vld [vmem:[%s5190_s25 + $0xd80] sm:$0xf] }
  0x35   : > { %v270_v49 = vld [vmem:[%s5190_s25 + $0xdc8] sm:$0xf]  ;;  %267 = vst [vmem:[%s5194_s26 + $0xbc] sm:$0xf] %v266_v47  ;;  %269 = vst [vmem:[%s5194_s26 + $0xc0] sm:$0xf] %v268_v48 }
  0x36   : > { %271 = vst [vmem:[%s5194_s26 + $0xc4] sm:$0xf] %v270_v49  ;;  %v272_v50 = vld [vmem:[%s5190_s25 + $0xe10] sm:$0xf]  ;;  %v274_v51 = vld [vmem:[%s5190_s25 + $0xe58] sm:$0xf] }
  0x37   : > { %v276_v52 = vld [vmem:[%s5190_s25 + $0xea0] sm:$0xf]  ;;  %273 = vst [vmem:[%s5194_s26 + $0xc8] sm:$0xf] %v272_v50  ;;  %275 = vst [vmem:[%s5194_s26 + $0xcc] sm:$0xf] %v274_v51 }
  0x38   : > { %277 = vst [vmem:[%s5194_s26 + $0xd0] sm:$0xf] %v276_v52  ;;  %v278_v53 = vld [vmem:[%s5190_s25 + $0xee8] sm:$0xf]  ;;  %v280_v54 = vld [vmem:[%s5190_s25 + $0xf30] sm:$0xf] }
  0x39   : > { %v282_v55 = vld [vmem:[%s5190_s25 + $0xf78] sm:$0xf]  ;;  %279 = vst [vmem:[%s5194_s26 + $0xd4] sm:$0xf] %v278_v53  ;;  %281 = vst [vmem:[%s5194_s26 + $0xd8] sm:$0xf] %v280_v54 }
  0x3a   : > { %283 = vst [vmem:[%s5194_s26 + $0xdc] sm:$0xf] %v282_v55  ;;  %v284_v56 = vld [vmem:[%s5190_s25 + $0xfc0] sm:$0xf]  ;;  %v286_v57 = vld [vmem:[%s5190_s25 + $0x1008] sm:$0xf] }
  0x3b   : > { %v288_v58 = vld [vmem:[%s5190_s25 + $0x1050] sm:$0xf]  ;;  %285 = vst [vmem:[%s5194_s26 + $0xe0] sm:$0xf] %v284_v56  ;;  %287 = vst [vmem:[%s5194_s26 + $0xe4] sm:$0xf] %v286_v57 }
  0x3c   : > { %289 = vst [vmem:[%s5194_s26 + $0xe8] sm:$0xf] %v288_v58  ;;  %v290_v59 = vld [vmem:[%s5190_s25 + $0x1098] sm:$0xf]  ;;  %v292_v60 = vld [vmem:[%s5190_s25 + $0x10e0] sm:$0xf] }
  0x3d   : > { %v294_v61 = vld [vmem:[%s5190_s25 + $0x1128] sm:$0xf]  ;;  %291 = vst [vmem:[%s5194_s26 + $0xec] sm:$0xf] %v290_v59  ;;  %293 = vst [vmem:[%s5194_s26 + $0xf0] sm:$0xf] %v292_v60 }
  0x3e   : > { %295 = vst [vmem:[%s5194_s26 + $0xf4] sm:$0xf] %v294_v61  ;;  %v296_v62 = vld [vmem:[%s5190_s25 + $0x1170] sm:$0xf]  ;;  %v298_v63 = vld [vmem:[%s5190_s25 + $0x11b8] sm:$0xf] }
  0x3f   : > { %v300_v0 = vld [vmem:[%s5190_s25 + $0x1200] sm:$0xf]  ;;  %297 = vst [vmem:[%s5194_s26 + $0xf8] sm:$0xf] %v296_v62  ;;  %299 = vst [vmem:[%s5194_s26 + $0xfc] sm:$0xf] %v298_v63 }
  0x40   : > { %301 = vst [vmem:[%s5194_s26 + $0x100] sm:$0xf] %v300_v0  ;;  %v302_v1 = vld [vmem:[%s5190_s25 + $0x1248] sm:$0xf]  ;;  %v304_v2 = vld [vmem:[%s5190_s25 + $0x1290] sm:$0xf] }
  0x41   : > { %v306_v3 = vld [vmem:[%s5190_s25 + $0x12d8] sm:$0xf]  ;;  %303 = vst [vmem:[%s5194_s26 + $0x104] sm:$0xf] %v302_v1  ;;  %305 = vst [vmem:[%s5194_s26 + $0x108] sm:$0xf] %v304_v2 }
  0x42   : > { %307 = vst [vmem:[%s5194_s26 + $0x10c] sm:$0xf] %v306_v3  ;;  %v308_v4 = vld [vmem:[%s5190_s25 + $0x1320] sm:$0xf]  ;;  %v310_v5 = vld [vmem:[%s5190_s25 + $0x1368] sm:$0xf] }
  0x43   : > { %v312_v6 = vld [vmem:[%s5190_s25 + $0x13b0] sm:$0xf]  ;;  %309 = vst [vmem:[%s5194_s26 + $0x110] sm:$0xf] %v308_v4  ;;  %311 = vst [vmem:[%s5194_s26 + $0x114] sm:$0xf] %v310_v5 }
  0x44   : > { %313 = vst [vmem:[%s5194_s26 + $0x118] sm:$0xf] %v312_v6  ;;  %v314_v7 = vld [vmem:[%s5190_s25 + $0x13f8] sm:$0xf]  ;;  %v316_v8 = vld [vmem:[%s5190_s25 + $0x1440] sm:$0xf] }
  0x45   : > { %v318_v9 = vld [vmem:[%s5190_s25 + $0x1488] sm:$0xf]  ;;  %315 = vst [vmem:[%s5194_s26 + $0x11c] sm:$0xf] %v314_v7  ;;  %317 = vst [vmem:[%s5194_s26 + $0x120] sm:$0xf] %v316_v8 }
  0x46   : > { %319 = vst [vmem:[%s5194_s26 + $0x124] sm:$0xf] %v318_v9  ;;  %v320_v10 = vld [vmem:[%s5190_s25 + $0x14d0] sm:$0xf]  ;;  %v322_v11 = vld [vmem:[%s5190_s25 + $0x1518] sm:$0xf] }
  0x47   : > { %v324_v12 = vld [vmem:[%s5190_s25 + $0x1560] sm:$0xf]  ;;  %321 = vst [vmem:[%s5194_s26 + $0x128] sm:$0xf] %v320_v10  ;;  %323 = vst [vmem:[%s5194_s26 + $0x12c] sm:$0xf] %v322_v11 }
  0x48   : > { %325 = vst [vmem:[%s5194_s26 + $0x130] sm:$0xf] %v324_v12  ;;  %v326_v13 = vld [vmem:[%s5190_s25 + $0x15a8] sm:$0xf]  ;;  %v328_v14 = vld [vmem:[%s5190_s25 + $0x15f0] sm:$0xf] }
  0x49   : > { %v330_v15 = vld [vmem:[%s5190_s25 + $0x1638] sm:$0xf]  ;;  %327 = vst [vmem:[%s5194_s26 + $0x134] sm:$0xf] %v326_v13  ;;  %329 = vst [vmem:[%s5194_s26 + $0x138] sm:$0xf] %v328_v14 }
  0x4a   : > { %331 = vst [vmem:[%s5194_s26 + $0x13c] sm:$0xf] %v330_v15  ;;  %v332_v16 = vld [vmem:[%s5190_s25 + $0x1680] sm:$0xf]  ;;  %v334_v17 = vld [vmem:[%s5190_s25 + $0x16c8] sm:$0xf] }
  0x4b   : > { %v336_v18 = vld [vmem:[%s5190_s25 + $0x1710] sm:$0xf]  ;;  %333 = vst [vmem:[%s5194_s26 + $0x140] sm:$0xf] %v332_v16  ;;  %335 = vst [vmem:[%s5194_s26 + $0x144] sm:$0xf] %v334_v17 }
  0x4c   : > { %337 = vst [vmem:[%s5194_s26 + $0x148] sm:$0xf] %v336_v18  ;;  %v338_v19 = vld [vmem:[%s5190_s25 + $0x1758] sm:$0xf]  ;;  %v340_v20 = vld [vmem:[%s5190_s25 + $0x17a0] sm:$0xf] }
  0x4d   : > { %v342_v21 = vld [vmem:[%s5190_s25 + $0x17e8] sm:$0xf]  ;;  %339 = vst [vmem:[%s5194_s26 + $0x14c] sm:$0xf] %v338_v19  ;;  %341 = vst [vmem:[%s5194_s26 + $0x150] sm:$0xf] %v340_v20 }
  0x4e   : > { %343 = vst [vmem:[%s5194_s26 + $0x154] sm:$0xf] %v342_v21  ;;  %v344_v22 = vld [vmem:[%s5190_s25 + $0x1830] sm:$0xf]  ;;  %v346_v23 = vld [vmem:[%s5190_s25 + $0x1878] sm:$0xf] }
  0x4f   : > { %v348_v24 = vld [vmem:[%s5190_s25 + $0x18c0] sm:$0xf]  ;;  %345 = vst [vmem:[%s5194_s26 + $0x158] sm:$0xf] %v344_v22  ;;  %347 = vst [vmem:[%s5194_s26 + $0x15c] sm:$0xf] %v346_v23 }
  0x50   : > { %349 = vst [vmem:[%s5194_s26 + $0x160] sm:$0xf] %v348_v24  ;;  %v350_v25 = vld [vmem:[%s5190_s25 + $0x1908] sm:$0xf]  ;;  %v352_v26 = vld [vmem:[%s5190_s25 + $0x1950] sm:$0xf] }
  0x51   : > { %v354_v27 = vld [vmem:[%s5190_s25 + $0x1998] sm:$0xf]  ;;  %351 = vst [vmem:[%s5194_s26 + $0x164] sm:$0xf] %v350_v25  ;;  %353 = vst [vmem:[%s5194_s26 + $0x168] sm:$0xf] %v352_v26 }
  0x52   : > { %355 = vst [vmem:[%s5194_s26 + $0x16c] sm:$0xf] %v354_v27  ;;  %v356_v28 = vld [vmem:[%s5190_s25 + $0x19e0] sm:$0xf]  ;;  %v358_v29 = vld [vmem:[%s5190_s25 + $0x1a28] sm:$0xf] }
  0x53   : > { %v360_v30 = vld [vmem:[%s5190_s25 + $0x1a70] sm:$0xf]  ;;  %357 = vst [vmem:[%s5194_s26 + $0x170] sm:$0xf] %v356_v28  ;;  %359 = vst [vmem:[%s5194_s26 + $0x174] sm:$0xf] %v358_v29 }
  0x54   : > { %361 = vst [vmem:[%s5194_s26 + $0x178] sm:$0xf] %v360_v30  ;;  %v362_v31 = vld [vmem:[%s5190_s25 + $0x1ab8] sm:$0xf]  ;;  %v364_v32 = vld [vmem:[%s5190_s25 + $0x1b00] sm:$0xf] }
  0x55   : > { %v366_v33 = vld [vmem:[%s5190_s25 + $0x1b48] sm:$0xf]  ;;  %363 = vst [vmem:[%s5194_s26 + $0x17c] sm:$0xf] %v362_v31  ;;  %365 = vst [vmem:[%s5194_s26 + $0x180] sm:$0xf] %v364_v32 }
  0x56   : > { %367 = vst [vmem:[%s5194_s26 + $0x184] sm:$0xf] %v366_v33  ;;  %v368_v34 = vld [vmem:[%s5190_s25 + $0x1b90] sm:$0xf]  ;;  %v370_v35 = vld [vmem:[%s5190_s25 + $0x1bd8] sm:$0xf] }
  0x57   : > { %v372_v36 = vld [vmem:[%s5190_s25 + $0x1c20] sm:$0xf]  ;;  %369 = vst [vmem:[%s5194_s26 + $0x188] sm:$0xf] %v368_v34  ;;  %371 = vst [vmem:[%s5194_s26 + $0x18c] sm:$0xf] %v370_v35 }
  0x58   : > { %373 = vst [vmem:[%s5194_s26 + $0x190] sm:$0xf] %v372_v36  ;;  %v374_v37 = vld [vmem:[%s5190_s25 + $0x1c68] sm:$0xf]  ;;  %v376_v38 = vld [vmem:[%s5190_s25 + $0x1cb0] sm:$0xf] }
  0x59   : > { %v378_v39 = vld [vmem:[%s5190_s25 + $0x1cf8] sm:$0xf]  ;;  %375 = vst [vmem:[%s5194_s26 + $0x194] sm:$0xf] %v374_v37  ;;  %377 = vst [vmem:[%s5194_s26 + $0x198] sm:$0xf] %v376_v38 }
  0x5a   : > { %379 = vst [vmem:[%s5194_s26 + $0x19c] sm:$0xf] %v378_v39  ;;  %v380_v40 = vld [vmem:[%s5190_s25 + $0x1d40] sm:$0xf]  ;;  %v382_v41 = vld [vmem:[%s5190_s25 + $0x1d88] sm:$0xf] }
  0x5b   : > { %v384_v42 = vld [vmem:[%s5190_s25 + $0x1dd0] sm:$0xf]  ;;  %381 = vst [vmem:[%s5194_s26 + $0x1a0] sm:$0xf] %v380_v40  ;;  %383 = vst [vmem:[%s5194_s26 + $0x1a4] sm:$0xf] %v382_v41 }
  0x5c   : > { %385 = vst [vmem:[%s5194_s26 + $0x1a8] sm:$0xf] %v384_v42  ;;  %v386_v43 = vld [vmem:[%s5190_s25 + $0x1e18] sm:$0xf]  ;;  %v388_v44 = vld [vmem:[%s5190_s25 + $0x1e60] sm:$0xf] }
  0x5d   : > { %v390_v45 = vld [vmem:[%s5190_s25 + $0x1ea8] sm:$0xf]  ;;  %387 = vst [vmem:[%s5194_s26 + $0x1ac] sm:$0xf] %v386_v43  ;;  %389 = vst [vmem:[%s5194_s26 + $0x1b0] sm:$0xf] %v388_v44 }
  0x5e   : > { %391 = vst [vmem:[%s5194_s26 + $0x1b4] sm:$0xf] %v390_v45  ;;  %v392_v46 = vld [vmem:[%s5190_s25 + $0x1ef0] sm:$0xf]  ;;  %v394_v47 = vld [vmem:[%s5190_s25 + $0x1f38] sm:$0xf] }
  0x5f   : > { %v396_v48 = vld [vmem:[%s5190_s25 + $0x1f80] sm:$0xf]  ;;  %393 = vst [vmem:[%s5194_s26 + $0x1b8] sm:$0xf] %v392_v46  ;;  %395 = vst [vmem:[%s5194_s26 + $0x1bc] sm:$0xf] %v394_v47 }
  0x60   : > { %397 = vst [vmem:[%s5194_s26 + $0x1c0] sm:$0xf] %v396_v48  ;;  %v398_v49 = vld [vmem:[%s5190_s25 + $0x1fc8] sm:$0xf]  ;;  %v400_v50 = vld [vmem:[%s5190_s25 + $0x2010] sm:$0xf] }
  0x61   : > { %v402_v51 = vld [vmem:[%s5190_s25 + $0x2058] sm:$0xf]  ;;  %399 = vst [vmem:[%s5194_s26 + $0x1c4] sm:$0xf] %v398_v49  ;;  %401 = vst [vmem:[%s5194_s26 + $0x1c8] sm:$0xf] %v400_v50 }
  0x62   : > { %403 = vst [vmem:[%s5194_s26 + $0x1cc] sm:$0xf] %v402_v51  ;;  %v404_v52 = vld [vmem:[%s5190_s25 + $0x20a0] sm:$0xf]  ;;  %v406_v53 = vld [vmem:[%s5190_s25 + $0x20e8] sm:$0xf] }
  0x63   : > { %v408_v54 = vld [vmem:[%s5190_s25 + $0x2130] sm:$0xf]  ;;  %405 = vst [vmem:[%s5194_s26 + $0x1d0] sm:$0xf] %v404_v52  ;;  %407 = vst [vmem:[%s5194_s26 + $0x1d4] sm:$0xf] %v406_v53 }
  0x64   : > { %409 = vst [vmem:[%s5194_s26 + $0x1d8] sm:$0xf] %v408_v54  ;;  %v410_v55 = vld [vmem:[%s5190_s25 + $0x2178] sm:$0xf]  ;;  %v412_v56 = vld [vmem:[%s5190_s25 + $0x21c0] sm:$0xf] }
  0x65   : > { %v414_v57 = vld [vmem:[%s5190_s25 + $0x2208] sm:$0xf]  ;;  %411 = vst [vmem:[%s5194_s26 + $0x1dc] sm:$0xf] %v410_v55  ;;  %413 = vst [vmem:[%s5194_s26 + $0x1e0] sm:$0xf] %v412_v56 }
  0x66   : > { %415 = vst [vmem:[%s5194_s26 + $0x1e4] sm:$0xf] %v414_v57  ;;  %v416_v58 = vld [vmem:[%s5190_s25 + $0x2250] sm:$0xf]  ;;  %v418_v59 = vld [vmem:[%s5190_s25 + $0x2298] sm:$0xf] }
  0x67   : > { %v420_v60 = vld [vmem:[%s5190_s25 + $0x22e0] sm:$0xf]  ;;  %417 = vst [vmem:[%s5194_s26 + $0x1e8] sm:$0xf] %v416_v58  ;;  %419 = vst [vmem:[%s5194_s26 + $0x1ec] sm:$0xf] %v418_v59 }
  0x68   : > { %421 = vst [vmem:[%s5194_s26 + $0x1f0] sm:$0xf] %v420_v60  ;;  %v422_v61 = vld [vmem:[%s5190_s25 + $0x2328] sm:$0xf]  ;;  %v424_v62 = vld [vmem:[%s5190_s25 + $0x2370] sm:$0xf] }
  0x69   : > { %v426_v63 = vld [vmem:[%s5190_s25 + $0x23b8] sm:$0xf]  ;;  %423 = vst [vmem:[%s5194_s26 + $0x1f4] sm:$0xf] %v422_v61  ;;  %425 = vst [vmem:[%s5194_s26 + $0x1f8] sm:$0xf] %v424_v62 }
  0x6a   : > { %427 = vst [vmem:[%s5194_s26 + $0x1fc] sm:$0xf] %v426_v63  ;;  %v428_v0 = vld [vmem:[%s5190_s25 + $0x2400] sm:$0xf]  ;;  %v430_v1 = vld [vmem:[%s5190_s25 + $0x2448] sm:$0xf] }
  0x6b   : > { %v432_v2 = vld [vmem:[%s5190_s25 + $0x2490] sm:$0xf]  ;;  %429 = vst [vmem:[%s5194_s26 + $0x200] sm:$0xf] %v428_v0  ;;  %431 = vst [vmem:[%s5194_s26 + $0x204] sm:$0xf] %v430_v1 }
  0x6c   : > { %433 = vst [vmem:[%s5194_s26 + $0x208] sm:$0xf] %v432_v2  ;;  %v434_v3 = vld [vmem:[%s5190_s25 + $0x24d8] sm:$0xf]  ;;  %v436_v4 = vld [vmem:[%s5190_s25 + $0x2520] sm:$0xf] }
  0x6d   : > { %v438_v5 = vld [vmem:[%s5190_s25 + $0x2568] sm:$0xf]  ;;  %435 = vst [vmem:[%s5194_s26 + $0x20c] sm:$0xf] %v434_v3  ;;  %437 = vst [vmem:[%s5194_s26 + $0x210] sm:$0xf] %v436_v4 }
  0x6e   : > { %439 = vst [vmem:[%s5194_s26 + $0x214] sm:$0xf] %v438_v5  ;;  %v440_v6 = vld [vmem:[%s5190_s25 + $0x25b0] sm:$0xf]  ;;  %v442_v7 = vld [vmem:[%s5190_s25 + $0x25f8] sm:$0xf] }
  0x6f   : > { %v444_v8 = vld [vmem:[%s5190_s25 + $0x2640] sm:$0xf]  ;;  %441 = vst [vmem:[%s5194_s26 + $0x218] sm:$0xf] %v440_v6  ;;  %443 = vst [vmem:[%s5194_s26 + $0x21c] sm:$0xf] %v442_v7 }
  0x70   : > { %445 = vst [vmem:[%s5194_s26 + $0x220] sm:$0xf] %v444_v8  ;;  %v446_v9 = vld [vmem:[%s5190_s25 + $0x2688] sm:$0xf]  ;;  %v448_v10 = vld [vmem:[%s5190_s25 + $0x26d0] sm:$0xf] }
  0x71   : > { %v450_v11 = vld [vmem:[%s5190_s25 + $0x2718] sm:$0xf]  ;;  %447 = vst [vmem:[%s5194_s26 + $0x224] sm:$0xf] %v446_v9  ;;  %449 = vst [vmem:[%s5194_s26 + $0x228] sm:$0xf] %v448_v10 }
  0x72   : > { %451 = vst [vmem:[%s5194_s26 + $0x22c] sm:$0xf] %v450_v11  ;;  %v452_v12 = vld [vmem:[%s5190_s25 + $0x2760] sm:$0xf]  ;;  %v454_v13 = vld [vmem:[%s5190_s25 + $0x27a8] sm:$0xf] }
  0x73   : > { %v456_v14 = vld [vmem:[%s5190_s25 + $0x27f0] sm:$0xf]  ;;  %453 = vst [vmem:[%s5194_s26 + $0x230] sm:$0xf] %v452_v12  ;;  %455 = vst [vmem:[%s5194_s26 + $0x234] sm:$0xf] %v454_v13 }
  0x74   : > { %457 = vst [vmem:[%s5194_s26 + $0x238] sm:$0xf] %v456_v14  ;;  %v458_v15 = vld [vmem:[%s5190_s25 + $0x2838] sm:$0xf]  ;;  %v460_v16 = vld [vmem:[%s5190_s25 + $0x2880] sm:$0xf] }
  0x75   : > { %v462_v17 = vld [vmem:[%s5190_s25 + $0x28c8] sm:$0xf]  ;;  %459 = vst [vmem:[%s5194_s26 + $0x23c] sm:$0xf] %v458_v15  ;;  %461 = vst [vmem:[%s5194_s26 + $0x240] sm:$0xf] %v460_v16 }
  0x76   : > { %463 = vst [vmem:[%s5194_s26 + $0x244] sm:$0xf] %v462_v17  ;;  %v464_v18 = vld [vmem:[%s5190_s25 + $0x2910] sm:$0xf]  ;;  %v466_v19 = vld [vmem:[%s5190_s25 + $0x2958] sm:$0xf] }
  0x77   : > { %v468_v20 = vld [vmem:[%s5190_s25 + $0x29a0] sm:$0xf]  ;;  %465 = vst [vmem:[%s5194_s26 + $0x248] sm:$0xf] %v464_v18  ;;  %467 = vst [vmem:[%s5194_s26 + $0x24c] sm:$0xf] %v466_v19 }
  0x78   : > { %469 = vst [vmem:[%s5194_s26 + $0x250] sm:$0xf] %v468_v20  ;;  %v470_v21 = vld [vmem:[%s5190_s25 + $0x29e8] sm:$0xf]  ;;  %v472_v22 = vld [vmem:[%s5190_s25 + $0x2a30] sm:$0xf] }
  0x79   : > { %v474_v23 = vld [vmem:[%s5190_s25 + $0x2a78] sm:$0xf]  ;;  %471 = vst [vmem:[%s5194_s26 + $0x254] sm:$0xf] %v470_v21  ;;  %473 = vst [vmem:[%s5194_s26 + $0x258] sm:$0xf] %v472_v22 }
  0x7a   : > { %475 = vst [vmem:[%s5194_s26 + $0x25c] sm:$0xf] %v474_v23  ;;  %v476_v24 = vld [vmem:[%s5190_s25 + $0x2ac0] sm:$0xf]  ;;  %v478_v25 = vld [vmem:[%s5190_s25 + $0x2b08] sm:$0xf] }
  0x7b   : > { %v480_v26 = vld [vmem:[%s5190_s25 + $0x2b50] sm:$0xf]  ;;  %477 = vst [vmem:[%s5194_s26 + $0x260] sm:$0xf] %v476_v24  ;;  %479 = vst [vmem:[%s5194_s26 + $0x264] sm:$0xf] %v478_v25 }
  0x7c   : > { %481 = vst [vmem:[%s5194_s26 + $0x268] sm:$0xf] %v480_v26  ;;  %v482_v27 = vld [vmem:[%s5190_s25 + $0x2b98] sm:$0xf]  ;;  %v484_v28 = vld [vmem:[%s5190_s25 + $0x2be0] sm:$0xf] }
  0x7d   : > { %v486_v29 = vld [vmem:[%s5190_s25 + $0x2c28] sm:$0xf]  ;;  %483 = vst [vmem:[%s5194_s26 + $0x26c] sm:$0xf] %v482_v27  ;;  %485 = vst [vmem:[%s5194_s26 + $0x270] sm:$0xf] %v484_v28 }
  0x7e   : > { %487 = vst [vmem:[%s5194_s26 + $0x274] sm:$0xf] %v486_v29  ;;  %v488_v30 = vld [vmem:[%s5190_s25 + $0x2c70] sm:$0xf]  ;;  %v490_v31 = vld [vmem:[%s5190_s25 + $0x2cb8] sm:$0xf] }
  0x7f   : > { %v492_v32 = vld [vmem:[%s5190_s25 + $0x2d00] sm:$0xf]  ;;  %489 = vst [vmem:[%s5194_s26 + $0x278] sm:$0xf] %v488_v30  ;;  %491 = vst [vmem:[%s5194_s26 + $0x27c] sm:$0xf] %v490_v31 }
  0x80   : > { %493 = vst [vmem:[%s5194_s26 + $0x280] sm:$0xf] %v492_v32  ;;  %v494_v33 = vld [vmem:[%s5190_s25 + $0x2d48] sm:$0xf]  ;;  %v496_v34 = vld [vmem:[%s5190_s25 + $0x2d90] sm:$0xf] }
  0x81   : > { %v498_v35 = vld [vmem:[%s5190_s25 + $0x2dd8] sm:$0xf]  ;;  %495 = vst [vmem:[%s5194_s26 + $0x284] sm:$0xf] %v494_v33  ;;  %497 = vst [vmem:[%s5194_s26 + $0x288] sm:$0xf] %v496_v34 }
  0x82   : > { %499 = vst [vmem:[%s5194_s26 + $0x28c] sm:$0xf] %v498_v35  ;;  %v500_v36 = vld [vmem:[%s5190_s25 + $0x2e20] sm:$0xf]  ;;  %v502_v37 = vld [vmem:[%s5190_s25 + $0x2e68] sm:$0xf] }
  0x83   : > { %v504_v38 = vld [vmem:[%s5190_s25 + $0x2eb0] sm:$0xf]  ;;  %501 = vst [vmem:[%s5194_s26 + $0x290] sm:$0xf] %v500_v36  ;;  %503 = vst [vmem:[%s5194_s26 + $0x294] sm:$0xf] %v502_v37 }
  0x84   : > { %505 = vst [vmem:[%s5194_s26 + $0x298] sm:$0xf] %v504_v38  ;;  %v506_v39 = vld [vmem:[%s5190_s25 + $0x2ef8] sm:$0xf]  ;;  %v508_v40 = vld [vmem:[%s5190_s25 + $0x2f40] sm:$0xf] }
  0x85   : > { %v510_v41 = vld [vmem:[%s5190_s25 + $0x2f88] sm:$0xf]  ;;  %507 = vst [vmem:[%s5194_s26 + $0x29c] sm:$0xf] %v506_v39  ;;  %509 = vst [vmem:[%s5194_s26 + $0x2a0] sm:$0xf] %v508_v40 }
  0x86   : > { %511 = vst [vmem:[%s5194_s26 + $0x2a4] sm:$0xf] %v510_v41  ;;  %v512_v42 = vld [vmem:[%s5190_s25 + $0x2fd0] sm:$0xf]  ;;  %v514_v43 = vld [vmem:[%s5190_s25 + $0x3018] sm:$0xf] }
  0x87   : > { %v516_v44 = vld [vmem:[%s5190_s25 + $0x3060] sm:$0xf]  ;;  %513 = vst [vmem:[%s5194_s26 + $0x2a8] sm:$0xf] %v512_v42  ;;  %515 = vst [vmem:[%s5194_s26 + $0x2ac] sm:$0xf] %v514_v43 }
  0x88   : > { %517 = vst [vmem:[%s5194_s26 + $0x2b0] sm:$0xf] %v516_v44  ;;  %v518_v45 = vld [vmem:[%s5190_s25 + $0x30a8] sm:$0xf]  ;;  %v520_v46 = vld [vmem:[%s5190_s25 + $0x30f0] sm:$0xf] }
  0x89   : > { %v522_v47 = vld [vmem:[%s5190_s25 + $0x3138] sm:$0xf]  ;;  %519 = vst [vmem:[%s5194_s26 + $0x2b4] sm:$0xf] %v518_v45  ;;  %521 = vst [vmem:[%s5194_s26 + $0x2b8] sm:$0xf] %v520_v46 }
  0x8a   : > { %523 = vst [vmem:[%s5194_s26 + $0x2bc] sm:$0xf] %v522_v47  ;;  %v524_v48 = vld [vmem:[%s5190_s25 + $0x3180] sm:$0xf]  ;;  %v526_v49 = vld [vmem:[%s5190_s25 + $0x31c8] sm:$0xf] }
  0x8b   : > { %v528_v50 = vld [vmem:[%s5190_s25 + $0x3210] sm:$0xf]  ;;  %525 = vst [vmem:[%s5194_s26 + $0x2c0] sm:$0xf] %v524_v48  ;;  %527 = vst [vmem:[%s5194_s26 + $0x2c4] sm:$0xf] %v526_v49 }
  0x8c   : > { %529 = vst [vmem:[%s5194_s26 + $0x2c8] sm:$0xf] %v528_v50  ;;  %v530_v51 = vld [vmem:[%s5190_s25 + $0x3258] sm:$0xf]  ;;  %v532_v52 = vld [vmem:[%s5190_s25 + $0x32a0] sm:$0xf] }
  0x8d   : > { %v534_v53 = vld [vmem:[%s5190_s25 + $0x32e8] sm:$0xf]  ;;  %531 = vst [vmem:[%s5194_s26 + $0x2cc] sm:$0xf] %v530_v51  ;;  %533 = vst [vmem:[%s5194_s26 + $0x2d0] sm:$0xf] %v532_v52 }
  0x8e   : > { %535 = vst [vmem:[%s5194_s26 + $0x2d4] sm:$0xf] %v534_v53  ;;  %v536_v54 = vld [vmem:[%s5190_s25 + $0x3330] sm:$0xf]  ;;  %v538_v55 = vld [vmem:[%s5190_s25 + $0x3378] sm:$0xf] }
  0x8f   : > { %v540_v56 = vld [vmem:[%s5190_s25 + $0x33c0] sm:$0xf]  ;;  %537 = vst [vmem:[%s5194_s26 + $0x2d8] sm:$0xf] %v536_v54  ;;  %539 = vst [vmem:[%s5194_s26 + $0x2dc] sm:$0xf] %v538_v55 }
  0x90   : > { %541 = vst [vmem:[%s5194_s26 + $0x2e0] sm:$0xf] %v540_v56  ;;  %v542_v57 = vld [vmem:[%s5190_s25 + $0x3408] sm:$0xf]  ;;  %v544_v58 = vld [vmem:[%s5190_s25 + $0x3450] sm:$0xf] }
  0x91   : > { %v546_v59 = vld [vmem:[%s5190_s25 + $0x3498] sm:$0xf]  ;;  %543 = vst [vmem:[%s5194_s26 + $0x2e4] sm:$0xf] %v542_v57  ;;  %545 = vst [vmem:[%s5194_s26 + $0x2e8] sm:$0xf] %v544_v58 }
  0x92   : > { %547 = vst [vmem:[%s5194_s26 + $0x2ec] sm:$0xf] %v546_v59  ;;  %v548_v60 = vld [vmem:[%s5190_s25 + $0x34e0] sm:$0xf]  ;;  %v550_v61 = vld [vmem:[%s5190_s25 + $0x3528] sm:$0xf] }
  0x93   : > { %v552_v62 = vld [vmem:[%s5190_s25 + $0x3570] sm:$0xf]  ;;  %549 = vst [vmem:[%s5194_s26 + $0x2f0] sm:$0xf] %v548_v60  ;;  %551 = vst [vmem:[%s5194_s26 + $0x2f4] sm:$0xf] %v550_v61 }
  0x94   : > { %553 = vst [vmem:[%s5194_s26 + $0x2f8] sm:$0xf] %v552_v62  ;;  %v554_v63 = vld [vmem:[%s5190_s25 + $0x35b8] sm:$0xf]  ;;  %v556_v0 = vld [vmem:[%s5190_s25 + $0x3600] sm:$0xf] }
  0x95   : > { %v558_v1 = vld [vmem:[%s5190_s25 + $0x3648] sm:$0xf]  ;;  %555 = vst [vmem:[%s5194_s26 + $0x2fc] sm:$0xf] %v554_v63  ;;  %557 = vst [vmem:[%s5194_s26 + $0x300] sm:$0xf] %v556_v0 }
  0x96   : > { %559 = vst [vmem:[%s5194_s26 + $0x304] sm:$0xf] %v558_v1  ;;  %v560_v2 = vld [vmem:[%s5190_s25 + $0x3690] sm:$0xf]  ;;  %v562_v3 = vld [vmem:[%s5190_s25 + $0x36d8] sm:$0xf] }
  0x97   : > { %v564_v4 = vld [vmem:[%s5190_s25 + $0x3720] sm:$0xf]  ;;  %561 = vst [vmem:[%s5194_s26 + $0x308] sm:$0xf] %v560_v2  ;;  %563 = vst [vmem:[%s5194_s26 + $0x30c] sm:$0xf] %v562_v3 }
  0x98   : > { %565 = vst [vmem:[%s5194_s26 + $0x310] sm:$0xf] %v564_v4  ;;  %v566_v5 = vld [vmem:[%s5190_s25 + $0x3768] sm:$0xf]  ;;  %v568_v6 = vld [vmem:[%s5190_s25 + $0x37b0] sm:$0xf] }
  0x99   : > { %v570_v7 = vld [vmem:[%s5190_s25 + $0x37f8] sm:$0xf]  ;;  %567 = vst [vmem:[%s5194_s26 + $0x314] sm:$0xf] %v566_v5  ;;  %569 = vst [vmem:[%s5194_s26 + $0x318] sm:$0xf] %v568_v6 }
  0x9a   : > { %571 = vst [vmem:[%s5194_s26 + $0x31c] sm:$0xf] %v570_v7  ;;  %v572_v8 = vld [vmem:[%s5190_s25 + $0x3840] sm:$0xf]  ;;  %v574_v9 = vld [vmem:[%s5190_s25 + $0x3888] sm:$0xf] }
  0x9b   : > { %v576_v10 = vld [vmem:[%s5190_s25 + $0x38d0] sm:$0xf]  ;;  %573 = vst [vmem:[%s5194_s26 + $0x320] sm:$0xf] %v572_v8  ;;  %575 = vst [vmem:[%s5194_s26 + $0x324] sm:$0xf] %v574_v9 }
  0x9c   : > { %577 = vst [vmem:[%s5194_s26 + $0x328] sm:$0xf] %v576_v10  ;;  %v578_v11 = vld [vmem:[%s5190_s25 + $0x3918] sm:$0xf]  ;;  %v580_v12 = vld [vmem:[%s5190_s25 + $0x3960] sm:$0xf] }
  0x9d   : > { %v582_v13 = vld [vmem:[%s5190_s25 + $0x39a8] sm:$0xf]  ;;  %579 = vst [vmem:[%s5194_s26 + $0x32c] sm:$0xf] %v578_v11  ;;  %581 = vst [vmem:[%s5194_s26 + $0x330] sm:$0xf] %v580_v12 }
  0x9e   : > { %583 = vst [vmem:[%s5194_s26 + $0x334] sm:$0xf] %v582_v13  ;;  %v584_v14 = vld [vmem:[%s5190_s25 + $0x39f0] sm:$0xf]  ;;  %v586_v15 = vld [vmem:[%s5190_s25 + $0x3a38] sm:$0xf] }
  0x9f   : > { %v588_v16 = vld [vmem:[%s5190_s25 + $0x3a80] sm:$0xf]  ;;  %585 = vst [vmem:[%s5194_s26 + $0x338] sm:$0xf] %v584_v14  ;;  %587 = vst [vmem:[%s5194_s26 + $0x33c] sm:$0xf] %v586_v15 }
  0xa0   : > { %589 = vst [vmem:[%s5194_s26 + $0x340] sm:$0xf] %v588_v16  ;;  %v590_v17 = vld [vmem:[%s5190_s25 + $0x3ac8] sm:$0xf]  ;;  %v592_v18 = vld [vmem:[%s5190_s25 + $0x3b10] sm:$0xf] }
  0xa1   : > { %v594_v19 = vld [vmem:[%s5190_s25 + $0x3b58] sm:$0xf]  ;;  %591 = vst [vmem:[%s5194_s26 + $0x344] sm:$0xf] %v590_v17  ;;  %593 = vst [vmem:[%s5194_s26 + $0x348] sm:$0xf] %v592_v18 }
  0xa2   : > { %595 = vst [vmem:[%s5194_s26 + $0x34c] sm:$0xf] %v594_v19  ;;  %v596_v20 = vld [vmem:[%s5190_s25 + $0x3ba0] sm:$0xf]  ;;  %v598_v21 = vld [vmem:[%s5190_s25 + $0x3be8] sm:$0xf] }
  0xa3   : > { %v600_v22 = vld [vmem:[%s5190_s25 + $0x3c30] sm:$0xf]  ;;  %597 = vst [vmem:[%s5194_s26 + $0x350] sm:$0xf] %v596_v20  ;;  %599 = vst [vmem:[%s5194_s26 + $0x354] sm:$0xf] %v598_v21 }
  0xa4   : > { %601 = vst [vmem:[%s5194_s26 + $0x358] sm:$0xf] %v600_v22  ;;  %v602_v23 = vld [vmem:[%s5190_s25 + $0x3c78] sm:$0xf]  ;;  %v604_v24 = vld [vmem:[%s5190_s25 + $0x3cc0] sm:$0xf] }
  0xa5   : > { %v606_v25 = vld [vmem:[%s5190_s25 + $0x3d08] sm:$0xf]  ;;  %603 = vst [vmem:[%s5194_s26 + $0x35c] sm:$0xf] %v602_v23  ;;  %605 = vst [vmem:[%s5194_s26 + $0x360] sm:$0xf] %v604_v24 }
  0xa6   : > { %607 = vst [vmem:[%s5194_s26 + $0x364] sm:$0xf] %v606_v25  ;;  %v608_v26 = vld [vmem:[%s5190_s25 + $0x3d50] sm:$0xf]  ;;  %v610_v27 = vld [vmem:[%s5190_s25 + $0x3d98] sm:$0xf] }
  0xa7   : > { %v612_v28 = vld [vmem:[%s5190_s25 + $0x3de0] sm:$0xf]  ;;  %609 = vst [vmem:[%s5194_s26 + $0x368] sm:$0xf] %v608_v26  ;;  %611 = vst [vmem:[%s5194_s26 + $0x36c] sm:$0xf] %v610_v27 }
  0xa8   : > { %613 = vst [vmem:[%s5194_s26 + $0x370] sm:$0xf] %v612_v28  ;;  %v614_v29 = vld [vmem:[%s5190_s25 + $0x3e28] sm:$0xf]  ;;  %v616_v30 = vld [vmem:[%s5190_s25 + $0x3e70] sm:$0xf] }
  0xa9   : > { %v618_v31 = vld [vmem:[%s5190_s25 + $0x3eb8] sm:$0xf]  ;;  %615 = vst [vmem:[%s5194_s26 + $0x374] sm:$0xf] %v614_v29  ;;  %617 = vst [vmem:[%s5194_s26 + $0x378] sm:$0xf] %v616_v30 }
  0xaa   : > { %619 = vst [vmem:[%s5194_s26 + $0x37c] sm:$0xf] %v618_v31  ;;  %v620_v32 = vld [vmem:[%s5190_s25 + $0x3f00] sm:$0xf]  ;;  %v622_v33 = vld [vmem:[%s5190_s25 + $0x3f48] sm:$0xf] }
  0xab   : > { %v624_v34 = vld [vmem:[%s5190_s25 + $0x3f90] sm:$0xf]  ;;  %621 = vst [vmem:[%s5194_s26 + $0x380] sm:$0xf] %v620_v32  ;;  %623 = vst [vmem:[%s5194_s26 + $0x384] sm:$0xf] %v622_v33 }
  0xac   : > { %625 = vst [vmem:[%s5194_s26 + $0x388] sm:$0xf] %v624_v34  ;;  %v626_v35 = vld [vmem:[%s5190_s25 + $0x3fd8] sm:$0xf]  ;;  %v628_v36 = vld [vmem:[%s5190_s25 + $0x4020] sm:$0xf] }
  0xad   : > { %v630_v37 = vld [vmem:[%s5190_s25 + $0x4068] sm:$0xf]  ;;  %627 = vst [vmem:[%s5194_s26 + $0x38c] sm:$0xf] %v626_v35  ;;  %629 = vst [vmem:[%s5194_s26 + $0x390] sm:$0xf] %v628_v36 }
  0xae   : > { %631 = vst [vmem:[%s5194_s26 + $0x394] sm:$0xf] %v630_v37  ;;  %v632_v38 = vld [vmem:[%s5190_s25 + $0x40b0] sm:$0xf]  ;;  %v634_v39 = vld [vmem:[%s5190_s25 + $0x40f8] sm:$0xf] }
  0xaf   : > { %v636_v40 = vld [vmem:[%s5190_s25 + $0x4140] sm:$0xf]  ;;  %633 = vst [vmem:[%s5194_s26 + $0x398] sm:$0xf] %v632_v38  ;;  %635 = vst [vmem:[%s5194_s26 + $0x39c] sm:$0xf] %v634_v39 }
  0xb0   : > { %637 = vst [vmem:[%s5194_s26 + $0x3a0] sm:$0xf] %v636_v40  ;;  %v638_v41 = vld [vmem:[%s5190_s25 + $0x4188] sm:$0xf]  ;;  %v640_v42 = vld [vmem:[%s5190_s25 + $0x41d0] sm:$0xf] }
  0xb1   : > { %v642_v43 = vld [vmem:[%s5190_s25 + $0x4218] sm:$0xf]  ;;  %639 = vst [vmem:[%s5194_s26 + $0x3a4] sm:$0xf] %v638_v41  ;;  %641 = vst [vmem:[%s5194_s26 + $0x3a8] sm:$0xf] %v640_v42 }
  0xb2   : > { %643 = vst [vmem:[%s5194_s26 + $0x3ac] sm:$0xf] %v642_v43  ;;  %v644_v44 = vld [vmem:[%s5190_s25 + $0x4260] sm:$0xf]  ;;  %v646_v45 = vld [vmem:[%s5190_s25 + $0x42a8] sm:$0xf] }
  0xb3   : > { %v648_v46 = vld [vmem:[%s5190_s25 + $0x42f0] sm:$0xf]  ;;  %645 = vst [vmem:[%s5194_s26 + $0x3b0] sm:$0xf] %v644_v44  ;;  %647 = vst [vmem:[%s5194_s26 + $0x3b4] sm:$0xf] %v646_v45 }
  0xb4   : > { %649 = vst [vmem:[%s5194_s26 + $0x3b8] sm:$0xf] %v648_v46  ;;  %v650_v47 = vld [vmem:[%s5190_s25 + $0x4338] sm:$0xf]  ;;  %v652_v48 = vld [vmem:[%s5190_s25 + $0x4380] sm:$0xf] }
  0xb5   : > { %v654_v49 = vld [vmem:[%s5190_s25 + $0x43c8] sm:$0xf]  ;;  %651 = vst [vmem:[%s5194_s26 + $0x3bc] sm:$0xf] %v650_v47  ;;  %653 = vst [vmem:[%s5194_s26 + $0x3c0] sm:$0xf] %v652_v48 }
  0xb6   : > { %655 = vst [vmem:[%s5194_s26 + $0x3c4] sm:$0xf] %v654_v49  ;;  %v656_v50 = vld [vmem:[%s5190_s25 + $0x4410] sm:$0xf]  ;;  %v658_v51 = vld [vmem:[%s5190_s25 + $0x4458] sm:$0xf] }
  0xb7   : > { %v660_v52 = vld [vmem:[%s5190_s25 + $0x44a0] sm:$0xf]  ;;  %657 = vst [vmem:[%s5194_s26 + $0x3c8] sm:$0xf] %v656_v50  ;;  %659 = vst [vmem:[%s5194_s26 + $0x3cc] sm:$0xf] %v658_v51 }
  0xb8   : > { %661 = vst [vmem:[%s5194_s26 + $0x3d0] sm:$0xf] %v660_v52  ;;  %v662_v53 = vld [vmem:[%s5190_s25 + $0x44e8] sm:$0xf]  ;;  %v664_v54 = vld [vmem:[%s5190_s25 + $0x4530] sm:$0xf] }
  0xb9   : > { %v666_v55 = vld [vmem:[%s5190_s25 + $0x4578] sm:$0xf]  ;;  %663 = vst [vmem:[%s5194_s26 + $0x3d4] sm:$0xf] %v662_v53  ;;  %665 = vst [vmem:[%s5194_s26 + $0x3d8] sm:$0xf] %v664_v54 }
  0xba   : > { %667 = vst [vmem:[%s5194_s26 + $0x3dc] sm:$0xf] %v666_v55  ;;  %v668_v56 = vld [vmem:[%s5190_s25 + $0x45c0] sm:$0xf]  ;;  %v670_v57 = vld [vmem:[%s5190_s25 + $0x4608] sm:$0xf] }
  0xbb   : > { %v672_v58 = vld [vmem:[%s5190_s25 + $0x4650] sm:$0xf]  ;;  %669 = vst [vmem:[%s5194_s26 + $0x3e0] sm:$0xf] %v668_v56  ;;  %671 = vst [vmem:[%s5194_s26 + $0x3e4] sm:$0xf] %v670_v57 }
  0xbc   : > { %673 = vst [vmem:[%s5194_s26 + $0x3e8] sm:$0xf] %v672_v58  ;;  %v674_v59 = vld [vmem:[%s5190_s25 + $0x4698] sm:$0xf]  ;;  %v676_v60 = vld [vmem:[%s5190_s25 + $0x46e0] sm:$0xf] }
  0xbd   : > { %v678_v61 = vld [vmem:[%s5190_s25 + $0x4728] sm:$0xf]  ;;  %675 = vst [vmem:[%s5194_s26 + $0x3ec] sm:$0xf] %v674_v59  ;;  %677 = vst [vmem:[%s5194_s26 + $0x3f0] sm:$0xf] %v676_v60 }
  0xbe   : > { %679 = vst [vmem:[%s5194_s26 + $0x3f4] sm:$0xf] %v678_v61  ;;  %v680_v62 = vld [vmem:[%s5190_s25 + $0x4770] sm:$0xf]  ;;  %v682_v63 = vld [vmem:[%s5190_s25 + $0x47b8] sm:$0xf] }
  0xbf   : > { %681 = vst [vmem:[%s5194_s26 + $0x3f8] sm:$0xf] %v680_v62  ;;  %683 = vst [vmem:[%s5194_s26 + $0x3fc] sm:$0xf] %v682_v63 }
  0xc0 PF: > { %p4144_p8 = scmp.ge.s32.totalorder %s5125_s13, 1  ;;  %p1217_p9 = scmp.lt.s32.totalorder %s5125_s13, 19 }
  0xc2   : > { %p1218_p10 = pnand %p4144_p8, %p1217_p9 }
  0xc3   : > { %s1224_s27 = sand.u32 (!%p1218_p10), 1, %s5109_s9   ;;  %v5712_v0 = vld [vmem:[%s6442_s0] sm:$0xff] (!%p1218_p10)  ;;  %v5722_v2 = vld [vmem:[%s6442_s0 + $0x8] sm:$0xff] (!%p1218_p10) }
  0xc4   : > { %1221 = sbr.rel (%p1218_p10) target bundleno = 710 (0x2c6), region = 65  ;;  %v5717_v1 = vld [vmem:[%s6442_s0 + $0x40] sm:$0xff] (!%p1218_p10)  ;;  %s4145_s6 = sshll.u32 (!%p1218_p10), %s1224_s27, 10  ;;  %v5731_v4 = vld [vmem:[%s6442_s0 + $0x48] sm:$0xff] (!%p1218_p10) }
  0xc5   : > { %v4148_v3 = vcombine.high (!%p1218_p10), %v5712_v0, %v5717_v1  ;;  %v4150_v5 = vcombine.high (!%p1218_p10), %v5722_v2, %v5731_v4  ;;  %s5735_s15 = scalar_lea.vmem (!%p1218_p10), [#allocation3], %s4145_s6  ;;  %v1321_v35 = vld [vmem:[%s6442_s0 + $0x80] sm:$0xff] (!%p1218_p10)  ;;  %v1322_v38 = vld [vmem:[%s6442_s0 + $0x88] sm:$0xff] (!%p1218_p10)  ;;  %v4147_v42 = vcombine.low (!%p1218_p10), %v5712_v0, %v5717_v1  ;;  %v4149_v43 = vcombine.low (!%p1218_p10), %v5722_v2, %v5731_v4 }
  0xc6   : > { %v4959_v6 = vld [vmem:[%s5735_s15 + $0x40] sm:$0xff] (!%p1218_p10)   ;;  %v4963_v10 = vld [vmem:[%s5735_s15 + $0x48] sm:$0xff] (!%p1218_p10)   ;;  %v4967_v14 = vld [vmem:[%s5735_s15 + $0x50] sm:$0xff] (!%p1218_p10)  }
  0xc7   : > { %3129 = vmatprep.mubr.bf16.mxu0 (!%p1218_p10), %v4148_v3  ;;  %v4960_v7 = vld [vmem:[%s5735_s15 + $0xc0] sm:$0xff] (!%p1218_p10)   ;;  %3226 = vmatprep.mubr.bf16.mxu1 (!%p1218_p10), %v4150_v5  ;;  %v4964_v11 = vld [vmem:[%s5735_s15 + $0xc8] sm:$0xff] (!%p1218_p10)   ;;  %v4968_v15 = vld [vmem:[%s5735_s15 + $0xd0] sm:$0xff] (!%p1218_p10)  }
  0xc8   : > { %4407 = vmatprep.subr.bf16.mxu0 (!%p1218_p10), %v4959_v6  ;;  %v4961_v8 = vld [vmem:[%s5735_s15] sm:$0xff] (!%p1218_p10)   ;;  %4471 = vmatprep.subr.bf16.mxu1 (!%p1218_p10), %v4960_v7  ;;  %v4965_v12 = vld [vmem:[%s5735_s15 + $0x8] sm:$0xff] (!%p1218_p10)   ;;  %v4969_v16 = vld [vmem:[%s5735_s15 + $0x10] sm:$0xff] (!%p1218_p10)  }
  0xc9   : > { %v4962_v9 = vld [vmem:[%s5735_s15 + $0x80] sm:$0xff] (!%p1218_p10)   ;;  %4408 = vmatpush3.bf16.msra.mxu0 (!%p1218_p10), %v4961_v8  ;;  %v4966_v13 = vld [vmem:[%s5735_s15 + $0x88] sm:$0xff] (!%p1218_p10)   ;;  %v4970_v17 = vld [vmem:[%s5735_s15 + $0x90] sm:$0xff] (!%p1218_p10)  }
  0xca   : > { %4472 = vmatpush3.bf16.msra.mxu1 (!%p1218_p10), %v4962_v9  ;;  %4409 = vmatprep.subr.bf16.mxu0 (!%p1218_p10), %v4963_v10  ;;  %v4971_v18 = vld [vmem:[%s5735_s15 + $0x58] sm:$0xff] (!%p1218_p10)   ;;  %v4975_v22 = vld [vmem:[%s5735_s15 + $0x60] sm:$0xff] (!%p1218_p10)   ;;  %v4979_v26 = vld [vmem:[%s5735_s15 + $0x68] sm:$0xff] (!%p1218_p10)  }
  0xcb   : > { %4473 = vmatprep.subr.bf16.mxu1 %v4964_v11  ;;  %v4972_v19 = vld [vmem:[%s5735_s15 + $0xd8] sm:$0xff]   ;;  %v4976_v23 = vld [vmem:[%s5735_s15 + $0xe0] sm:$0xff]   ;;  %v4980_v27 = vld [vmem:[%s5735_s15 + $0xe8] sm:$0xff]   ;;  %s4404_s9 = sshll.u32 (%p5177_p6), %s5117_s11, 3 }
  0xcc   : > { %v4973_v20 = vld [vmem:[%s5735_s15 + $0x18] sm:$0xff]   ;;  %v4977_v24 = vld [vmem:[%s5735_s15 + $0x20] sm:$0xff]   ;;  %v4981_v28 = vld [vmem:[%s5735_s15 + $0x28] sm:$0xff]   ;;  %s3951_s3 = scalar_lea.vmem (%p5177_p6), %s6444_s2, %s4404_s9 }
  0xcd   : > { %4410 = vmatpush3.bf16.msra.mxu0 %v4965_v12  ;;  %v4974_v21 = vld [vmem:[%s5735_s15 + $0x98] sm:$0xff]   ;;  %v4978_v25 = vld [vmem:[%s5735_s15 + $0xa0] sm:$0xff]   ;;  %v4982_v29 = vld [vmem:[%s5735_s15 + $0xa8] sm:$0xff]  }
  0xce   : > { %4474 = vmatpush3.bf16.msra.mxu1 %v4966_v13  ;;  %4411 = vmatprep.subr.bf16.mxu0 %v4967_v14  ;;  %v4983_v30 = vld [vmem:[%s5735_s15 + $0x70] sm:$0xff]   ;;  %v4987_v34 = vld [vmem:[%s5735_s15 + $0x78] sm:$0xff]   ;;  %v1329_v36 = vld [vmem:[%s6442_s0 + $0xc0] sm:$0xff] }
  0xcf   : > { %4475 = vmatprep.subr.bf16.mxu1 %v4968_v15  ;;  %v4984_v31 = vld [vmem:[%s5735_s15 + $0xf0] sm:$0xff]   ;;  %v4988_v37 = vld [vmem:[%s5735_s15 + $0xf8] sm:$0xff]   ;;  %v1330_v39 = vld [vmem:[%s6442_s0 + $0xc8] sm:$0xff]  ;;  %v4164_v46 = vcombine.high %v1321_v35, %v1329_v36  ;;  %v4163_v54 = vcombine.low %v1321_v35, %v1329_v36 }
  0xd0   : > { %v4985_v32 = vld [vmem:[%s5735_s15 + $0x30] sm:$0xff]   ;;  %v4989_v40 = vld [vmem:[%s5735_s15 + $0x38] sm:$0xff]   ;;  %v4991_v44 = vld [vmem:[%s5735_s15 + $0x140] sm:$0xff]   ;;  %v4166_v48 = vcombine.high %v1322_v38, %v1330_v39  ;;  %v4165_v56 = vcombine.low %v1322_v38, %v1330_v39 }
  0xd1   : > { %4412 = vmatpush3.bf16.msra.mxu0 %v4969_v16  ;;  %v4986_v33 = vld [vmem:[%s5735_s15 + $0xb0] sm:$0xff]   ;;  %v4990_v41 = vld [vmem:[%s5735_s15 + $0xb8] sm:$0xff]   ;;  %v4992_v45 = vld [vmem:[%s5735_s15 + $0x100] sm:$0xff]  }
  0xd2   : > { %4476 = vmatpush3.bf16.msra.mxu1 %v4970_v17  ;;  %4413 = vmatprep.subr.bf16.mxu0 %v4971_v18  ;;  %v4993_v47 = vld [vmem:[%s5735_s15 + $0x1c0] sm:$0xff]   ;;  %v4995_v50 = vld [vmem:[%s5735_s15 + $0x148] sm:$0xff]   ;;  %v4999_v62 = vld [vmem:[%s5735_s15 + $0x150] sm:$0xff]  }
  0xd3   : > { %4477 = vmatprep.subr.bf16.mxu1 %v4972_v19  ;;  %v4994_v49 = vld [vmem:[%s5735_s15 + $0x180] sm:$0xff]   ;;  %v4996_v52 = vld [vmem:[%s5735_s15 + $0x108] sm:$0xff]   ;;  %v5000_v63 = vld [vmem:[%s5735_s15 + $0x110] sm:$0xff]  }
  0xd4   : > { %v1337_v51 = vld [vmem:[%s6442_s0 + $0x100] sm:$0xff]  ;;  %v4997_v53 = vld [vmem:[%s5735_s15 + $0x1c8] sm:$0xff]   ;;  %v5001_v0 = vld [vmem:[%s5735_s15 + $0x1d0] sm:$0xff]  }
  0xd5   : > { %4414 = vmatpush3.bf16.msra.mxu0 %v4973_v20  ;;  %v4998_v55 = vld [vmem:[%s5735_s15 + $0x188] sm:$0xff]   ;;  %v1345_v57 = vld [vmem:[%s6442_s0 + $0x140] sm:$0xff]  ;;  %v5002_v1 = vld [vmem:[%s5735_s15 + $0x190] sm:$0xff]  }
  0xd6   : > { %4478 = vmatpush3.bf16.msra.mxu1 %v4974_v21  ;;  %4415 = vmatprep.subr.bf16.mxu0 %v4975_v22  ;;  %v1338_v58 = vld [vmem:[%s6442_s0 + $0x108] sm:$0xff]  ;;  %v4180_v60 = vcombine.high %v1337_v51, %v1345_v57  ;;  %v1353_v2 = vld [vmem:[%s6442_s0 + $0x180] sm:$0xff]  ;;  %v4179_v6 = vcombine.low %v1337_v51, %v1345_v57  ;;  %v5003_v7 = vld [vmem:[%s5735_s15 + $0x158] sm:$0xff]  }
  0xd7   : > { %4479 = vmatprep.subr.bf16.mxu1 %v4976_v23  ;;  %v1346_v59 = vld [vmem:[%s6442_s0 + $0x148] sm:$0xff]  ;;  %v1361_v3 = vld [vmem:[%s6442_s0 + $0x1c0] sm:$0xff]  ;;  %v5004_v10 = vld [vmem:[%s5735_s15 + $0x118] sm:$0xff]  }
  0xd8   : > { %v4182_v61 = vcombine.high %v1338_v58, %v1346_v59  ;;  %v1354_v4 = vld [vmem:[%s6442_s0 + $0x188] sm:$0xff]  ;;  %v4181_v8 = vcombine.low %v1338_v58, %v1346_v59  ;;  %v4196_v9 = vcombine.high %v1353_v2, %v1361_v3  ;;  %v5005_v12 = vld [vmem:[%s5735_s15 + $0x1d8] sm:$0xff]   ;;  %v1369_v14 = vld [vmem:[%s6442_s0 + $0x200] sm:$0xff]  ;;  %v4195_v21 = vcombine.low %v1353_v2, %v1361_v3 }
  0xd9   : > { %4416 = vmatpush3.bf16.msra.mxu0 %v4977_v24  ;;  %v1362_v5 = vld [vmem:[%s6442_s0 + $0x1c8] sm:$0xff]  ;;  %v5006_v13 = vld [vmem:[%s5735_s15 + $0x198] sm:$0xff]   ;;  %v1377_v15 = vld [vmem:[%s6442_s0 + $0x240] sm:$0xff] }
  0xda   : > { %4480 = vmatpush3.bf16.msra.mxu1 %v4978_v25  ;;  %4417 = vmatprep.subr.bf16.mxu0 %v4979_v26  ;;  %v4198_v11 = vcombine.high %v1354_v4, %v1362_v5  ;;  %v1370_v16 = vld [vmem:[%s6442_s0 + $0x208] sm:$0xff]  ;;  %v5007_v18 = vld [vmem:[%s5735_s15 + $0x160] sm:$0xff]   ;;  %v4197_v23 = vcombine.low %v1354_v4, %v1362_v5  ;;  %v4212_v24 = vcombine.high %v1369_v14, %v1377_v15  ;;  %v5015_v35 = vld [vmem:[%s5735_s15 + $0x170] sm:$0xff]  }
  0xdb   : > { %4481 = vmatprep.subr.bf16.mxu1 %v4980_v27  ;;  %v1378_v17 = vld [vmem:[%s6442_s0 + $0x248] sm:$0xff]  ;;  %v5008_v19 = vld [vmem:[%s5735_s15 + $0x120] sm:$0xff]   ;;  %v5016_v38 = vld [vmem:[%s5735_s15 + $0x130] sm:$0xff]  }
  0xdc   : > { %v5009_v20 = vld [vmem:[%s5735_s15 + $0x1e0] sm:$0xff]   ;;  %v4214_v25 = vcombine.high %v1370_v16, %v1378_v17  ;;  %v5011_v26 = vld [vmem:[%s5735_s15 + $0x168] sm:$0xff]   ;;  %v4213_v36 = vcombine.low %v1370_v16, %v1378_v17  ;;  %v1308_v2 = vld [vmem:[%s6442_s0 + $0x18] sm:$0xff] }
  0xdd   : > { %4418 = vmatpush3.bf16.msra.mxu0 %v4981_v28  ;;  %v5010_v22 = vld [vmem:[%s5735_s15 + $0x1a0] sm:$0xff]   ;;  %v5012_v27 = vld [vmem:[%s5735_s15 + $0x128] sm:$0xff]   ;;  %v1316_v3 = vld [vmem:[%s6442_s0 + $0x58] sm:$0xff] }
  0xde   : > { %4482 = vmatpush3.bf16.msra.mxu1 %v4982_v29  ;;  %4419 = vmatprep.subr.bf16.mxu0 %v4983_v30  ;;  %v5013_v28 = vld [vmem:[%s5735_s15 + $0x1e8] sm:$0xff]   ;;  %v1385_v30 = vld [vmem:[%s6442_s0 + $0x280] sm:$0xff] }
  0xdf   : > { %4483 = vmatprep.subr.bf16.mxu1 %v4984_v31  ;;  %v5014_v29 = vld [vmem:[%s5735_s15 + $0x1a8] sm:$0xff]   ;;  %v1393_v31 = vld [vmem:[%s6442_s0 + $0x2c0] sm:$0xff] }
  0xe0   : > { %v1425_v57 = vld [vmem:[%s6442_s0 + $0x3c0] sm:$0xff]  ;;  %v1418_v58 = vld [vmem:[%s6442_s0 + $0x388] sm:$0xff] }
  0xe1   : > { %4420 = vmatpush3.bf16.msra.mxu0 %v4985_v32  ;;  %v1386_v32 = vld [vmem:[%s6442_s0 + $0x288] sm:$0xff] }
  0xe2   : > { %4484 = vmatpush3.bf16.msra.mxu1 %v4986_v33  ;;  %4421 = vmatprep.subr.bf16.mxu0 %v4987_v34  ;;  %v1394_v33 = vld [vmem:[%s6442_s0 + $0x2c8] sm:$0xff]  ;;  %v4211_v34 = vcombine.low %v1369_v14, %v1377_v15  ;;  %v5024_v14 = vld [vmem:[%s5735_s15 + $0x200] sm:$0xff]  }
  0xe3   : > { %4485 = vmatprep.subr.bf16.mxu1 %v4988_v37  ;;  %v4228_v37 = vcombine.high %v1385_v30, %v1393_v31  ;;  %v4230_v39 = vcombine.high %v1386_v32, %v1394_v33  ;;  %v4229_v51 = vcombine.low %v1386_v32, %v1394_v33  ;;  %v1426_v59 = vld [vmem:[%s6442_s0 + $0x3c8] sm:$0xff]  ;;  %v5026_v15 = vld [vmem:[%s5735_s15 + $0x280] sm:$0xff]   ;;  %v5034_v33 = vld [vmem:[%s5735_s15 + $0x290] sm:$0xff]  }
  0xe4   : > { %v4261_v5 = vcombine.low %v1418_v58, %v1426_v59 }
  0xe5   : > { %4422 = vmatpush3.bf16.msra.mxu0 %v4989_v40  ;;  %v5017_v40 = vld [vmem:[%s5735_s15 + $0x1f0] sm:$0xff]  }
  0xe6   : > { %4486 = vmatpush3.bf16.msra.mxu1 %v4990_v41  ;;  %4535 = vmatprep.subr.bf16.mxu0 %v4991_v44  ;;  %v5018_v41 = vld [vmem:[%s5735_s15 + $0x1b0] sm:$0xff]   ;;  %v1402_v44 = vld [vmem:[%s6442_s0 + $0x308] sm:$0xff] }
  0xe7   : > { %4599 = vmatprep.subr.bf16.mxu1 %v4993_v47  ;;  %v5020_v47 = vld [vmem:[%s5735_s15 + $0x138] sm:$0xff]  }
  0xe8   : > { %3130 = vmatmul.mubr.bf16.vlgmr.msra.gmra.mrb[0].mxu0 %v4147_v42  ;;  %v1401_v42 = vld [vmem:[%s6442_s0 + $0x300] sm:$0xff] }
  0xe9   : > { %3227 = vmatmul.mubr.bf16.vlgmr.msra.gmra.mrb[0].mxu1 %v4149_v43  ;;  %4536 = vmatpush3.bf16.msra.mxu0 %v4992_v45  ;;  %v1409_v43 = vld [vmem:[%s6442_s0 + $0x340] sm:$0xff]  ;;  %v1410_v45 = vld [vmem:[%s6442_s0 + $0x348] sm:$0xff] }
  0xea   : > { %3137 = vmatprep.mubr.bf16.mxu0 %v4164_v46  ;;  %4600 = vmatpush3.bf16.msra.mxu1 %v4994_v49  ;;  %v5019_v46 = vld [vmem:[%s5735_s15 + $0x178] sm:$0xff]   ;;  %v4227_v49 = vcombine.low %v1385_v30, %v1393_v31  ;;  %v5032_v31 = vld [vmem:[%s5735_s15 + $0x210] sm:$0xff]  }
  0xeb   : > { %3234 = vmatprep.mubr.bf16.mxu1 %v4166_v48  ;;  %4537 = vmatprep.subr.bf16.mxu0 %v4995_v50  ;;  %v5021_v48 = vld [vmem:[%s5735_s15 + $0x1f8] sm:$0xff]  }
  0xec   : > { %4601 = vmatprep.subr.bf16.mxu1 %v4997_v53  ;;  %v5022_v50 = vld [vmem:[%s5735_s15 + $0x1b8] sm:$0xff]   ;;  %v4246_v53 = vcombine.high %v1402_v44, %v1410_v45 }
  0xed   : > { %4538 = vmatpush3.bf16.msra.mxu0 %v4996_v52  ;;  %v4244_v52 = vcombine.high %v1401_v42, %v1409_v43 }
  0xee   : > { %4602 = vmatpush3.bf16.msra.mxu1 %v4998_v55  ;;  %4539 = vmatprep.subr.bf16.mxu0 %v4999_v62  ;;  %v5025_v55 = vld [vmem:[%s5735_s15 + $0x2c0] sm:$0xff]  }
  0xef   : > { %4603 = vmatprep.subr.bf16.mxu1 %v5001_v0  ;;  %v1307_v0 = vld [vmem:[%s6442_s0 + $0x10] sm:$0xff] }
  0xf0   : > { %3138 = vmatmul.mubr.bf16.gmra.mrb[4].mxu0 %v4163_v54  ;;  %v5023_v54 = vld [vmem:[%s5735_s15 + $0x240] sm:$0xff]  }
  0xf1   : > { %3235 = vmatmul.mubr.bf16.gmra.mrb[4].mxu1 %v4165_v56  ;;  %3145 = vmatprep.mubr.bf16.mxu0 %v4180_v60  ;;  %v1417_v56 = vld [vmem:[%s6442_s0 + $0x380] sm:$0xff]  ;;  %v4243_v60 = vcombine.low %v1401_v42, %v1409_v43 }
  0xf2   : > { %3242 = vmatprep.mubr.bf16.mxu1 %v4182_v61  ;;  %4540 = vmatpush3.bf16.msra.mxu0 %v5000_v63  ;;  %v4245_v61 = vcombine.low %v1402_v44, %v1410_v45  ;;  %v4260_v62 = vcombine.high %v1417_v56, %v1425_v57  ;;  %v4262_v63 = vcombine.high %v1418_v58, %v1426_v59  ;;  %v5039_v42 = vld [vmem:[%s5735_s15 + $0x260] sm:$0xff]   ;;  %v5047_v58 = vld [vmem:[%s5735_s15 + $0x270] sm:$0xff]  }
  0xf3   : > { %4604 = vmatpush3.bf16.msra.mxu1 %v5002_v1  ;;  %4541 = vmatprep.subr.bf16.mxu0 %v5003_v7  ;;  %v1315_v1 = vld [vmem:[%s6442_s0 + $0x50] sm:$0xff]  ;;  %v4259_v4 = vcombine.low %v1417_v56, %v1425_v57  ;;  %v4154_v7 = vcombine.high %v1308_v2, %v1316_v3  ;;  %v5041_v44 = vld [vmem:[%s5735_s15 + $0x2e0] sm:$0xff]   ;;  %v5044_v56 = vld [vmem:[%s5735_s15 + $0x228] sm:$0xff]  }
  0xf4   : > { %4605 = vmatprep.subr.bf16.mxu1 %v5005_v12  ;;  %v1332_v12 = vld [vmem:[%s6442_s0 + $0xd8] sm:$0xff]  ;;  %v5046_v57 = vld [vmem:[%s5735_s15 + $0x2a8] sm:$0xff]  }
  0xf6   : > { %4542 = vmatpush3.bf16.msra.mxu0 %v5004_v10  ;;  %v1324_v10 = vld [vmem:[%s6442_s0 + $0x98] sm:$0xff] }
  0xf7   : > { %4606 = vmatpush3.bf16.msra.mxu1 %v5006_v13  ;;  %4543 = vmatprep.subr.bf16.mxu0 %v5007_v18  ;;  %v4153_v13 = vcombine.low %v1308_v2, %v1316_v3  ;;  %v4170_v17 = vcombine.high %v1324_v10, %v1332_v12  ;;  %v5027_v18 = vld [vmem:[%s5735_s15 + $0x248] sm:$0xff]   ;;  %v5051_v2 = vld [vmem:[%s5735_s15 + $0x278] sm:$0xff]   ;;  %v1387_v3 = vld [vmem:[%s6442_s0 + $0x290] sm:$0xff] }
  0xf8   : > { %3146 = vmatmul.mubr.bf16.gmra.mrb[8].mxu0 %v4179_v6  ;;  %4607 = vmatprep.subr.bf16.mxu1 %v5009_v20  ;;  %v4152_v6 = vcombine.high %v1307_v0, %v1315_v1  ;;  %v5029_v20 = vld [vmem:[%s5735_s15 + $0x2c8] sm:$0xff]  }
  0xf9   : > { %3243 = vmatmul.mubr.bf16.gmra.mrb[8].mxu1 %v4181_v8  ;;  %3153 = vmatprep.mubr.bf16.mxu0 %v4196_v9  ;;  %v1323_v8 = vld [vmem:[%s6442_s0 + $0x90] sm:$0xff] }
  0xfa   : > { %3250 = vmatprep.mubr.bf16.mxu1 %v4198_v11  ;;  %4544 = vmatpush3.bf16.msra.mxu0 %v5008_v19  ;;  %v1331_v9 = vld [vmem:[%s6442_s0 + $0xd0] sm:$0xff]  ;;  %v4151_v11 = vcombine.low %v1307_v0, %v1315_v1  ;;  %v5028_v19 = vld [vmem:[%s5735_s15 + $0x208] sm:$0xff]  }
  0xfb   : > { %4608 = vmatpush3.bf16.msra.mxu1 %v5010_v22  ;;  %4545 = vmatprep.subr.bf16.mxu0 %v5011_v26  ;;  %v4168_v16 = vcombine.high %v1323_v8, %v1331_v9  ;;  %v1339_v22 = vld [vmem:[%s6442_s0 + $0x110] sm:$0xff] }
  0xfc   : > { %4609 = vmatprep.subr.bf16.mxu1 %v5013_v28  ;;  %v5031_v26 = vld [vmem:[%s5735_s15 + $0x250] sm:$0xff]   ;;  %v4167_v28 = vcombine.low %v1323_v8, %v1331_v9  ;;  %v5052_v8 = vld [vmem:[%s5735_s15 + $0x238] sm:$0xff]  }
  0xfd   : > { %v5050_v1 = vld [vmem:[%s5735_s15 + $0x2b0] sm:$0xff]   ;;  %v5054_v9 = vld [vmem:[%s5735_s15 + $0x2b8] sm:$0xff]  }
  0xfe   : > { %4546 = vmatpush3.bf16.msra.mxu0 %v5012_v27  ;;  %v5033_v27 = vld [vmem:[%s5735_s15 + $0x2d0] sm:$0xff]  }
  0xff   : > { %4610 = vmatpush3.bf16.msra.mxu1 %v5014_v29  ;;  %4547 = vmatprep.subr.bf16.mxu0 %v5015_v35  ;;  %v4169_v29 = vcombine.low %v1324_v10, %v1332_v12  ;;  %v1355_v35 = vld [vmem:[%s6442_s0 + $0x190] sm:$0xff]  ;;  %v5055_v10 = vld [vmem:[%s5735_s15 + $0x340] sm:$0xff]  }
 0x100   : > { %3154 = vmatmul.mubr.bf16.gmra.mrb[12].mxu0 %v4195_v21  ;;  %4611 = vmatprep.subr.bf16.mxu1 %v5017_v40  ;;  %v5030_v21 = vld [vmem:[%s5735_s15 + $0x288] sm:$0xff]   ;;  %v5036_v40 = vld [vmem:[%s5735_s15 + $0x218] sm:$0xff]   ;;  %v5057_v12 = vld [vmem:[%s5735_s15 + $0x3c0] sm:$0xff]  }
 0x101   : > { %3251 = vmatmul.mubr.bf16.gmra.mrb[12].mxu1 %v4197_v23  ;;  %3161 = vmatprep.mubr.bf16.mxu0 %v4212_v24  ;;  %v1347_v23 = vld [vmem:[%s6442_s0 + $0x150] sm:$0xff]  ;;  %v1340_v24 = vld [vmem:[%s6442_s0 + $0x118] sm:$0xff] }
 0x102   : > { %3258 = vmatprep.mubr.bf16.mxu1 %v4214_v25  ;;  %4548 = vmatpush3.bf16.msra.mxu0 %v5016_v38  ;;  %v1348_v25 = vld [vmem:[%s6442_s0 + $0x158] sm:$0xff]  ;;  %v4184_v30 = vcombine.high %v1339_v22, %v1347_v23  ;;  %v4183_v43 = vcombine.low %v1339_v22, %v1347_v23 }
 0x103   : > { %4612 = vmatpush3.bf16.msra.mxu1 %v5018_v41  ;;  %4549 = vmatprep.subr.bf16.mxu0 %v5019_v46  ;;  %v4186_v32 = vcombine.high %v1340_v24, %v1348_v25  ;;  %v1356_v38 = vld [vmem:[%s6442_s0 + $0x198] sm:$0xff]  ;;  %v4185_v45 = vcombine.low %v1340_v24, %v1348_v25  ;;  %v1419_v24 = vld [vmem:[%s6442_s0 + $0x390] sm:$0xff] }
 0x104   : > { %4613 = vmatprep.subr.bf16.mxu1 %v5021_v48  ;;  %v5038_v41 = vld [vmem:[%s5735_s15 + $0x298] sm:$0xff]   ;;  %v5040_v48 = vld [vmem:[%s5735_s15 + $0x220] sm:$0xff]   ;;  %v1427_v25 = vld [vmem:[%s6442_s0 + $0x3d0] sm:$0xff] }
 0x106   : > { %4550 = vmatpush3.bf16.msra.mxu0 %v5020_v47 }
 0x107   : > { %4614 = vmatpush3.bf16.msra.mxu1 %v5022_v50  ;;  %4663 = vmatprep.subr.bf16.mxu0 %v5023_v54  ;;  %v5043_v50 = vld [vmem:[%s5735_s15 + $0x268] sm:$0xff]   ;;  %v1372_v54 = vld [vmem:[%s6442_s0 + $0x218] sm:$0xff] }
 0x108   : > { %3162 = vmatmul.mubr.bf16.gmra.mrb[16].mxu0 %v4211_v34  ;;  %4727 = vmatprep.subr.bf16.mxu1 %v5025_v55  ;;  %v5035_v34 = vld [vmem:[%s5735_s15 + $0x258] sm:$0xff]  }
 0x109   : > { %3259 = vmatmul.mubr.bf16.gmra.mrb[16].mxu1 %v4213_v36  ;;  %3169 = vmatprep.mubr.bf16.mxu0 %v4228_v37  ;;  %v1363_v36 = vld [vmem:[%s6442_s0 + $0x1d0] sm:$0xff]  ;;  %v5037_v37 = vld [vmem:[%s5735_s15 + $0x2d8] sm:$0xff]  }
 0x10a   : > { %3266 = vmatprep.mubr.bf16.mxu1 %v4230_v39  ;;  %v1364_v39 = vld [vmem:[%s6442_s0 + $0x1d8] sm:$0xff]  ;;  %v4200_v46 = vcombine.high %v1355_v35, %v1363_v36  ;;  %v4199_v59 = vcombine.low %v1355_v35, %v1363_v36  ;;  %v1318_v35 = vld [vmem:[%s6442_s0 + $0x68] sm:$0xff]  ;;  %v4263_v36 = vcombine.low %v1419_v24, %v1427_v25 }
 0x10b   : > { %v4202_v47 = vcombine.high %v1356_v38, %v1364_v39  ;;  %v1380_v55 = vld [vmem:[%s6442_s0 + $0x258] sm:$0xff] }
 0x10c   : > { %v4218_v0 = vcombine.high %v1372_v54, %v1380_v55 }
 0x110   : > { %3170 = vmatmul.mubr.bf16.gmra.mrb[20].mxu0 %v4227_v49  ;;  %v5042_v49 = vld [vmem:[%s5735_s15 + $0x2a0] sm:$0xff]  }
 0x111   : > { %3267 = vmatmul.mubr.bf16.gmra.mrb[20].mxu1 %v4229_v51  ;;  %3177 = vmatprep.mubr.bf16.mxu0 %v4244_v52  ;;  %v1371_v51 = vld [vmem:[%s6442_s0 + $0x210] sm:$0xff] }
 0x112   : > { %3274 = vmatprep.mubr.bf16.mxu1 %v4246_v53  ;;  %v1379_v52 = vld [vmem:[%s6442_s0 + $0x250] sm:$0xff]  ;;  %v5045_v53 = vld [vmem:[%s5735_s15 + $0x2e8] sm:$0xff]  }
 0x118   : > { %3178 = vmatmul.mubr.bf16.gmra.mrb[24].mxu0 %v4243_v60  ;;  %v5049_v60 = vld [vmem:[%s5735_s15 + $0x2f0] sm:$0xff]  }
 0x119   : > { %3275 = vmatmul.mubr.bf16.gmra.mrb[24].mxu1 %v4245_v61  ;;  %3185 = vmatprep.mubr.bf16.mxu0 %v4260_v62  ;;  %v4201_v61 = vcombine.low %v1356_v38, %v1364_v39  ;;  %v4216_v62 = vcombine.high %v1371_v51, %v1379_v52 }
 0x11a   : > { %3282 = vmatprep.mubr.bf16.mxu1 %v4262_v63  ;;  %v5048_v63 = vld [vmem:[%s5735_s15 + $0x230] sm:$0xff]  }
 0x120   : > { %3186 = vmatmul.mubr.bf16.gmra.mrb[28].mxu0 %v4259_v4  ;;  %v1395_v4 = vld [vmem:[%s6442_s0 + $0x2d0] sm:$0xff] }
 0x121   : > { %3283 = vmatmul.mubr.bf16.gmra.mrb[28].mxu1 %v4261_v5  ;;  %3323 = vmatprep.mubr.bf16.mxu0 %v4152_v6  ;;  %v5053_v5 = vld [vmem:[%s5735_s15 + $0x2f8] sm:$0xff]  }
 0x122   : > { %3420 = vmatprep.mubr.bf16.mxu1 %v4154_v7  ;;  %v1388_v6 = vld [vmem:[%s6442_s0 + $0x298] sm:$0xff] }
 0x123   : > { %v1396_v7 = vld [vmem:[%s6442_s0 + $0x2d8] sm:$0xff] }
 0x128   : > { %3324 = vmatmul.mubr.bf16.vlgmr.msra.gmra.mrb[32].mxu0 %v4151_v11  ;;  %v4215_v11 = vcombine.low %v1371_v51, %v1379_v52  ;;  %v5061_v51 = vld [vmem:[%s5735_s15 + $0x3c8] sm:$0xff]  }
 0x129   : > { %3421 = vmatmul.mubr.bf16.vlgmr.msra.gmra.mrb[32].mxu1 %v4153_v13  ;;  %4664 = vmatpush3.bf16.msra.mxu0 %v5024_v14  ;;  %v4217_v13 = vcombine.low %v1372_v54, %v1380_v55  ;;  %v4232_v14 = vcombine.high %v1387_v3, %v1395_v4  ;;  %v5060_v52 = vld [vmem:[%s5735_s15 + $0x308] sm:$0xff]   ;;  %v1341_v54 = vld [vmem:[%s6442_s0 + $0x120] sm:$0xff] }
 0x12a   : > { %4728 = vmatpush3.bf16.msra.mxu1 %v5026_v15  ;;  %3331 = vmatprep.mubr.bf16.mxu0 %v4168_v16  ;;  %v4234_v15 = vcombine.high %v1388_v6, %v1396_v7  ;;  %v1403_v16 = vld [vmem:[%s6442_s0 + $0x310] sm:$0xff]  ;;  %v1349_v55 = vld [vmem:[%s6442_s0 + $0x160] sm:$0xff] }
 0x12b   : > { %3428 = vmatprep.mubr.bf16.mxu1 %v4170_v17  ;;  %4665 = vmatprep.subr.bf16.mxu0 %v5027_v18  ;;  %v1411_v17 = vld [vmem:[%s6442_s0 + $0x350] sm:$0xff]  ;;  %v1404_v18 = vld [vmem:[%s6442_s0 + $0x318] sm:$0xff] }
 0x12c   : > { %4729 = vmatprep.subr.bf16.mxu1 %v5029_v20  ;;  %v4231_v20 = vcombine.low %v1387_v3, %v1395_v4  ;;  %v4248_v22 = vcombine.high %v1403_v16, %v1411_v17  ;;  %v5069_v3 = vld [vmem:[%s5735_s15 + $0x3d8] sm:$0xff]   ;;  %v1357_v4 = vld [vmem:[%s6442_s0 + $0x1a0] sm:$0xff] }
 0x12d   : > { %4666 = vmatpush3.bf16.msra.mxu0 %v5028_v19  ;;  %v1412_v19 = vld [vmem:[%s6442_s0 + $0x358] sm:$0xff] }
 0x12e   : > { %4730 = vmatpush3.bf16.msra.mxu1 %v5030_v21  ;;  %4667 = vmatprep.subr.bf16.mxu0 %v5031_v26  ;;  %v4233_v21 = vcombine.low %v1388_v6, %v1396_v7  ;;  %v4250_v23 = vcombine.high %v1404_v18, %v1412_v19  ;;  %v1420_v26 = vld [vmem:[%s6442_s0 + $0x398] sm:$0xff]  ;;  %v1358_v6 = vld [vmem:[%s6442_s0 + $0x1a8] sm:$0xff] }
 0x12f   : > { %4731 = vmatprep.subr.bf16.mxu1 %v5033_v27  ;;  %v1428_v27 = vld [vmem:[%s6442_s0 + $0x3d8] sm:$0xff] }
 0x130   : > { %3332 = vmatmul.mubr.bf16.gmra.mrb[36].mxu0 %v4167_v28  ;;  %v4247_v28 = vcombine.low %v1403_v16, %v1411_v17  ;;  %v5068_v7 = vld [vmem:[%s5735_s15 + $0x318] sm:$0xff]   ;;  %v5072_v16 = vld [vmem:[%s5735_s15 + $0x320] sm:$0xff]  }
 0x131   : > { %3429 = vmatmul.mubr.bf16.gmra.mrb[36].mxu1 %v4169_v29  ;;  %3339 = vmatprep.mubr.bf16.mxu0 %v4184_v30  ;;  %v4249_v29 = vcombine.low %v1404_v18, %v1412_v19  ;;  %v4264_v30 = vcombine.high %v1419_v24, %v1427_v25  ;;  %v5074_v17 = vld [vmem:[%s5735_s15 + $0x3a0] sm:$0xff]   ;;  %v5075_v18 = vld [vmem:[%s5735_s15 + $0x368] sm:$0xff]  }
 0x132   : > { %3436 = vmatprep.mubr.bf16.mxu1 %v4186_v32  ;;  %4668 = vmatpush3.bf16.msra.mxu0 %v5032_v31  ;;  %v4266_v31 = vcombine.high %v1420_v26, %v1428_v27  ;;  %v1309_v32 = vld [vmem:[%s6442_s0 + $0x20] sm:$0xff]  ;;  %v5077_v19 = vld [vmem:[%s5735_s15 + $0x3e8] sm:$0xff]  }
 0x133   : > { %4732 = vmatpush3.bf16.msra.mxu1 %v5034_v33  ;;  %4669 = vmatprep.subr.bf16.mxu0 %v5035_v34  ;;  %v1317_v33 = vld [vmem:[%s6442_s0 + $0x60] sm:$0xff]  ;;  %v1310_v34 = vld [vmem:[%s6442_s0 + $0x28] sm:$0xff] }
 0x134   : > { %4733 = vmatprep.subr.bf16.mxu1 %v5037_v37  ;;  %v4265_v37 = vcombine.low %v1420_v26, %v1428_v27  ;;  %v4156_v38 = vcombine.high %v1309_v32, %v1317_v33  ;;  %v4158_v39 = vcombine.high %v1310_v34, %v1318_v35  ;;  %v1382_v24 = vld [vmem:[%s6442_s0 + $0x268] sm:$0xff]  ;;  %v5079_v26 = vld [vmem:[%s5735_s15 + $0x370] sm:$0xff]  }
 0x135   : > { %v5078_v25 = vld [vmem:[%s5735_s15 + $0x3a8] sm:$0xff]  }
 0x136   : > { %4670 = vmatpush3.bf16.msra.mxu0 %v5036_v40  ;;  %v1325_v40 = vld [vmem:[%s6442_s0 + $0xa0] sm:$0xff] }
 0x137   : > { %4734 = vmatpush3.bf16.msra.mxu1 %v5038_v41  ;;  %4671 = vmatprep.subr.bf16.mxu0 %v5039_v42  ;;  %v1333_v41 = vld [vmem:[%s6442_s0 + $0xe0] sm:$0xff]  ;;  %v4155_v42 = vcombine.low %v1309_v32, %v1317_v33  ;;  %v5080_v32 = vld [vmem:[%s5735_s15 + $0x330] sm:$0xff]  }
 0x138   : > { %3340 = vmatmul.mubr.bf16.gmra.mrb[40].mxu0 %v4183_v43  ;;  %4735 = vmatprep.subr.bf16.mxu1 %v5041_v44  ;;  %v1326_v43 = vld [vmem:[%s6442_s0 + $0xa8] sm:$0xff]  ;;  %v5082_v33 = vld [vmem:[%s5735_s15 + $0x3b0] sm:$0xff]  }
 0x139   : > { %3437 = vmatmul.mubr.bf16.gmra.mrb[40].mxu1 %v4185_v45  ;;  %3347 = vmatprep.mubr.bf16.mxu0 %v4200_v46  ;;  %v1334_v44 = vld [vmem:[%s6442_s0 + $0xe8] sm:$0xff]  ;;  %v4157_v45 = vcombine.low %v1310_v34, %v1318_v35  ;;  %v5056_v46 = vld [vmem:[%s5735_s15 + $0x300] sm:$0xff]   ;;  %v5083_v34 = vld [vmem:[%s5735_s15 + $0x378] sm:$0xff]  }
 0x13a   : > { %3444 = vmatprep.mubr.bf16.mxu1 %v4202_v47  ;;  %4672 = vmatpush3.bf16.msra.mxu0 %v5040_v48  ;;  %v5058_v47 = vld [vmem:[%s5735_s15 + $0x380] sm:$0xff]   ;;  %v4172_v48 = vcombine.high %v1325_v40, %v1333_v41  ;;  %v5085_v35 = vld [vmem:[%s5735_s15 + $0x3f8] sm:$0xff]  }
 0x13b   : > { %4736 = vmatpush3.bf16.msra.mxu1 %v5042_v49  ;;  %4673 = vmatprep.subr.bf16.mxu0 %v5043_v50  ;;  %v4174_v49 = vcombine.high %v1326_v43, %v1334_v44  ;;  %v5059_v50 = vld [vmem:[%s5735_s15 + $0x348] sm:$0xff]  }
 0x13c   : > { %4737 = vmatprep.subr.bf16.mxu1 %v5045_v53  ;;  %v5062_v53 = vld [vmem:[%s5735_s15 + $0x388] sm:$0xff]  }
 0x13e   : > { %4674 = vmatpush3.bf16.msra.mxu0 %v5044_v56  ;;  %v5063_v56 = vld [vmem:[%s5735_s15 + $0x350] sm:$0xff]  }
 0x13f   : > { %4738 = vmatpush3.bf16.msra.mxu1 %v5046_v57  ;;  %4675 = vmatprep.subr.bf16.mxu0 %v5047_v58  ;;  %v1342_v57 = vld [vmem:[%s6442_s0 + $0x128] sm:$0xff] }
 0x140   : > { %3348 = vmatmul.mubr.bf16.gmra.mrb[44].mxu0 %v4199_v59  ;;  %4739 = vmatprep.subr.bf16.mxu1 %v5049_v60  ;;  %v1350_v58 = vld [vmem:[%s6442_s0 + $0x168] sm:$0xff]  ;;  %v5065_v59 = vld [vmem:[%s5735_s15 + $0x3d0] sm:$0xff]   ;;  %v4171_v60 = vcombine.low %v1325_v40, %v1333_v41  ;;  %v5086_v41 = vld [vmem:[%s5735_s15 + $0x3b8] sm:$0xff]  }
 0x141   : > { %3445 = vmatmul.mubr.bf16.gmra.mrb[44].mxu1 %v4201_v61  ;;  %3355 = vmatprep.mubr.bf16.mxu0 %v4216_v62  ;;  %v4173_v61 = vcombine.low %v1326_v43, %v1334_v44  ;;  %v4188_v62 = vcombine.high %v1341_v54, %v1349_v55  ;;  %v1398_v40 = vld [vmem:[%s6442_s0 + $0x2e8] sm:$0xff] }
 0x142   : > { %3452 = vmatprep.mubr.bf16.mxu1 %v4218_v0  ;;  %4676 = vmatpush3.bf16.msra.mxu0 %v5048_v63  ;;  %v4190_v63 = vcombine.high %v1342_v57, %v1350_v58  ;;  %v5064_v0 = vld [vmem:[%s5735_s15 + $0x310] sm:$0xff]  }
 0x143   : > { %4740 = vmatpush3.bf16.msra.mxu1 %v5050_v1  ;;  %4677 = vmatprep.subr.bf16.mxu0 %v5051_v2  ;;  %v5066_v1 = vld [vmem:[%s5735_s15 + $0x390] sm:$0xff]   ;;  %v5067_v2 = vld [vmem:[%s5735_s15 + $0x358] sm:$0xff]  }
 0x144   : > { %4741 = vmatprep.subr.bf16.mxu1 %v5053_v5  ;;  %v1365_v5 = vld [vmem:[%s6442_s0 + $0x1e0] sm:$0xff] }
 0x145   : > { %v4203_v27 = vcombine.low %v1357_v4, %v1365_v5 }
 0x146   : > { %4678 = vmatpush3.bf16.msra.mxu0 %v5052_v8  ;;  %v1366_v8 = vld [vmem:[%s6442_s0 + $0x1e8] sm:$0xff] }
 0x147   : > { %4742 = vmatpush3.bf16.msra.mxu1 %v5054_v9  ;;  %4791 = vmatprep.subr.bf16.mxu0 %v5055_v10  ;;  %v5070_v9 = vld [vmem:[%s5735_s15 + $0x398] sm:$0xff]   ;;  %v5071_v10 = vld [vmem:[%s5735_s15 + $0x360] sm:$0xff]  }
 0x148   : > { %3356 = vmatmul.mubr.bf16.gmra.mrb[48].mxu0 %v4215_v11  ;;  %4855 = vmatprep.subr.bf16.mxu1 %v5057_v12  ;;  %v4187_v11 = vcombine.low %v1341_v54, %v1349_v55  ;;  %v5073_v12 = vld [vmem:[%s5735_s15 + $0x3e0] sm:$0xff]  }
 0x149   : > { %3453 = vmatmul.mubr.bf16.gmra.mrb[48].mxu1 %v4217_v13  ;;  %3363 = vmatprep.mubr.bf16.mxu0 %v4232_v14  ;;  %v4189_v13 = vcombine.low %v1342_v57, %v1350_v58  ;;  %v4204_v14 = vcombine.high %v1357_v4, %v1365_v5  ;;  %v1421_v54 = vld [vmem:[%s6442_s0 + $0x3a0] sm:$0xff]  ;;  %v1430_v57 = vld [vmem:[%s6442_s0 + $0x3e8] sm:$0xff] }
 0x14a   : > { %3460 = vmatprep.mubr.bf16.mxu1 %v4234_v15  ;;  %v4206_v15 = vcombine.high %v1358_v6, %v1366_v8  ;;  %v1429_v55 = vld [vmem:[%s6442_s0 + $0x3e0] sm:$0xff] }
 0x150   : > { %3364 = vmatmul.mubr.bf16.gmra.mrb[52].mxu0 %v4231_v20  ;;  %v1373_v20 = vld [vmem:[%s6442_s0 + $0x220] sm:$0xff] }
 0x151   : > { %3461 = vmatmul.mubr.bf16.gmra.mrb[52].mxu1 %v4233_v21  ;;  %3371 = vmatprep.mubr.bf16.mxu0 %v4248_v22  ;;  %v1381_v21 = vld [vmem:[%s6442_s0 + $0x260] sm:$0xff]  ;;  %v1374_v22 = vld [vmem:[%s6442_s0 + $0x228] sm:$0xff] }
 0x152   : > { %3468 = vmatprep.mubr.bf16.mxu1 %v4250_v23  ;;  %v5076_v23 = vld [vmem:[%s5735_s15 + $0x328] sm:$0xff]   ;;  %v4221_v43 = vcombine.low %v1374_v22, %v1382_v24 }
 0x158   : > { %3372 = vmatmul.mubr.bf16.gmra.mrb[56].mxu0 %v4247_v28  ;;  %v5081_v28 = vld [vmem:[%s5735_s15 + $0x3f0] sm:$0xff]  }
 0x159   : > { %3469 = vmatmul.mubr.bf16.gmra.mrb[56].mxu1 %v4249_v29  ;;  %3379 = vmatprep.mubr.bf16.mxu0 %v4264_v30  ;;  %v4205_v29 = vcombine.low %v1358_v6, %v1366_v8  ;;  %v4220_v30 = vcombine.high %v1373_v20, %v1381_v21  ;;  %v1327_v6 = vld [vmem:[%s6442_s0 + $0xb0] sm:$0xff]  ;;  %v1328_v8 = vld [vmem:[%s6442_s0 + $0xb8] sm:$0xff] }
 0x15a   : > { %3476 = vmatprep.mubr.bf16.mxu1 %v4266_v31  ;;  %v4222_v31 = vcombine.high %v1374_v22, %v1382_v24  ;;  %v1359_v22 = vld [vmem:[%s6442_s0 + $0x1b0] sm:$0xff]  ;;  %v1360_v24 = vld [vmem:[%s6442_s0 + $0x1b8] sm:$0xff] }
 0x160   : > { %3380 = vmatmul.mubr.bf16.gmra.mrb[60].mxu0 %v4263_v36  ;;  %v1389_v36 = vld [vmem:[%s6442_s0 + $0x2a0] sm:$0xff] }
 0x161   : > { %3477 = vmatmul.mubr.bf16.gmra.mrb[60].mxu1 %v4265_v37  ;;  %3517 = vmatprep.mubr.bf16.mxu0 %v4156_v38  ;;  %v1397_v37 = vld [vmem:[%s6442_s0 + $0x2e0] sm:$0xff]  ;;  %v5084_v38 = vld [vmem:[%s5735_s15 + $0x338] sm:$0xff]   ;;  %s4146_s15 = sshll.u32 %s1224_s27, 7 }
 0x162   : > { %3614 = vmatprep.mubr.bf16.mxu1 %v4158_v39  ;;  %v1390_v39 = vld [vmem:[%s6442_s0 + $0x2a8] sm:$0xff]  ;;  %v4236_v44 = vcombine.high %v1389_v36, %v1397_v37  ;;  %s6373_s29 = scalar_lea.vmem [#allocation4], %s4146_s15 }
 0x168   : > { %3518 = vmatmul.mubr.bf16.vlgmr.msra.gmra.mrb[64].mxu0 %v4155_v42  ;;  %v4219_v42 = vcombine.low %v1373_v20, %v1381_v21 }
 0x169   : > { %3615 = vmatmul.mubr.bf16.vlgmr.msra.gmra.mrb[64].mxu1 %v4157_v45  ;;  %4792 = vmatpush3.bf16.msra.mxu0 %v5056_v46  ;;  %v4238_v45 = vcombine.high %v1390_v39, %v1398_v40  ;;  %v1405_v46 = vld [vmem:[%s6442_s0 + $0x320] sm:$0xff] }
 0x16a   : > { %4856 = vmatpush3.bf16.msra.mxu1 %v5058_v47  ;;  %3525 = vmatprep.mubr.bf16.mxu0 %v4172_v48  ;;  %v1413_v47 = vld [vmem:[%s6442_s0 + $0x360] sm:$0xff]  ;;  %v1406_v48 = vld [vmem:[%s6442_s0 + $0x328] sm:$0xff] }
 0x16b   : > { %3622 = vmatprep.mubr.bf16.mxu1 %v4174_v49  ;;  %4793 = vmatprep.subr.bf16.mxu0 %v5059_v50  ;;  %v1414_v49 = vld [vmem:[%s6442_s0 + $0x368] sm:$0xff]  ;;  %v4235_v50 = vcombine.low %v1389_v36, %v1397_v37  ;;  %v4251_v58 = vcombine.low %v1405_v46, %v1413_v47 }
 0x16c   : > { %4857 = vmatprep.subr.bf16.mxu1 %v5061_v51  ;;  %v4237_v51 = vcombine.low %v1390_v39, %v1398_v40 }
 0x16d   : > { %4794 = vmatpush3.bf16.msra.mxu0 %v5060_v52  ;;  %v4252_v52 = vcombine.high %v1405_v46, %v1413_v47 }
 0x16e   : > { %4858 = vmatpush3.bf16.msra.mxu1 %v5062_v53  ;;  %4795 = vmatprep.subr.bf16.mxu0 %v5063_v56  ;;  %v4254_v53 = vcombine.high %v1406_v48, %v1414_v49  ;;  %v1422_v56 = vld [vmem:[%s6442_s0 + $0x3a8] sm:$0xff] }
 0x16f   : > { %4859 = vmatprep.subr.bf16.mxu1 %v5065_v59  ;;  %v4253_v59 = vcombine.low %v1406_v48, %v1414_v49 }
 0x170   : > { %3526 = vmatmul.mubr.bf16.gmra.mrb[68].mxu0 %v4171_v60  ;;  %v4268_v60 = vcombine.high %v1421_v54, %v1429_v55 }
 0x171   : > { %3623 = vmatmul.mubr.bf16.gmra.mrb[68].mxu1 %v4173_v61  ;;  %3533 = vmatprep.mubr.bf16.mxu0 %v4188_v62  ;;  %v4270_v61 = vcombine.high %v1422_v56, %v1430_v57  ;;  %v1311_v62 = vld [vmem:[%s6442_s0 + $0x30] sm:$0xff] }
 0x172   : > { %3630 = vmatprep.mubr.bf16.mxu1 %v4190_v63  ;;  %4796 = vmatpush3.bf16.msra.mxu0 %v5064_v0  ;;  %v1319_v63 = vld [vmem:[%s6442_s0 + $0x70] sm:$0xff]  ;;  %v1312_v0 = vld [vmem:[%s6442_s0 + $0x38] sm:$0xff] }
 0x173   : > { %4860 = vmatpush3.bf16.msra.mxu1 %v5066_v1  ;;  %4797 = vmatprep.subr.bf16.mxu0 %v5067_v2  ;;  %v1320_v1 = vld [vmem:[%s6442_s0 + $0x78] sm:$0xff]  ;;  %v4267_v2 = vcombine.low %v1421_v54, %v1429_v55  ;;  %v4160_v4 = vcombine.high %v1311_v62, %v1319_v63 }
 0x174   : > { %4861 = vmatprep.subr.bf16.mxu1 %v5069_v3  ;;  %v4269_v3 = vcombine.low %v1422_v56, %v1430_v57  ;;  %v4162_v5 = vcombine.high %v1312_v0, %v1320_v1  ;;  %v1392_v55 = vld [vmem:[%s6442_s0 + $0x2b8] sm:$0xff] }
 0x175   : > { %v1400_v56 = vld [vmem:[%s6442_s0 + $0x2f8] sm:$0xff] }
 0x176   : > { %4798 = vmatpush3.bf16.msra.mxu0 %v5068_v7  ;;  %v1335_v7 = vld [vmem:[%s6442_s0 + $0xf0] sm:$0xff] }
 0x177   : > { %4862 = vmatpush3.bf16.msra.mxu1 %v5070_v9  ;;  %4799 = vmatprep.subr.bf16.mxu0 %v5071_v10  ;;  %v1336_v9 = vld [vmem:[%s6442_s0 + $0xf8] sm:$0xff]  ;;  %v4159_v10 = vcombine.low %v1311_v62, %v1319_v63 }
 0x178   : > { %3534 = vmatmul.mubr.bf16.gmra.mrb[72].mxu0 %v4187_v11  ;;  %4863 = vmatprep.subr.bf16.mxu1 %v5073_v12  ;;  %v4161_v11 = vcombine.low %v1312_v0, %v1320_v1  ;;  %v4176_v12 = vcombine.high %v1327_v6, %v1335_v7 }
 0x179   : > { %3631 = vmatmul.mubr.bf16.gmra.mrb[72].mxu1 %v4189_v13  ;;  %3541 = vmatprep.mubr.bf16.mxu0 %v4204_v14  ;;  %v4178_v13 = vcombine.high %v1328_v8, %v1336_v9  ;;  %v1343_v14 = vld [vmem:[%s6442_s0 + $0x130] sm:$0xff] }
 0x17a   : > { %3638 = vmatprep.mubr.bf16.mxu1 %v4206_v15  ;;  %4800 = vmatpush3.bf16.msra.mxu0 %v5072_v16  ;;  %v1351_v15 = vld [vmem:[%s6442_s0 + $0x170] sm:$0xff]  ;;  %v1344_v16 = vld [vmem:[%s6442_s0 + $0x138] sm:$0xff] }
 0x17b   : > { %4864 = vmatpush3.bf16.msra.mxu1 %v5074_v17  ;;  %4801 = vmatprep.subr.bf16.mxu0 %v5075_v18  ;;  %v1352_v17 = vld [vmem:[%s6442_s0 + $0x178] sm:$0xff]  ;;  %v4175_v18 = vcombine.low %v1327_v6, %v1335_v7  ;;  %v4192_v20 = vcombine.high %v1343_v14, %v1351_v15 }
 0x17c   : > { %4865 = vmatprep.subr.bf16.mxu1 %v5077_v19  ;;  %v4177_v19 = vcombine.low %v1328_v8, %v1336_v9  ;;  %v4194_v21 = vcombine.high %v1344_v16, %v1352_v17 }
 0x17e   : > { %4802 = vmatpush3.bf16.msra.mxu0 %v5076_v23  ;;  %v1367_v23 = vld [vmem:[%s6442_s0 + $0x1f0] sm:$0xff] }
 0x17f   : > { %4866 = vmatpush3.bf16.msra.mxu1 %v5078_v25  ;;  %4803 = vmatprep.subr.bf16.mxu0 %v5079_v26  ;;  %v1368_v25 = vld [vmem:[%s6442_s0 + $0x1f8] sm:$0xff]  ;;  %v4191_v26 = vcombine.low %v1343_v14, %v1351_v15  ;;  %v4207_v37 = vcombine.low %v1359_v22, %v1367_v23 }
 0x180   : > { %3542 = vmatmul.mubr.bf16.gmra.mrb[76].mxu0 %v4203_v27  ;;  %4867 = vmatprep.subr.bf16.mxu1 %v5081_v28  ;;  %v4193_v27 = vcombine.low %v1344_v16, %v1352_v17  ;;  %v4208_v28 = vcombine.high %v1359_v22, %v1367_v23  ;;  %v1416_v14 = vld [vmem:[%s6442_s0 + $0x378] sm:$0xff] }
 0x181   : > { %3639 = vmatmul.mubr.bf16.gmra.mrb[76].mxu1 %v4205_v29  ;;  %3549 = vmatprep.mubr.bf16.mxu0 %v4220_v30  ;;  %v4210_v29 = vcombine.high %v1360_v24, %v1368_v25  ;;  %v1375_v30 = vld [vmem:[%s6442_s0 + $0x230] sm:$0xff] }
 0x182   : > { %3646 = vmatprep.mubr.bf16.mxu1 %v4222_v31  ;;  %4804 = vmatpush3.bf16.msra.mxu0 %v5080_v32  ;;  %v1383_v31 = vld [vmem:[%s6442_s0 + $0x270] sm:$0xff] }
 0x183   : > { %4868 = vmatpush3.bf16.msra.mxu1 %v5082_v33  ;;  %4805 = vmatprep.subr.bf16.mxu0 %v5083_v34  ;;  %v1376_v33 = vld [vmem:[%s6442_s0 + $0x238] sm:$0xff] }
 0x184   : > { %4869 = vmatprep.subr.bf16.mxu1 %v5085_v35  ;;  %v1384_v34 = vld [vmem:[%s6442_s0 + $0x278] sm:$0xff] }
 0x185   : > { %v4226_v46 = vcombine.high %v1376_v33, %v1384_v34  ;;  %v4225_v63 = vcombine.low %v1376_v33, %v1384_v34  ;;  %v1431_v33 = vld [vmem:[%s6442_s0 + $0x3f0] sm:$0xff] }
 0x186   : > { %4806 = vmatpush3.bf16.msra.mxu0 %v5084_v38 }
 0x187   : > { %4870 = vmatpush3.bf16.msra.mxu1 %v5086_v41  ;;  %v4209_v41 = vcombine.low %v1360_v24, %v1368_v25 }
 0x188   : > { %3550 = vmatmul.mubr.bf16.gmra.mrb[80].mxu0 %v4219_v42  ;;  %v4224_v42 = vcombine.high %v1375_v30, %v1383_v31 }
 0x189   : > { %3647 = vmatmul.mubr.bf16.gmra.mrb[80].mxu1 %v4221_v43  ;;  %3557 = vmatprep.mubr.bf16.mxu0 %v4236_v44 }
 0x18a   : > { %3654 = vmatprep.mubr.bf16.mxu1 %v4238_v45 }
 0x190   : > { %3558 = vmatmul.mubr.bf16.gmra.mrb[84].mxu0 %v4235_v50 }
 0x191   : > { %3655 = vmatmul.mubr.bf16.gmra.mrb[84].mxu1 %v4237_v51  ;;  %3565 = vmatprep.mubr.bf16.mxu0 %v4252_v52  ;;  %v1391_v52 = vld [vmem:[%s6442_s0 + $0x2b0] sm:$0xff] }
 0x192   : > { %3662 = vmatprep.mubr.bf16.mxu1 %v4254_v53  ;;  %v1399_v53 = vld [vmem:[%s6442_s0 + $0x2f0] sm:$0xff] }
 0x193   : > { %v4240_v0 = vcombine.high %v1391_v52, %v1399_v53  ;;  %v4239_v17 = vcombine.low %v1391_v52, %v1399_v53 }
 0x198   : > { %3566 = vmatmul.mubr.bf16.gmra.mrb[88].mxu0 %v4251_v58 }
 0x199   : > { %3663 = vmatmul.mubr.bf16.gmra.mrb[88].mxu1 %v4253_v59  ;;  %3573 = vmatprep.mubr.bf16.mxu0 %v4268_v60  ;;  %v4223_v59 = vcombine.low %v1375_v30, %v1383_v31 }
 0x19a   : > { %3670 = vmatprep.mubr.bf16.mxu1 %v4270_v61 }
 0x1a0   : > { %3574 = vmatmul.mubr.bf16.gmra.mrb[92].mxu0 %v4267_v2 }
 0x1a1   : > { %3671 = vmatmul.mubr.bf16.gmra.mrb[92].mxu1 %v4269_v3  ;;  %3711 = vmatprep.mubr.bf16.mxu0 %v4160_v4  ;;  %v4242_v4 = vcombine.high %v1392_v55, %v1400_v56 }
 0x1a2   : > { %3808 = vmatprep.mubr.bf16.mxu1 %v4162_v5 }
 0x1a8   : > { %3712 = vmatmul.mubr.bf16.vlgmr.msra.gmra.mrb[96].mxu0 %v4159_v10  ;;  %v1407_v10 = vld [vmem:[%s6442_s0 + $0x330] sm:$0xff] }
 0x1a9   : > { %3809 = vmatmul.mubr.bf16.vlgmr.msra.gmra.mrb[96].mxu1 %v4161_v11  ;;  %3719 = vmatprep.mubr.bf16.mxu0 %v4176_v12  ;;  %v1415_v11 = vld [vmem:[%s6442_s0 + $0x370] sm:$0xff] }
 0x1aa   : > { %3816 = vmatprep.mubr.bf16.mxu1 %v4178_v13  ;;  %v1408_v13 = vld [vmem:[%s6442_s0 + $0x338] sm:$0xff]  ;;  %v4256_v22 = vcombine.high %v1407_v10, %v1415_v11 }
 0x1b0   : > { %3720 = vmatmul.mubr.bf16.gmra.mrb[100].mxu0 %v4175_v18 }
 0x1b1   : > { %3817 = vmatmul.mubr.bf16.gmra.mrb[100].mxu1 %v4177_v19  ;;  %3727 = vmatprep.mubr.bf16.mxu0 %v4192_v20 }
 0x1b2   : > { %3824 = vmatprep.mubr.bf16.mxu1 %v4194_v21  ;;  %v4241_v21 = vcombine.low %v1392_v55, %v1400_v56 }
 0x1b8   : > { %3728 = vmatmul.mubr.bf16.gmra.mrb[104].mxu0 %v4191_v26  ;;  %v4258_v26 = vcombine.high %v1408_v13, %v1416_v14 }
 0x1b9   : > { %3825 = vmatmul.mubr.bf16.gmra.mrb[104].mxu1 %v4193_v27  ;;  %3735 = vmatprep.mubr.bf16.mxu0 %v4208_v28 }
 0x1ba   : > { %3832 = vmatprep.mubr.bf16.mxu1 %v4210_v29 }
 0x1bb   : > { %v4423_v32 = vpop.f32.mrb[0].mxu0 }
 0x1bc   : > { %v4487_v35 = vpop.f32.mrb[0].mxu1  ;;  %v4424_v36 = vpop.f32.mrb[1].mxu0 }
 0x1bd   : > { %v4425_v38 = vadd.f32 %v4424_v36, %v4423_v32  ;;  %v4488_v39 = vpop.f32.mrb[1].mxu1  ;;  %v4426_v40 = vpop.f32.mrb[2].mxu0  ;;  %v1423_v32 = vld [vmem:[%s6442_s0 + $0x3b0] sm:$0xff]  ;;  %v1432_v36 = vld [vmem:[%s6442_s0 + $0x3f8] sm:$0xff] }
 0x1be   : > { %v4489_v43 = vadd.f32 %v4488_v39, %v4487_v35  ;;  %v4490_v44 = vpop.f32.mrb[2].mxu1  ;;  %v4427_v45 = vpop.f32.mrb[3].mxu0  ;;  %v1424_v35 = vld [vmem:[%s6442_s0 + $0x3b8] sm:$0xff]  ;;  %v4255_v39 = vcombine.low %v1407_v10, %v1415_v11 }
 0x1bf   : > { %v4428_v47 = vadd.f32 %v4427_v45, %v4426_v40  ;;  %v4491_v48 = vpop.f32.mrb[3].mxu1 }
 0x1c0   : > { %v6205_v49 = vadd.f32 %v4489_v43, %v4425_v38  ;;  %v4492_v50 = vadd.f32 %v4491_v48, %v4490_v44  ;;  %3736 = vmatmul.mubr.bf16.gmra.mrb[108].mxu0 %v4207_v37  ;;  %v4257_v43 = vcombine.low %v1408_v13, %v1416_v14  ;;  %v4272_v44 = vcombine.high %v1423_v32, %v1431_v33 }
 0x1c1   : > { %3833 = vmatmul.mubr.bf16.gmra.mrb[108].mxu1 %v4209_v41  ;;  %3743 = vmatprep.mubr.bf16.mxu0 %v4224_v42  ;;  %v4274_v48 = vcombine.high %v1424_v35, %v1432_v36 }
 0x1c2   : > { %v6207_v51 = vadd.f32 %v4492_v50, %v4428_v47  ;;  %3840 = vmatprep.mubr.bf16.mxu1 %v4226_v46 }
 0x1c3   : > { %v4429_v54 = vpop.f32.mrb[4].mxu0 }
 0x1c4   : > { %v4493_v57 = vpop.f32.mrb[4].mxu1  ;;  %v4430_v58 = vpop.f32.mrb[5].mxu0 }
 0x1c5   : > { %v4431_v60 = vadd.f32 %v4430_v58, %v4429_v54  ;;  %v4494_v61 = vpop.f32.mrb[5].mxu1  ;;  %v4432_v62 = vpop.f32.mrb[6].mxu0 }
 0x1c6   : > { %v4495_v1 = vadd.f32 %v4494_v61, %v4493_v57  ;;  %v4496_v2 = vpop.f32.mrb[6].mxu1  ;;  %v4433_v3 = vpop.f32.mrb[7].mxu0 }
 0x1c7   : > { %v4434_v5 = vadd.f32 %v4433_v3, %v4432_v62  ;;  %v4497_v6 = vpop.f32.mrb[7].mxu1 }
 0x1c8   : > { %v6221_v7 = vadd.f32 %v4495_v1, %v4431_v60  ;;  %v4498_v8 = vadd.f32 %v4497_v6, %v4496_v2  ;;  %3744 = vmatmul.mubr.bf16.gmra.mrb[112].mxu0 %v4223_v59  ;;  %v4271_v59 = vcombine.low %v1423_v32, %v1431_v33 }
 0x1c9   : > { %3841 = vmatmul.mubr.bf16.gmra.mrb[112].mxu1 %v4225_v63  ;;  %3751 = vmatprep.mubr.bf16.mxu0 %v4240_v0  ;;  %v4273_v63 = vcombine.low %v1424_v35, %v1432_v36 }
 0x1ca   : > { %v6223_v9 = vadd.f32 %v4498_v8, %v4434_v5  ;;  %3848 = vmatprep.mubr.bf16.mxu1 %v4242_v4 }
 0x1cb   : > { %v4435_v12 = vpop.f32.mrb[8].mxu0 }
 0x1cc   : > { %v4499_v15 = vpop.f32.mrb[8].mxu1  ;;  %v4436_v16 = vpop.f32.mrb[9].mxu0 }
 0x1cd   : > { %v4437_v18 = vadd.f32 %v4436_v16, %v4435_v12  ;;  %v4500_v19 = vpop.f32.mrb[9].mxu1  ;;  %v4438_v20 = vpop.f32.mrb[10].mxu0 }
 0x1ce   : > { %v4501_v23 = vadd.f32 %v4500_v19, %v4499_v15  ;;  %v4502_v24 = vpop.f32.mrb[10].mxu1  ;;  %v4439_v25 = vpop.f32.mrb[11].mxu0 }
 0x1cf   : > { %v4440_v27 = vadd.f32 %v4439_v25, %v4438_v20  ;;  %v4503_v28 = vpop.f32.mrb[11].mxu1 }
 0x1d0   : > { %v6237_v29 = vadd.f32 %v4501_v23, %v4437_v18  ;;  %v4504_v30 = vadd.f32 %v4503_v28, %v4502_v24  ;;  %3752 = vmatmul.mubr.bf16.gmra.mrb[116].mxu0 %v4239_v17 }
 0x1d1   : > { %3849 = vmatmul.mubr.bf16.gmra.mrb[116].mxu1 %v4241_v21  ;;  %3759 = vmatprep.mubr.bf16.mxu0 %v4256_v22 }
 0x1d2   : > { %v6239_v31 = vadd.f32 %v4504_v30, %v4440_v27  ;;  %3856 = vmatprep.mubr.bf16.mxu1 %v4258_v26 }
 0x1d3   : > { %v4441_v34 = vpop.f32.mrb[12].mxu0 }
 0x1d4   : > { %v4505_v37 = vpop.f32.mrb[12].mxu1  ;;  %v4442_v38 = vpop.f32.mrb[13].mxu0 }
 0x1d5   : > { %v4443_v40 = vadd.f32 %v4442_v38, %v4441_v34  ;;  %v4506_v41 = vpop.f32.mrb[13].mxu1  ;;  %v4444_v42 = vpop.f32.mrb[14].mxu0 }
 0x1d6   : > { %v4507_v45 = vadd.f32 %v4506_v41, %v4505_v37  ;;  %v4508_v46 = vpop.f32.mrb[14].mxu1  ;;  %v4445_v47 = vpop.f32.mrb[15].mxu0 }
 0x1d7   : > { %v4446_v50 = vadd.f32 %v4445_v47, %v4444_v42  ;;  %v4509_v52 = vpop.f32.mrb[15].mxu1 }
 0x1d8   : > { %v6253_v53 = vadd.f32 %v4507_v45, %v4443_v40  ;;  %v4510_v54 = vadd.f32 %v4509_v52, %v4508_v46  ;;  %3760 = vmatmul.mubr.bf16.gmra.mrb[120].mxu0 %v4255_v39 }
 0x1d9   : > { %3857 = vmatmul.mubr.bf16.gmra.mrb[120].mxu1 %v4257_v43  ;;  %3767 = vmatprep.mubr.bf16.mxu0 %v4272_v44 }
 0x1da   : > { %v6255_v55 = vadd.f32 %v4510_v54, %v4446_v50  ;;  %3864 = vmatprep.mubr.bf16.mxu1 %v4274_v48 }
 0x1db   : > { %v4447_v56 = vpop.f32.mrb[16].mxu0 }
 0x1dc   : > { %v4511_v57 = vpop.f32.mrb[16].mxu1  ;;  %v4448_v58 = vpop.f32.mrb[17].mxu0 }
 0x1dd   : > { %v4449_v60 = vadd.f32 %v4448_v58, %v4447_v56  ;;  %v4512_v61 = vpop.f32.mrb[17].mxu1  ;;  %v4450_v62 = vpop.f32.mrb[18].mxu0 }
 0x1de   : > { %v4513_v0 = vadd.f32 %v4512_v61, %v4511_v57  ;;  %v4514_v1 = vpop.f32.mrb[18].mxu1  ;;  %v4451_v2 = vpop.f32.mrb[19].mxu0 }
 0x1df   : > { %v4452_v3 = vadd.f32 %v4451_v2, %v4450_v62  ;;  %v4515_v4 = vpop.f32.mrb[19].mxu1 }
 0x1e0   : > { %v6257_v5 = vadd.f32 %v4513_v0, %v4449_v60  ;;  %v4516_v6 = vadd.f32 %v4515_v4, %v4514_v1  ;;  %3768 = vmatmul.mubr.bf16.gmra.mrb[124].mxu0 %v4271_v59 }
 0x1e1   : > { %3865 = vmatmul.mubr.bf16.gmra.mrb[124].mxu1 %v4273_v63 }
 0x1e2   : > { %v6259_v8 = vadd.f32 %v4516_v6, %v4452_v3 }
 0x1e3   : > { %v4453_v10 = vpop.f32.mrb[20].mxu0 }
 0x1e4   : > { %v4517_v11 = vpop.f32.mrb[20].mxu1  ;;  %v4454_v12 = vpop.f32.mrb[21].mxu0 }
 0x1e5   : > { %v4455_v13 = vadd.f32 %v4454_v12, %v4453_v10  ;;  %v4518_v14 = vpop.f32.mrb[21].mxu1  ;;  %v4456_v15 = vpop.f32.mrb[22].mxu0 }
 0x1e6   : > { %v4519_v16 = vadd.f32 %v4518_v14, %v4517_v11  ;;  %v4520_v17 = vpop.f32.mrb[22].mxu1  ;;  %v4457_v18 = vpop.f32.mrb[23].mxu0 }
 0x1e7   : > { %v4458_v19 = vadd.f32 %v4457_v18, %v4456_v15  ;;  %v4521_v20 = vpop.f32.mrb[23].mxu1 }
 0x1e8   : > { %v6261_v21 = vadd.f32 %v4519_v16, %v4455_v13  ;;  %v4522_v22 = vadd.f32 %v4521_v20, %v4520_v17 }
 0x1ea   : > { %v6263_v23 = vadd.f32 %v4522_v22, %v4458_v19 }
 0x1eb   : > { %v4459_v24 = vpop.f32.mrb[24].mxu0 }
 0x1ec   : > { %v4523_v25 = vpop.f32.mrb[24].mxu1  ;;  %v4460_v26 = vpop.f32.mrb[25].mxu0 }
 0x1ed   : > { %v4461_v27 = vadd.f32 %v4460_v26, %v4459_v24  ;;  %v4524_v28 = vpop.f32.mrb[25].mxu1  ;;  %v4462_v30 = vpop.f32.mrb[26].mxu0 }
 0x1ee   : > { %v4525_v32 = vadd.f32 %v4524_v28, %v4523_v25  ;;  %v4526_v33 = vpop.f32.mrb[26].mxu1  ;;  %v4463_v34 = vpop.f32.mrb[27].mxu0 }
 0x1ef   : > { %v4464_v35 = vadd.f32 %v4463_v34, %v4462_v30  ;;  %v4527_v36 = vpop.f32.mrb[27].mxu1 }
 0x1f0   : > { %v6265_v37 = vadd.f32 %v4525_v32, %v4461_v27  ;;  %v4528_v38 = vadd.f32 %v4527_v36, %v4526_v33 }
 0x1f2   : > { %v6267_v39 = vadd.f32 %v4528_v38, %v4464_v35 }
 0x1f3   : > { %v4465_v40 = vpop.f32.mrb[28].mxu0 }
 0x1f4   : > { %v4529_v41 = vpop.f32.mrb[28].mxu1  ;;  %v4466_v42 = vpop.f32.mrb[29].mxu0 }
 0x1f5   : > { %v4467_v43 = vadd.f32 %v4466_v42, %v4465_v40  ;;  %v4530_v44 = vpop.f32.mrb[29].mxu1  ;;  %v4468_v45 = vpop.f32.mrb[30].mxu0 }
 0x1f6   : > { %v4531_v46 = vadd.f32 %v4530_v44, %v4529_v41  ;;  %v4532_v47 = vpop.f32.mrb[30].mxu1  ;;  %v4469_v48 = vpop.f32.mrb[31].mxu0 }
 0x1f7   : > { %v4470_v50 = vadd.f32 %v4469_v48, %v4468_v45  ;;  %v4533_v52 = vpop.f32.mrb[31].mxu1 }
 0x1f8   : > { %v6269_v54 = vadd.f32 %v4531_v46, %v4467_v43  ;;  %v4534_v56 = vadd.f32 %v4533_v52, %v4532_v47 }
 0x1fa   : > { %v6271_v57 = vadd.f32 %v4534_v56, %v4470_v50 }
 0x1fb   : > { %v4551_v58 = vpop.f32.mrb[32].mxu0 }
 0x1fc   : > { %v4615_v59 = vpop.f32.mrb[32].mxu1  ;;  %v4552_v60 = vpop.f32.mrb[33].mxu0 }
 0x1fd   : > { %v4553_v61 = vadd.f32 %v4552_v60, %v4551_v58  ;;  %v4616_v62 = vpop.f32.mrb[33].mxu1  ;;  %v4554_v63 = vpop.f32.mrb[34].mxu0 }
 0x1fe   : > { %v4617_v0 = vadd.f32 %v4616_v62, %v4615_v59  ;;  %v4618_v1 = vpop.f32.mrb[34].mxu1  ;;  %v4555_v2 = vpop.f32.mrb[35].mxu0 }
 0x1ff   : > { %v3326_v3 = vadd.f32 %v4553_v61, %v6205_v49  ;;  %v4556_v4 = vadd.f32 %v4555_v2, %v4554_v63  ;;  %v4619_v6 = vpop.f32.mrb[35].mxu1 }
 0x200   : > { %v4620_v10 = vadd.f32 %v4619_v6, %v4618_v1 }
 0x201   : > { %v6274_v11 = vadd.f32 %v4617_v0, %v3326_v3  ;;  %v3329_v12 = vadd.f32 %v4556_v4, %v6207_v51 }
 0x203   : > { %v6277_v13 = vadd.f32 %v4620_v10, %v3329_v12  ;;  %v4557_v14 = vpop.f32.mrb[36].mxu0 }
 0x204   : > { %v4621_v15 = vpop.f32.mrb[36].mxu1  ;;  %v4558_v16 = vpop.f32.mrb[37].mxu0 }
 0x205   : > { %v4559_v17 = vadd.f32 %v4558_v16, %v4557_v14  ;;  %v4622_v18 = vpop.f32.mrb[37].mxu1  ;;  %v4560_v19 = vpop.f32.mrb[38].mxu0 }
 0x206   : > { %v4623_v20 = vadd.f32 %v4622_v18, %v4621_v15  ;;  %v4624_v22 = vpop.f32.mrb[38].mxu1  ;;  %v4561_v24 = vpop.f32.mrb[39].mxu0 }
 0x207   : > { %v3334_v49 = vadd.f32 %v4559_v17, %v6221_v7  ;;  %v4562_v25 = vadd.f32 %v4561_v24, %v4560_v19  ;;  %v4625_v26 = vpop.f32.mrb[39].mxu1 }
 0x208   : > { %v4626_v27 = vadd.f32 %v4625_v26, %v4624_v22 }
 0x209   : > { %v6280_v28 = vadd.f32 %v4623_v20, %v3334_v49  ;;  %v3337_v51 = vadd.f32 %v4562_v25, %v6223_v9 }
 0x20b   : > { %v6283_v30 = vadd.f32 %v4626_v27, %v3337_v51  ;;  %v4563_v32 = vpop.f32.mrb[40].mxu0 }
 0x20c   : > { %v4627_v33 = vpop.f32.mrb[40].mxu1  ;;  %v4564_v34 = vpop.f32.mrb[41].mxu0 }
 0x20d   : > { %v4565_v35 = vadd.f32 %v4564_v34, %v4563_v32  ;;  %v4628_v36 = vpop.f32.mrb[41].mxu1  ;;  %v4566_v38 = vpop.f32.mrb[42].mxu0 }
 0x20e   : > { %v4629_v40 = vadd.f32 %v4628_v36, %v4627_v33  ;;  %v4630_v41 = vpop.f32.mrb[42].mxu1  ;;  %v4567_v42 = vpop.f32.mrb[43].mxu0 }
 0x20f   : > { %v3342_v7 = vadd.f32 %v4565_v35, %v6237_v29  ;;  %v4568_v43 = vadd.f32 %v4567_v42, %v4566_v38  ;;  %v4631_v44 = vpop.f32.mrb[43].mxu1 }
 0x210   : > { %v4632_v45 = vadd.f32 %v4631_v44, %v4630_v41 }
 0x211   : > { %v6286_v46 = vadd.f32 %v4629_v40, %v3342_v7  ;;  %v3345_v9 = vadd.f32 %v4568_v43, %v6239_v31 }
 0x213   : > { %v6289_v47 = vadd.f32 %v4632_v45, %v3345_v9  ;;  %v4569_v48 = vpop.f32.mrb[44].mxu0 }
 0x214   : > { %v4633_v50 = vpop.f32.mrb[44].mxu1  ;;  %v4570_v52 = vpop.f32.mrb[45].mxu0 }
 0x215   : > { %v4571_v56 = vadd.f32 %v4570_v52, %v4569_v48  ;;  %v4634_v58 = vpop.f32.mrb[45].mxu1  ;;  %v4572_v59 = vpop.f32.mrb[46].mxu0 }
 0x216   : > { %v4635_v60 = vadd.f32 %v4634_v58, %v4633_v50  ;;  %v4636_v61 = vpop.f32.mrb[46].mxu1  ;;  %v4573_v62 = vpop.f32.mrb[47].mxu0 }
 0x217   : > { %v3350_v29 = vadd.f32 %v4571_v56, %v6253_v53  ;;  %v4574_v63 = vadd.f32 %v4573_v62, %v4572_v59  ;;  %v4637_v0 = vpop.f32.mrb[47].mxu1 }
 0x218   : > { %v4638_v1 = vadd.f32 %v4637_v0, %v4636_v61 }
 0x219   : > { %v6292_v2 = vadd.f32 %v4635_v60, %v3350_v29  ;;  %v3353_v31 = vadd.f32 %v4574_v63, %v6255_v55 }
 0x21b   : > { %v6295_v3 = vadd.f32 %v4638_v1, %v3353_v31  ;;  %v4575_v4 = vpop.f32.mrb[48].mxu0 }
 0x21c   : > { %v4639_v6 = vpop.f32.mrb[48].mxu1  ;;  %v4576_v10 = vpop.f32.mrb[49].mxu0 }
 0x21d   : > { %v4577_v12 = vadd.f32 %v4576_v10, %v4575_v4  ;;  %v4640_v14 = vpop.f32.mrb[49].mxu1  ;;  %v4578_v15 = vpop.f32.mrb[50].mxu0 }
 0x21e   : > { %v4641_v16 = vadd.f32 %v4640_v14, %v4639_v6  ;;  %v4642_v17 = vpop.f32.mrb[50].mxu1  ;;  %v4579_v18 = vpop.f32.mrb[51].mxu0 }
 0x21f   : > { %v3358_v53 = vadd.f32 %v4577_v12, %v6257_v5  ;;  %v4580_v19 = vadd.f32 %v4579_v18, %v4578_v15  ;;  %v4643_v20 = vpop.f32.mrb[51].mxu1 }
 0x220   : > { %v4644_v22 = vadd.f32 %v4643_v20, %v4642_v17 }
 0x221   : > { %v6298_v24 = vadd.f32 %v4641_v16, %v3358_v53  ;;  %v3361_v55 = vadd.f32 %v4580_v19, %v6259_v8 }
 0x223   : > { %v6301_v49 = vadd.f32 %v4644_v22, %v3361_v55  ;;  %v4581_v25 = vpop.f32.mrb[52].mxu0 }
 0x224   : > { %v4645_v26 = vpop.f32.mrb[52].mxu1  ;;  %v4582_v27 = vpop.f32.mrb[53].mxu0 }
 0x225   : > { %v4583_v51 = vadd.f32 %v4582_v27, %v4581_v25  ;;  %v4646_v32 = vpop.f32.mrb[53].mxu1  ;;  %v4584_v33 = vpop.f32.mrb[54].mxu0 }
 0x226   : > { %v4647_v34 = vadd.f32 %v4646_v32, %v4645_v26  ;;  %v4648_v35 = vpop.f32.mrb[54].mxu1  ;;  %v4585_v36 = vpop.f32.mrb[55].mxu0 }
 0x227   : > { %v3366_v5 = vadd.f32 %v4583_v51, %v6261_v21  ;;  %v4586_v38 = vadd.f32 %v4585_v36, %v4584_v33  ;;  %v4649_v40 = vpop.f32.mrb[55].mxu1 }
 0x228   : > { %v4650_v41 = vadd.f32 %v4649_v40, %v4648_v35 }
 0x229   : > { %v6304_v42 = vadd.f32 %v4647_v34, %v3366_v5  ;;  %v3369_v8 = vadd.f32 %v4586_v38, %v6263_v23 }
 0x22b   : > { %v6307_v7 = vadd.f32 %v4650_v41, %v3369_v8  ;;  %v4587_v43 = vpop.f32.mrb[56].mxu0 }
 0x22c   : > { %v4651_v44 = vpop.f32.mrb[56].mxu1  ;;  %v4588_v45 = vpop.f32.mrb[57].mxu0 }
 0x22d   : > { %v4589_v9 = vadd.f32 %v4588_v45, %v4587_v43  ;;  %v4652_v48 = vpop.f32.mrb[57].mxu1  ;;  %v4590_v50 = vpop.f32.mrb[58].mxu0 }
 0x22e   : > { %v4653_v52 = vadd.f32 %v4652_v48, %v4651_v44  ;;  %v4654_v56 = vpop.f32.mrb[58].mxu1  ;;  %v4591_v58 = vpop.f32.mrb[59].mxu0 }
 0x22f   : > { %v3374_v21 = vadd.f32 %v4589_v9, %v6265_v37  ;;  %v4592_v59 = vadd.f32 %v4591_v58, %v4590_v50  ;;  %v4655_v60 = vpop.f32.mrb[59].mxu1 }
 0x230   : > { %v4656_v61 = vadd.f32 %v4655_v60, %v4654_v56 }
 0x231   : > { %v6310_v62 = vadd.f32 %v4653_v52, %v3374_v21  ;;  %v3377_v23 = vadd.f32 %v4592_v59, %v6267_v39 }
 0x233   : > { %v6313_v29 = vadd.f32 %v4656_v61, %v3377_v23  ;;  %v4593_v63 = vpop.f32.mrb[60].mxu0 }
 0x234   : > { %v4657_v0 = vpop.f32.mrb[60].mxu1  ;;  %v4594_v1 = vpop.f32.mrb[61].mxu0 }
 0x235   : > { %v4595_v31 = vadd.f32 %v4594_v1, %v4593_v63  ;;  %v4658_v4 = vpop.f32.mrb[61].mxu1  ;;  %v4596_v6 = vpop.f32.mrb[62].mxu0 }
 0x236   : > { %v4659_v10 = vadd.f32 %v4658_v4, %v4657_v0  ;;  %v4660_v12 = vpop.f32.mrb[62].mxu1  ;;  %v4597_v14 = vpop.f32.mrb[63].mxu0 }
 0x237   : > { %v3382_v37 = vadd.f32 %v4595_v31, %v6269_v54  ;;  %v4598_v15 = vadd.f32 %v4597_v14, %v4596_v6  ;;  %v4661_v16 = vpop.f32.mrb[63].mxu1 }
 0x238   : > { %v4662_v17 = vadd.f32 %v4661_v16, %v4660_v12 }
 0x239   : > { %v6316_v18 = vadd.f32 %v4659_v10, %v3382_v37  ;;  %v3385_v39 = vadd.f32 %v4598_v15, %v6271_v57 }
 0x23b   : > { %v6319_v53 = vadd.f32 %v4662_v17, %v3385_v39  ;;  %v4679_v19 = vpop.f32.mrb[64].mxu0 }
 0x23c   : > { %v4743_v20 = vpop.f32.mrb[64].mxu1  ;;  %v4680_v22 = vpop.f32.mrb[65].mxu0 }
 0x23d   : > { %v4681_v55 = vadd.f32 %v4680_v22, %v4679_v19  ;;  %v4744_v25 = vpop.f32.mrb[65].mxu1  ;;  %v4682_v26 = vpop.f32.mrb[66].mxu0 }
 0x23e   : > { %v4745_v27 = vadd.f32 %v4744_v25, %v4743_v20  ;;  %v4746_v51 = vpop.f32.mrb[66].mxu1  ;;  %v4683_v32 = vpop.f32.mrb[67].mxu0 }
 0x23f   : > { %v3520_v54 = vadd.f32 %v4681_v55, %v6274_v11  ;;  %v4684_v33 = vadd.f32 %v4683_v32, %v4682_v26  ;;  %v4747_v34 = vpop.f32.mrb[67].mxu1 }
 0x240   : > { %v4748_v35 = vadd.f32 %v4747_v34, %v4746_v51 }
 0x241   : > { %v6322_v36 = vadd.f32 %v4745_v27, %v3520_v54  ;;  %v3523_v57 = vadd.f32 %v4684_v33, %v6277_v13 }
 0x243   : > { %v6325_v5 = vadd.f32 %v4748_v35, %v3523_v57  ;;  %v4685_v38 = vpop.f32.mrb[68].mxu0 }
 0x244   : > { %v4749_v40 = vpop.f32.mrb[68].mxu1  ;;  %v4686_v41 = vpop.f32.mrb[69].mxu0 }
 0x245   : > { %v4687_v8 = vadd.f32 %v4686_v41, %v4685_v38  ;;  %v4750_v43 = vpop.f32.mrb[69].mxu1  ;;  %v4688_v44 = vpop.f32.mrb[70].mxu0 }
 0x246   : > { %v4751_v45 = vadd.f32 %v4750_v43, %v4749_v40  ;;  %v4752_v9 = vpop.f32.mrb[70].mxu1  ;;  %v4689_v48 = vpop.f32.mrb[71].mxu0 }
 0x247   : > { %v3528_v11 = vadd.f32 %v4687_v8, %v6280_v28  ;;  %v4690_v50 = vadd.f32 %v4689_v48, %v4688_v44  ;;  %v4753_v52 = vpop.f32.mrb[71].mxu1 }
 0x248   : > { %v4754_v56 = vadd.f32 %v4753_v52, %v4752_v9 }
 0x249   : > { %v6328_v58 = vadd.f32 %v4751_v45, %v3528_v11  ;;  %v3531_v13 = vadd.f32 %v4690_v50, %v6283_v30 }
 0x24b   : > { %v6331_v21 = vadd.f32 %v4754_v56, %v3531_v13  ;;  %v4691_v59 = vpop.f32.mrb[72].mxu0 }
 0x24c   : > { %v4755_v60 = vpop.f32.mrb[72].mxu1  ;;  %v4692_v61 = vpop.f32.mrb[73].mxu0 }
 0x24d   : > { %v4693_v23 = vadd.f32 %v4692_v61, %v4691_v59  ;;  %v4756_v63 = vpop.f32.mrb[73].mxu1  ;;  %v4694_v0 = vpop.f32.mrb[74].mxu0 }
 0x24e   : > { %v4757_v1 = vadd.f32 %v4756_v63, %v4755_v60  ;;  %v4758_v31 = vpop.f32.mrb[74].mxu1  ;;  %v4695_v4 = vpop.f32.mrb[75].mxu0 }
 0x24f   : > { %v3536_v28 = vadd.f32 %v4693_v23, %v6286_v46  ;;  %v4696_v6 = vadd.f32 %v4695_v4, %v4694_v0  ;;  %v4759_v10 = vpop.f32.mrb[75].mxu1 }
 0x250   : > { %v4760_v12 = vadd.f32 %v4759_v10, %v4758_v31 }
 0x251   : > { %v6334_v14 = vadd.f32 %v4757_v1, %v3536_v28  ;;  %v3539_v30 = vadd.f32 %v4696_v6, %v6289_v47 }
 0x253   : > { %v6337_v37 = vadd.f32 %v4760_v12, %v3539_v30  ;;  %v4697_v15 = vpop.f32.mrb[76].mxu0 }
 0x254   : > { %v4761_v16 = vpop.f32.mrb[76].mxu1  ;;  %v4698_v17 = vpop.f32.mrb[77].mxu0 }
 0x255   : > { %v4699_v39 = vadd.f32 %v4698_v17, %v4697_v15  ;;  %v4762_v19 = vpop.f32.mrb[77].mxu1  ;;  %v4700_v20 = vpop.f32.mrb[78].mxu0 }
 0x256   : > { %v4763_v22 = vadd.f32 %v4762_v19, %v4761_v16  ;;  %v4764_v55 = vpop.f32.mrb[78].mxu1  ;;  %v4701_v25 = vpop.f32.mrb[79].mxu0 }
 0x257   : > { %v3544_v46 = vadd.f32 %v4699_v39, %v6292_v2  ;;  %v4702_v26 = vadd.f32 %v4701_v25, %v4700_v20  ;;  %v4765_v27 = vpop.f32.mrb[79].mxu1 }
 0x258   : > { %v4766_v51 = vadd.f32 %v4765_v27, %v4764_v55 }
 0x259   : > { %v6340_v32 = vadd.f32 %v4763_v22, %v3544_v46  ;;  %v3547_v47 = vadd.f32 %v4702_v26, %v6295_v3 }
 0x25b   : > { %v6343_v54 = vadd.f32 %v4766_v51, %v3547_v47  ;;  %v4703_v33 = vpop.f32.mrb[80].mxu0 }
 0x25c   : > { %v4767_v34 = vpop.f32.mrb[80].mxu1  ;;  %v4704_v35 = vpop.f32.mrb[81].mxu0 }
 0x25d   : > { %v4705_v57 = vadd.f32 %v4704_v35, %v4703_v33  ;;  %v4768_v38 = vpop.f32.mrb[81].mxu1  ;;  %v4706_v40 = vpop.f32.mrb[82].mxu0 }
 0x25e   : > { %v4769_v41 = vadd.f32 %v4768_v38, %v4767_v34  ;;  %v4770_v8 = vpop.f32.mrb[82].mxu1  ;;  %v4707_v43 = vpop.f32.mrb[83].mxu0 }
 0x25f   : > { %v3552_v2 = vadd.f32 %v4705_v57, %v6298_v24  ;;  %v4708_v44 = vadd.f32 %v4707_v43, %v4706_v40  ;;  %v4771_v45 = vpop.f32.mrb[83].mxu1 }
 0x260   : > { %v4772_v9 = vadd.f32 %v4771_v45, %v4770_v8 }
 0x261   : > { %v6346_v48 = vadd.f32 %v4769_v41, %v3552_v2  ;;  %v3555_v3 = vadd.f32 %v4708_v44, %v6301_v49 }
 0x263   : > { %v6349_v11 = vadd.f32 %v4772_v9, %v3555_v3  ;;  %v4709_v50 = vpop.f32.mrb[84].mxu0 }
 0x264   : > { %v4773_v52 = vpop.f32.mrb[84].mxu1  ;;  %v4710_v56 = vpop.f32.mrb[85].mxu0 }
 0x265   : > { %v4711_v13 = vadd.f32 %v4710_v56, %v4709_v50  ;;  %v4774_v59 = vpop.f32.mrb[85].mxu1  ;;  %v4712_v60 = vpop.f32.mrb[86].mxu0 }
 0x266   : > { %v4775_v61 = vadd.f32 %v4774_v59, %v4773_v52  ;;  %v4776_v23 = vpop.f32.mrb[86].mxu1  ;;  %v4713_v63 = vpop.f32.mrb[87].mxu0 }
 0x267   : > { %v3560_v24 = vadd.f32 %v4711_v13, %v6304_v42  ;;  %v4714_v0 = vadd.f32 %v4713_v63, %v4712_v60  ;;  %v4777_v1 = vpop.f32.mrb[87].mxu1 }
 0x268   : > { %v4778_v31 = vadd.f32 %v4777_v1, %v4776_v23 }
 0x269   : > { %v6352_v4 = vadd.f32 %v4775_v61, %v3560_v24  ;;  %v3563_v49 = vadd.f32 %v4714_v0, %v6307_v7 }
 0x26b   : > { %v6355_v28 = vadd.f32 %v4778_v31, %v3563_v49  ;;  %v4715_v6 = vpop.f32.mrb[88].mxu0 }
 0x26c   : > { %v4779_v10 = vpop.f32.mrb[88].mxu1  ;;  %v4716_v12 = vpop.f32.mrb[89].mxu0 }
 0x26d   : > { %v4717_v30 = vadd.f32 %v4716_v12, %v4715_v6  ;;  %v4780_v15 = vpop.f32.mrb[89].mxu1  ;;  %v4718_v16 = vpop.f32.mrb[90].mxu0 }
 0x26e   : > { %v4781_v17 = vadd.f32 %v4780_v15, %v4779_v10  ;;  %v4782_v39 = vpop.f32.mrb[90].mxu1  ;;  %v4719_v19 = vpop.f32.mrb[91].mxu0 }
 0x26f   : > { %v3568_v42 = vadd.f32 %v4717_v30, %v6310_v62  ;;  %v4720_v20 = vadd.f32 %v4719_v19, %v4718_v16  ;;  %v4783_v22 = vpop.f32.mrb[91].mxu1 }
 0x270   : > { %v4784_v55 = vadd.f32 %v4783_v22, %v4782_v39 }
 0x271   : > { %v6358_v25 = vadd.f32 %v4781_v17, %v3568_v42  ;;  %v3571_v7 = vadd.f32 %v4720_v20, %v6313_v29 }
 0x273   : > { %v6361_v46 = vadd.f32 %v4784_v55, %v3571_v7  ;;  %v4721_v26 = vpop.f32.mrb[92].mxu0 }
 0x274   : > { %v4785_v27 = vpop.f32.mrb[92].mxu1  ;;  %v4722_v51 = vpop.f32.mrb[93].mxu0 }
 0x275   : > { %v4723_v47 = vadd.f32 %v4722_v51, %v4721_v26  ;;  %v4786_v33 = vpop.f32.mrb[93].mxu1  ;;  %v4724_v34 = vpop.f32.mrb[94].mxu0 }
 0x276   : > { %v4787_v35 = vadd.f32 %v4786_v33, %v4785_v27  ;;  %v4788_v57 = vpop.f32.mrb[94].mxu1  ;;  %v4725_v38 = vpop.f32.mrb[95].mxu0 }
 0x277   : > { %v3576_v62 = vadd.f32 %v4723_v47, %v6316_v18  ;;  %v4726_v40 = vadd.f32 %v4725_v38, %v4724_v34  ;;  %v4789_v41 = vpop.f32.mrb[95].mxu1 }
 0x278   : > { %v4790_v8 = vadd.f32 %v4789_v41, %v4788_v57 }
 0x279   : > { %v6364_v43 = vadd.f32 %v4787_v35, %v3576_v62  ;;  %v3579_v29 = vadd.f32 %v4726_v40, %v6319_v53 }
 0x27b   : > { %v6367_v2 = vadd.f32 %v4790_v8, %v3579_v29  ;;  %v4807_v44 = vpop.f32.mrb[96].mxu0 }
 0x27c   : > { %v4871_v45 = vpop.f32.mrb[96].mxu1  ;;  %v4808_v9 = vpop.f32.mrb[97].mxu0 }
 0x27d   : > { %v4809_v3 = vadd.f32 %v4808_v9, %v4807_v44  ;;  %v4872_v50 = vpop.f32.mrb[97].mxu1  ;;  %v4810_v52 = vpop.f32.mrb[98].mxu0 }
 0x27e   : > { %v4873_v56 = vadd.f32 %v4872_v50, %v4871_v45  ;;  %v4874_v13 = vpop.f32.mrb[98].mxu1  ;;  %v4811_v18 = vpop.f32.mrb[99].mxu0 }
 0x27f   : > { %v3714_v59 = vadd.f32 %v4809_v3, %v6322_v36  ;;  %v4812_v60 = vadd.f32 %v4811_v18, %v4810_v52  ;;  %v4875_v61 = vpop.f32.mrb[99].mxu1 }
 0x280   : > { %v4876_v23 = vadd.f32 %v4875_v61, %v4874_v13 }
 0x281   : > { %v3811_v63 = vadd.f32 %v4873_v56, %v3714_v59  ;;  %v3717_v53 = vadd.f32 %v4812_v60, %v6325_v5 }
 0x283   : > { %3924 = vst [vmem:[%s6373_s29] sm:$0xff] %v3811_v63  ;;  %v3814_v24 = vadd.f32 %v4876_v23, %v3717_v53  ;;  %v4813_v0 = vpop.f32.mrb[100].mxu0 }
 0x284   : > { %v4877_v1 = vpop.f32.mrb[100].mxu1  ;;  %v4814_v31 = vpop.f32.mrb[101].mxu0 }
 0x285   : > { %3925 = vst [vmem:[%s6373_s29 + $0x8] sm:$0xff] %v3814_v24  ;;  %v4815_v49 = vadd.f32 %v4814_v31, %v4813_v0  ;;  %v4878_v6 = vpop.f32.mrb[101].mxu1  ;;  %v4816_v36 = vpop.f32.mrb[102].mxu0 }
 0x286   : > { %v4879_v10 = vadd.f32 %v4878_v6, %v4877_v1  ;;  %v4880_v12 = vpop.f32.mrb[102].mxu1  ;;  %v4817_v30 = vpop.f32.mrb[103].mxu0 }
 0x287   : > { %v3722_v5 = vadd.f32 %v4815_v49, %v6328_v58  ;;  %v4818_v15 = vadd.f32 %v4817_v30, %v4816_v36  ;;  %v4881_v16 = vpop.f32.mrb[103].mxu1 }
 0x288   : > { %v4882_v17 = vadd.f32 %v4881_v16, %v4880_v12 }
 0x289   : > { %v3819_v39 = vadd.f32 %v4879_v10, %v3722_v5  ;;  %v3725_v19 = vadd.f32 %v4818_v15, %v6331_v21 }
 0x28b   : > { %3926 = vst [vmem:[%s6373_s29 + $0x10] sm:$0xff] %v3819_v39  ;;  %v3822_v42 = vadd.f32 %v4882_v17, %v3725_v19  ;;  %v4819_v20 = vpop.f32.mrb[104].mxu0 }
 0x28c   : > { %v4883_v22 = vpop.f32.mrb[104].mxu1  ;;  %v4820_v55 = vpop.f32.mrb[105].mxu0 }
 0x28d   : > { %3927 = vst [vmem:[%s6373_s29 + $0x18] sm:$0xff] %v3822_v42  ;;  %v4821_v7 = vadd.f32 %v4820_v55, %v4819_v20  ;;  %v4884_v26 = vpop.f32.mrb[105].mxu1  ;;  %v4822_v27 = vpop.f32.mrb[106].mxu0 }
 0x28e   : > { %v4885_v51 = vadd.f32 %v4884_v26, %v4883_v22  ;;  %v4886_v47 = vpop.f32.mrb[106].mxu1  ;;  %v4823_v58 = vpop.f32.mrb[107].mxu0 }
 0x28f   : > { %v3730_v33 = vadd.f32 %v4821_v7, %v6334_v14  ;;  %v4824_v34 = vadd.f32 %v4823_v58, %v4822_v27  ;;  %v4887_v35 = vpop.f32.mrb[107].mxu1 }
 0x290   : > { %v4888_v57 = vadd.f32 %v4887_v35, %v4886_v47 }
 0x291   : > { %v3827_v21 = vadd.f32 %v4885_v51, %v3730_v33  ;;  %v3733_v38 = vadd.f32 %v4824_v34, %v6337_v37 }
 0x293   : > { %3928 = vst [vmem:[%s6373_s29 + $0x20] sm:$0xff] %v3827_v21  ;;  %v3830_v62 = vadd.f32 %v4888_v57, %v3733_v38  ;;  %v4825_v40 = vpop.f32.mrb[108].mxu0 }
 0x294   : > { %v4889_v41 = vpop.f32.mrb[108].mxu1  ;;  %v4826_v8 = vpop.f32.mrb[109].mxu0 }
 0x295   : > { %3929 = vst [vmem:[%s6373_s29 + $0x28] sm:$0xff] %v3830_v62  ;;  %v4827_v29 = vadd.f32 %v4826_v8, %v4825_v40  ;;  %v4890_v44 = vpop.f32.mrb[109].mxu1  ;;  %v4828_v45 = vpop.f32.mrb[110].mxu0 }
 0x296   : > { %v4891_v9 = vadd.f32 %v4890_v44, %v4889_v41  ;;  %v4892_v3 = vpop.f32.mrb[110].mxu1  ;;  %v4829_v14 = vpop.f32.mrb[111].mxu0 }
 0x297   : > { %v3738_v50 = vadd.f32 %v4827_v29, %v6340_v32  ;;  %v4830_v52 = vadd.f32 %v4829_v14, %v4828_v45  ;;  %v4893_v56 = vpop.f32.mrb[111].mxu1 }
 0x298   : > { %v4894_v13 = vadd.f32 %v4893_v56, %v4892_v3 }
 0x299   : > { %v3835_v37 = vadd.f32 %v4891_v9, %v3738_v50  ;;  %v3741_v18 = vadd.f32 %v4830_v52, %v6343_v54 }
 0x29b   : > { %3930 = vst [vmem:[%s6373_s29 + $0x30] sm:$0xff] %v3835_v37  ;;  %v3838_v59 = vadd.f32 %v4894_v13, %v3741_v18  ;;  %v4831_v60 = vpop.f32.mrb[112].mxu0 }
 0x29c   : > { %v4895_v61 = vpop.f32.mrb[112].mxu1  ;;  %v4832_v23 = vpop.f32.mrb[113].mxu0 }
 0x29d   : > { %3931 = vst [vmem:[%s6373_s29 + $0x38] sm:$0xff] %v3838_v59  ;;  %v4833_v63 = vadd.f32 %v4832_v23, %v4831_v60  ;;  %v4896_v53 = vpop.f32.mrb[113].mxu1  ;;  %v4834_v24 = vpop.f32.mrb[114].mxu0  ;;  %v4011_v23 = vld [vmem:[%s6373_s29 + $0x8] sm:$0xff] (%p5177_p6) }
 0x29e   : > { %v4897_v0 = vadd.f32 %v4896_v53, %v4895_v61  ;;  %v4898_v1 = vpop.f32.mrb[114].mxu1  ;;  %v4835_v32 = vpop.f32.mrb[115].mxu0  ;;  %v4017_v53 = vld [vmem:[%s6373_s29 + $0x20] sm:$0xff] (%p5177_p6)  ;;  %4012 = vst [vmem:[%s3951_s3 + $0x90] sm:$0xff] (%p5177_p6), %v4011_v23 }
 0x29f   : > { %v3746_v31 = vadd.f32 %v4833_v63, %v6346_v48  ;;  %v4836_v49 = vadd.f32 %v4835_v32, %v4834_v24  ;;  %v4899_v6 = vpop.f32.mrb[115].mxu1  ;;  %v4015_v63 = vld [vmem:[%s6373_s29 + $0x18] sm:$0xff] (%p5177_p6)  ;;  %v4019_v24 = vld [vmem:[%s6373_s29 + $0x28] sm:$0xff] (%p5177_p6)  ;;  %4018 = vst [vmem:[%s3951_s3 + $0x240] sm:$0xff] (%p5177_p6), %v4017_v53 }
 0x2a0   : > { %v4900_v36 = vadd.f32 %v4899_v6, %v4898_v1  ;;  %4016 = vst [vmem:[%s3951_s3 + $0x1b0] sm:$0xff] (%p5177_p6), %v4015_v63  ;;  %4020 = vst [vmem:[%s3951_s3 + $0x2d0] sm:$0xff] (%p5177_p6), %v4019_v24 }
 0x2a1   : > { %v3843_v54 = vadd.f32 %v4897_v0, %v3746_v31  ;;  %v3749_v10 = vadd.f32 %v4836_v49, %v6349_v11 }
 0x2a2   : > { %v4021_v0 = vld [vmem:[%s6373_s29 + $0x30] sm:$0xff] (%p5177_p6) }
 0x2a3   : > { %3932 = vst [vmem:[%s6373_s29 + $0x40] sm:$0xff] %v3843_v54  ;;  %v3846_v12 = vadd.f32 %v4900_v36, %v3749_v10  ;;  %v4837_v30 = vpop.f32.mrb[116].mxu0  ;;  %4022 = vst [vmem:[%s3951_s3 + $0x360] sm:$0xff] (%p5177_p6), %v4021_v0 }
 0x2a4   : > { %v4901_v5 = vpop.f32.mrb[116].mxu1  ;;  %v4838_v15 = vpop.f32.mrb[117].mxu0  ;;  %v4023_v1 = vld [vmem:[%s6373_s29 + $0x38] sm:$0xff] (%p5177_p6) }
 0x2a5   : > { %3933 = vst [vmem:[%s6373_s29 + $0x48] sm:$0xff] %v3846_v12  ;;  %v4839_v16 = vadd.f32 %v4838_v15, %v4837_v30  ;;  %v4902_v17 = vpop.f32.mrb[117].mxu1  ;;  %v4840_v39 = vpop.f32.mrb[118].mxu0  ;;  %4024 = vst [vmem:[%s3951_s3 + $0x3f0] sm:$0xff] (%p5177_p6), %v4023_v1 }
 0x2a6   : > { %v4903_v19 = vadd.f32 %v4902_v17, %v4901_v5  ;;  %v4904_v42 = vpop.f32.mrb[118].mxu1  ;;  %v4841_v48 = vpop.f32.mrb[119].mxu0 }
 0x2a7   : > { %v3754_v20 = vadd.f32 %v4839_v16, %v6352_v4  ;;  %v4842_v22 = vadd.f32 %v4841_v48, %v4840_v39  ;;  %v4905_v55 = vpop.f32.mrb[119].mxu1 }
 0x2a8   : > { %v4906_v7 = vadd.f32 %v4905_v55, %v4904_v42 }
 0x2a9   : > { %v3851_v11 = vadd.f32 %v4903_v19, %v3754_v20  ;;  %v3757_v26 = vadd.f32 %v4842_v22, %v6355_v28 }
 0x2aa   : > { %v4025_v32 = vld [vmem:[%s6373_s29 + $0x40] sm:$0xff] (%p5177_p6) }
 0x2ab   : > { %3934 = vst [vmem:[%s6373_s29 + $0x50] sm:$0xff] %v3851_v11  ;;  %v3854_v27 = vadd.f32 %v4906_v7, %v3757_v26  ;;  %v4843_v51 = vpop.f32.mrb[120].mxu0  ;;  %4026 = vst [vmem:[%s3951_s3 + $0x480] sm:$0xff] (%p5177_p6), %v4025_v32 }
 0x2ac   : > { %v4907_v47 = vpop.f32.mrb[120].mxu1  ;;  %v4844_v58 = vpop.f32.mrb[121].mxu0  ;;  %v4027_v31 = vld [vmem:[%s6373_s29 + $0x48] sm:$0xff] (%p5177_p6) }
 0x2ad   : > { %3935 = vst [vmem:[%s6373_s29 + $0x58] sm:$0xff] %v3854_v27  ;;  %v4845_v33 = vadd.f32 %v4844_v58, %v4843_v51  ;;  %v4908_v34 = vpop.f32.mrb[121].mxu1  ;;  %v4846_v35 = vpop.f32.mrb[122].mxu0  ;;  %4028 = vst [vmem:[%s3951_s3 + $0x510] sm:$0xff] (%p5177_p6), %v4027_v31 }
 0x2ae   : > { %v4909_v57 = vadd.f32 %v4908_v34, %v4907_v47  ;;  %v4910_v21 = vpop.f32.mrb[122].mxu1  ;;  %v4847_v4 = vpop.f32.mrb[123].mxu0 }
 0x2af   : > { %v3762_v38 = vadd.f32 %v4845_v33, %v6358_v25  ;;  %v4848_v62 = vadd.f32 %v4847_v4, %v4846_v35  ;;  %v4911_v40 = vpop.f32.mrb[123].mxu1 }
 0x2b0   : > { %v4912_v41 = vadd.f32 %v4911_v40, %v4910_v21 }
 0x2b1   : > { %v3859_v28 = vadd.f32 %v4909_v57, %v3762_v38  ;;  %v3765_v8 = vadd.f32 %v4848_v62, %v6361_v46 }
 0x2b2   : > { %v4029_v49 = vld [vmem:[%s6373_s29 + $0x50] sm:$0xff] (%p5177_p6) }
 0x2b3   : > { %3936 = vst [vmem:[%s6373_s29 + $0x60] sm:$0xff] %v3859_v28  ;;  %v3862_v29 = vadd.f32 %v4912_v41, %v3765_v8  ;;  %v4849_v44 = vpop.f32.mrb[124].mxu0  ;;  %4030 = vst [vmem:[%s3951_s3 + $0x5a0] sm:$0xff] (%p5177_p6), %v4029_v49 }
 0x2b4   : > { %v4913_v45 = vpop.f32.mrb[124].mxu1  ;;  %v4850_v9 = vpop.f32.mrb[125].mxu0  ;;  %v4031_v6 = vld [vmem:[%s6373_s29 + $0x58] sm:$0xff] (%p5177_p6) }
 0x2b5   : > { %3937 = vst [vmem:[%s6373_s29 + $0x68] sm:$0xff] %v3862_v29  ;;  %v4851_v3 = vadd.f32 %v4850_v9, %v4849_v44  ;;  %v4914_v14 = vpop.f32.mrb[125].mxu1  ;;  %v4852_v50 = vpop.f32.mrb[126].mxu0  ;;  %4032 = vst [vmem:[%s3951_s3 + $0x630] sm:$0xff] (%p5177_p6), %v4031_v6 }
 0x2b6   : > { %v4915_v52 = vadd.f32 %v4914_v14, %v4913_v45  ;;  %v4916_v56 = vpop.f32.mrb[126].mxu1  ;;  %v4853_v25 = vpop.f32.mrb[127].mxu0 }
 0x2b7   : > { %v3770_v13 = vadd.f32 %v4851_v3, %v6364_v43  ;;  %v4854_v37 = vadd.f32 %v4853_v25, %v4852_v50  ;;  %v4917_v18 = vpop.f32.mrb[127].mxu1  ;;  %3946 = sbr.rel (!%p5177_p6) target bundleno = 710 (0x2c6), region = 81  ;;  %v4009_v43 = vld [vmem:[%s6373_s29] sm:$0xff] (%p5177_p6) }
 0x2b8   : > { %v4918_v59 = vadd.f32 %v4917_v18, %v4916_v56  ;;  %4010 = vst [vmem:[%s3951_s3] sm:$0xff] (%p5177_p6), %v4009_v43 }
 0x2b9   : > { %v3867_v46 = vadd.f32 %v4915_v52, %v3770_v13  ;;  %v3773_v60 = vadd.f32 %v4854_v37, %v6367_v2  ;;  %v4013_v2 = vld [vmem:[%s6373_s29 + $0x10] sm:$0xff] (%p5177_p6) }
 0x2ba   : > { %4014 = vst [vmem:[%s3951_s3 + $0x120] sm:$0xff] (%p5177_p6), %v4013_v2  ;;  %v4033_v36 = vld [vmem:[%s6373_s29 + $0x60] sm:$0xff] (%p5177_p6) }
 0x2bb   : > { %3938 = vst [vmem:[%s6373_s29 + $0x70] sm:$0xff] %v3867_v46  ;;  %v3870_v61 = vadd.f32 %v4918_v59, %v3773_v60  ;;  %4034 = vst [vmem:[%s3951_s3 + $0x6c0] sm:$0xff] (%p5177_p6), %v4033_v36 }
 0x2bc   : > { %v4035_v54 = vld [vmem:[%s6373_s29 + $0x68] sm:$0xff] (%p5177_p6) }
 0x2bd   : > { %3939 = vst [vmem:[%s6373_s29 + $0x78] sm:$0xff] %v3870_v61  ;;  %4036 = vst [vmem:[%s3951_s3 + $0x750] sm:$0xff] (%p5177_p6), %v4035_v54 }
 0x2c2   : > { %v4037_v10 = vld [vmem:[%s6373_s29 + $0x70] sm:$0xff] }
 0x2c3   : > { %4038 = vst [vmem:[%s3951_s3 + $0x7e0] sm:$0xff] %v4037_v10 }
 0x2c4   : > { %v4039_v12 = vld [vmem:[%s6373_s29 + $0x78] sm:$0xff] }
 0x2c5   : > { %4040 = vst [vmem:[%s3951_s3 + $0x870] sm:$0xff] %v4039_v12 }
 0x2c6 PF: > { %s12_s13 = sadd.s32 1, %s5125_s13   ;;  %s6446_s9 = smov %s5113_s10 }
 0x2c7   : > { %p9_p11 = scmp.ge.s32.totalorder %s12_s13, 20   ;;  %s6447_s10 = smov %s5182_s19 }
 0x2c8   : > { %s6448_s11 = smov %s5121_s12  ;;  %s6449_s12 = smov %s6451_s14 }
 0x2c9   :  { %11 = sbr.rel (!%p9_p11) target bundleno = 3 (0x3), region = 153 }

// kernel: ms_encoder_forward.12
= control target key start
LH: loop header
LB: loop body
LE: loop exit
PB: predicated region body
PF: predicated region fallthrough
CT: control target
= control target key end

     0   :  { %s1171_s18 = smov 0   ;;  %s1534_s0 = inlined_call_operand.vmem [shape: f32[2,64,256], index: 0, kind: input, shape index: {}]   ;;  %s1535_s1 = inlined_call_operand.vmem [shape: f32[256,128], index: 1, kind: input, shape index: {}]   ;;  %s1536_s2 = inlined_call_operand.vmem [shape: f32[128,256], index: 2, kind: input, shape index: {}]   ;;  %s1537_s3 = inlined_call_operand.vmem [shape: f32[1,256], index: 3, kind: input, shape index: {}]   ;;  %s1538_s4 = inlined_call_operand.vmem [shape: f32[1,256], index: 4, kind: input, shape index: {}]   ;;  %s1539_s5 = inlined_call_operand.vmem [shape: bf16[2,64,256], index: 5, kind: output, shape index: {}]  }
   0x1 LB: > { %s894_s19 = sadd.s32 4294967295, %s1138_s18   ;;  %p898_p0 = scmp.ge.s32.totalorder %s1138_s18, 1  ;;  %s1138_s18 = sphi %s1171_s18, %s15_s18  }
   0x2   : > { %p187_p1 = scmp.lt.s32.totalorder %s1138_s18, 3 }
   0x4   : > { %p188_p2 = pnand %p898_p0, %p187_p1 }
   0x5   : > { %v257_v0 = vld [vmem:[%s1535_s1 + $0x80] sm:$0xff] (!%p188_p2)  ;;  %v258_v1 = vld [vmem:[%s1535_s1 + $0x88] sm:$0xff] (!%p188_p2)  ;;  %p215_p3 = scmp.lt.s32.totalorder (!%p188_p2), %s894_s19, 1  ;;  %v259_v5 = vld [vmem:[%s1535_s1 + $0x90] sm:$0xff] (!%p188_p2) }
   0x6   : > { %191 = sbr.rel (%p188_p2) target bundleno = 518 (0x206), region = 40  ;;  %v241_v2 = vld [vmem:[%s1535_s1] sm:$0xff] (!%p188_p2)  ;;  %v993_v3 = vpack.c.bf16 (!%p188_p2), %v258_v1, %v257_v0  ;;  %v242_v4 = vld [vmem:[%s1535_s1 + $0x8] sm:$0xff] (!%p188_p2)  ;;  %v260_v6 = vld [vmem:[%s1535_s1 + $0x98] sm:$0xff] (!%p188_p2) }
   0x7   : > { %v995_v7 = vpack.c.bf16 (!%p188_p2), %v242_v4, %v241_v2  ;;  %v997_v8 = vpack.c.bf16 (!%p188_p2), %v260_v6, %v259_v5  ;;  %v243_v9 = vld [vmem:[%s1535_s1 + $0x10] sm:$0xff] (!%p188_p2)  ;;  %v244_v10 = vld [vmem:[%s1535_s1 + $0x18] sm:$0xff] (!%p188_p2)  ;;  %v261_v11 = vld [vmem:[%s1535_s1 + $0xa0] sm:$0xff] (!%p188_p2) }
   0x8   : > { %994 = vmatprep.subr.bf16.mxu0 (!%p188_p2), %v993_v3  ;;  %1026 = vmatprep.subr.bf16.mxu1 (!%p188_p2), %v993_v3  ;;  %v262_v12 = vld [vmem:[%s1535_s1 + $0xa8] sm:$0xff] (!%p188_p2)  ;;  %v999_v13 = vpack.c.bf16 (!%p188_p2), %v244_v10, %v243_v9  ;;  %v245_v15 = vld [vmem:[%s1535_s1 + $0x20] sm:$0xff] (!%p188_p2)  ;;  %v263_v17 = vld [vmem:[%s1535_s1 + $0xb0] sm:$0xff] (!%p188_p2) }
   0x9   : > { %996 = vmatpush3.bf16.msra.mxu0 (!%p188_p2), %v995_v7  ;;  %1028 = vmatpush3.bf16.msra.mxu1 (!%p188_p2), %v995_v7  ;;  %v1001_v14 = vpack.c.bf16 (!%p188_p2), %v262_v12, %v261_v11  ;;  %v246_v16 = vld [vmem:[%s1535_s1 + $0x28] sm:$0xff] (!%p188_p2)  ;;  %v264_v18 = vld [vmem:[%s1535_s1 + $0xb8] sm:$0xff] (!%p188_p2)  ;;  %v247_v21 = vld [vmem:[%s1535_s1 + $0x30] sm:$0xff] (!%p188_p2) }
   0xa   : > { %998 = vmatprep.subr.bf16.mxu0 (!%p188_p2), %v997_v8  ;;  %1030 = vmatprep.subr.bf16.mxu1 (!%p188_p2), %v997_v8  ;;  %v1003_v19 = vpack.c.bf16 (!%p188_p2), %v246_v16, %v245_v15  ;;  %v1005_v20 = vpack.c.bf16 (!%p188_p2), %v264_v18, %v263_v17  ;;  %v248_v22 = vld [vmem:[%s1535_s1 + $0x38] sm:$0xff] (!%p188_p2)  ;;  %v265_v23 = vld [vmem:[%s1535_s1 + $0xc0] sm:$0xff] (!%p188_p2)  ;;  %v266_v24 = vld [vmem:[%s1535_s1 + $0xc8] sm:$0xff] (!%p188_p2) }
   0xb   : > { %v249_v25 = vld [vmem:[%s1535_s1 + $0x40] sm:$0xff] (!%p188_p2)  ;;  %v250_v27 = vld [vmem:[%s1535_s1 + $0x48] sm:$0xff] (!%p188_p2)  ;;  %v1007_v31 = vpack.c.bf16 (!%p188_p2), %v248_v22, %v247_v21  ;;  %v267_v32 = vld [vmem:[%s1535_s1 + $0xd0] sm:$0xff] (!%p188_p2)  ;;  %v1009_v37 = vpack.c.bf16 (!%p188_p2), %v266_v24, %v265_v23 }
   0xc   : > { %v268_v33 = vld [vmem:[%s1535_s1 + $0xd8] sm:$0xff] (!%p188_p2)  ;;  %v251_v38 = vld [vmem:[%s1535_s1 + $0x50] sm:$0xff] (!%p188_p2)  ;;  %v1011_v42 = vpack.c.bf16 (!%p188_p2), %v250_v27, %v249_v25  ;;  %v269_v48 = vld [vmem:[%s1535_s1 + $0xe0] sm:$0xff] (!%p188_p2) }
   0xd   : > { %s1541_s19 = smov (!%p215_p3, %s894_s19), 1  ;;  %1000 = vmatpush3.bf16.msra.mxu0 %v999_v13  ;;  %1032 = vmatpush3.bf16.msra.mxu1 %v999_v13  ;;  %v252_v43 = vld [vmem:[%s1535_s1 + $0x58] sm:$0xff]  ;;  %v270_v49 = vld [vmem:[%s1535_s1 + $0xe8] sm:$0xff]  ;;  %v1013_v55 = vpack.c.bf16 %v268_v33, %v267_v32  ;;  %v253_v4 = vld [vmem:[%s1535_s1 + $0x60] sm:$0xff] }
   0xe   : > { %s913_s15 = sshll.u32 %s1541_s19, 7  ;;  %1002 = vmatprep.subr.bf16.mxu0 %v1001_v14  ;;  %1034 = vmatprep.subr.bf16.mxu1 %v1001_v14  ;;  %v1015_v0 = vpack.c.bf16 %v252_v43, %v251_v38  ;;  %v1017_v1 = vpack.c.bf16 %v270_v49, %v269_v48  ;;  %v254_v5 = vld [vmem:[%s1535_s1 + $0x68] sm:$0xff]  ;;  %v271_v15 = vld [vmem:[%s1535_s1 + $0xf0] sm:$0xff]  ;;  %v272_v16 = vld [vmem:[%s1535_s1 + $0xf8] sm:$0xff]  ;;  %s914_s16 = sshll.u32 %s1541_s19, 6 }
   0xf   : > { %s1227_s28 = scalar_lea.vmem %s1534_s0, %s913_s15  ;;  %v1019_v21 = vpack.c.bf16 %v254_v5, %v253_v4  ;;  %v1021_v32 = vpack.c.bf16 %v272_v16, %v271_v15  ;;  %v276_v48 = vld [vmem:[%s1536_s2 + $0x18] sm:$0xff]  ;;  %s224_s20 = scalar_lea.vmem %s1539_s5, %s914_s16 }
  0x10   : > { %v1245_v26 = vld [vmem:[%s1227_s28 + $0x8] sm:$0xff]  ;;  %v1251_v28 = vld [vmem:[%s1227_s28 + $0x18] sm:$0xff]  ;;  %v1275_v39 = vld [vmem:[%s1227_s28] sm:$0xff] }
  0x11   : > { %v1254_v29 = vld [vmem:[%s1227_s28 + $0x28] sm:$0xff]  ;;  %v332_v30 = vmul.f32 %v1245_v26, %v1245_v26  ;;  %1004 = vmatpush3.bf16.msra.mxu0 %v1003_v19  ;;  %1036 = vmatpush3.bf16.msra.mxu1 %v1003_v19  ;;  %v1265_v34 = vld [vmem:[%s1227_s28 + $0x38] sm:$0xff]  ;;  %v318_v35 = vadd.f32 %v1251_v28, %v1245_v26  ;;  %v334_v36 = vmul.f32 %v1251_v28, %v1251_v28  ;;  %v1278_v40 = vld [vmem:[%s1227_s28 + $0x10] sm:$0xff] }
  0x12   : > { %1006 = vmatprep.subr.bf16.mxu0 %v1005_v20  ;;  %1038 = vmatprep.subr.bf16.mxu1 %v1005_v20  ;;  %v336_v41 = vmul.f32 %v1254_v29, %v1254_v29  ;;  %v1286_v44 = vld [vmem:[%s1227_s28 + $0x48] sm:$0xff]  ;;  %v1290_v46 = vld [vmem:[%s1227_s28 + $0x20] sm:$0xff]  ;;  %v305_v47 = vadd.f32 %v1278_v40, %v1275_v39  ;;  %v1301_v50 = vld [vmem:[%s1227_s28 + $0x30] sm:$0xff]  ;;  %v338_v51 = vmul.f32 %v1265_v34, %v1265_v34 }
  0x13   : > { %v319_v45 = vadd.f32 %v318_v35, %v1254_v29  ;;  %v360_v52 = vadd.f32 %v334_v36, %v332_v30  ;;  %v331_v53 = vmul.f32 %v1275_v39, %v1275_v39  ;;  %v333_v54 = vmul.f32 %v1278_v40, %v1278_v40  ;;  %v1310_v56 = vld [vmem:[%s1227_s28 + $0x58] sm:$0xff]  ;;  %v1315_v59 = vld [vmem:[%s1227_s28 + $0x68] sm:$0xff]  ;;  %v1318_v60 = vld [vmem:[%s1227_s28 + $0x40] sm:$0xff] }
  0x14   : > { %v306_v58 = vadd.f32 %v305_v47, %v1290_v46  ;;  %v340_v61 = vmul.f32 %v1286_v44, %v1286_v44  ;;  %v335_v63 = vmul.f32 %v1290_v46, %v1290_v46  ;;  %v1333_v6 = vld [vmem:[%s1227_s28 + $0x50] sm:$0xff]  ;;  %v342_v7 = vmul.f32 %v1310_v56, %v1310_v56  ;;  %v1340_v11 = vld [vmem:[%s1227_s28 + $0x78] sm:$0xff]  ;;  %v1353_v17 = vld [vmem:[%s1227_s28 + $0x60] sm:$0xff] }
  0x15   : > { %1008 = vmatpush3.bf16.msra.mxu0 %v1007_v31  ;;  %1040 = vmatpush3.bf16.msra.mxu1 %v1007_v31  ;;  %v320_v57 = vadd.f32 %v319_v45, %v1265_v34  ;;  %v361_v62 = vadd.f32 %v360_v52, %v336_v41  ;;  %v337_v9 = vmul.f32 %v1301_v50, %v1301_v50  ;;  %v1360_v24 = vld [vmem:[%s1227_s28 + $0x70] sm:$0xff]  ;;  %v274_v47 = vld [vmem:[%s1536_s2 + $0x8] sm:$0xff]  ;;  %v280_v15 = vld [vmem:[%s1536_s2 + $0x38] sm:$0xff] }
  0x16   : > { %1010 = vmatprep.subr.bf16.mxu0 %v1009_v37  ;;  %1042 = vmatprep.subr.bf16.mxu1 %v1009_v37  ;;  %v307_v3 = vadd.f32 %v306_v58, %v1301_v50  ;;  %v347_v10 = vadd.f32 %v333_v54, %v331_v53  ;;  %v344_v14 = vmul.f32 %v1315_v59, %v1315_v59  ;;  %v255_v36 = vld [vmem:[%s1535_s1 + $0x70] sm:$0xff]  ;;  %v256_v37 = vld [vmem:[%s1535_s1 + $0x78] sm:$0xff] }
  0x17   : > { %v321_v2 = vadd.f32 %v320_v57, %v1286_v44  ;;  %v362_v8 = vadd.f32 %v361_v62, %v338_v51  ;;  %v339_v19 = vmul.f32 %v1318_v60, %v1318_v60  ;;  %v346_v25 = vmul.f32 %v1340_v11, %v1340_v11 }
  0x18   : > { %v308_v13 = vadd.f32 %v307_v3, %v1318_v60  ;;  %v348_v20 = vadd.f32 %v347_v10, %v335_v63  ;;  %v341_v30 = vmul.f32 %v1333_v6, %v1333_v6  ;;  %v343_v41 = vmul.f32 %v1353_v17, %v1353_v17  ;;  %v275_v10 = vld [vmem:[%s1536_s2 + $0x10] sm:$0xff] }
  0x19   : > { %1012 = vmatpush3.bf16.msra.mxu0 %v1011_v42  ;;  %1044 = vmatpush3.bf16.msra.mxu1 %v1011_v42  ;;  %v322_v12 = vadd.f32 %v321_v2, %v1310_v56  ;;  %v363_v18 = vadd.f32 %v362_v8, %v340_v61  ;;  %v345_v51 = vmul.f32 %v1360_v24, %v1360_v24 }
  0x1a   : > { %1014 = vmatprep.subr.bf16.mxu0 %v1013_v55  ;;  %1046 = vmatprep.subr.bf16.mxu1 %v1013_v55  ;;  %v309_v23 = vadd.f32 %v308_v13, %v1333_v6  ;;  %v349_v31 = vadd.f32 %v348_v20, %v337_v9  ;;  %v1023_v53 = vpack.c.bf16 %v256_v37, %v255_v36  ;;  %v273_v9 = vld [vmem:[%s1536_s2] sm:$0xff] }
  0x1b   : > { %v323_v22 = vadd.f32 %v322_v12, %v1315_v59  ;;  %v364_v27 = vadd.f32 %v363_v18, %v342_v7  ;;  %v1057_v61 = vpack.c.bf16 %v276_v48, %v274_v47 }
  0x1c   : > { %v310_v35 = vadd.f32 %v309_v23, %v1353_v17  ;;  %v350_v42 = vadd.f32 %v349_v31, %v339_v19 }
  0x1d   : > { %1016 = vmatpush3.bf16.msra.mxu0 %v1015_v0  ;;  %1048 = vmatpush3.bf16.msra.mxu1 %v1015_v0  ;;  %v324_v33 = vadd.f32 %v323_v22, %v1340_v11  ;;  %v365_v38 = vadd.f32 %v364_v27, %v344_v14  ;;  %v278_v14 = vld [vmem:[%s1536_s2 + $0x28] sm:$0xff]  ;;  %v279_v27 = vld [vmem:[%s1536_s2 + $0x30] sm:$0xff] }
  0x1e   : > { %1018 = vmatprep.subr.bf16.mxu0 %v1017_v1  ;;  %1050 = vmatprep.subr.bf16.mxu1 %v1017_v1  ;;  %v311_v45 = vadd.f32 %v310_v35, %v1360_v24  ;;  %v351_v52 = vadd.f32 %v350_v42, %v341_v30  ;;  %v1061_v23 = vpack.c.bf16 %v280_v15, %v278_v14  ;;  %v301_v15 = vld [vmem:[%s1536_s2 + $0xe0] sm:$0xff] }
  0x1f   : > { %v325_v43 = vrot.slane %v324_v33, 4  ;;  %v366_v49 = vadd.f32 %v365_v38, %v346_v25  ;;  %v277_v25 = vld [vmem:[%s1536_s2 + $0x20] sm:$0xff] }
  0x20   : > { %v312_v55 = vrot.slane %v311_v45, 4  ;;  %v352_v58 = vadd.f32 %v351_v52, %v343_v41  ;;  %v1063_v36 = vpack.c.bf16 %v279_v27, %v277_v25  ;;  %v281_v38 = vld [vmem:[%s1536_s2 + $0x40] sm:$0xff]  ;;  %v283_v41 = vld [vmem:[%s1536_s2 + $0x50] sm:$0xff]  ;;  %v290_v52 = vld [vmem:[%s1536_s2 + $0x88] sm:$0xff] }
  0x21   : > { %1020 = vmatpush3.bf16.msra.mxu0 %v1019_v21  ;;  %1052 = vmatpush3.bf16.msra.mxu1 %v1019_v21  ;;  %v326_v54 = vadd.f32 %v325_v43, %v324_v33  ;;  %v367_v57 = vrot.slane %v366_v49, 4  ;;  %v1059_v21 = vpack.c.bf16 %v275_v10, %v273_v9  ;;  %v284_v33 = vld [vmem:[%s1536_s2 + $0x58] sm:$0xff]  ;;  %v286_v43 = vld [vmem:[%s1536_s2 + $0x68] sm:$0xff]  ;;  %v1067_v47 = vpack.c.bf16 %v283_v41, %v281_v38  ;;  %v299_v9 = vld [vmem:[%s1536_s2 + $0xd0] sm:$0xff] }
  0x22   : > { %1022 = vmatprep.subr.bf16.mxu0 %v1021_v32  ;;  %1054 = vmatprep.subr.bf16.mxu1 %v1021_v32  ;;  %v313_v63 = vadd.f32 %v312_v55, %v311_v45  ;;  %v353_v1 = vadd.f32 %v352_v58, %v345_v51  ;;  %v282_v32 = vld [vmem:[%s1536_s2 + $0x48] sm:$0xff]  ;;  %v288_v45 = vld [vmem:[%s1536_s2 + $0x78] sm:$0xff]  ;;  %v287_v51 = vld [vmem:[%s1536_s2 + $0x70] sm:$0xff] }
  0x23   : > { %v327_v62 = vrot.slane %v326_v54, 2  ;;  %v368_v0 = vadd.f32 %v367_v57, %v366_v49  ;;  %v1065_v37 = vpack.c.bf16 %v284_v33, %v282_v32  ;;  %v1069_v48 = vpack.c.bf16 %v288_v45, %v286_v43  ;;  %v285_v49 = vld [vmem:[%s1536_s2 + $0x60] sm:$0xff]  ;;  %v291_v58 = vld [vmem:[%s1536_s2 + $0x90] sm:$0xff] }
  0x24   : > { %v314_v3 = vrot.slane %v313_v63, 2  ;;  %v354_v5 = vrot.slane %v353_v1, 4  ;;  %v289_v57 = vld [vmem:[%s1536_s2 + $0x80] sm:$0xff] }
  0x25   : > { %1024 = vmatpush3.bf16.msra.mxu0 %v1023_v53  ;;  %1056 = vmatpush3.bf16.msra.mxu1 %v1023_v53  ;;  %v328_v2 = vadd.f32 %v327_v62, %v326_v54  ;;  %v369_v4 = vrot.slane %v368_v0, 2  ;;  %v292_v53 = vld [vmem:[%s1536_s2 + $0x98] sm:$0xff]  ;;  %v1071_v54 = vpack.c.bf16 %v287_v51, %v285_v49  ;;  %v739_v51 = vld [vmem:[%s1538_s4] sm:$0x3] }
  0x26   : > { %1058 = vmatprep.subr.bf16.mxu0 %v1057_v61  ;;  %1090 = vmatprep.subr.bf16.mxu1 %v1057_v61  ;;  %v315_v8 = vadd.f32 %v314_v3, %v313_v63  ;;  %v355_v13 = vadd.f32 %v354_v5, %v353_v1  ;;  %v1073_v55 = vpack.c.bf16 %v292_v53, %v290_v52  ;;  %v294_v61 = vld [vmem:[%s1536_s2 + $0xa8] sm:$0xff]  ;;  %v296_v62 = vld [vmem:[%s1536_s2 + $0xb8] sm:$0xff]  ;;  %v293_v1 = vld [vmem:[%s1536_s2 + $0xa0] sm:$0xff] }
  0x27   : > { %v329_v7 = vrot.slane %v328_v2, 1  ;;  %v370_v12 = vadd.f32 %v369_v4, %v368_v0  ;;  %v1075_v63 = vpack.c.bf16 %v291_v58, %v289_v57  ;;  %v1077_v0 = vpack.c.bf16 %v296_v62, %v294_v61  ;;  %v298_v3 = vld [vmem:[%s1536_s2 + $0xc8] sm:$0xff]  ;;  %v300_v4 = vld [vmem:[%s1536_s2 + $0xd8] sm:$0xff] }
  0x28   : > { %v316_v18 = vrot.slane %v315_v8, 1  ;;  %v356_v20 = vrot.slane %v355_v13, 2 }
  0x29   : > { %v330_v16 = vadd.f32 %v329_v7, %v328_v2  ;;  %v371_v19 = vrot.slane %v370_v12, 1  ;;  %v295_v2 = vld [vmem:[%s1536_s2 + $0xb0] sm:$0xff]  ;;  %v1081_v7 = vpack.c.bf16 %v300_v4, %v298_v3 }
  0x2a   : > { %v317_v22 = vadd.f32 %v316_v18, %v315_v8  ;;  %v357_v31 = vadd.f32 %v356_v20, %v355_v13  ;;  %v1079_v5 = vpack.c.bf16 %v295_v2, %v293_v1  ;;  %v297_v8 = vld [vmem:[%s1536_s2 + $0xc0] sm:$0xff]  ;;  %v304_v13 = vld [vmem:[%s1536_s2 + $0xf8] sm:$0xff] }
  0x2b   : > { %437 = vmatprep.mubr.f32.mxu0 %v330_v16  ;;  %v372_v30 = vadd.f32 %v371_v19, %v370_v12  ;;  %v1083_v10 = vpack.c.bf16 %v299_v9, %v297_v8  ;;  %v302_v12 = vld [vmem:[%s1536_s2 + $0xe8] sm:$0xff]  ;;  %v303_v16 = vld [vmem:[%s1536_s2 + $0xf0] sm:$0xff]  ;;  %v1140_v19 = vmov 0.0  }
  0x2c   : > { %438 = vmatmul.mubr.f32.vlgmr.msra.gmra.mrb[0].mxu0 %v317_v22  ;;  %v358_v35 = vrot.slane %v357_v31, 1  ;;  %v1085_v14 = vpack.c.bf16 %v304_v13, %v302_v12  ;;  %v1087_v18 = vpack.c.bf16 %v303_v16, %v301_v15 }
  0x2d   : > { %507 = vmatprep.mubr.f32.mxu1 %v372_v30  ;;  %1060 = vmatpush1.bf16.msra.mxu0 %v1059_v21 }
  0x2e   : > { %1062 = vmatprep.subr.bf16.mxu0 %v1061_v23  ;;  %v359_v42 = vadd.f32 %v358_v35, %v357_v31  ;;  %585 = vmatprep.mubr.f32.mxu0 %v1140_v19 }
  0x30   : > { %508 = vmatmul.mubr.f32.vlgmr.msra.gmra.mrb[0].mxu1 %v359_v42  ;;  %v663_v42 = vlaneseq }
  0x31   : > { %1064 = vmatpush1.bf16.msra.mxu0 %v1063_v36  ;;  %1092 = vmatpush1.bf16.msra.mxu1 %v1059_v21 }
  0x32   : > { %1066 = vmatprep.subr.bf16.mxu0 %v1065_v37  ;;  %1094 = vmatprep.subr.bf16.mxu1 %v1061_v23  ;;  %v664_v43 = vshrl.u32 %v663_v42, 7 }
  0x33   : > { %656 = vmatprep.mubr.f32.mxu1 %v1140_v19 }
  0x34   : > { %v665_v45 = vsub.s32 0, %v664_v43  ;;  %v719_v49 = vsub.s32 1, %v664_v43 }
  0x35   : > { %1068 = vmatpush1.bf16.msra.mxu0 %v1067_v47  ;;  %1096 = vmatpush1.bf16.msra.mxu1 %v1063_v36 }
  0x36   : > { %1070 = vmatprep.subr.bf16.mxu0 %v1069_v48  ;;  %1098 = vmatprep.subr.bf16.mxu1 %v1065_v37  ;;  %v1487_v61 = vrot.slane %v739_v51, %v719_v49 }
  0x39   : > { %1072 = vmatpush1.bf16.msra.mxu0 %v1071_v54  ;;  %1100 = vmatpush1.bf16.msra.mxu1 %v1067_v47 }
  0x3a   : > { %1074 = vmatprep.subr.bf16.mxu0 %v1073_v55  ;;  %1102 = vmatprep.subr.bf16.mxu1 %v1069_v48  ;;  %v711_v48 = vld [vmem:[%s1537_s3] sm:$0x3] }
  0x3b   : > { %v716_v53 = vrot.slane %v711_v48, %v665_v45  ;;  %v1485_v58 = vrot.slane %v711_v48, %v719_v49 }
  0x3d   : > { %1076 = vmatpush1.bf16.msra.mxu0 %v1075_v63  ;;  %1104 = vmatpush1.bf16.msra.mxu1 %v1071_v54  ;;  %v744_v54 = vrot.slane %v739_v51, %v665_v45 }
  0x3e   : > { %1078 = vmatprep.subr.bf16.mxu0 %v1077_v0  ;;  %1106 = vmatprep.subr.bf16.mxu1 %v1073_v55 }
  0x41   : > { %1080 = vmatpush1.bf16.msra.mxu0 %v1079_v5  ;;  %1108 = vmatpush1.bf16.msra.mxu1 %v1075_v63 }
  0x42   : > { %1082 = vmatprep.subr.bf16.mxu0 %v1081_v7  ;;  %1110 = vmatprep.subr.bf16.mxu1 %v1077_v0 }
  0x45   : > { %1084 = vmatpush1.bf16.msra.mxu0 %v1083_v10  ;;  %1112 = vmatpush1.bf16.msra.mxu1 %v1079_v5 }
  0x46   : > { %1114 = vmatprep.subr.bf16.mxu1 %v1081_v7  ;;  %1086 = vmatprep.subr.bf16.mxu0 %v1085_v14 }
  0x49   : > { %1116 = vmatpush1.bf16.msra.mxu1 %v1083_v10  ;;  %1088 = vmatpush1.bf16.msra.mxu0 %v1087_v18 }
  0x4a   : > { %1118 = vmatprep.subr.bf16.mxu1 %v1085_v14 }
  0x4d   : > { %1120 = vmatpush1.bf16.msra.mxu1 %v1087_v18 }
  0xff   : > { %v955_v20 = vpop.f32.mrb[0].mxu0 }
 0x100   : > { %v956_v21 = vpop.f32.mrb[1].mxu0 }
 0x101   : > { %v957_v22 = vadd.f32 %v956_v21, %v955_v20 }
 0x103   : > { %v514_v23 = vmul.f32 0.00048828125, %v957_v22  ;;  %v990_v25 = vpop.f32.mrb[0].mxu1 }
 0x104   : > { %v991_v27 = vpop.f32.mrb[1].mxu1 }
 0x105   : > { %586 = vmatmul.mubr.f32.vlgmr.msra.gmra.mrb[2].mxu0 %v514_v23  ;;  %v516_v30 = vmul.f32 %v514_v23, %v514_v23  ;;  %v992_v31 = vadd.f32 %v991_v27, %v990_v25 }
 0x107   : > { %v515_v32 = vmul.f32 0.00048828125, %v992_v31 }
 0x109   : > { %v517_v33 = vsub.f32 %v515_v32, %v516_v30 }
 0x10b   : > { %v518_v35 = vmax.f32 %v517_v33, 0.0 }
 0x10d   : > { %v519_v36 = vadd.f32 1e-05, %v518_v35 }
 0x10f   : > { %1130 = vrsqrt.f32 %v519_v36 }
 0x119   : > { %v1131_v37 = vpop.eup %1130 }
 0x11a   : > { %657 = vmatmul.mubr.f32.vlgmr.msra.gmra.mrb[2].mxu1 %v1131_v37 }
 0x1d8   : > { %v587_v38 = vpop.f32.mrb[2].mxu0 }
 0x1d9   : > { %v589_v41 = vpop.f32.mrb[3].mxu0  ;;  %v666_v47 = vrot.slane %v587_v38, %v665_v45 }
 0x1da   : > { %v1481_v52 = vrot.slane %v589_v41, %v665_v45 }
 0x1db   : > { %v671_v55 = vsub.f32 %v1275_v39, %v666_v47  ;;  %v673_v57 = vsub.f32 %v1278_v40, %v666_v47  ;;  %v675_v62 = vsub.f32 %v1290_v46, %v666_v47  ;;  %v677_v63 = vsub.f32 %v1301_v50, %v666_v47 }
 0x1dc   : > { %v679_v0 = vsub.f32 %v1318_v60, %v666_v47  ;;  %v681_v1 = vsub.f32 %v1333_v6, %v666_v47  ;;  %v683_v2 = vsub.f32 %v1353_v17, %v666_v47  ;;  %v685_v3 = vsub.f32 %v1360_v24, %v666_v47 }
 0x1dd   : > { %v672_v39 = vsub.f32 %v1245_v26, %v1481_v52  ;;  %v674_v40 = vsub.f32 %v1251_v28, %v1481_v52  ;;  %v676_v46 = vsub.f32 %v1254_v29, %v1481_v52  ;;  %v678_v50 = vsub.f32 %v1265_v34, %v1481_v52 }
 0x1de   : > { %v680_v60 = vsub.f32 %v1286_v44, %v1481_v52  ;;  %v682_v24 = vsub.f32 %v1310_v56, %v1481_v52  ;;  %v684_v26 = vsub.f32 %v1315_v59, %v1481_v52  ;;  %v686_v28 = vsub.f32 %v1340_v11, %v1481_v52 }
 0x1ed   : > { %v658_v4 = vpop.f32.mrb[2].mxu1 }
 0x1ee   : > { %v690_v6 = vrot.slane %v658_v4, %v665_v45  ;;  %v660_v17 = vpop.f32.mrb[3].mxu1 }
 0x1ef   : > { %v694_v5 = vrot.slane %v660_v17, %v665_v45 }
 0x1f0   : > { %v695_v7 = vmul.f32 %v690_v6, %v671_v55  ;;  %v697_v29 = vmul.f32 %v690_v6, %v673_v57  ;;  %v699_v8 = vmul.f32 %v690_v6, %v675_v62  ;;  %v701_v9 = vmul.f32 %v690_v6, %v677_v63 }
 0x1f1   : > { %v703_v34 = vmul.f32 %v690_v6, %v679_v0  ;;  %v705_v10 = vmul.f32 %v690_v6, %v681_v1  ;;  %v707_v12 = vmul.f32 %v690_v6, %v683_v2  ;;  %v709_v44 = vmul.f32 %v690_v6, %v685_v3 }
 0x1f2   : > { %v723_v13 = vmul.f32 %v716_v53, %v695_v7  ;;  %v725_v14 = vmul.f32 %v716_v53, %v697_v29  ;;  %v727_v15 = vmul.f32 %v716_v53, %v699_v8  ;;  %v729_v16 = vmul.f32 %v716_v53, %v701_v9 }
 0x1f3   : > { %v731_v56 = vmul.f32 %v716_v53, %v703_v34  ;;  %v733_v18 = vmul.f32 %v716_v53, %v705_v10  ;;  %v735_v19 = vmul.f32 %v716_v53, %v707_v12  ;;  %v737_v59 = vmul.f32 %v716_v53, %v709_v44 }
 0x1f4   : > { %v751_v20 = vadd.f32 %v744_v54, %v723_v13  ;;  %v753_v21 = vadd.f32 %v744_v54, %v725_v14  ;;  %v755_v11 = vadd.f32 %v744_v54, %v727_v15  ;;  %v757_v22 = vadd.f32 %v744_v54, %v729_v16 }
 0x1f5   : > { %v759_v23 = vadd.f32 %v744_v54, %v731_v56  ;;  %v761_v25 = vadd.f32 %v744_v54, %v733_v18  ;;  %v763_v27 = vadd.f32 %v744_v54, %v735_v19  ;;  %v765_v30 = vadd.f32 %v744_v54, %v737_v59 }
 0x1f6   : > { %v767_v31 = vmax.f32 %v751_v20, 0.0  ;;  %v769_v32 = vmax.f32 %v753_v21, 0.0  ;;  %v771_v33 = vmax.f32 %v755_v11, 0.0  ;;  %v773_v35 = vmax.f32 %v757_v22, 0.0 }
 0x1f7   : > { %v775_v36 = vmax.f32 %v759_v23, 0.0  ;;  %v777_v37 = vmax.f32 %v761_v25, 0.0  ;;  %v779_v38 = vmax.f32 %v763_v27, 0.0  ;;  %v781_v41 = vmax.f32 %v765_v30, 0.0 }
 0x1f8   : > { %v696_v42 = vmul.f32 %v694_v5, %v672_v39  ;;  %v698_v43 = vmul.f32 %v694_v5, %v674_v40  ;;  %v700_v45 = vmul.f32 %v694_v5, %v676_v46  ;;  %v702_v47 = vmul.f32 %v694_v5, %v678_v50 }
 0x1f9   : > { %v704_v48 = vmul.f32 %v694_v5, %v680_v60  ;;  %v706_v49 = vmul.f32 %v694_v5, %v682_v24  ;;  %v708_v51 = vmul.f32 %v694_v5, %v684_v26  ;;  %v710_v52 = vmul.f32 %v694_v5, %v686_v28 }
 0x1fa   : > { %v724_v53 = vmul.f32 %v1485_v58, %v696_v42  ;;  %v726_v54 = vmul.f32 %v1485_v58, %v698_v43  ;;  %v728_v55 = vmul.f32 %v1485_v58, %v700_v45  ;;  %v730_v57 = vmul.f32 %v1485_v58, %v702_v47 }
 0x1fb   : > { %v732_v62 = vmul.f32 %v1485_v58, %v704_v48  ;;  %v734_v63 = vmul.f32 %v1485_v58, %v706_v49  ;;  %v736_v0 = vmul.f32 %v1485_v58, %v708_v51  ;;  %v738_v1 = vmul.f32 %v1485_v58, %v710_v52 }
 0x1fc   : > { %v752_v2 = vadd.f32 %v1487_v61, %v724_v53  ;;  %v754_v3 = vadd.f32 %v1487_v61, %v726_v54  ;;  %v756_v39 = vadd.f32 %v1487_v61, %v728_v55  ;;  %v758_v40 = vadd.f32 %v1487_v61, %v730_v57 }
 0x1fd   : > { %v760_v4 = vadd.f32 %v1487_v61, %v732_v62  ;;  %v762_v46 = vadd.f32 %v1487_v61, %v734_v63  ;;  %v764_v50 = vadd.f32 %v1487_v61, %v736_v0  ;;  %v766_v60 = vadd.f32 %v1487_v61, %v738_v1 }
 0x1fe   : > { %v768_v6 = vmax.f32 %v752_v2, 0.0  ;;  %v770_v17 = vmax.f32 %v754_v3, 0.0  ;;  %v772_v58 = vmax.f32 %v756_v39, 0.0  ;;  %v774_v24 = vmax.f32 %v758_v40, 0.0 }
 0x1ff   : > { %v776_v26 = vmax.f32 %v760_v4, 0.0  ;;  %v778_v28 = vmax.f32 %v762_v46, 0.0  ;;  %v780_v5 = vmax.f32 %v764_v50, 0.0  ;;  %v782_v7 = vmax.f32 %v766_v60, 0.0 }
 0x200   : > { %v915_v29 = vpack.c.bf16 %v768_v6, %v767_v31  ;;  %v916_v8 = vpack.c.bf16 %v770_v17, %v769_v32  ;;  %v917_v9 = vpack.c.bf16 %v772_v58, %v771_v33  ;;  %v918_v34 = vpack.c.bf16 %v774_v24, %v773_v35 }
 0x201   : > { %v919_v10 = vpack.c.bf16 %v776_v26, %v775_v36  ;;  %v920_v12 = vpack.c.bf16 %v778_v28, %v777_v37  ;;  %v921_v44 = vpack.c.bf16 %v780_v5, %v779_v38  ;;  %v922_v61 = vpack.c.bf16 %v782_v7, %v781_v41 }
 0x202   : > { %831 = vst [vmem:[%s224_s20] sm:$0xff] %v915_v29  ;;  %832 = vst [vmem:[%s224_s20 + $0x8] sm:$0xff] %v916_v8 }
 0x203   : > { %833 = vst [vmem:[%s224_s20 + $0x10] sm:$0xff] %v917_v9  ;;  %834 = vst [vmem:[%s224_s20 + $0x18] sm:$0xff] %v918_v34 }
 0x204   : > { %835 = vst [vmem:[%s224_s20 + $0x20] sm:$0xff] %v919_v10  ;;  %836 = vst [vmem:[%s224_s20 + $0x28] sm:$0xff] %v920_v12 }
 0x205   : > { %837 = vst [vmem:[%s224_s20 + $0x30] sm:$0xff] %v921_v44  ;;  %838 = vst [vmem:[%s224_s20 + $0x38] sm:$0xff] %v922_v61 }
 0x206 PF: > { %s15_s18 = sadd.s32 1, %s1138_s18  }
 0x207   : > { %p12_p4 = scmp.ge.s32.totalorder %s15_s18, 4  }
 0x209   :  { %14 = sbr.rel (!%p12_p4) target bundleno = 1 (0x1), region = 70 }

// kernel: ms_encoder_forward.13
= control target key start
LH: loop header
LB: loop body
LE: loop exit
PB: predicated region body
PF: predicated region fallthrough
CT: control target
= control target key end

     0   :  { %s5142_s9 = smov 0   ;;  %s5144_s10 = smov 0   ;;  %s6442_s0 = inlined_call_operand.vmem [shape: bf16[128,2048], index: 0, kind: input, shape index: {}]   ;;  %s6443_s1 = inlined_call_operand.vmem [shape: bf16[2048,256], index: 1, kind: input, shape index: {}]   ;;  %s6444_s2 = inlined_call_operand.vmem [shape: f32[128,256], index: 2, kind: output, shape index: {}]  }
   0x1   :  { %s5146_s11 = smov 0   ;;  %s5148_s12 = smov 0  }
   0x2   :  { %s5150_s13 = smov 0  }
   0x3 LB: > { %s27_s14 = sadd.s32 1, %s5121_s12  ;;  %s4137_s15 = sadd.s32 4294967295, %s5125_s13   ;;  %s5125_s13 = sphi %s5150_s13, %s12_s13   ;;  %s5121_s12 = sphi %s5148_s12, %s6449_s12   ;;  %s5117_s11 = sphi %s5146_s11, %s6448_s11   ;;  %s5113_s10 = sphi %s5144_s10, %s6447_s10   ;;  %s5109_s9 = sphi %s5142_s9, %s6446_s9  }
   0x4   : > { %p29_p0 = scmp.ge.s32.totalorder %s27_s14, 2  ;;  %p75_p1 = scmp.ne.s32.totalorder %s5113_s10, %s5109_s9 }
   0x5   : > { %p76_p2 = scmp.eq.s32.totalorder %s5125_s13, 0  ;;  %p107_p4 = scmp.eq.s32.totalorder %s4137_s15, 1 }
   0x6   : > { %s6451_s14 = smov (%p29_p0, %s27_s14), 0  ;;  %s68_s17 = sadd.s32 1, %s5113_s10 }
   0x7   : > { %p77_p3 = por %p76_p2, %p75_p1  ;;  %s64_s16 = ssub.s32 %s5121_s12, %s6451_s14 }
   0x8   : > { %p66_p5 = scmp.eq.s32.totalorder %s64_s16, 0  ;;  %p5177_p6 = por %p107_p4, %p75_p1 }
   0x9   : > { %p4141_p7 = scmp.ge.s32.totalorder %s5125_s13, 2 }
   0xa   : > { %s5182_s19 = scalar_select %p66_p5, %s5113_s10, %s68_s17  }
   0xb   : > { %144 = sbr.rel (%p4141_p7) target bundleno = 192 (0xc0), region = 20 }
  0x12   : > { %147 = sbr.rel (!%p77_p3) target bundleno = 192 (0xc0), region = 24  ;;  %s149_s20 = sand.u32 (%p77_p3), 1, %s5113_s10  }
  0x13   : > { %s4143_s21 = sshll.u32 (%p77_p3), %s5121_s12, 2  ;;  %s4142_s22 = sshll.u32 (%p77_p3), %s149_s20, 10 }
  0x14   : > { %s5190_s25 = scalar_lea.vmem (%p77_p3), %s6443_s1, %s4143_s21  ;;  %s5194_s26 = scalar_lea.vmem (%p77_p3), [#allocation3], %s4142_s22 }
  0x15   : > { %v172_v0 = vld [vmem:[%s5190_s25] sm:$0xf] (%p77_p3)  ;;  %v174_v1 = vld [vmem:[%s5190_s25 + $0x8] sm:$0xf] (%p77_p3)  ;;  %v176_v2 = vld [vmem:[%s5190_s25 + $0x10] sm:$0xf] (%p77_p3) }
  0x16   : > { %173 = vst [vmem:[%s5194_s26] sm:$0xf] (%p77_p3), %v172_v0  ;;  %175 = vst [vmem:[%s5194_s26 + $0x4] sm:$0xf] (%p77_p3), %v174_v1  ;;  %v178_v3 = vld [vmem:[%s5190_s25 + $0x18] sm:$0xf] (%p77_p3) }
  0x17   : > { %v180_v4 = vld [vmem:[%s5190_s25 + $0x20] sm:$0xf] (%p77_p3)  ;;  %177 = vst [vmem:[%s5194_s26 + $0x8] sm:$0xf] (%p77_p3), %v176_v2  ;;  %179 = vst [vmem:[%s5194_s26 + $0xc] sm:$0xf] (%p77_p3), %v178_v3 }
  0x18   : > { %181 = vst [vmem:[%s5194_s26 + $0x10] sm:$0xf] (%p77_p3), %v180_v4  ;;  %v182_v5 = vld [vmem:[%s5190_s25 + $0x28] sm:$0xf] (%p77_p3)  ;;  %v184_v6 = vld [vmem:[%s5190_s25 + $0x30] sm:$0xf] (%p77_p3) }
  0x19   : > { %v186_v7 = vld [vmem:[%s5190_s25 + $0x38] sm:$0xf]  ;;  %183 = vst [vmem:[%s5194_s26 + $0x14] sm:$0xf] %v182_v5  ;;  %185 = vst [vmem:[%s5194_s26 + $0x18] sm:$0xf] %v184_v6 }
  0x1a   : > { %187 = vst [vmem:[%s5194_s26 + $0x1c] sm:$0xf] %v186_v7  ;;  %v188_v8 = vld [vmem:[%s5190_s25 + $0x40] sm:$0xf]  ;;  %v190_v9 = vld [vmem:[%s5190_s25 + $0x48] sm:$0xf] }
  0x1b   : > { %v192_v10 = vld [vmem:[%s5190_s25 + $0x50] sm:$0xf]  ;;  %189 = vst [vmem:[%s5194_s26 + $0x20] sm:$0xf] %v188_v8  ;;  %191 = vst [vmem:[%s5194_s26 + $0x24] sm:$0xf] %v190_v9 }
  0x1c   : > { %193 = vst [vmem:[%s5194_s26 + $0x28] sm:$0xf] %v192_v10  ;;  %v194_v11 = vld [vmem:[%s5190_s25 + $0x58] sm:$0xf]  ;;  %v196_v12 = vld [vmem:[%s5190_s25 + $0x60] sm:$0xf] }
  0x1d   : > { %v198_v13 = vld [vmem:[%s5190_s25 + $0x68] sm:$0xf]  ;;  %195 = vst [vmem:[%s5194_s26 + $0x2c] sm:$0xf] %v194_v11  ;;  %197 = vst [vmem:[%s5194_s26 + $0x30] sm:$0xf] %v196_v12 }
  0x1e   : > { %199 = vst [vmem:[%s5194_s26 + $0x34] sm:$0xf] %v198_v13  ;;  %v200_v14 = vld [vmem:[%s5190_s25 + $0x70] sm:$0xf]  ;;  %v202_v15 = vld [vmem:[%s5190_s25 + $0x78] sm:$0xf] }
  0x1f   : > { %v204_v16 = vld [vmem:[%s5190_s25 + $0x80] sm:$0xf]  ;;  %201 = vst [vmem:[%s5194_s26 + $0x38] sm:$0xf] %v200_v14  ;;  %203 = vst [vmem:[%s5194_s26 + $0x3c] sm:$0xf] %v202_v15 }
  0x20   : > { %205 = vst [vmem:[%s5194_s26 + $0x40] sm:$0xf] %v204_v16  ;;  %v206_v17 = vld [vmem:[%s5190_s25 + $0x88] sm:$0xf]  ;;  %v208_v18 = vld [vmem:[%s5190_s25 + $0x90] sm:$0xf] }
  0x21   : > { %v210_v19 = vld [vmem:[%s5190_s25 + $0x98] sm:$0xf]  ;;  %207 = vst [vmem:[%s5194_s26 + $0x44] sm:$0xf] %v206_v17  ;;  %209 = vst [vmem:[%s5194_s26 + $0x48] sm:$0xf] %v208_v18 }
  0x22   : > { %211 = vst [vmem:[%s5194_s26 + $0x4c] sm:$0xf] %v210_v19  ;;  %v212_v20 = vld [vmem:[%s5190_s25 + $0xa0] sm:$0xf]  ;;  %v214_v21 = vld [vmem:[%s5190_s25 + $0xa8] sm:$0xf] }
  0x23   : > { %v216_v22 = vld [vmem:[%s5190_s25 + $0xb0] sm:$0xf]  ;;  %213 = vst [vmem:[%s5194_s26 + $0x50] sm:$0xf] %v212_v20  ;;  %215 = vst [vmem:[%s5194_s26 + $0x54] sm:$0xf] %v214_v21 }
  0x24   : > { %217 = vst [vmem:[%s5194_s26 + $0x58] sm:$0xf] %v216_v22  ;;  %v218_v23 = vld [vmem:[%s5190_s25 + $0xb8] sm:$0xf]  ;;  %v220_v24 = vld [vmem:[%s5190_s25 + $0xc0] sm:$0xf] }
  0x25   : > { %v222_v25 = vld [vmem:[%s5190_s25 + $0xc8] sm:$0xf]  ;;  %219 = vst [vmem:[%s5194_s26 + $0x5c] sm:$0xf] %v218_v23  ;;  %221 = vst [vmem:[%s5194_s26 + $0x60] sm:$0xf] %v220_v24 }
  0x26   : > { %223 = vst [vmem:[%s5194_s26 + $0x64] sm:$0xf] %v222_v25  ;;  %v224_v26 = vld [vmem:[%s5190_s25 + $0xd0] sm:$0xf]  ;;  %v226_v27 = vld [vmem:[%s5190_s25 + $0xd8] sm:$0xf] }
  0x27   : > { %v228_v28 = vld [vmem:[%s5190_s25 + $0xe0] sm:$0xf]  ;;  %225 = vst [vmem:[%s5194_s26 + $0x68] sm:$0xf] %v224_v26  ;;  %227 = vst [vmem:[%s5194_s26 + $0x6c] sm:$0xf] %v226_v27 }
  0x28   : > { %229 = vst [vmem:[%s5194_s26 + $0x70] sm:$0xf] %v228_v28  ;;  %v230_v29 = vld [vmem:[%s5190_s25 + $0xe8] sm:$0xf]  ;;  %v232_v30 = vld [vmem:[%s5190_s25 + $0xf0] sm:$0xf] }
  0x29   : > { %v234_v31 = vld [vmem:[%s5190_s25 + $0xf8] sm:$0xf]  ;;  %231 = vst [vmem:[%s5194_s26 + $0x74] sm:$0xf] %v230_v29  ;;  %233 = vst [vmem:[%s5194_s26 + $0x78] sm:$0xf] %v232_v30 }
  0x2a   : > { %235 = vst [vmem:[%s5194_s26 + $0x7c] sm:$0xf] %v234_v31  ;;  %v236_v32 = vld [vmem:[%s5190_s25 + $0x100] sm:$0xf]  ;;  %v238_v33 = vld [vmem:[%s5190_s25 + $0x108] sm:$0xf] }
  0x2b   : > { %v240_v34 = vld [vmem:[%s5190_s25 + $0x110] sm:$0xf]  ;;  %237 = vst [vmem:[%s5194_s26 + $0x80] sm:$0xf] %v236_v32  ;;  %239 = vst [vmem:[%s5194_s26 + $0x84] sm:$0xf] %v238_v33 }
  0x2c   : > { %241 = vst [vmem:[%s5194_s26 + $0x88] sm:$0xf] %v240_v34  ;;  %v242_v35 = vld [vmem:[%s5190_s25 + $0x118] sm:$0xf]  ;;  %v244_v36 = vld [vmem:[%s5190_s25 + $0x120] sm:$0xf] }
  0x2d   : > { %v246_v37 = vld [vmem:[%s5190_s25 + $0x128] sm:$0xf]  ;;  %243 = vst [vmem:[%s5194_s26 + $0x8c] sm:$0xf] %v242_v35  ;;  %245 = vst [vmem:[%s5194_s26 + $0x90] sm:$0xf] %v244_v36 }
  0x2e   : > { %247 = vst [vmem:[%s5194_s26 + $0x94] sm:$0xf] %v246_v37  ;;  %v248_v38 = vld [vmem:[%s5190_s25 + $0x130] sm:$0xf]  ;;  %v250_v39 = vld [vmem:[%s5190_s25 + $0x138] sm:$0xf] }
  0x2f   : > { %v252_v40 = vld [vmem:[%s5190_s25 + $0x140] sm:$0xf]  ;;  %249 = vst [vmem:[%s5194_s26 + $0x98] sm:$0xf] %v248_v38  ;;  %251 = vst [vmem:[%s5194_s26 + $0x9c] sm:$0xf] %v250_v39 }
  0x30   : > { %253 = vst [vmem:[%s5194_s26 + $0xa0] sm:$0xf] %v252_v40  ;;  %v254_v41 = vld [vmem:[%s5190_s25 + $0x148] sm:$0xf]  ;;  %v256_v42 = vld [vmem:[%s5190_s25 + $0x150] sm:$0xf] }
  0x31   : > { %v258_v43 = vld [vmem:[%s5190_s25 + $0x158] sm:$0xf]  ;;  %255 = vst [vmem:[%s5194_s26 + $0xa4] sm:$0xf] %v254_v41  ;;  %257 = vst [vmem:[%s5194_s26 + $0xa8] sm:$0xf] %v256_v42 }
  0x32   : > { %259 = vst [vmem:[%s5194_s26 + $0xac] sm:$0xf] %v258_v43  ;;  %v260_v44 = vld [vmem:[%s5190_s25 + $0x160] sm:$0xf]  ;;  %v262_v45 = vld [vmem:[%s5190_s25 + $0x168] sm:$0xf] }
  0x33   : > { %v264_v46 = vld [vmem:[%s5190_s25 + $0x170] sm:$0xf]  ;;  %261 = vst [vmem:[%s5194_s26 + $0xb0] sm:$0xf] %v260_v44  ;;  %263 = vst [vmem:[%s5194_s26 + $0xb4] sm:$0xf] %v262_v45 }
  0x34   : > { %265 = vst [vmem:[%s5194_s26 + $0xb8] sm:$0xf] %v264_v46  ;;  %v266_v47 = vld [vmem:[%s5190_s25 + $0x178] sm:$0xf]  ;;  %v268_v48 = vld [vmem:[%s5190_s25 + $0x180] sm:$0xf] }
  0x35   : > { %v270_v49 = vld [vmem:[%s5190_s25 + $0x188] sm:$0xf]  ;;  %267 = vst [vmem:[%s5194_s26 + $0xbc] sm:$0xf] %v266_v47  ;;  %269 = vst [vmem:[%s5194_s26 + $0xc0] sm:$0xf] %v268_v48 }
  0x36   : > { %271 = vst [vmem:[%s5194_s26 + $0xc4] sm:$0xf] %v270_v49  ;;  %v272_v50 = vld [vmem:[%s5190_s25 + $0x190] sm:$0xf]  ;;  %v274_v51 = vld [vmem:[%s5190_s25 + $0x198] sm:$0xf] }
  0x37   : > { %v276_v52 = vld [vmem:[%s5190_s25 + $0x1a0] sm:$0xf]  ;;  %273 = vst [vmem:[%s5194_s26 + $0xc8] sm:$0xf] %v272_v50  ;;  %275 = vst [vmem:[%s5194_s26 + $0xcc] sm:$0xf] %v274_v51 }
  0x38   : > { %277 = vst [vmem:[%s5194_s26 + $0xd0] sm:$0xf] %v276_v52  ;;  %v278_v53 = vld [vmem:[%s5190_s25 + $0x1a8] sm:$0xf]  ;;  %v280_v54 = vld [vmem:[%s5190_s25 + $0x1b0] sm:$0xf] }
  0x39   : > { %v282_v55 = vld [vmem:[%s5190_s25 + $0x1b8] sm:$0xf]  ;;  %279 = vst [vmem:[%s5194_s26 + $0xd4] sm:$0xf] %v278_v53  ;;  %281 = vst [vmem:[%s5194_s26 + $0xd8] sm:$0xf] %v280_v54 }
  0x3a   : > { %283 = vst [vmem:[%s5194_s26 + $0xdc] sm:$0xf] %v282_v55  ;;  %v284_v56 = vld [vmem:[%s5190_s25 + $0x1c0] sm:$0xf]  ;;  %v286_v57 = vld [vmem:[%s5190_s25 + $0x1c8] sm:$0xf] }
  0x3b   : > { %v288_v58 = vld [vmem:[%s5190_s25 + $0x1d0] sm:$0xf]  ;;  %285 = vst [vmem:[%s5194_s26 + $0xe0] sm:$0xf] %v284_v56  ;;  %287 = vst [vmem:[%s5194_s26 + $0xe4] sm:$0xf] %v286_v57 }
  0x3c   : > { %289 = vst [vmem:[%s5194_s26 + $0xe8] sm:$0xf] %v288_v58  ;;  %v290_v59 = vld [vmem:[%s5190_s25 + $0x1d8] sm:$0xf]  ;;  %v292_v60 = vld [vmem:[%s5190_s25 + $0x1e0] sm:$0xf] }
  0x3d   : > { %v294_v61 = vld [vmem:[%s5190_s25 + $0x1e8] sm:$0xf]  ;;  %291 = vst [vmem:[%s5194_s26 + $0xec] sm:$0xf] %v290_v59  ;;  %293 = vst [vmem:[%s5194_s26 + $0xf0] sm:$0xf] %v292_v60 }
  0x3e   : > { %295 = vst [vmem:[%s5194_s26 + $0xf4] sm:$0xf] %v294_v61  ;;  %v296_v62 = vld [vmem:[%s5190_s25 + $0x1f0] sm:$0xf]  ;;  %v298_v63 = vld [vmem:[%s5190_s25 + $0x1f8] sm:$0xf] }
  0x3f   : > { %v300_v0 = vld [vmem:[%s5190_s25 + $0x200] sm:$0xf]  ;;  %297 = vst [vmem:[%s5194_s26 + $0xf8] sm:$0xf] %v296_v62  ;;  %299 = vst [vmem:[%s5194_s26 + $0xfc] sm:$0xf] %v298_v63 }
  0x40   : > { %301 = vst [vmem:[%s5194_s26 + $0x100] sm:$0xf] %v300_v0  ;;  %v302_v1 = vld [vmem:[%s5190_s25 + $0x208] sm:$0xf]  ;;  %v304_v2 = vld [vmem:[%s5190_s25 + $0x210] sm:$0xf] }
  0x41   : > { %v306_v3 = vld [vmem:[%s5190_s25 + $0x218] sm:$0xf]  ;;  %303 = vst [vmem:[%s5194_s26 + $0x104] sm:$0xf] %v302_v1  ;;  %305 = vst [vmem:[%s5194_s26 + $0x108] sm:$0xf] %v304_v2 }
  0x42   : > { %307 = vst [vmem:[%s5194_s26 + $0x10c] sm:$0xf] %v306_v3  ;;  %v308_v4 = vld [vmem:[%s5190_s25 + $0x220] sm:$0xf]  ;;  %v310_v5 = vld [vmem:[%s5190_s25 + $0x228] sm:$0xf] }
  0x43   : > { %v312_v6 = vld [vmem:[%s5190_s25 + $0x230] sm:$0xf]  ;;  %309 = vst [vmem:[%s5194_s26 + $0x110] sm:$0xf] %v308_v4  ;;  %311 = vst [vmem:[%s5194_s26 + $0x114] sm:$0xf] %v310_v5 }
  0x44   : > { %313 = vst [vmem:[%s5194_s26 + $0x118] sm:$0xf] %v312_v6  ;;  %v314_v7 = vld [vmem:[%s5190_s25 + $0x238] sm:$0xf]  ;;  %v316_v8 = vld [vmem:[%s5190_s25 + $0x240] sm:$0xf] }
  0x45   : > { %v318_v9 = vld [vmem:[%s5190_s25 + $0x248] sm:$0xf]  ;;  %315 = vst [vmem:[%s5194_s26 + $0x11c] sm:$0xf] %v314_v7  ;;  %317 = vst [vmem:[%s5194_s26 + $0x120] sm:$0xf] %v316_v8 }
  0x46   : > { %319 = vst [vmem:[%s5194_s26 + $0x124] sm:$0xf] %v318_v9  ;;  %v320_v10 = vld [vmem:[%s5190_s25 + $0x250] sm:$0xf]  ;;  %v322_v11 = vld [vmem:[%s5190_s25 + $0x258] sm:$0xf] }
  0x47   : > { %v324_v12 = vld [vmem:[%s5190_s25 + $0x260] sm:$0xf]  ;;  %321 = vst [vmem:[%s5194_s26 + $0x128] sm:$0xf] %v320_v10  ;;  %323 = vst [vmem:[%s5194_s26 + $0x12c] sm:$0xf] %v322_v11 }
  0x48   : > { %325 = vst [vmem:[%s5194_s26 + $0x130] sm:$0xf] %v324_v12  ;;  %v326_v13 = vld [vmem:[%s5190_s25 + $0x268] sm:$0xf]  ;;  %v328_v14 = vld [vmem:[%s5190_s25 + $0x270] sm:$0xf] }
  0x49   : > { %v330_v15 = vld [vmem:[%s5190_s25 + $0x278] sm:$0xf]  ;;  %327 = vst [vmem:[%s5194_s26 + $0x134] sm:$0xf] %v326_v13  ;;  %329 = vst [vmem:[%s5194_s26 + $0x138] sm:$0xf] %v328_v14 }
  0x4a   : > { %331 = vst [vmem:[%s5194_s26 + $0x13c] sm:$0xf] %v330_v15  ;;  %v332_v16 = vld [vmem:[%s5190_s25 + $0x280] sm:$0xf]  ;;  %v334_v17 = vld [vmem:[%s5190_s25 + $0x288] sm:$0xf] }
  0x4b   : > { %v336_v18 = vld [vmem:[%s5190_s25 + $0x290] sm:$0xf]  ;;  %333 = vst [vmem:[%s5194_s26 + $0x140] sm:$0xf] %v332_v16  ;;  %335 = vst [vmem:[%s5194_s26 + $0x144] sm:$0xf] %v334_v17 }
  0x4c   : > { %337 = vst [vmem:[%s5194_s26 + $0x148] sm:$0xf] %v336_v18  ;;  %v338_v19 = vld [vmem:[%s5190_s25 + $0x298] sm:$0xf]  ;;  %v340_v20 = vld [vmem:[%s5190_s25 + $0x2a0] sm:$0xf] }
  0x4d   : > { %v342_v21 = vld [vmem:[%s5190_s25 + $0x2a8] sm:$0xf]  ;;  %339 = vst [vmem:[%s5194_s26 + $0x14c] sm:$0xf] %v338_v19  ;;  %341 = vst [vmem:[%s5194_s26 + $0x150] sm:$0xf] %v340_v20 }
  0x4e   : > { %343 = vst [vmem:[%s5194_s26 + $0x154] sm:$0xf] %v342_v21  ;;  %v344_v22 = vld [vmem:[%s5190_s25 + $0x2b0] sm:$0xf]  ;;  %v346_v23 = vld [vmem:[%s5190_s25 + $0x2b8] sm:$0xf] }
  0x4f   : > { %v348_v24 = vld [vmem:[%s5190_s25 + $0x2c0] sm:$0xf]  ;;  %345 = vst [vmem:[%s5194_s26 + $0x158] sm:$0xf] %v344_v22  ;;  %347 = vst [vmem:[%s5194_s26 + $0x15c] sm:$0xf] %v346_v23 }
  0x50   : > { %349 = vst [vmem:[%s5194_s26 + $0x160] sm:$0xf] %v348_v24  ;;  %v350_v25 = vld [vmem:[%s5190_s25 + $0x2c8] sm:$0xf]  ;;  %v352_v26 = vld [vmem:[%s5190_s25 + $0x2d0] sm:$0xf] }
  0x51   : > { %v354_v27 = vld [vmem:[%s5190_s25 + $0x2d8] sm:$0xf]  ;;  %351 = vst [vmem:[%s5194_s26 + $0x164] sm:$0xf] %v350_v25  ;;  %353 = vst [vmem:[%s5194_s26 + $0x168] sm:$0xf] %v352_v26 }
  0x52   : > { %355 = vst [vmem:[%s5194_s26 + $0x16c] sm:$0xf] %v354_v27  ;;  %v356_v28 = vld [vmem:[%s5190_s25 + $0x2e0] sm:$0xf]  ;;  %v358_v29 = vld [vmem:[%s5190_s25 + $0x2e8] sm:$0xf] }
  0x53   : > { %v360_v30 = vld [vmem:[%s5190_s25 + $0x2f0] sm:$0xf]  ;;  %357 = vst [vmem:[%s5194_s26 + $0x170] sm:$0xf] %v356_v28  ;;  %359 = vst [vmem:[%s5194_s26 + $0x174] sm:$0xf] %v358_v29 }
  0x54   : > { %361 = vst [vmem:[%s5194_s26 + $0x178] sm:$0xf] %v360_v30  ;;  %v362_v31 = vld [vmem:[%s5190_s25 + $0x2f8] sm:$0xf]  ;;  %v364_v32 = vld [vmem:[%s5190_s25 + $0x300] sm:$0xf] }
  0x55   : > { %v366_v33 = vld [vmem:[%s5190_s25 + $0x308] sm:$0xf]  ;;  %363 = vst [vmem:[%s5194_s26 + $0x17c] sm:$0xf] %v362_v31  ;;  %365 = vst [vmem:[%s5194_s26 + $0x180] sm:$0xf] %v364_v32 }
  0x56   : > { %367 = vst [vmem:[%s5194_s26 + $0x184] sm:$0xf] %v366_v33  ;;  %v368_v34 = vld [vmem:[%s5190_s25 + $0x310] sm:$0xf]  ;;  %v370_v35 = vld [vmem:[%s5190_s25 + $0x318] sm:$0xf] }
  0x57   : > { %v372_v36 = vld [vmem:[%s5190_s25 + $0x320] sm:$0xf]  ;;  %369 = vst [vmem:[%s5194_s26 + $0x188] sm:$0xf] %v368_v34  ;;  %371 = vst [vmem:[%s5194_s26 + $0x18c] sm:$0xf] %v370_v35 }
  0x58   : > { %373 = vst [vmem:[%s5194_s26 + $0x190] sm:$0xf] %v372_v36  ;;  %v374_v37 = vld [vmem:[%s5190_s25 + $0x328] sm:$0xf]  ;;  %v376_v38 = vld [vmem:[%s5190_s25 + $0x330] sm:$0xf] }
  0x59   : > { %v378_v39 = vld [vmem:[%s5190_s25 + $0x338] sm:$0xf]  ;;  %375 = vst [vmem:[%s5194_s26 + $0x194] sm:$0xf] %v374_v37  ;;  %377 = vst [vmem:[%s5194_s26 + $0x198] sm:$0xf] %v376_v38 }
  0x5a   : > { %379 = vst [vmem:[%s5194_s26 + $0x19c] sm:$0xf] %v378_v39  ;;  %v380_v40 = vld [vmem:[%s5190_s25 + $0x340] sm:$0xf]  ;;  %v382_v41 = vld [vmem:[%s5190_s25 + $0x348] sm:$0xf] }
  0x5b   : > { %v384_v42 = vld [vmem:[%s5190_s25 + $0x350] sm:$0xf]  ;;  %381 = vst [vmem:[%s5194_s26 + $0x1a0] sm:$0xf] %v380_v40  ;;  %383 = vst [vmem:[%s5194_s26 + $0x1a4] sm:$0xf] %v382_v41 }
  0x5c   : > { %385 = vst [vmem:[%s5194_s26 + $0x1a8] sm:$0xf] %v384_v42  ;;  %v386_v43 = vld [vmem:[%s5190_s25 + $0x358] sm:$0xf]  ;;  %v388_v44 = vld [vmem:[%s5190_s25 + $0x360] sm:$0xf] }
  0x5d   : > { %v390_v45 = vld [vmem:[%s5190_s25 + $0x368] sm:$0xf]  ;;  %387 = vst [vmem:[%s5194_s26 + $0x1ac] sm:$0xf] %v386_v43  ;;  %389 = vst [vmem:[%s5194_s26 + $0x1b0] sm:$0xf] %v388_v44 }
  0x5e   : > { %391 = vst [vmem:[%s5194_s26 + $0x1b4] sm:$0xf] %v390_v45  ;;  %v392_v46 = vld [vmem:[%s5190_s25 + $0x370] sm:$0xf]  ;;  %v394_v47 = vld [vmem:[%s5190_s25 + $0x378] sm:$0xf] }
  0x5f   : > { %v396_v48 = vld [vmem:[%s5190_s25 + $0x380] sm:$0xf]  ;;  %393 = vst [vmem:[%s5194_s26 + $0x1b8] sm:$0xf] %v392_v46  ;;  %395 = vst [vmem:[%s5194_s26 + $0x1bc] sm:$0xf] %v394_v47 }
  0x60   : > { %397 = vst [vmem:[%s5194_s26 + $0x1c0] sm:$0xf] %v396_v48  ;;  %v398_v49 = vld [vmem:[%s5190_s25 + $0x388] sm:$0xf]  ;;  %v400_v50 = vld [vmem:[%s5190_s25 + $0x390] sm:$0xf] }
  0x61   : > { %v402_v51 = vld [vmem:[%s5190_s25 + $0x398] sm:$0xf]  ;;  %399 = vst [vmem:[%s5194_s26 + $0x1c4] sm:$0xf] %v398_v49  ;;  %401 = vst [vmem:[%s5194_s26 + $0x1c8] sm:$0xf] %v400_v50 }
  0x62   : > { %403 = vst [vmem:[%s5194_s26 + $0x1cc] sm:$0xf] %v402_v51  ;;  %v404_v52 = vld [vmem:[%s5190_s25 + $0x3a0] sm:$0xf]  ;;  %v406_v53 = vld [vmem:[%s5190_s25 + $0x3a8] sm:$0xf] }
  0x63   : > { %v408_v54 = vld [vmem:[%s5190_s25 + $0x3b0] sm:$0xf]  ;;  %405 = vst [vmem:[%s5194_s26 + $0x1d0] sm:$0xf] %v404_v52  ;;  %407 = vst [vmem:[%s5194_s26 + $0x1d4] sm:$0xf] %v406_v53 }
  0x64   : > { %409 = vst [vmem:[%s5194_s26 + $0x1d8] sm:$0xf] %v408_v54  ;;  %v410_v55 = vld [vmem:[%s5190_s25 + $0x3b8] sm:$0xf]  ;;  %v412_v56 = vld [vmem:[%s5190_s25 + $0x3c0] sm:$0xf] }
  0x65   : > { %v414_v57 = vld [vmem:[%s5190_s25 + $0x3c8] sm:$0xf]  ;;  %411 = vst [vmem:[%s5194_s26 + $0x1dc] sm:$0xf] %v410_v55  ;;  %413 = vst [vmem:[%s5194_s26 + $0x1e0] sm:$0xf] %v412_v56 }
  0x66   : > { %415 = vst [vmem:[%s5194_s26 + $0x1e4] sm:$0xf] %v414_v57  ;;  %v416_v58 = vld [vmem:[%s5190_s25 + $0x3d0] sm:$0xf]  ;;  %v418_v59 = vld [vmem:[%s5190_s25 + $0x3d8] sm:$0xf] }
  0x67   : > { %v420_v60 = vld [vmem:[%s5190_s25 + $0x3e0] sm:$0xf]  ;;  %417 = vst [vmem:[%s5194_s26 + $0x1e8] sm:$0xf] %v416_v58  ;;  %419 = vst [vmem:[%s5194_s26 + $0x1ec] sm:$0xf] %v418_v59 }
  0x68   : > { %421 = vst [vmem:[%s5194_s26 + $0x1f0] sm:$0xf] %v420_v60  ;;  %v422_v61 = vld [vmem:[%s5190_s25 + $0x3e8] sm:$0xf]  ;;  %v424_v62 = vld [vmem:[%s5190_s25 + $0x3f0] sm:$0xf] }
  0x69   : > { %v426_v63 = vld [vmem:[%s5190_s25 + $0x3f8] sm:$0xf]  ;;  %423 = vst [vmem:[%s5194_s26 + $0x1f4] sm:$0xf] %v422_v61  ;;  %425 = vst [vmem:[%s5194_s26 + $0x1f8] sm:$0xf] %v424_v62 }
  0x6a   : > { %427 = vst [vmem:[%s5194_s26 + $0x1fc] sm:$0xf] %v426_v63  ;;  %v428_v0 = vld [vmem:[%s5190_s25 + $0x400] sm:$0xf]  ;;  %v430_v1 = vld [vmem:[%s5190_s25 + $0x408] sm:$0xf] }
  0x6b   : > { %v432_v2 = vld [vmem:[%s5190_s25 + $0x410] sm:$0xf]  ;;  %429 = vst [vmem:[%s5194_s26 + $0x200] sm:$0xf] %v428_v0  ;;  %431 = vst [vmem:[%s5194_s26 + $0x204] sm:$0xf] %v430_v1 }
  0x6c   : > { %433 = vst [vmem:[%s5194_s26 + $0x208] sm:$0xf] %v432_v2  ;;  %v434_v3 = vld [vmem:[%s5190_s25 + $0x418] sm:$0xf]  ;;  %v436_v4 = vld [vmem:[%s5190_s25 + $0x420] sm:$0xf] }
  0x6d   : > { %v438_v5 = vld [vmem:[%s5190_s25 + $0x428] sm:$0xf]  ;;  %435 = vst [vmem:[%s5194_s26 + $0x20c] sm:$0xf] %v434_v3  ;;  %437 = vst [vmem:[%s5194_s26 + $0x210] sm:$0xf] %v436_v4 }
  0x6e   : > { %439 = vst [vmem:[%s5194_s26 + $0x214] sm:$0xf] %v438_v5  ;;  %v440_v6 = vld [vmem:[%s5190_s25 + $0x430] sm:$0xf]  ;;  %v442_v7 = vld [vmem:[%s5190_s25 + $0x438] sm:$0xf] }
  0x6f   : > { %v444_v8 = vld [vmem:[%s5190_s25 + $0x440] sm:$0xf]  ;;  %441 = vst [vmem:[%s5194_s26 + $0x218] sm:$0xf] %v440_v6  ;;  %443 = vst [vmem:[%s5194_s26 + $0x21c] sm:$0xf] %v442_v7 }
  0x70   : > { %445 = vst [vmem:[%s5194_s26 + $0x220] sm:$0xf] %v444_v8  ;;  %v446_v9 = vld [vmem:[%s5190_s25 + $0x448] sm:$0xf]  ;;  %v448_v10 = vld [vmem:[%s5190_s25 + $0x450] sm:$0xf] }
  0x71   : > { %v450_v11 = vld [vmem:[%s5190_s25 + $0x458] sm:$0xf]  ;;  %447 = vst [vmem:[%s5194_s26 + $0x224] sm:$0xf] %v446_v9  ;;  %449 = vst [vmem:[%s5194_s26 + $0x228] sm:$0xf] %v448_v10 }
  0x72   : > { %451 = vst [vmem:[%s5194_s26 + $0x22c] sm:$0xf] %v450_v11  ;;  %v452_v12 = vld [vmem:[%s5190_s25 + $0x460] sm:$0xf]  ;;  %v454_v13 = vld [vmem:[%s5190_s25 + $0x468] sm:$0xf] }
  0x73   : > { %v456_v14 = vld [vmem:[%s5190_s25 + $0x470] sm:$0xf]  ;;  %453 = vst [vmem:[%s5194_s26 + $0x230] sm:$0xf] %v452_v12  ;;  %455 = vst [vmem:[%s5194_s26 + $0x234] sm:$0xf] %v454_v13 }
  0x74   : > { %457 = vst [vmem:[%s5194_s26 + $0x238] sm:$0xf] %v456_v14  ;;  %v458_v15 = vld [vmem:[%s5190_s25 + $0x478] sm:$0xf]  ;;  %v460_v16 = vld [vmem:[%s5190_s25 + $0x480] sm:$0xf] }
  0x75   : > { %v462_v17 = vld [vmem:[%s5190_s25 + $0x488] sm:$0xf]  ;;  %459 = vst [vmem:[%s5194_s26 + $0x23c] sm:$0xf] %v458_v15  ;;  %461 = vst [vmem:[%s5194_s26 + $0x240] sm:$0xf] %v460_v16 }
  0x76   : > { %463 = vst [vmem:[%s5194_s26 + $0x244] sm:$0xf] %v462_v17  ;;  %v464_v18 = vld [vmem:[%s5190_s25 + $0x490] sm:$0xf]  ;;  %v466_v19 = vld [vmem:[%s5190_s25 + $0x498] sm:$0xf] }
  0x77   : > { %v468_v20 = vld [vmem:[%s5190_s25 + $0x4a0] sm:$0xf]  ;;  %465 = vst [vmem:[%s5194_s26 + $0x248] sm:$0xf] %v464_v18  ;;  %467 = vst [vmem:[%s5194_s26 + $0x24c] sm:$0xf] %v466_v19 }
  0x78   : > { %469 = vst [vmem:[%s5194_s26 + $0x250] sm:$0xf] %v468_v20  ;;  %v470_v21 = vld [vmem:[%s5190_s25 + $0x4a8] sm:$0xf]  ;;  %v472_v22 = vld [vmem:[%s5190_s25 + $0x4b0] sm:$0xf] }
  0x79   : > { %v474_v23 = vld [vmem:[%s5190_s25 + $0x4b8] sm:$0xf]  ;;  %471 = vst [vmem:[%s5194_s26 + $0x254] sm:$0xf] %v470_v21  ;;  %473 = vst [vmem:[%s5194_s26 + $0x258] sm:$0xf] %v472_v22 }
  0x7a   : > { %475 = vst [vmem:[%s5194_s26 + $0x25c] sm:$0xf] %v474_v23  ;;  %v476_v24 = vld [vmem:[%s5190_s25 + $0x4c0] sm:$0xf]  ;;  %v478_v25 = vld [vmem:[%s5190_s25 + $0x4c8] sm:$0xf] }
  0x7b   : > { %v480_v26 = vld [vmem:[%s5190_s25 + $0x4d0] sm:$0xf]  ;;  %477 = vst [vmem:[%s5194_s26 + $0x260] sm:$0xf] %v476_v24  ;;  %479 = vst [vmem:[%s5194_s26 + $0x264] sm:$0xf] %v478_v25 }
  0x7c   : > { %481 = vst [vmem:[%s5194_s26 + $0x268] sm:$0xf] %v480_v26  ;;  %v482_v27 = vld [vmem:[%s5190_s25 + $0x4d8] sm:$0xf]  ;;  %v484_v28 = vld [vmem:[%s5190_s25 + $0x4e0] sm:$0xf] }
  0x7d   : > { %v486_v29 = vld [vmem:[%s5190_s25 + $0x4e8] sm:$0xf]  ;;  %483 = vst [vmem:[%s5194_s26 + $0x26c] sm:$0xf] %v482_v27  ;;  %485 = vst [vmem:[%s5194_s26 + $0x270] sm:$0xf] %v484_v28 }
  0x7e   : > { %487 = vst [vmem:[%s5194_s26 + $0x274] sm:$0xf] %v486_v29  ;;  %v488_v30 = vld [vmem:[%s5190_s25 + $0x4f0] sm:$0xf]  ;;  %v490_v31 = vld [vmem:[%s5190_s25 + $0x4f8] sm:$0xf] }
  0x7f   : > { %v492_v32 = vld [vmem:[%s5190_s25 + $0x500] sm:$0xf]  ;;  %489 = vst [vmem:[%s5194_s26 + $0x278] sm:$0xf] %v488_v30  ;;  %491 = vst [vmem:[%s5194_s26 + $0x27c] sm:$0xf] %v490_v31 }
  0x80   : > { %493 = vst [vmem:[%s5194_s26 + $0x280] sm:$0xf] %v492_v32  ;;  %v494_v33 = vld [vmem:[%s5190_s25 + $0x508] sm:$0xf]  ;;  %v496_v34 = vld [vmem:[%s5190_s25 + $0x510] sm:$0xf] }
  0x81   : > { %v498_v35 = vld [vmem:[%s5190_s25 + $0x518] sm:$0xf]  ;;  %495 = vst [vmem:[%s5194_s26 + $0x284] sm:$0xf] %v494_v33  ;;  %497 = vst [vmem:[%s5194_s26 + $0x288] sm:$0xf] %v496_v34 }
  0x82   : > { %499 = vst [vmem:[%s5194_s26 + $0x28c] sm:$0xf] %v498_v35  ;;  %v500_v36 = vld [vmem:[%s5190_s25 + $0x520] sm:$0xf]  ;;  %v502_v37 = vld [vmem:[%s5190_s25 + $0x528] sm:$0xf] }
  0x83   : > { %v504_v38 = vld [vmem:[%s5190_s25 + $0x530] sm:$0xf]  ;;  %501 = vst [vmem:[%s5194_s26 + $0x290] sm:$0xf] %v500_v36  ;;  %503 = vst [vmem:[%s5194_s26 + $0x294] sm:$0xf] %v502_v37 }
  0x84   : > { %505 = vst [vmem:[%s5194_s26 + $0x298] sm:$0xf] %v504_v38  ;;  %v506_v39 = vld [vmem:[%s5190_s25 + $0x538] sm:$0xf]  ;;  %v508_v40 = vld [vmem:[%s5190_s25 + $0x540] sm:$0xf] }
  0x85   : > { %v510_v41 = vld [vmem:[%s5190_s25 + $0x548] sm:$0xf]  ;;  %507 = vst [vmem:[%s5194_s26 + $0x29c] sm:$0xf] %v506_v39  ;;  %509 = vst [vmem:[%s5194_s26 + $0x2a0] sm:$0xf] %v508_v40 }
  0x86   : > { %511 = vst [vmem:[%s5194_s26 + $0x2a4] sm:$0xf] %v510_v41  ;;  %v512_v42 = vld [vmem:[%s5190_s25 + $0x550] sm:$0xf]  ;;  %v514_v43 = vld [vmem:[%s5190_s25 + $0x558] sm:$0xf] }
  0x87   : > { %v516_v44 = vld [vmem:[%s5190_s25 + $0x560] sm:$0xf]  ;;  %513 = vst [vmem:[%s5194_s26 + $0x2a8] sm:$0xf] %v512_v42  ;;  %515 = vst [vmem:[%s5194_s26 + $0x2ac] sm:$0xf] %v514_v43 }
  0x88   : > { %517 = vst [vmem:[%s5194_s26 + $0x2b0] sm:$0xf] %v516_v44  ;;  %v518_v45 = vld [vmem:[%s5190_s25 + $0x568] sm:$0xf]  ;;  %v520_v46 = vld [vmem:[%s5190_s25 + $0x570] sm:$0xf] }
  0x89   : > { %v522_v47 = vld [vmem:[%s5190_s25 + $0x578] sm:$0xf]  ;;  %519 = vst [vmem:[%s5194_s26 + $0x2b4] sm:$0xf] %v518_v45  ;;  %521 = vst [vmem:[%s5194_s26 + $0x2b8] sm:$0xf] %v520_v46 }
  0x8a   : > { %523 = vst [vmem:[%s5194_s26 + $0x2bc] sm:$0xf] %v522_v47  ;;  %v524_v48 = vld [vmem:[%s5190_s25 + $0x580] sm:$0xf]  ;;  %v526_v49 = vld [vmem:[%s5190_s25 + $0x588] sm:$0xf] }
  0x8b   : > { %v528_v50 = vld [vmem:[%s5190_s25 + $0x590] sm:$0xf]  ;;  %525 = vst [vmem:[%s5194_s26 + $0x2c0] sm:$0xf] %v524_v48  ;;  %527 = vst [vmem:[%s5194_s26 + $0x2c4] sm:$0xf] %v526_v49 }
  0x8c   : > { %529 = vst [vmem:[%s5194_s26 + $0x2c8] sm:$0xf] %v528_v50  ;;  %v530_v51 = vld [vmem:[%s5190_s25 + $0x598] sm:$0xf]  ;;  %v532_v52 = vld [vmem:[%s5190_s25 + $0x5a0] sm:$0xf] }
  0x8d   : > { %v534_v53 = vld [vmem:[%s5190_s25 + $0x5a8] sm:$0xf]  ;;  %531 = vst [vmem:[%s5194_s26 + $0x2cc] sm:$0xf] %v530_v51  ;;  %533 = vst [vmem:[%s5194_s26 + $0x2d0] sm:$0xf] %v532_v52 }
  0x8e   : > { %535 = vst [vmem:[%s5194_s26 + $0x2d4] sm:$0xf] %v534_v53  ;;  %v536_v54 = vld [vmem:[%s5190_s25 + $0x5b0] sm:$0xf]  ;;  %v538_v55 = vld [vmem:[%s5190_s25 + $0x5b8] sm:$0xf] }
  0x8f   : > { %v540_v56 = vld [vmem:[%s5190_s25 + $0x5c0] sm:$0xf]  ;;  %537 = vst [vmem:[%s5194_s26 + $0x2d8] sm:$0xf] %v536_v54  ;;  %539 = vst [vmem:[%s5194_s26 + $0x2dc] sm:$0xf] %v538_v55 }
  0x90   : > { %541 = vst [vmem:[%s5194_s26 + $0x2e0] sm:$0xf] %v540_v56  ;;  %v542_v57 = vld [vmem:[%s5190_s25 + $0x5c8] sm:$0xf]  ;;  %v544_v58 = vld [vmem:[%s5190_s25 + $0x5d0] sm:$0xf] }
  0x91   : > { %v546_v59 = vld [vmem:[%s5190_s25 + $0x5d8] sm:$0xf]  ;;  %543 = vst [vmem:[%s5194_s26 + $0x2e4] sm:$0xf] %v542_v57  ;;  %545 = vst [vmem:[%s5194_s26 + $0x2e8] sm:$0xf] %v544_v58 }
  0x92   : > { %547 = vst [vmem:[%s5194_s26 + $0x2ec] sm:$0xf] %v546_v59  ;;  %v548_v60 = vld [vmem:[%s5190_s25 + $0x5e0] sm:$0xf]  ;;  %v550_v61 = vld [vmem:[%s5190_s25 + $0x5e8] sm:$0xf] }
  0x93   : > { %v552_v62 = vld [vmem:[%s5190_s25 + $0x5f0] sm:$0xf]  ;;  %549 = vst [vmem:[%s5194_s26 + $0x2f0] sm:$0xf] %v548_v60  ;;  %551 = vst [vmem:[%s5194_s26 + $0x2f4] sm:$0xf] %v550_v61 }
  0x94   : > { %553 = vst [vmem:[%s5194_s26 + $0x2f8] sm:$0xf] %v552_v62  ;;  %v554_v63 = vld [vmem:[%s5190_s25 + $0x5f8] sm:$0xf]  ;;  %v556_v0 = vld [vmem:[%s5190_s25 + $0x600] sm:$0xf] }
  0x95   : > { %v558_v1 = vld [vmem:[%s5190_s25 + $0x608] sm:$0xf]  ;;  %555 = vst [vmem:[%s5194_s26 + $0x2fc] sm:$0xf] %v554_v63  ;;  %557 = vst [vmem:[%s5194_s26 + $0x300] sm:$0xf] %v556_v0 }
  0x96   : > { %559 = vst [vmem:[%s5194_s26 + $0x304] sm:$0xf] %v558_v1  ;;  %v560_v2 = vld [vmem:[%s5190_s25 + $0x610] sm:$0xf]  ;;  %v562_v3 = vld [vmem:[%s5190_s25 + $0x618] sm:$0xf] }
  0x97   : > { %v564_v4 = vld [vmem:[%s5190_s25 + $0x620] sm:$0xf]  ;;  %561 = vst [vmem:[%s5194_s26 + $0x308] sm:$0xf] %v560_v2  ;;  %563 = vst [vmem:[%s5194_s26 + $0x30c] sm:$0xf] %v562_v3 }
  0x98   : > { %565 = vst [vmem:[%s5194_s26 + $0x310] sm:$0xf] %v564_v4  ;;  %v566_v5 = vld [vmem:[%s5190_s25 + $0x628] sm:$0xf]  ;;  %v568_v6 = vld [vmem:[%s5190_s25 + $0x630] sm:$0xf] }
  0x99   : > { %v570_v7 = vld [vmem:[%s5190_s25 + $0x638] sm:$0xf]  ;;  %567 = vst [vmem:[%s5194_s26 + $0x314] sm:$0xf] %v566_v5  ;;  %569 = vst [vmem:[%s5194_s26 + $0x318] sm:$0xf] %v568_v6 }
  0x9a   : > { %571 = vst [vmem:[%s5194_s26 + $0x31c] sm:$0xf] %v570_v7  ;;  %v572_v8 = vld [vmem:[%s5190_s25 + $0x640] sm:$0xf]  ;;  %v574_v9 = vld [vmem:[%s5190_s25 + $0x648] sm:$0xf] }
  0x9b   : > { %v576_v10 = vld [vmem:[%s5190_s25 + $0x650] sm:$0xf]  ;;  %573 = vst [vmem:[%s5194_s26 + $0x320] sm:$0xf] %v572_v8  ;;  %575 = vst [vmem:[%s5194_s26 + $0x324] sm:$0xf] %v574_v9 }
  0x9c   : > { %577 = vst [vmem:[%s5194_s26 + $0x328] sm:$0xf] %v576_v10  ;;  %v578_v11 = vld [vmem:[%s5190_s25 + $0x658] sm:$0xf]  ;;  %v580_v12 = vld [vmem:[%s5190_s25 + $0x660] sm:$0xf] }
  0x9d   : > { %v582_v13 = vld [vmem:[%s5190_s25 + $0x668] sm:$0xf]  ;;  %579 = vst [vmem:[%s5194_s26 + $0x32c] sm:$0xf] %v578_v11  ;;  %581 = vst [vmem:[%s5194_s26 + $0x330] sm:$0xf] %v580_v12 }
  0x9e   : > { %583 = vst [vmem:[%s5194_s26 + $0x334] sm:$0xf] %v582_v13  ;;  %v584_v14 = vld [vmem:[%s5190_s25 + $0x670] sm:$0xf]  ;;  %v586_v15 = vld [vmem:[%s5190_s25 + $0x678] sm:$0xf] }
  0x9f   : > { %v588_v16 = vld [vmem:[%s5190_s25 + $0x680] sm:$0xf]  ;;  %585 = vst [vmem:[%s5194_s26 + $0x338] sm:$0xf] %v584_v14  ;;  %587 = vst [vmem:[%s5194_s26 + $0x33c] sm:$0xf] %v586_v15 }
  0xa0   : > { %589 = vst [vmem:[%s5194_s26 + $0x340] sm:$0xf] %v588_v16  ;;  %v590_v17 = vld [vmem:[%s5190_s25 + $0x688] sm:$0xf]  ;;  %v592_v18 = vld [vmem:[%s5190_s25 + $0x690] sm:$0xf] }
  0xa1   : > { %v594_v19 = vld [vmem:[%s5190_s25 + $0x698] sm:$0xf]  ;;  %591 = vst [vmem:[%s5194_s26 + $0x344] sm:$0xf] %v590_v17  ;;  %593 = vst [vmem:[%s5194_s26 + $0x348] sm:$0xf] %v592_v18 }
  0xa2   : > { %595 = vst [vmem:[%s5194_s26 + $0x34c] sm:$0xf] %v594_v19  ;;  %v596_v20 = vld [vmem:[%s5190_s25 + $0x6a0] sm:$0xf]  ;;  %v598_v21 = vld [vmem:[%s5190_s25 + $0x6a8] sm:$0xf] }
  0xa3   : > { %v600_v22 = vld [vmem:[%s5190_s25 + $0x6b0] sm:$0xf]  ;;  %597 = vst [vmem:[%s5194_s26 + $0x350] sm:$0xf] %v596_v20  ;;  %599 = vst [vmem:[%s5194_s26 + $0x354] sm:$0xf] %v598_v21 }
  0xa4   : > { %601 = vst [vmem:[%s5194_s26 + $0x358] sm:$0xf] %v600_v22  ;;  %v602_v23 = vld [vmem:[%s5190_s25 + $0x6b8] sm:$0xf]  ;;  %v604_v24 = vld [vmem:[%s5190_s25 + $0x6c0] sm:$0xf] }
  0xa5   : > { %v606_v25 = vld [vmem:[%s5190_s25 + $0x6c8] sm:$0xf]  ;;  %603 = vst [vmem:[%s5194_s26 + $0x35c] sm:$0xf] %v602_v23  ;;  %605 = vst [vmem:[%s5194_s26 + $0x360] sm:$0xf] %v604_v24 }
  0xa6   : > { %607 = vst [vmem:[%s5194_s26 + $0x364] sm:$0xf] %v606_v25  ;;  %v608_v26 = vld [vmem:[%s5190_s25 + $0x6d0] sm:$0xf]  ;;  %v610_v27 = vld [vmem:[%s5190_s25 + $0x6d8] sm:$0xf] }
  0xa7   : > { %v612_v28 = vld [vmem:[%s5190_s25 + $0x6e0] sm:$0xf]  ;;  %609 = vst [vmem:[%s5194_s26 + $0x368] sm:$0xf] %v608_v26  ;;  %611 = vst [vmem:[%s5194_s26 + $0x36c] sm:$0xf] %v610_v27 }
  0xa8   : > { %613 = vst [vmem:[%s5194_s26 + $0x370] sm:$0xf] %v612_v28  ;;  %v614_v29 = vld [vmem:[%s5190_s25 + $0x6e8] sm:$0xf]  ;;  %v616_v30 = vld [vmem:[%s5190_s25 + $0x6f0] sm:$0xf] }
  0xa9   : > { %v618_v31 = vld [vmem:[%s5190_s25 + $0x6f8] sm:$0xf]  ;;  %615 = vst [vmem:[%s5194_s26 + $0x374] sm:$0xf] %v614_v29  ;;  %617 = vst [vmem:[%s5194_s26 + $0x378] sm:$0xf] %v616_v30 }
  0xaa   : > { %619 = vst [vmem:[%s5194_s26 + $0x37c] sm:$0xf] %v618_v31  ;;  %v620_v32 = vld [vmem:[%s5190_s25 + $0x700] sm:$0xf]  ;;  %v622_v33 = vld [vmem:[%s5190_s25 + $0x708] sm:$0xf] }
  0xab   : > { %v624_v34 = vld [vmem:[%s5190_s25 + $0x710] sm:$0xf]  ;;  %621 = vst [vmem:[%s5194_s26 + $0x380] sm:$0xf] %v620_v32  ;;  %623 = vst [vmem:[%s5194_s26 + $0x384] sm:$0xf] %v622_v33 }
  0xac   : > { %625 = vst [vmem:[%s5194_s26 + $0x388] sm:$0xf] %v624_v34  ;;  %v626_v35 = vld [vmem:[%s5190_s25 + $0x718] sm:$0xf]  ;;  %v628_v36 = vld [vmem:[%s5190_s25 + $0x720] sm:$0xf] }
  0xad   : > { %v630_v37 = vld [vmem:[%s5190_s25 + $0x728] sm:$0xf]  ;;  %627 = vst [vmem:[%s5194_s26 + $0x38c] sm:$0xf] %v626_v35  ;;  %629 = vst [vmem:[%s5194_s26 + $0x390] sm:$0xf] %v628_v36 }
  0xae   : > { %631 = vst [vmem:[%s5194_s26 + $0x394] sm:$0xf] %v630_v37  ;;  %v632_v38 = vld [vmem:[%s5190_s25 + $0x730] sm:$0xf]  ;;  %v634_v39 = vld [vmem:[%s5190_s25 + $0x738] sm:$0xf] }
  0xaf   : > { %v636_v40 = vld [vmem:[%s5190_s25 + $0x740] sm:$0xf]  ;;  %633 = vst [vmem:[%s5194_s26 + $0x398] sm:$0xf] %v632_v38  ;;  %635 = vst [vmem:[%s5194_s26 + $0x39c] sm:$0xf] %v634_v39 }
  0xb0   : > { %637 = vst [vmem:[%s5194_s26 + $0x3a0] sm:$0xf] %v636_v40  ;;  %v638_v41 = vld [vmem:[%s5190_s25 + $0x748] sm:$0xf]  ;;  %v640_v42 = vld [vmem:[%s5190_s25 + $0x750] sm:$0xf] }
  0xb1   : > { %v642_v43 = vld [vmem:[%s5190_s25 + $0x758] sm:$0xf]  ;;  %639 = vst [vmem:[%s5194_s26 + $0x3a4] sm:$0xf] %v638_v41  ;;  %641 = vst [vmem:[%s5194_s26 + $0x3a8] sm:$0xf] %v640_v42 }
  0xb2   : > { %643 = vst [vmem:[%s5194_s26 + $0x3ac] sm:$0xf] %v642_v43  ;;  %v644_v44 = vld [vmem:[%s5190_s25 + $0x760] sm:$0xf]  ;;  %v646_v45 = vld [vmem:[%s5190_s25 + $0x768] sm:$0xf] }
  0xb3   : > { %v648_v46 = vld [vmem:[%s5190_s25 + $0x770] sm:$0xf]  ;;  %645 = vst [vmem:[%s5194_s26 + $0x3b0] sm:$0xf] %v644_v44  ;;  %647 = vst [vmem:[%s5194_s26 + $0x3b4] sm:$0xf] %v646_v45 }
  0xb4   : > { %649 = vst [vmem:[%s5194_s26 + $0x3b8] sm:$0xf] %v648_v46  ;;  %v650_v47 = vld [vmem:[%s5190_s25 + $0x778] sm:$0xf]  ;;  %v652_v48 = vld [vmem:[%s5190_s25 + $0x780] sm:$0xf] }
  0xb5   : > { %v654_v49 = vld [vmem:[%s5190_s25 + $0x788] sm:$0xf]  ;;  %651 = vst [vmem:[%s5194_s26 + $0x3bc] sm:$0xf] %v650_v47  ;;  %653 = vst [vmem:[%s5194_s26 + $0x3c0] sm:$0xf] %v652_v48 }
  0xb6   : > { %655 = vst [vmem:[%s5194_s26 + $0x3c4] sm:$0xf] %v654_v49  ;;  %v656_v50 = vld [vmem:[%s5190_s25 + $0x790] sm:$0xf]  ;;  %v658_v51 = vld [vmem:[%s5190_s25 + $0x798] sm:$0xf] }
  0xb7   : > { %v660_v52 = vld [vmem:[%s5190_s25 + $0x7a0] sm:$0xf]  ;;  %657 = vst [vmem:[%s5194_s26 + $0x3c8] sm:$0xf] %v656_v50  ;;  %659 = vst [vmem:[%s5194_s26 + $0x3cc] sm:$0xf] %v658_v51 }
  0xb8   : > { %661 = vst [vmem:[%s5194_s26 + $0x3d0] sm:$0xf] %v660_v52  ;;  %v662_v53 = vld [vmem:[%s5190_s25 + $0x7a8] sm:$0xf]  ;;  %v664_v54 = vld [vmem:[%s5190_s25 + $0x7b0] sm:$0xf] }
  0xb9   : > { %v666_v55 = vld [vmem:[%s5190_s25 + $0x7b8] sm:$0xf]  ;;  %663 = vst [vmem:[%s5194_s26 + $0x3d4] sm:$0xf] %v662_v53  ;;  %665 = vst [vmem:[%s5194_s26 + $0x3d8] sm:$0xf] %v664_v54 }
  0xba   : > { %667 = vst [vmem:[%s5194_s26 + $0x3dc] sm:$0xf] %v666_v55  ;;  %v668_v56 = vld [vmem:[%s5190_s25 + $0x7c0] sm:$0xf]  ;;  %v670_v57 = vld [vmem:[%s5190_s25 + $0x7c8] sm:$0xf] }
  0xbb   : > { %v672_v58 = vld [vmem:[%s5190_s25 + $0x7d0] sm:$0xf]  ;;  %669 = vst [vmem:[%s5194_s26 + $0x3e0] sm:$0xf] %v668_v56  ;;  %671 = vst [vmem:[%s5194_s26 + $0x3e4] sm:$0xf] %v670_v57 }
  0xbc   : > { %673 = vst [vmem:[%s5194_s26 + $0x3e8] sm:$0xf] %v672_v58  ;;  %v674_v59 = vld [vmem:[%s5190_s25 + $0x7d8] sm:$0xf]  ;;  %v676_v60 = vld [vmem:[%s5190_s25 + $0x7e0] sm:$0xf] }
  0xbd   : > { %v678_v61 = vld [vmem:[%s5190_s25 + $0x7e8] sm:$0xf]  ;;  %675 = vst [vmem:[%s5194_s26 + $0x3ec] sm:$0xf] %v674_v59  ;;  %677 = vst [vmem:[%s5194_s26 + $0x3f0] sm:$0xf] %v676_v60 }
  0xbe   : > { %679 = vst [vmem:[%s5194_s26 + $0x3f4] sm:$0xf] %v678_v61  ;;  %v680_v62 = vld [vmem:[%s5190_s25 + $0x7f0] sm:$0xf]  ;;  %v682_v63 = vld [vmem:[%s5190_s25 + $0x7f8] sm:$0xf] }
  0xbf   : > { %681 = vst [vmem:[%s5194_s26 + $0x3f8] sm:$0xf] %v680_v62  ;;  %683 = vst [vmem:[%s5194_s26 + $0x3fc] sm:$0xf] %v682_v63 }
  0xc0 PF: > { %p4144_p8 = scmp.ge.s32.totalorder %s5125_s13, 1  ;;  %p1217_p9 = scmp.lt.s32.totalorder %s5125_s13, 3 }
  0xc2   : > { %p1218_p10 = pnand %p4144_p8, %p1217_p9 }
  0xc3   : > { %s1224_s27 = sand.u32 (!%p1218_p10), 1, %s5109_s9   ;;  %v5712_v0 = vld [vmem:[%s6442_s0] sm:$0xff] (!%p1218_p10)  ;;  %v5722_v2 = vld [vmem:[%s6442_s0 + $0x8] sm:$0xff] (!%p1218_p10) }
  0xc4   : > { %1221 = sbr.rel (%p1218_p10) target bundleno = 710 (0x2c6), region = 65  ;;  %v5717_v1 = vld [vmem:[%s6442_s0 + $0x40] sm:$0xff] (!%p1218_p10)  ;;  %s4145_s6 = sshll.u32 (!%p1218_p10), %s1224_s27, 10  ;;  %v5731_v4 = vld [vmem:[%s6442_s0 + $0x48] sm:$0xff] (!%p1218_p10) }
  0xc5   : > { %v4148_v3 = vcombine.high (!%p1218_p10), %v5712_v0, %v5717_v1  ;;  %v4150_v5 = vcombine.high (!%p1218_p10), %v5722_v2, %v5731_v4  ;;  %s5735_s15 = scalar_lea.vmem (!%p1218_p10), [#allocation3], %s4145_s6  ;;  %v1321_v35 = vld [vmem:[%s6442_s0 + $0x80] sm:$0xff] (!%p1218_p10)  ;;  %v1322_v38 = vld [vmem:[%s6442_s0 + $0x88] sm:$0xff] (!%p1218_p10)  ;;  %v4147_v42 = vcombine.low (!%p1218_p10), %v5712_v0, %v5717_v1  ;;  %v4149_v43 = vcombine.low (!%p1218_p10), %v5722_v2, %v5731_v4 }
  0xc6   : > { %v4959_v6 = vld [vmem:[%s5735_s15 + $0x40] sm:$0xff] (!%p1218_p10)   ;;  %v4963_v10 = vld [vmem:[%s5735_s15 + $0x48] sm:$0xff] (!%p1218_p10)   ;;  %v4967_v14 = vld [vmem:[%s5735_s15 + $0x50] sm:$0xff] (!%p1218_p10)  }
  0xc7   : > { %3129 = vmatprep.mubr.bf16.mxu0 (!%p1218_p10), %v4148_v3  ;;  %v4960_v7 = vld [vmem:[%s5735_s15 + $0xc0] sm:$0xff] (!%p1218_p10)   ;;  %3226 = vmatprep.mubr.bf16.mxu1 (!%p1218_p10), %v4150_v5  ;;  %v4964_v11 = vld [vmem:[%s5735_s15 + $0xc8] sm:$0xff] (!%p1218_p10)   ;;  %v4968_v15 = vld [vmem:[%s5735_s15 + $0xd0] sm:$0xff] (!%p1218_p10)  }
  0xc8   : > { %4407 = vmatprep.subr.bf16.mxu0 (!%p1218_p10), %v4959_v6  ;;  %v4961_v8 = vld [vmem:[%s5735_s15] sm:$0xff] (!%p1218_p10)   ;;  %4471 = vmatprep.subr.bf16.mxu1 (!%p1218_p10), %v4960_v7  ;;  %v4965_v12 = vld [vmem:[%s5735_s15 + $0x8] sm:$0xff] (!%p1218_p10)   ;;  %v4969_v16 = vld [vmem:[%s5735_s15 + $0x10] sm:$0xff] (!%p1218_p10)  }
  0xc9   : > { %v4962_v9 = vld [vmem:[%s5735_s15 + $0x80] sm:$0xff] (!%p1218_p10)   ;;  %4408 = vmatpush3.bf16.msra.mxu0 (!%p1218_p10), %v4961_v8  ;;  %v4966_v13 = vld [vmem:[%s5735_s15 + $0x88] sm:$0xff] (!%p1218_p10)   ;;  %v4970_v17 = vld [vmem:[%s5735_s15 + $0x90] sm:$0xff] (!%p1218_p10)  }
  0xca   : > { %4472 = vmatpush3.bf16.msra.mxu1 (!%p1218_p10), %v4962_v9  ;;  %4409 = vmatprep.subr.bf16.mxu0 (!%p1218_p10), %v4963_v10  ;;  %v4971_v18 = vld [vmem:[%s5735_s15 + $0x58] sm:$0xff] (!%p1218_p10)   ;;  %v4975_v22 = vld [vmem:[%s5735_s15 + $0x60] sm:$0xff] (!%p1218_p10)   ;;  %v4979_v26 = vld [vmem:[%s5735_s15 + $0x68] sm:$0xff] (!%p1218_p10)  }
  0xcb   : > { %4473 = vmatprep.subr.bf16.mxu1 %v4964_v11  ;;  %v4972_v19 = vld [vmem:[%s5735_s15 + $0xd8] sm:$0xff]   ;;  %v4976_v23 = vld [vmem:[%s5735_s15 + $0xe0] sm:$0xff]   ;;  %v4980_v27 = vld [vmem:[%s5735_s15 + $0xe8] sm:$0xff]   ;;  %s4404_s9 = sshll.u32 (%p5177_p6), %s5117_s11, 3 }
  0xcc   : > { %v4973_v20 = vld [vmem:[%s5735_s15 + $0x18] sm:$0xff]   ;;  %v4977_v24 = vld [vmem:[%s5735_s15 + $0x20] sm:$0xff]   ;;  %v4981_v28 = vld [vmem:[%s5735_s15 + $0x28] sm:$0xff]   ;;  %s3951_s3 = scalar_lea.vmem (%p5177_p6), %s6444_s2, %s4404_s9 }
  0xcd   : > { %4410 = vmatpush3.bf16.msra.mxu0 %v4965_v12  ;;  %v4974_v21 = vld [vmem:[%s5735_s15 + $0x98] sm:$0xff]   ;;  %v4978_v25 = vld [vmem:[%s5735_s15 + $0xa0] sm:$0xff]   ;;  %v4982_v29 = vld [vmem:[%s5735_s15 + $0xa8] sm:$0xff]  }
  0xce   : > { %4474 = vmatpush3.bf16.msra.mxu1 %v4966_v13  ;;  %4411 = vmatprep.subr.bf16.mxu0 %v4967_v14  ;;  %v4983_v30 = vld [vmem:[%s5735_s15 + $0x70] sm:$0xff]   ;;  %v4987_v34 = vld [vmem:[%s5735_s15 + $0x78] sm:$0xff]   ;;  %v1329_v36 = vld [vmem:[%s6442_s0 + $0xc0] sm:$0xff] }
  0xcf   : > { %4475 = vmatprep.subr.bf16.mxu1 %v4968_v15  ;;  %v4984_v31 = vld [vmem:[%s5735_s15 + $0xf0] sm:$0xff]   ;;  %v4988_v37 = vld [vmem:[%s5735_s15 + $0xf8] sm:$0xff]   ;;  %v1330_v39 = vld [vmem:[%s6442_s0 + $0xc8] sm:$0xff]  ;;  %v4164_v46 = vcombine.high %v1321_v35, %v1329_v36  ;;  %v4163_v54 = vcombine.low %v1321_v35, %v1329_v36 }
  0xd0   : > { %v4985_v32 = vld [vmem:[%s5735_s15 + $0x30] sm:$0xff]   ;;  %v4989_v40 = vld [vmem:[%s5735_s15 + $0x38] sm:$0xff]   ;;  %v4991_v44 = vld [vmem:[%s5735_s15 + $0x140] sm:$0xff]   ;;  %v4166_v48 = vcombine.high %v1322_v38, %v1330_v39  ;;  %v4165_v56 = vcombine.low %v1322_v38, %v1330_v39 }
  0xd1   : > { %4412 = vmatpush3.bf16.msra.mxu0 %v4969_v16  ;;  %v4986_v33 = vld [vmem:[%s5735_s15 + $0xb0] sm:$0xff]   ;;  %v4990_v41 = vld [vmem:[%s5735_s15 + $0xb8] sm:$0xff]   ;;  %v4992_v45 = vld [vmem:[%s5735_s15 + $0x100] sm:$0xff]  }
  0xd2   : > { %4476 = vmatpush3.bf16.msra.mxu1 %v4970_v17  ;;  %4413 = vmatprep.subr.bf16.mxu0 %v4971_v18  ;;  %v4993_v47 = vld [vmem:[%s5735_s15 + $0x1c0] sm:$0xff]   ;;  %v4995_v50 = vld [vmem:[%s5735_s15 + $0x148] sm:$0xff]   ;;  %v4999_v62 = vld [vmem:[%s5735_s15 + $0x150] sm:$0xff]  }
  0xd3   : > { %4477 = vmatprep.subr.bf16.mxu1 %v4972_v19  ;;  %v4994_v49 = vld [vmem:[%s5735_s15 + $0x180] sm:$0xff]   ;;  %v4996_v52 = vld [vmem:[%s5735_s15 + $0x108] sm:$0xff]   ;;  %v5000_v63 = vld [vmem:[%s5735_s15 + $0x110] sm:$0xff]  }
  0xd4   : > { %v1337_v51 = vld [vmem:[%s6442_s0 + $0x100] sm:$0xff]  ;;  %v4997_v53 = vld [vmem:[%s5735_s15 + $0x1c8] sm:$0xff]   ;;  %v5001_v0 = vld [vmem:[%s5735_s15 + $0x1d0] sm:$0xff]  }
  0xd5   : > { %4414 = vmatpush3.bf16.msra.mxu0 %v4973_v20  ;;  %v4998_v55 = vld [vmem:[%s5735_s15 + $0x188] sm:$0xff]   ;;  %v1345_v57 = vld [vmem:[%s6442_s0 + $0x140] sm:$0xff]  ;;  %v5002_v1 = vld [vmem:[%s5735_s15 + $0x190] sm:$0xff]  }
  0xd6   : > { %4478 = vmatpush3.bf16.msra.mxu1 %v4974_v21  ;;  %4415 = vmatprep.subr.bf16.mxu0 %v4975_v22  ;;  %v1338_v58 = vld [vmem:[%s6442_s0 + $0x108] sm:$0xff]  ;;  %v4180_v60 = vcombine.high %v1337_v51, %v1345_v57  ;;  %v1353_v2 = vld [vmem:[%s6442_s0 + $0x180] sm:$0xff]  ;;  %v4179_v6 = vcombine.low %v1337_v51, %v1345_v57  ;;  %v5003_v7 = vld [vmem:[%s5735_s15 + $0x158] sm:$0xff]  }
  0xd7   : > { %4479 = vmatprep.subr.bf16.mxu1 %v4976_v23  ;;  %v1346_v59 = vld [vmem:[%s6442_s0 + $0x148] sm:$0xff]  ;;  %v1361_v3 = vld [vmem:[%s6442_s0 + $0x1c0] sm:$0xff]  ;;  %v5004_v10 = vld [vmem:[%s5735_s15 + $0x118] sm:$0xff]  }
  0xd8   : > { %v4182_v61 = vcombine.high %v1338_v58, %v1346_v59  ;;  %v1354_v4 = vld [vmem:[%s6442_s0 + $0x188] sm:$0xff]  ;;  %v4181_v8 = vcombine.low %v1338_v58, %v1346_v59  ;;  %v4196_v9 = vcombine.high %v1353_v2, %v1361_v3  ;;  %v5005_v12 = vld [vmem:[%s5735_s15 + $0x1d8] sm:$0xff]   ;;  %v1369_v14 = vld [vmem:[%s6442_s0 + $0x200] sm:$0xff]  ;;  %v4195_v21 = vcombine.low %v1353_v2, %v1361_v3 }
  0xd9   : > { %4416 = vmatpush3.bf16.msra.mxu0 %v4977_v24  ;;  %v1362_v5 = vld [vmem:[%s6442_s0 + $0x1c8] sm:$0xff]  ;;  %v5006_v13 = vld [vmem:[%s5735_s15 + $0x198] sm:$0xff]   ;;  %v1377_v15 = vld [vmem:[%s6442_s0 + $0x240] sm:$0xff] }
  0xda   : > { %4480 = vmatpush3.bf16.msra.mxu1 %v4978_v25  ;;  %4417 = vmatprep.subr.bf16.mxu0 %v4979_v26  ;;  %v4198_v11 = vcombine.high %v1354_v4, %v1362_v5  ;;  %v1370_v16 = vld [vmem:[%s6442_s0 + $0x208] sm:$0xff]  ;;  %v5007_v18 = vld [vmem:[%s5735_s15 + $0x160] sm:$0xff]   ;;  %v4197_v23 = vcombine.low %v1354_v4, %v1362_v5  ;;  %v4212_v24 = vcombine.high %v1369_v14, %v1377_v15  ;;  %v5015_v35 = vld [vmem:[%s5735_s15 + $0x170] sm:$0xff]  }
  0xdb   : > { %4481 = vmatprep.subr.bf16.mxu1 %v4980_v27  ;;  %v1378_v17 = vld [vmem:[%s6442_s0 + $0x248] sm:$0xff]  ;;  %v5008_v19 = vld [vmem:[%s5735_s15 + $0x120] sm:$0xff]   ;;  %v5016_v38 = vld [vmem:[%s5735_s15 + $0x130] sm:$0xff]  }
  0xdc   : > { %v5009_v20 = vld [vmem:[%s5735_s15 + $0x1e0] sm:$0xff]   ;;  %v4214_v25 = vcombine.high %v1370_v16, %v1378_v17  ;;  %v5011_v26 = vld [vmem:[%s5735_s15 + $0x168] sm:$0xff]   ;;  %v4213_v36 = vcombine.low %v1370_v16, %v1378_v17  ;;  %v1308_v2 = vld [vmem:[%s6442_s0 + $0x18] sm:$0xff] }
  0xdd   : > { %4418 = vmatpush3.bf16.msra.mxu0 %v4981_v28  ;;  %v5010_v22 = vld [vmem:[%s5735_s15 + $0x1a0] sm:$0xff]   ;;  %v5012_v27 = vld [vmem:[%s5735_s15 + $0x128] sm:$0xff]   ;;  %v1316_v3 = vld [vmem:[%s6442_s0 + $0x58] sm:$0xff] }
  0xde   : > { %4482 = vmatpush3.bf16.msra.mxu1 %v4982_v29  ;;  %4419 = vmatprep.subr.bf16.mxu0 %v4983_v30  ;;  %v5013_v28 = vld [vmem:[%s5735_s15 + $0x1e8] sm:$0xff]   ;;  %v1385_v30 = vld [vmem:[%s6442_s0 + $0x280] sm:$0xff] }
  0xdf   : > { %4483 = vmatprep.subr.bf16.mxu1 %v4984_v31  ;;  %v5014_v29 = vld [vmem:[%s5735_s15 + $0x1a8] sm:$0xff]   ;;  %v1393_v31 = vld [vmem:[%s6442_s0 + $0x2c0] sm:$0xff] }
  0xe0   : > { %v1425_v57 = vld [vmem:[%s6442_s0 + $0x3c0] sm:$0xff]  ;;  %v1418_v58 = vld [vmem:[%s6442_s0 + $0x388] sm:$0xff] }
  0xe1   : > { %4420 = vmatpush3.bf16.msra.mxu0 %v4985_v32  ;;  %v1386_v32 = vld [vmem:[%s6442_s0 + $0x288] sm:$0xff] }
  0xe2   : > { %4484 = vmatpush3.bf16.msra.mxu1 %v4986_v33  ;;  %4421 = vmatprep.subr.bf16.mxu0 %v4987_v34  ;;  %v1394_v33 = vld [vmem:[%s6442_s0 + $0x2c8] sm:$0xff]  ;;  %v4211_v34 = vcombine.low %v1369_v14, %v1377_v15  ;;  %v5024_v14 = vld [vmem:[%s5735_s15 + $0x200] sm:$0xff]  }
  0xe3   : > { %4485 = vmatprep.subr.bf16.mxu1 %v4988_v37  ;;  %v4228_v37 = vcombine.high %v1385_v30, %v1393_v31  ;;  %v4230_v39 = vcombine.high %v1386_v32, %v1394_v33  ;;  %v4229_v51 = vcombine.low %v1386_v32, %v1394_v33  ;;  %v1426_v59 = vld [vmem:[%s6442_s0 + $0x3c8] sm:$0xff]  ;;  %v5026_v15 = vld [vmem:[%s5735_s15 + $0x280] sm:$0xff]   ;;  %v5034_v33 = vld [vmem:[%s5735_s15 + $0x290] sm:$0xff]  }
  0xe4   : > { %v4261_v5 = vcombine.low %v1418_v58, %v1426_v59 }
  0xe5   : > { %4422 = vmatpush3.bf16.msra.mxu0 %v4989_v40  ;;  %v5017_v40 = vld [vmem:[%s5735_s15 + $0x1f0] sm:$0xff]  }
  0xe6   : > { %4486 = vmatpush3.bf16.msra.mxu1 %v4990_v41  ;;  %4535 = vmatprep.subr.bf16.mxu0 %v4991_v44  ;;  %v5018_v41 = vld [vmem:[%s5735_s15 + $0x1b0] sm:$0xff]   ;;  %v1402_v44 = vld [vmem:[%s6442_s0 + $0x308] sm:$0xff] }
  0xe7   : > { %4599 = vmatprep.subr.bf16.mxu1 %v4993_v47  ;;  %v5020_v47 = vld [vmem:[%s5735_s15 + $0x138] sm:$0xff]  }
  0xe8   : > { %3130 = vmatmul.mubr.bf16.vlgmr.msra.gmra.mrb[0].mxu0 %v4147_v42  ;;  %v1401_v42 = vld [vmem:[%s6442_s0 + $0x300] sm:$0xff] }
  0xe9   : > { %3227 = vmatmul.mubr.bf16.vlgmr.msra.gmra.mrb[0].mxu1 %v4149_v43  ;;  %4536 = vmatpush3.bf16.msra.mxu0 %v4992_v45  ;;  %v1409_v43 = vld [vmem:[%s6442_s0 + $0x340] sm:$0xff]  ;;  %v1410_v45 = vld [vmem:[%s6442_s0 + $0x348] sm:$0xff] }
  0xea   : > { %3137 = vmatprep.mubr.bf16.mxu0 %v4164_v46  ;;  %4600 = vmatpush3.bf16.msra.mxu1 %v4994_v49  ;;  %v5019_v46 = vld [vmem:[%s5735_s15 + $0x178] sm:$0xff]   ;;  %v4227_v49 = vcombine.low %v1385_v30, %v1393_v31  ;;  %v5032_v31 = vld [vmem:[%s5735_s15 + $0x210] sm:$0xff]  }
  0xeb   : > { %3234 = vmatprep.mubr.bf16.mxu1 %v4166_v48  ;;  %4537 = vmatprep.subr.bf16.mxu0 %v4995_v50  ;;  %v5021_v48 = vld [vmem:[%s5735_s15 + $0x1f8] sm:$0xff]  }
  0xec   : > { %4601 = vmatprep.subr.bf16.mxu1 %v4997_v53  ;;  %v5022_v50 = vld [vmem:[%s5735_s15 + $0x1b8] sm:$0xff]   ;;  %v4246_v53 = vcombine.high %v1402_v44, %v1410_v45 }
  0xed   : > { %4538 = vmatpush3.bf16.msra.mxu0 %v4996_v52  ;;  %v4244_v52 = vcombine.high %v1401_v42, %v1409_v43 }
  0xee   : > { %4602 = vmatpush3.bf16.msra.mxu1 %v4998_v55  ;;  %4539 = vmatprep.subr.bf16.mxu0 %v4999_v62  ;;  %v5025_v55 = vld [vmem:[%s5735_s15 + $0x2c0] sm:$0xff]  }
  0xef   : > { %4603 = vmatprep.subr.bf16.mxu1 %v5001_v0  ;;  %v1307_v0 = vld [vmem:[%s6442_s0 + $0x10] sm:$0xff] }
  0xf0   : > { %3138 = vmatmul.mubr.bf16.gmra.mrb[4].mxu0 %v4163_v54  ;;  %v5023_v54 = vld [vmem:[%s5735_s15 + $0x240] sm:$0xff]  }
  0xf1   : > { %3235 = vmatmul.mubr.bf16.gmra.mrb[4].mxu1 %v4165_v56  ;;  %3145 = vmatprep.mubr.bf16.mxu0 %v4180_v60  ;;  %v1417_v56 = vld [vmem:[%s6442_s0 + $0x380] sm:$0xff]  ;;  %v4243_v60 = vcombine.low %v1401_v42, %v1409_v43 }
  0xf2   : > { %3242 = vmatprep.mubr.bf16.mxu1 %v4182_v61  ;;  %4540 = vmatpush3.bf16.msra.mxu0 %v5000_v63  ;;  %v4245_v61 = vcombine.low %v1402_v44, %v1410_v45  ;;  %v4260_v62 = vcombine.high %v1417_v56, %v1425_v57  ;;  %v4262_v63 = vcombine.high %v1418_v58, %v1426_v59  ;;  %v5039_v42 = vld [vmem:[%s5735_s15 + $0x260] sm:$0xff]   ;;  %v5047_v58 = vld [vmem:[%s5735_s15 + $0x270] sm:$0xff]  }
  0xf3   : > { %4604 = vmatpush3.bf16.msra.mxu1 %v5002_v1  ;;  %4541 = vmatprep.subr.bf16.mxu0 %v5003_v7  ;;  %v1315_v1 = vld [vmem:[%s6442_s0 + $0x50] sm:$0xff]  ;;  %v4259_v4 = vcombine.low %v1417_v56, %v1425_v57  ;;  %v4154_v7 = vcombine.high %v1308_v2, %v1316_v3  ;;  %v5041_v44 = vld [vmem:[%s5735_s15 + $0x2e0] sm:$0xff]   ;;  %v5044_v56 = vld [vmem:[%s5735_s15 + $0x228] sm:$0xff]  }
  0xf4   : > { %4605 = vmatprep.subr.bf16.mxu1 %v5005_v12  ;;  %v1332_v12 = vld [vmem:[%s6442_s0 + $0xd8] sm:$0xff]  ;;  %v5046_v57 = vld [vmem:[%s5735_s15 + $0x2a8] sm:$0xff]  }
  0xf6   : > { %4542 = vmatpush3.bf16.msra.mxu0 %v5004_v10  ;;  %v1324_v10 = vld [vmem:[%s6442_s0 + $0x98] sm:$0xff] }
  0xf7   : > { %4606 = vmatpush3.bf16.msra.mxu1 %v5006_v13  ;;  %4543 = vmatprep.subr.bf16.mxu0 %v5007_v18  ;;  %v4153_v13 = vcombine.low %v1308_v2, %v1316_v3  ;;  %v4170_v17 = vcombine.high %v1324_v10, %v1332_v12  ;;  %v5027_v18 = vld [vmem:[%s5735_s15 + $0x248] sm:$0xff]   ;;  %v5051_v2 = vld [vmem:[%s5735_s15 + $0x278] sm:$0xff]   ;;  %v1387_v3 = vld [vmem:[%s6442_s0 + $0x290] sm:$0xff] }
  0xf8   : > { %3146 = vmatmul.mubr.bf16.gmra.mrb[8].mxu0 %v4179_v6  ;;  %4607 = vmatprep.subr.bf16.mxu1 %v5009_v20  ;;  %v4152_v6 = vcombine.high %v1307_v0, %v1315_v1  ;;  %v5029_v20 = vld [vmem:[%s5735_s15 + $0x2c8] sm:$0xff]  }
  0xf9   : > { %3243 = vmatmul.mubr.bf16.gmra.mrb[8].mxu1 %v4181_v8  ;;  %3153 = vmatprep.mubr.bf16.mxu0 %v4196_v9  ;;  %v1323_v8 = vld [vmem:[%s6442_s0 + $0x90] sm:$0xff] }
  0xfa   : > { %3250 = vmatprep.mubr.bf16.mxu1 %v4198_v11  ;;  %4544 = vmatpush3.bf16.msra.mxu0 %v5008_v19  ;;  %v1331_v9 = vld [vmem:[%s6442_s0 + $0xd0] sm:$0xff]  ;;  %v4151_v11 = vcombine.low %v1307_v0, %v1315_v1  ;;  %v5028_v19 = vld [vmem:[%s5735_s15 + $0x208] sm:$0xff]  }
  0xfb   : > { %4608 = vmatpush3.bf16.msra.mxu1 %v5010_v22  ;;  %4545 = vmatprep.subr.bf16.mxu0 %v5011_v26  ;;  %v4168_v16 = vcombine.high %v1323_v8, %v1331_v9  ;;  %v1339_v22 = vld [vmem:[%s6442_s0 + $0x110] sm:$0xff] }
  0xfc   : > { %4609 = vmatprep.subr.bf16.mxu1 %v5013_v28  ;;  %v5031_v26 = vld [vmem:[%s5735_s15 + $0x250] sm:$0xff]   ;;  %v4167_v28 = vcombine.low %v1323_v8, %v1331_v9  ;;  %v5052_v8 = vld [vmem:[%s5735_s15 + $0x238] sm:$0xff]  }
  0xfd   : > { %v5050_v1 = vld [vmem:[%s5735_s15 + $0x2b0] sm:$0xff]   ;;  %v5054_v9 = vld [vmem:[%s5735_s15 + $0x2b8] sm:$0xff]  }
  0xfe   : > { %4546 = vmatpush3.bf16.msra.mxu0 %v5012_v27  ;;  %v5033_v27 = vld [vmem:[%s5735_s15 + $0x2d0] sm:$0xff]  }
  0xff   : > { %4610 = vmatpush3.bf16.msra.mxu1 %v5014_v29  ;;  %4547 = vmatprep.subr.bf16.mxu0 %v5015_v35  ;;  %v4169_v29 = vcombine.low %v1324_v10, %v1332_v12  ;;  %v1355_v35 = vld [vmem:[%s6442_s0 + $0x190] sm:$0xff]  ;;  %v5055_v10 = vld [vmem:[%s5735_s15 + $0x340] sm:$0xff]  }
 0x100   : > { %3154 = vmatmul.mubr.bf16.gmra.mrb[12].mxu0 %v4195_v21  ;;  %4611 = vmatprep.subr.bf16.mxu1 %v5017_v40  ;;  %v5030_v21 = vld [vmem:[%s5735_s15 + $0x288] sm:$0xff]   ;;  %v5036_v40 = vld [vmem:[%s5735_s15 + $0x218] sm:$0xff]   ;;  %v5057_v12 = vld [vmem:[%s5735_s15 + $0x3c0] sm:$0xff]  }
 0x101   : > { %3251 = vmatmul.mubr.bf16.gmra.mrb[12].mxu1 %v4197_v23  ;;  %3161 = vmatprep.mubr.bf16.mxu0 %v4212_v24  ;;  %v1347_v23 = vld [vmem:[%s6442_s0 + $0x150] sm:$0xff]  ;;  %v1340_v24 = vld [vmem:[%s6442_s0 + $0x118] sm:$0xff] }
 0x102   : > { %3258 = vmatprep.mubr.bf16.mxu1 %v4214_v25  ;;  %4548 = vmatpush3.bf16.msra.mxu0 %v5016_v38  ;;  %v1348_v25 = vld [vmem:[%s6442_s0 + $0x158] sm:$0xff]  ;;  %v4184_v30 = vcombine.high %v1339_v22, %v1347_v23  ;;  %v4183_v43 = vcombine.low %v1339_v22, %v1347_v23 }
 0x103   : > { %4612 = vmatpush3.bf16.msra.mxu1 %v5018_v41  ;;  %4549 = vmatprep.subr.bf16.mxu0 %v5019_v46  ;;  %v4186_v32 = vcombine.high %v1340_v24, %v1348_v25  ;;  %v1356_v38 = vld [vmem:[%s6442_s0 + $0x198] sm:$0xff]  ;;  %v4185_v45 = vcombine.low %v1340_v24, %v1348_v25  ;;  %v1419_v24 = vld [vmem:[%s6442_s0 + $0x390] sm:$0xff] }
 0x104   : > { %4613 = vmatprep.subr.bf16.mxu1 %v5021_v48  ;;  %v5038_v41 = vld [vmem:[%s5735_s15 + $0x298] sm:$0xff]   ;;  %v5040_v48 = vld [vmem:[%s5735_s15 + $0x220] sm:$0xff]   ;;  %v1427_v25 = vld [vmem:[%s6442_s0 + $0x3d0] sm:$0xff] }
 0x106   : > { %4550 = vmatpush3.bf16.msra.mxu0 %v5020_v47 }
 0x107   : > { %4614 = vmatpush3.bf16.msra.mxu1 %v5022_v50  ;;  %4663 = vmatprep.subr.bf16.mxu0 %v5023_v54  ;;  %v5043_v50 = vld [vmem:[%s5735_s15 + $0x268] sm:$0xff]   ;;  %v1372_v54 = vld [vmem:[%s6442_s0 + $0x218] sm:$0xff] }
 0x108   : > { %3162 = vmatmul.mubr.bf16.gmra.mrb[16].mxu0 %v4211_v34  ;;  %4727 = vmatprep.subr.bf16.mxu1 %v5025_v55  ;;  %v5035_v34 = vld [vmem:[%s5735_s15 + $0x258] sm:$0xff]  }
 0x109   : > { %3259 = vmatmul.mubr.bf16.gmra.mrb[16].mxu1 %v4213_v36  ;;  %3169 = vmatprep.mubr.bf16.mxu0 %v4228_v37  ;;  %v1363_v36 = vld [vmem:[%s6442_s0 + $0x1d0] sm:$0xff]  ;;  %v5037_v37 = vld [vmem:[%s5735_s15 + $0x2d8] sm:$0xff]  }
 0x10a   : > { %3266 = vmatprep.mubr.bf16.mxu1 %v4230_v39  ;;  %v1364_v39 = vld [vmem:[%s6442_s0 + $0x1d8] sm:$0xff]  ;;  %v4200_v46 = vcombine.high %v1355_v35, %v1363_v36  ;;  %v4199_v59 = vcombine.low %v1355_v35, %v1363_v36  ;;  %v1318_v35 = vld [vmem:[%s6442_s0 + $0x68] sm:$0xff]  ;;  %v4263_v36 = vcombine.low %v1419_v24, %v1427_v25 }
 0x10b   : > { %v4202_v47 = vcombine.high %v1356_v38, %v1364_v39  ;;  %v1380_v55 = vld [vmem:[%s6442_s0 + $0x258] sm:$0xff] }
 0x10c   : > { %v4218_v0 = vcombine.high %v1372_v54, %v1380_v55 }
 0x110   : > { %3170 = vmatmul.mubr.bf16.gmra.mrb[20].mxu0 %v4227_v49  ;;  %v5042_v49 = vld [vmem:[%s5735_s15 + $0x2a0] sm:$0xff]  }
 0x111   : > { %3267 = vmatmul.mubr.bf16.gmra.mrb[20].mxu1 %v4229_v51  ;;  %3177 = vmatprep.mubr.bf16.mxu0 %v4244_v52  ;;  %v1371_v51 = vld [vmem:[%s6442_s0 + $0x210] sm:$0xff] }
 0x112   : > { %3274 = vmatprep.mubr.bf16.mxu1 %v4246_v53  ;;  %v1379_v52 = vld [vmem:[%s6442_s0 + $0x250] sm:$0xff]  ;;  %v5045_v53 = vld [vmem:[%s5735_s15 + $0x2e8] sm:$0xff]  }
 0x118   : > { %3178 = vmatmul.mubr.bf16.gmra.mrb[24].mxu0 %v4243_v60  ;;  %v5049_v60 = vld [vmem:[%s5735_s15 + $0x2f0] sm:$0xff]  }
 0x119   : > { %3275 = vmatmul.mubr.bf16.gmra.mrb[24].mxu1 %v4245_v61  ;;  %3185 = vmatprep.mubr.bf16.mxu0 %v4260_v62  ;;  %v4201_v61 = vcombine.low %v1356_v38, %v1364_v39  ;;  %v4216_v62 = vcombine.high %v1371_v51, %v1379_v52 }
 0x11a   : > { %3282 = vmatprep.mubr.bf16.mxu1 %v4262_v63  ;;  %v5048_v63 = vld [vmem:[%s5735_s15 + $0x230] sm:$0xff]  }
 0x120   : > { %3186 = vmatmul.mubr.bf16.gmra.mrb[28].mxu0 %v4259_v4  ;;  %v1395_v4 = vld [vmem:[%s6442_s0 + $0x2d0] sm:$0xff] }
 0x121   : > { %3283 = vmatmul.mubr.bf16.gmra.mrb[28].mxu1 %v4261_v5  ;;  %3323 = vmatprep.mubr.bf16.mxu0 %v4152_v6  ;;  %v5053_v5 = vld [vmem:[%s5735_s15 + $0x2f8] sm:$0xff]  }
 0x122   : > { %3420 = vmatprep.mubr.bf16.mxu1 %v4154_v7  ;;  %v1388_v6 = vld [vmem:[%s6442_s0 + $0x298] sm:$0xff] }
 0x123   : > { %v1396_v7 = vld [vmem:[%s6442_s0 + $0x2d8] sm:$0xff] }
 0x128   : > { %3324 = vmatmul.mubr.bf16.vlgmr.msra.gmra.mrb[32].mxu0 %v4151_v11  ;;  %v4215_v11 = vcombine.low %v1371_v51, %v1379_v52  ;;  %v5061_v51 = vld [vmem:[%s5735_s15 + $0x3c8] sm:$0xff]  }
 0x129   : > { %3421 = vmatmul.mubr.bf16.vlgmr.msra.gmra.mrb[32].mxu1 %v4153_v13  ;;  %4664 = vmatpush3.bf16.msra.mxu0 %v5024_v14  ;;  %v4217_v13 = vcombine.low %v1372_v54, %v1380_v55  ;;  %v4232_v14 = vcombine.high %v1387_v3, %v1395_v4  ;;  %v5060_v52 = vld [vmem:[%s5735_s15 + $0x308] sm:$0xff]   ;;  %v1341_v54 = vld [vmem:[%s6442_s0 + $0x120] sm:$0xff] }
 0x12a   : > { %4728 = vmatpush3.bf16.msra.mxu1 %v5026_v15  ;;  %3331 = vmatprep.mubr.bf16.mxu0 %v4168_v16  ;;  %v4234_v15 = vcombine.high %v1388_v6, %v1396_v7  ;;  %v1403_v16 = vld [vmem:[%s6442_s0 + $0x310] sm:$0xff]  ;;  %v1349_v55 = vld [vmem:[%s6442_s0 + $0x160] sm:$0xff] }
 0x12b   : > { %3428 = vmatprep.mubr.bf16.mxu1 %v4170_v17  ;;  %4665 = vmatprep.subr.bf16.mxu0 %v5027_v18  ;;  %v1411_v17 = vld [vmem:[%s6442_s0 + $0x350] sm:$0xff]  ;;  %v1404_v18 = vld [vmem:[%s6442_s0 + $0x318] sm:$0xff] }
 0x12c   : > { %4729 = vmatprep.subr.bf16.mxu1 %v5029_v20  ;;  %v4231_v20 = vcombine.low %v1387_v3, %v1395_v4  ;;  %v4248_v22 = vcombine.high %v1403_v16, %v1411_v17  ;;  %v5069_v3 = vld [vmem:[%s5735_s15 + $0x3d8] sm:$0xff]   ;;  %v1357_v4 = vld [vmem:[%s6442_s0 + $0x1a0] sm:$0xff] }
 0x12d   : > { %4666 = vmatpush3.bf16.msra.mxu0 %v5028_v19  ;;  %v1412_v19 = vld [vmem:[%s6442_s0 + $0x358] sm:$0xff] }
 0x12e   : > { %4730 = vmatpush3.bf16.msra.mxu1 %v5030_v21  ;;  %4667 = vmatprep.subr.bf16.mxu0 %v5031_v26  ;;  %v4233_v21 = vcombine.low %v1388_v6, %v1396_v7  ;;  %v4250_v23 = vcombine.high %v1404_v18, %v1412_v19  ;;  %v1420_v26 = vld [vmem:[%s6442_s0 + $0x398] sm:$0xff]  ;;  %v1358_v6 = vld [vmem:[%s6442_s0 + $0x1a8] sm:$0xff] }
 0x12f   : > { %4731 = vmatprep.subr.bf16.mxu1 %v5033_v27  ;;  %v1428_v27 = vld [vmem:[%s6442_s0 + $0x3d8] sm:$0xff] }
 0x130   : > { %3332 = vmatmul.mubr.bf16.gmra.mrb[36].mxu0 %v4167_v28  ;;  %v4247_v28 = vcombine.low %v1403_v16, %v1411_v17  ;;  %v5068_v7 = vld [vmem:[%s5735_s15 + $0x318] sm:$0xff]   ;;  %v5072_v16 = vld [vmem:[%s5735_s15 + $0x320] sm:$0xff]  }
 0x131   : > { %3429 = vmatmul.mubr.bf16.gmra.mrb[36].mxu1 %v4169_v29  ;;  %3339 = vmatprep.mubr.bf16.mxu0 %v4184_v30  ;;  %v4249_v29 = vcombine.low %v1404_v18, %v1412_v19  ;;  %v4264_v30 = vcombine.high %v1419_v24, %v1427_v25  ;;  %v5074_v17 = vld [vmem:[%s5735_s15 + $0x3a0] sm:$0xff]   ;;  %v5075_v18 = vld [vmem:[%s5735_s15 + $0x368] sm:$0xff]  }
 0x132   : > { %3436 = vmatprep.mubr.bf16.mxu1 %v4186_v32  ;;  %4668 = vmatpush3.bf16.msra.mxu0 %v5032_v31  ;;  %v4266_v31 = vcombine.high %v1420_v26, %v1428_v27  ;;  %v1309_v32 = vld [vmem:[%s6442_s0 + $0x20] sm:$0xff]  ;;  %v5077_v19 = vld [vmem:[%s5735_s15 + $0x3e8] sm:$0xff]  }
 0x133   : > { %4732 = vmatpush3.bf16.msra.mxu1 %v5034_v33  ;;  %4669 = vmatprep.subr.bf16.mxu0 %v5035_v34  ;;  %v1317_v33 = vld [vmem:[%s6442_s0 + $0x60] sm:$0xff]  ;;  %v1310_v34 = vld [vmem:[%s6442_s0 + $0x28] sm:$0xff] }
 0x134   : > { %4733 = vmatprep.subr.bf16.mxu1 %v5037_v37  ;;  %v4265_v37 = vcombine.low %v1420_v26, %v1428_v27  ;;  %v4156_v38 = vcombine.high %v1309_v32, %v1317_v33  ;;  %v4158_v39 = vcombine.high %v1310_v34, %v1318_v35  ;;  %v1382_v24 = vld [vmem:[%s6442_s0 + $0x268] sm:$0xff]  ;;  %v5079_v26 = vld [vmem:[%s5735_s15 + $0x370] sm:$0xff]  }
 0x135   : > { %v5078_v25 = vld [vmem:[%s5735_s15 + $0x3a8] sm:$0xff]  }
 0x136   : > { %4670 = vmatpush3.bf16.msra.mxu0 %v5036_v40  ;;  %v1325_v40 = vld [vmem:[%s6442_s0 + $0xa0] sm:$0xff] }
 0x137   : > { %4734 = vmatpush3.bf16.msra.mxu1 %v5038_v41  ;;  %4671 = vmatprep.subr.bf16.mxu0 %v5039_v42  ;;  %v1333_v41 = vld [vmem:[%s6442_s0 + $0xe0] sm:$0xff]  ;;  %v4155_v42 = vcombine.low %v1309_v32, %v1317_v33  ;;  %v5080_v32 = vld [vmem:[%s5735_s15 + $0x330] sm:$0xff]  }
 0x138   : > { %3340 = vmatmul.mubr.bf16.gmra.mrb[40].mxu0 %v4183_v43  ;;  %4735 = vmatprep.subr.bf16.mxu1 %v5041_v44  ;;  %v1326_v43 = vld [vmem:[%s6442_s0 + $0xa8] sm:$0xff]  ;;  %v5082_v33 = vld [vmem:[%s5735_s15 + $0x3b0] sm:$0xff]  }
 0x139   : > { %3437 = vmatmul.mubr.bf16.gmra.mrb[40].mxu1 %v4185_v45  ;;  %3347 = vmatprep.mubr.bf16.mxu0 %v4200_v46  ;;  %v1334_v44 = vld [vmem:[%s6442_s0 + $0xe8] sm:$0xff]  ;;  %v4157_v45 = vcombine.low %v1310_v34, %v1318_v35  ;;  %v5056_v46 = vld [vmem:[%s5735_s15 + $0x300] sm:$0xff]   ;;  %v5083_v34 = vld [vmem:[%s5735_s15 + $0x378] sm:$0xff]  }
 0x13a   : > { %3444 = vmatprep.mubr.bf16.mxu1 %v4202_v47  ;;  %4672 = vmatpush3.bf16.msra.mxu0 %v5040_v48  ;;  %v5058_v47 = vld [vmem:[%s5735_s15 + $0x380] sm:$0xff]   ;;  %v4172_v48 = vcombine.high %v1325_v40, %v1333_v41  ;;  %v5085_v35 = vld [vmem:[%s5735_s15 + $0x3f8] sm:$0xff]  }
 0x13b   : > { %4736 = vmatpush3.bf16.msra.mxu1 %v5042_v49  ;;  %4673 = vmatprep.subr.bf16.mxu0 %v5043_v50  ;;  %v4174_v49 = vcombine.high %v1326_v43, %v1334_v44  ;;  %v5059_v50 = vld [vmem:[%s5735_s15 + $0x348] sm:$0xff]  }
 0x13c   : > { %4737 = vmatprep.subr.bf16.mxu1 %v5045_v53  ;;  %v5062_v53 = vld [vmem:[%s5735_s15 + $0x388] sm:$0xff]  }
 0x13e   : > { %4674 = vmatpush3.bf16.msra.mxu0 %v5044_v56  ;;  %v5063_v56 = vld [vmem:[%s5735_s15 + $0x350] sm:$0xff]  }
 0x13f   : > { %4738 = vmatpush3.bf16.msra.mxu1 %v5046_v57  ;;  %4675 = vmatprep.subr.bf16.mxu0 %v5047_v58  ;;  %v1342_v57 = vld [vmem:[%s6442_s0 + $0x128] sm:$0xff] }
 0x140   : > { %3348 = vmatmul.mubr.bf16.gmra.mrb[44].mxu0 %v4199_v59  ;;  %4739 = vmatprep.subr.bf16.mxu1 %v5049_v60  ;;  %v1350_v58 = vld [vmem:[%s6442_s0 + $0x168] sm:$0xff]  ;;  %v5065_v59 = vld [vmem:[%s5735_s15 + $0x3d0] sm:$0xff]   ;;  %v4171_v60 = vcombine.low %v1325_v40, %v1333_v41  ;;  %v5086_v41 = vld [vmem:[%s5735_s15 + $0x3b8] sm:$0xff]  }
 0x141   : > { %3445 = vmatmul.mubr.bf16.gmra.mrb[44].mxu1 %v4201_v61  ;;  %3355 = vmatprep.mubr.bf16.mxu0 %v4216_v62  ;;  %v4173_v61 = vcombine.low %v1326_v43, %v1334_v44  ;;  %v4188_v62 = vcombine.high %v1341_v54, %v1349_v55  ;;  %v1398_v40 = vld [vmem:[%s6442_s0 + $0x2e8] sm:$0xff] }
 0x142   : > { %3452 = vmatprep.mubr.bf16.mxu1 %v4218_v0  ;;  %4676 = vmatpush3.bf16.msra.mxu0 %v5048_v63  ;;  %v4190_v63 = vcombine.high %v1342_v57, %v1350_v58  ;;  %v5064_v0 = vld [vmem:[%s5735_s15 + $0x310] sm:$0xff]  }
 0x143   : > { %4740 = vmatpush3.bf16.msra.mxu1 %v5050_v1  ;;  %4677 = vmatprep.subr.bf16.mxu0 %v5051_v2  ;;  %v5066_v1 = vld [vmem:[%s5735_s15 + $0x390] sm:$0xff]   ;;  %v5067_v2 = vld [vmem:[%s5735_s15 + $0x358] sm:$0xff]  }
 0x144   : > { %4741 = vmatprep.subr.bf16.mxu1 %v5053_v5  ;;  %v1365_v5 = vld [vmem:[%s6442_s0 + $0x1e0] sm:$0xff] }
 0x145   : > { %v4203_v27 = vcombine.low %v1357_v4, %v1365_v5 }
 0x146   : > { %4678 = vmatpush3.bf16.msra.mxu0 %v5052_v8  ;;  %v1366_v8 = vld [vmem:[%s6442_s0 + $0x1e8] sm:$0xff] }
 0x147   : > { %4742 = vmatpush3.bf16.msra.mxu1 %v5054_v9  ;;  %4791 = vmatprep.subr.bf16.mxu0 %v5055_v10  ;;  %v5070_v9 = vld [vmem:[%s5735_s15 + $0x398] sm:$0xff]   ;;  %v5071_v10 = vld [vmem:[%s5735_s15 + $0x360] sm:$0xff]  }
 0x148   : > { %3356 = vmatmul.mubr.bf16.gmra.mrb[48].mxu0 %v4215_v11  ;;  %4855 = vmatprep.subr.bf16.mxu1 %v5057_v12  ;;  %v4187_v11 = vcombine.low %v1341_v54, %v1349_v55  ;;  %v5073_v12 = vld [vmem:[%s5735_s15 + $0x3e0] sm:$0xff]  }
 0x149   : > { %3453 = vmatmul.mubr.bf16.gmra.mrb[48].mxu1 %v4217_v13  ;;  %3363 = vmatprep.mubr.bf16.mxu0 %v4232_v14  ;;  %v4189_v13 = vcombine.low %v1342_v57, %v1350_v58  ;;  %v4204_v14 = vcombine.high %v1357_v4, %v1365_v5  ;;  %v1421_v54 = vld [vmem:[%s6442_s0 + $0x3a0] sm:$0xff]  ;;  %v1430_v57 = vld [vmem:[%s6442_s0 + $0x3e8] sm:$0xff] }
 0x14a   : > { %3460 = vmatprep.mubr.bf16.mxu1 %v4234_v15  ;;  %v4206_v15 = vcombine.high %v1358_v6, %v1366_v8  ;;  %v1429_v55 = vld [vmem:[%s6442_s0 + $0x3e0] sm:$0xff] }
 0x150   : > { %3364 = vmatmul.mubr.bf16.gmra.mrb[52].mxu0 %v4231_v20  ;;  %v1373_v20 = vld [vmem:[%s6442_s0 + $0x220] sm:$0xff] }
 0x151   : > { %3461 = vmatmul.mubr.bf16.gmra.mrb[52].mxu1 %v4233_v21  ;;  %3371 = vmatprep.mubr.bf16.mxu0 %v4248_v22  ;;  %v1381_v21 = vld [vmem:[%s6442_s0 + $0x260] sm:$0xff]  ;;  %v1374_v22 = vld [vmem:[%s6442_s0 + $0x228] sm:$0xff] }
 0x152   : > { %3468 = vmatprep.mubr.bf16.mxu1 %v4250_v23  ;;  %v5076_v23 = vld [vmem:[%s5735_s15 + $0x328] sm:$0xff]   ;;  %v4221_v43 = vcombine.low %v1374_v22, %v1382_v24 }
 0x158   : > { %3372 = vmatmul.mubr.bf16.gmra.mrb[56].mxu0 %v4247_v28  ;;  %v5081_v28 = vld [vmem:[%s5735_s15 + $0x3f0] sm:$0xff]  }
 0x159   : > { %3469 = vmatmul.mubr.bf16.gmra.mrb[56].mxu1 %v4249_v29  ;;  %3379 = vmatprep.mubr.bf16.mxu0 %v4264_v30  ;;  %v4205_v29 = vcombine.low %v1358_v6, %v1366_v8  ;;  %v4220_v30 = vcombine.high %v1373_v20, %v1381_v21  ;;  %v1327_v6 = vld [vmem:[%s6442_s0 + $0xb0] sm:$0xff]  ;;  %v1328_v8 = vld [vmem:[%s6442_s0 + $0xb8] sm:$0xff] }
 0x15a   : > { %3476 = vmatprep.mubr.bf16.mxu1 %v4266_v31  ;;  %v4222_v31 = vcombine.high %v1374_v22, %v1382_v24  ;;  %v1359_v22 = vld [vmem:[%s6442_s0 + $0x1b0] sm:$0xff]  ;;  %v1360_v24 = vld [vmem:[%s6442_s0 + $0x1b8] sm:$0xff] }
 0x160   : > { %3380 = vmatmul.mubr.bf16.gmra.mrb[60].mxu0 %v4263_v36  ;;  %v1389_v36 = vld [vmem:[%s6442_s0 + $0x2a0] sm:$0xff] }
 0x161   : > { %3477 = vmatmul.mubr.bf16.gmra.mrb[60].mxu1 %v4265_v37  ;;  %3517 = vmatprep.mubr.bf16.mxu0 %v4156_v38  ;;  %v1397_v37 = vld [vmem:[%s6442_s0 + $0x2e0] sm:$0xff]  ;;  %v5084_v38 = vld [vmem:[%s5735_s15 + $0x338] sm:$0xff]   ;;  %s4146_s15 = sshll.u32 %s1224_s27, 7 }
 0x162   : > { %3614 = vmatprep.mubr.bf16.mxu1 %v4158_v39  ;;  %v1390_v39 = vld [vmem:[%s6442_s0 + $0x2a8] sm:$0xff]  ;;  %v4236_v44 = vcombine.high %v1389_v36, %v1397_v37  ;;  %s6373_s29 = scalar_lea.vmem [#allocation4], %s4146_s15 }
 0x168   : > { %3518 = vmatmul.mubr.bf16.vlgmr.msra.gmra.mrb[64].mxu0 %v4155_v42  ;;  %v4219_v42 = vcombine.low %v1373_v20, %v1381_v21 }
 0x169   : > { %3615 = vmatmul.mubr.bf16.vlgmr.msra.gmra.mrb[64].mxu1 %v4157_v45  ;;  %4792 = vmatpush3.bf16.msra.mxu0 %v5056_v46  ;;  %v4238_v45 = vcombine.high %v1390_v39, %v1398_v40  ;;  %v1405_v46 = vld [vmem:[%s6442_s0 + $0x320] sm:$0xff] }
 0x16a   : > { %4856 = vmatpush3.bf16.msra.mxu1 %v5058_v47  ;;  %3525 = vmatprep.mubr.bf16.mxu0 %v4172_v48  ;;  %v1413_v47 = vld [vmem:[%s6442_s0 + $0x360] sm:$0xff]  ;;  %v1406_v48 = vld [vmem:[%s6442_s0 + $0x328] sm:$0xff] }
 0x16b   : > { %3622 = vmatprep.mubr.bf16.mxu1 %v4174_v49  ;;  %4793 = vmatprep.subr.bf16.mxu0 %v5059_v50  ;;  %v1414_v49 = vld [vmem:[%s6442_s0 + $0x368] sm:$0xff]  ;;  %v4235_v50 = vcombine.low %v1389_v36, %v1397_v37  ;;  %v4251_v58 = vcombine.low %v1405_v46, %v1413_v47 }
 0x16c   : > { %4857 = vmatprep.subr.bf16.mxu1 %v5061_v51  ;;  %v4237_v51 = vcombine.low %v1390_v39, %v1398_v40 }
 0x16d   : > { %4794 = vmatpush3.bf16.msra.mxu0 %v5060_v52  ;;  %v4252_v52 = vcombine.high %v1405_v46, %v1413_v47 }
 0x16e   : > { %4858 = vmatpush3.bf16.msra.mxu1 %v5062_v53  ;;  %4795 = vmatprep.subr.bf16.mxu0 %v5063_v56  ;;  %v4254_v53 = vcombine.high %v1406_v48, %v1414_v49  ;;  %v1422_v56 = vld [vmem:[%s6442_s0 + $0x3a8] sm:$0xff] }
 0x16f   : > { %4859 = vmatprep.subr.bf16.mxu1 %v5065_v59  ;;  %v4253_v59 = vcombine.low %v1406_v48, %v1414_v49 }
 0x170   : > { %3526 = vmatmul.mubr.bf16.gmra.mrb[68].mxu0 %v4171_v60  ;;  %v4268_v60 = vcombine.high %v1421_v54, %v1429_v55 }
 0x171   : > { %3623 = vmatmul.mubr.bf16.gmra.mrb[68].mxu1 %v4173_v61  ;;  %3533 = vmatprep.mubr.bf16.mxu0 %v4188_v62  ;;  %v4270_v61 = vcombine.high %v1422_v56, %v1430_v57  ;;  %v1311_v62 = vld [vmem:[%s6442_s0 + $0x30] sm:$0xff] }
 0x172   : > { %3630 = vmatprep.mubr.bf16.mxu1 %v4190_v63  ;;  %4796 = vmatpush3.bf16.msra.mxu0 %v5064_v0  ;;  %v1319_v63 = vld [vmem:[%s6442_s0 + $0x70] sm:$0xff]  ;;  %v1312_v0 = vld [vmem:[%s6442_s0 + $0x38] sm:$0xff] }
 0x173   : > { %4860 = vmatpush3.bf16.msra.mxu1 %v5066_v1  ;;  %4797 = vmatprep.subr.bf16.mxu0 %v5067_v2  ;;  %v1320_v1 = vld [vmem:[%s6442_s0 + $0x78] sm:$0xff]  ;;  %v4267_v2 = vcombine.low %v1421_v54, %v1429_v55  ;;  %v4160_v4 = vcombine.high %v1311_v62, %v1319_v63 }
 0x174   : > { %4861 = vmatprep.subr.bf16.mxu1 %v5069_v3  ;;  %v4269_v3 = vcombine.low %v1422_v56, %v1430_v57  ;;  %v4162_v5 = vcombine.high %v1312_v0, %v1320_v1  ;;  %v1392_v55 = vld [vmem:[%s6442_s0 + $0x2b8] sm:$0xff] }
 0x175   : > { %v1400_v56 = vld [vmem:[%s6442_s0 + $0x2f8] sm:$0xff] }
 0x176   : > { %4798 = vmatpush3.bf16.msra.mxu0 %v5068_v7  ;;  %v1335_v7 = vld [vmem:[%s6442_s0 + $0xf0] sm:$0xff] }
 0x177   : > { %4862 = vmatpush3.bf16.msra.mxu1 %v5070_v9  ;;  %4799 = vmatprep.subr.bf16.mxu0 %v5071_v10  ;;  %v1336_v9 = vld [vmem:[%s6442_s0 + $0xf8] sm:$0xff]  ;;  %v4159_v10 = vcombine.low %v1311_v62, %v1319_v63 }
 0x178   : > { %3534 = vmatmul.mubr.bf16.gmra.mrb[72].mxu0 %v4187_v11  ;;  %4863 = vmatprep.subr.bf16.mxu1 %v5073_v12  ;;  %v4161_v11 = vcombine.low %v1312_v0, %v1320_v1  ;;  %v4176_v12 = vcombine.high %v1327_v6, %v1335_v7 }
 0x179   : > { %3631 = vmatmul.mubr.bf16.gmra.mrb[72].mxu1 %v4189_v13  ;;  %3541 = vmatprep.mubr.bf16.mxu0 %v4204_v14  ;;  %v4178_v13 = vcombine.high %v1328_v8, %v1336_v9  ;;  %v1343_v14 = vld [vmem:[%s6442_s0 + $0x130] sm:$0xff] }
 0x17a   : > { %3638 = vmatprep.mubr.bf16.mxu1 %v4206_v15  ;;  %4800 = vmatpush3.bf16.msra.mxu0 %v5072_v16  ;;  %v1351_v15 = vld [vmem:[%s6442_s0 + $0x170] sm:$0xff]  ;;  %v1344_v16 = vld [vmem:[%s6442_s0 + $0x138] sm:$0xff] }
 0x17b   : > { %4864 = vmatpush3.bf16.msra.mxu1 %v5074_v17  ;;  %4801 = vmatprep.subr.bf16.mxu0 %v5075_v18  ;;  %v1352_v17 = vld [vmem:[%s6442_s0 + $0x178] sm:$0xff]  ;;  %v4175_v18 = vcombine.low %v1327_v6, %v1335_v7  ;;  %v4192_v20 = vcombine.high %v1343_v14, %v1351_v15 }
 0x17c   : > { %4865 = vmatprep.subr.bf16.mxu1 %v5077_v19  ;;  %v4177_v19 = vcombine.low %v1328_v8, %v1336_v9  ;;  %v4194_v21 = vcombine.high %v1344_v16, %v1352_v17 }
 0x17e   : > { %4802 = vmatpush3.bf16.msra.mxu0 %v5076_v23  ;;  %v1367_v23 = vld [vmem:[%s6442_s0 + $0x1f0] sm:$0xff] }
 0x17f   : > { %4866 = vmatpush3.bf16.msra.mxu1 %v5078_v25  ;;  %4803 = vmatprep.subr.bf16.mxu0 %v5079_v26  ;;  %v1368_v25 = vld [vmem:[%s6442_s0 + $0x1f8] sm:$0xff]  ;;  %v4191_v26 = vcombine.low %v1343_v14, %v1351_v15  ;;  %v4207_v37 = vcombine.low %v1359_v22, %v1367_v23 }
 0x180   : > { %3542 = vmatmul.mubr.bf16.gmra.mrb[76].mxu0 %v4203_v27  ;;  %4867 = vmatprep.subr.bf16.mxu1 %v5081_v28  ;;  %v4193_v27 = vcombine.low %v1344_v16, %v1352_v17  ;;  %v4208_v28 = vcombine.high %v1359_v22, %v1367_v23  ;;  %v1416_v14 = vld [vmem:[%s6442_s0 + $0x378] sm:$0xff] }
 0x181   : > { %3639 = vmatmul.mubr.bf16.gmra.mrb[76].mxu1 %v4205_v29  ;;  %3549 = vmatprep.mubr.bf16.mxu0 %v4220_v30  ;;  %v4210_v29 = vcombine.high %v1360_v24, %v1368_v25  ;;  %v1375_v30 = vld [vmem:[%s6442_s0 + $0x230] sm:$0xff] }
 0x182   : > { %3646 = vmatprep.mubr.bf16.mxu1 %v4222_v31  ;;  %4804 = vmatpush3.bf16.msra.mxu0 %v5080_v32  ;;  %v1383_v31 = vld [vmem:[%s6442_s0 + $0x270] sm:$0xff] }
 0x183   : > { %4868 = vmatpush3.bf16.msra.mxu1 %v5082_v33  ;;  %4805 = vmatprep.subr.bf16.mxu0 %v5083_v34  ;;  %v1376_v33 = vld [vmem:[%s6442_s0 + $0x238] sm:$0xff] }
 0x184   : > { %4869 = vmatprep.subr.bf16.mxu1 %v5085_v35  ;;  %v1384_v34 = vld [vmem:[%s6442_s0 + $0x278] sm:$0xff] }
 0x185   : > { %v4226_v46 = vcombine.high %v1376_v33, %v1384_v34  ;;  %v4225_v63 = vcombine.low %v1376_v33, %v1384_v34  ;;  %v1431_v33 = vld [vmem:[%s6442_s0 + $0x3f0] sm:$0xff] }
 0x186   : > { %4806 = vmatpush3.bf16.msra.mxu0 %v5084_v38 }
 0x187   : > { %4870 = vmatpush3.bf16.msra.mxu1 %v5086_v41  ;;  %v4209_v41 = vcombine.low %v1360_v24, %v1368_v25 }
 0x188   : > { %3550 = vmatmul.mubr.bf16.gmra.mrb[80].mxu0 %v4219_v42  ;;  %v4224_v42 = vcombine.high %v1375_v30, %v1383_v31 }
 0x189   : > { %3647 = vmatmul.mubr.bf16.gmra.mrb[80].mxu1 %v4221_v43  ;;  %3557 = vmatprep.mubr.bf16.mxu0 %v4236_v44 }
 0x18a   : > { %3654 = vmatprep.mubr.bf16.mxu1 %v4238_v45 }
 0x190   : > { %3558 = vmatmul.mubr.bf16.gmra.mrb[84].mxu0 %v4235_v50 }
 0x191   : > { %3655 = vmatmul.mubr.bf16.gmra.mrb[84].mxu1 %v4237_v51  ;;  %3565 = vmatprep.mubr.bf16.mxu0 %v4252_v52  ;;  %v1391_v52 = vld [vmem:[%s6442_s0 + $0x2b0] sm:$0xff] }
 0x192   : > { %3662 = vmatprep.mubr.bf16.mxu1 %v4254_v53  ;;  %v1399_v53 = vld [vmem:[%s6442_s0 + $0x2f0] sm:$0xff] }
 0x193   : > { %v4240_v0 = vcombine.high %v1391_v52, %v1399_v53  ;;  %v4239_v17 = vcombine.low %v1391_v52, %v1399_v53 }
 0x198   : > { %3566 = vmatmul.mubr.bf16.gmra.mrb[88].mxu0 %v4251_v58 }
 0x199   : > { %3663 = vmatmul.mubr.bf16.gmra.mrb[88].mxu1 %v4253_v59  ;;  %3573 = vmatprep.mubr.bf16.mxu0 %v4268_v60  ;;  %v4223_v59 = vcombine.low %v1375_v30, %v1383_v31 }
 0x19a   : > { %3670 = vmatprep.mubr.bf16.mxu1 %v4270_v61 }
 0x1a0   : > { %3574 = vmatmul.mubr.bf16.gmra.mrb[92].mxu0 %v4267_v2 }
 0x1a1   : > { %3671 = vmatmul.mubr.bf16.gmra.mrb[92].mxu1 %v4269_v3  ;;  %3711 = vmatprep.mubr.bf16.mxu0 %v4160_v4  ;;  %v4242_v4 = vcombine.high %v1392_v55, %v1400_v56 }
 0x1a2   : > { %3808 = vmatprep.mubr.bf16.mxu1 %v4162_v5 }
 0x1a8   : > { %3712 = vmatmul.mubr.bf16.vlgmr.msra.gmra.mrb[96].mxu0 %v4159_v10  ;;  %v1407_v10 = vld [vmem:[%s6442_s0 + $0x330] sm:$0xff] }
 0x1a9   : > { %3809 = vmatmul.mubr.bf16.vlgmr.msra.gmra.mrb[96].mxu1 %v4161_v11  ;;  %3719 = vmatprep.mubr.bf16.mxu0 %v4176_v12  ;;  %v1415_v11 = vld [vmem:[%s6442_s0 + $0x370] sm:$0xff] }
 0x1aa   : > { %3816 = vmatprep.mubr.bf16.mxu1 %v4178_v13  ;;  %v1408_v13 = vld [vmem:[%s6442_s0 + $0x338] sm:$0xff]  ;;  %v4256_v22 = vcombine.high %v1407_v10, %v1415_v11 }
 0x1b0   : > { %3720 = vmatmul.mubr.bf16.gmra.mrb[100].mxu0 %v4175_v18 }
 0x1b1   : > { %3817 = vmatmul.mubr.bf16.gmra.mrb[100].mxu1 %v4177_v19  ;;  %3727 = vmatprep.mubr.bf16.mxu0 %v4192_v20 }
 0x1b2   : > { %3824 = vmatprep.mubr.bf16.mxu1 %v4194_v21  ;;  %v4241_v21 = vcombine.low %v1392_v55, %v1400_v56 }
 0x1b8   : > { %3728 = vmatmul.mubr.bf16.gmra.mrb[104].mxu0 %v4191_v26  ;;  %v4258_v26 = vcombine.high %v1408_v13, %v1416_v14 }
 0x1b9   : > { %3825 = vmatmul.mubr.bf16.gmra.mrb[104].mxu1 %v4193_v27  ;;  %3735 = vmatprep.mubr.bf16.mxu0 %v4208_v28 }
 0x1ba   : > { %3832 = vmatprep.mubr.bf16.mxu1 %v4210_v29 }
 0x1bb   : > { %v4423_v32 = vpop.f32.mrb[0].mxu0 }
 0x1bc   : > { %v4487_v35 = vpop.f32.mrb[0].mxu1  ;;  %v4424_v36 = vpop.f32.mrb[1].mxu0 }
 0x1bd   : > { %v4425_v38 = vadd.f32 %v4424_v36, %v4423_v32  ;;  %v4488_v39 = vpop.f32.mrb[1].mxu1  ;;  %v4426_v40 = vpop.f32.mrb[2].mxu0  ;;  %v1423_v32 = vld [vmem:[%s6442_s0 + $0x3b0] sm:$0xff]  ;;  %v1432_v36 = vld [vmem:[%s6442_s0 + $0x3f8] sm:$0xff] }
 0x1be   : > { %v4489_v43 = vadd.f32 %v4488_v39, %v4487_v35  ;;  %v4490_v44 = vpop.f32.mrb[2].mxu1  ;;  %v4427_v45 = vpop.f32.mrb[3].mxu0  ;;  %v1424_v35 = vld [vmem:[%s6442_s0 + $0x3b8] sm:$0xff]  ;;  %v4255_v39 = vcombine.low %v1407_v10, %v1415_v11 }
 0x1bf   : > { %v4428_v47 = vadd.f32 %v4427_v45, %v4426_v40  ;;  %v4491_v48 = vpop.f32.mrb[3].mxu1 }
 0x1c0   : > { %v6205_v49 = vadd.f32 %v4489_v43, %v4425_v38  ;;  %v4492_v50 = vadd.f32 %v4491_v48, %v4490_v44  ;;  %3736 = vmatmul.mubr.bf16.gmra.mrb[108].mxu0 %v4207_v37  ;;  %v4257_v43 = vcombine.low %v1408_v13, %v1416_v14  ;;  %v4272_v44 = vcombine.high %v1423_v32, %v1431_v33 }
 0x1c1   : > { %3833 = vmatmul.mubr.bf16.gmra.mrb[108].mxu1 %v4209_v41  ;;  %3743 = vmatprep.mubr.bf16.mxu0 %v4224_v42  ;;  %v4274_v48 = vcombine.high %v1424_v35, %v1432_v36 }
 0x1c2   : > { %v6207_v51 = vadd.f32 %v4492_v50, %v4428_v47  ;;  %3840 = vmatprep.mubr.bf16.mxu1 %v4226_v46 }
 0x1c3   : > { %v4429_v54 = vpop.f32.mrb[4].mxu0 }
 0x1c4   : > { %v4493_v57 = vpop.f32.mrb[4].mxu1  ;;  %v4430_v58 = vpop.f32.mrb[5].mxu0 }
 0x1c5   : > { %v4431_v60 = vadd.f32 %v4430_v58, %v4429_v54  ;;  %v4494_v61 = vpop.f32.mrb[5].mxu1  ;;  %v4432_v62 = vpop.f32.mrb[6].mxu0 }
 0x1c6   : > { %v4495_v1 = vadd.f32 %v4494_v61, %v4493_v57  ;;  %v4496_v2 = vpop.f32.mrb[6].mxu1  ;;  %v4433_v3 = vpop.f32.mrb[7].mxu0 }
 0x1c7   : > { %v4434_v5 = vadd.f32 %v4433_v3, %v4432_v62  ;;  %v4497_v6 = vpop.f32.mrb[7].mxu1 }
 0x1c8   : > { %v6221_v7 = vadd.f32 %v4495_v1, %v4431_v60  ;;  %v4498_v8 = vadd.f32 %v4497_v6, %v4496_v2  ;;  %3744 = vmatmul.mubr.bf16.gmra.mrb[112].mxu0 %v4223_v59  ;;  %v4271_v59 = vcombine.low %v1423_v32, %v1431_v33 }
 0x1c9   : > { %3841 = vmatmul.mubr.bf16.gmra.mrb[112].mxu1 %v4225_v63  ;;  %3751 = vmatprep.mubr.bf16.mxu0 %v4240_v0  ;;  %v4273_v63 = vcombine.low %v1424_v35, %v1432_v36 }
 0x1ca   : > { %v6223_v9 = vadd.f32 %v4498_v8, %v4434_v5  ;;  %3848 = vmatprep.mubr.bf16.mxu1 %v4242_v4 }
 0x1cb   : > { %v4435_v12 = vpop.f32.mrb[8].mxu0 }
 0x1cc   : > { %v4499_v15 = vpop.f32.mrb[8].mxu1  ;;  %v4436_v16 = vpop.f32.mrb[9].mxu0 }
 0x1cd   : > { %v4437_v18 = vadd.f32 %v4436_v16, %v4435_v12  ;;  %v4500_v19 = vpop.f32.mrb[9].mxu1  ;;  %v4438_v20 = vpop.f32.mrb[10].mxu0 }
 0x1ce   : > { %v4501_v23 = vadd.f32 %v4500_v19, %v4499_v15  ;;  %v4502_v24 = vpop.f32.mrb[10].mxu1  ;;  %v4439_v25 = vpop.f32.mrb[11].mxu0 }
 0x1cf   : > { %v4440_v27 = vadd.f32 %v4439_v25, %v4438_v20  ;;  %v4503_v28 = vpop.f32.mrb[11].mxu1 }
 0x1d0   : > { %v6237_v29 = vadd.f32 %v4501_v23, %v4437_v18  ;;  %v4504_v30 = vadd.f32 %v4503_v28, %v4502_v24  ;;  %3752 = vmatmul.mubr.bf16.gmra.mrb[116].mxu0 %v4239_v17 }
 0x1d1   : > { %3849 = vmatmul.mubr.bf16.gmra.mrb[116].mxu1 %v4241_v21  ;;  %3759 = vmatprep.mubr.bf16.mxu0 %v4256_v22 }
 0x1d2   : > { %v6239_v31 = vadd.f32 %v4504_v30, %v4440_v27  ;;  %3856 = vmatprep.mubr.bf16.mxu1 %v4258_v26 }
 0x1d3   : > { %v4441_v34 = vpop.f32.mrb[12].mxu0 }
 0x1d4   : > { %v4505_v37 = vpop.f32.mrb[12].mxu1  ;;  %v4442_v38 = vpop.f32.mrb[13].mxu0 }
 0x1d5   : > { %v4443_v40 = vadd.f32 %v4442_v38, %v4441_v34  ;;  %v4506_v41 = vpop.f32.mrb[13].mxu1  ;;  %v4444_v42 = vpop.f32.mrb[14].mxu0 }
 0x1d6   : > { %v4507_v45 = vadd.f32 %v4506_v41, %v4505_v37  ;;  %v4508_v46 = vpop.f32.mrb[14].mxu1  ;;  %v4445_v47 = vpop.f32.mrb[15].mxu0 }
 0x1d7   : > { %v4446_v50 = vadd.f32 %v4445_v47, %v4444_v42  ;;  %v4509_v52 = vpop.f32.mrb[15].mxu1 }
 0x1d8   : > { %v6253_v53 = vadd.f32 %v4507_v45, %v4443_v40  ;;  %v4510_v54 = vadd.f32 %v4509_v52, %v4508_v46  ;;  %3760 = vmatmul.mubr.bf16.gmra.mrb[120].mxu0 %v4255_v39 }
 0x1d9   : > { %3857 = vmatmul.mubr.bf16.gmra.mrb[120].mxu1 %v4257_v43  ;;  %3767 = vmatprep.mubr.bf16.mxu0 %v4272_v44 }
 0x1da   : > { %v6255_v55 = vadd.f32 %v4510_v54, %v4446_v50  ;;  %3864 = vmatprep.mubr.bf16.mxu1 %v4274_v48 }
 0x1db   : > { %v4447_v56 = vpop.f32.mrb[16].mxu0 }
 0x1dc   : > { %v4511_v57 = vpop.f32.mrb[16].mxu1  ;;  %v4448_v58 = vpop.f32.mrb[17].mxu0 }
 0x1dd   : > { %v4449_v60 = vadd.f32 %v4448_v58, %v4447_v56  ;;  %v4512_v61 = vpop.f32.mrb[17].mxu1  ;;  %v4450_v62 = vpop.f32.mrb[18].mxu0 }
 0x1de   : > { %v4513_v0 = vadd.f32 %v4512_v61, %v4511_v57  ;;  %v4514_v1 = vpop.f32.mrb[18].mxu1  ;;  %v4451_v2 = vpop.f32.mrb[19].mxu0 }
 0x1df   : > { %v4452_v3 = vadd.f32 %v4451_v2, %v4450_v62  ;;  %v4515_v4 = vpop.f32.mrb[19].mxu1 }
 0x1e0   : > { %v6257_v5 = vadd.f32 %v4513_v0, %v4449_v60  ;;  %v4516_v6 = vadd.f32 %v4515_v4, %v4514_v1  ;;  %3768 = vmatmul.mubr.bf16.gmra.mrb[124].mxu0 %v4271_v59 }
 0x1e1   : > { %3865 = vmatmul.mubr.bf16.gmra.mrb[124].mxu1 %v4273_v63 }
 0x1e2   : > { %v6259_v8 = vadd.f32 %v4516_v6, %v4452_v3 }
 0x1e3   : > { %v4453_v10 = vpop.f32.mrb[20].mxu0 }
 0x1e4   : > { %v4517_v11 = vpop.f32.mrb[20].mxu1  ;;  %v4454_v12 = vpop.f32.mrb[21].mxu0 }
 0x1e5   : > { %v4455_v13 = vadd.f32 %v4454_v12, %v4453_v10  ;;  %v4518_v14 = vpop.f32.mrb[21].mxu1  ;;  %v4456_v15 = vpop.f32.mrb[22].mxu0 }
 0x1e6   : > { %v4519_v16 = vadd.f32 %v4518_v14, %v4517_v11  ;;  %v4520_v17 = vpop.f32.mrb[22].mxu1  ;;  %v4457_v18 = vpop.f32.mrb[23].mxu0 }
 0x1e7   : > { %v4458_v19 = vadd.f32 %v4457_v18, %v4456_v15  ;;  %v4521_v20 = vpop.f32.mrb[23].mxu1 }
 0x1e8   : > { %v6261_v21 = vadd.f32 %v4519_v16, %v4455_v13  ;;  %v4522_v22 = vadd.f32 %v4521_v20, %v4520_v17 }
 0x1ea   : > { %v6263_v23 = vadd.f32 %v4522_v22, %v4458_v19 }
 0x1eb   : > { %v4459_v24 = vpop.f32.mrb[24].mxu0 }
 0x1ec   : > { %v4523_v25 = vpop.f32.mrb[24].mxu1  ;;  %v4460_v26 = vpop.f32.mrb[25].mxu0 }
 0x1ed   : > { %v4461_v27 = vadd.f32 %v4460_v26, %v4459_v24  ;;  %v4524_v28 = vpop.f32.mrb[25].mxu1  ;;  %v4462_v30 = vpop.f32.mrb[26].mxu0 }
 0x1ee   : > { %v4525_v32 = vadd.f32 %v4524_v28, %v4523_v25  ;;  %v4526_v33 = vpop.f32.mrb[26].mxu1  ;;  %v4463_v34 = vpop.f32.mrb[27].mxu0 }
 0x1ef   : > { %v4464_v35 = vadd.f32 %v4463_v34, %v4462_v30  ;;  %v4527_v36 = vpop.f32.mrb[27].mxu1 }
 0x1f0   : > { %v6265_v37 = vadd.f32 %v4525_v32, %v4461_v27  ;;  %v4528_v38 = vadd.f32 %v4527_v36, %v4526_v33 }
 0x1f2   : > { %v6267_v39 = vadd.f32 %v4528_v38, %v4464_v35 }
 0x1f3   : > { %v4465_v40 = vpop.f32.mrb[28].mxu0 }
 0x1f4   : > { %v4529_v41 = vpop.f32.mrb[28].mxu1  ;;  %v4466_v42 = vpop.f32.mrb[29].mxu0 }
 0x1f5   : > { %v4467_v43 = vadd.f32 %v4466_v42, %v4465_v40  ;;  %v4530_v44 = vpop.f32.mrb[29].mxu1  ;;  %v4468_v45 = vpop.f32.mrb[30].mxu0 }
 0x1f6   : > { %v4531_v46 = vadd.f32 %v4530_v44, %v4529_v41  ;;  %v4532_v47 = vpop.f32.mrb[30].mxu1  ;;  %v4469_v48 = vpop.f32.mrb[31].mxu0 }
 0x1f7   : > { %v4470_v50 = vadd.f32 %v4469_v48, %v4468_v45  ;;  %v4533_v52 = vpop.f32.mrb[31].mxu1 }
 0x1f8   : > { %v6269_v54 = vadd.f32 %v4531_v46, %v4467_v43  ;;  %v4534_v56 = vadd.f32 %v4533_v52, %v4532_v47 }
 0x1fa   : > { %v6271_v57 = vadd.f32 %v4534_v56, %v4470_v50 }
 0x1fb   : > { %v4551_v58 = vpop.f32.mrb[32].mxu0 }
 0x1fc   : > { %v4615_v59 = vpop.f32.mrb[32].mxu1  ;;  %v4552_v60 = vpop.f32.mrb[33].mxu0 }
 0x1fd   : > { %v4553_v61 = vadd.f32 %v4552_v60, %v4551_v58  ;;  %v4616_v62 = vpop.f32.mrb[33].mxu1  ;;  %v4554_v63 = vpop.f32.mrb[34].mxu0 }
 0x1fe   : > { %v4617_v0 = vadd.f32 %v4616_v62, %v4615_v59  ;;  %v4618_v1 = vpop.f32.mrb[34].mxu1  ;;  %v4555_v2 = vpop.f32.mrb[35].mxu0 }
 0x1ff   : > { %v3326_v3 = vadd.f32 %v4553_v61, %v6205_v49  ;;  %v4556_v4 = vadd.f32 %v4555_v2, %v4554_v63  ;;  %v4619_v6 = vpop.f32.mrb[35].mxu1 }
 0x200   : > { %v4620_v10 = vadd.f32 %v4619_v6, %v4618_v1 }
 0x201   : > { %v6274_v11 = vadd.f32 %v4617_v0, %v3326_v3  ;;  %v3329_v12 = vadd.f32 %v4556_v4, %v6207_v51 }
 0x203   : > { %v6277_v13 = vadd.f32 %v4620_v10, %v3329_v12  ;;  %v4557_v14 = vpop.f32.mrb[36].mxu0 }
 0x204   : > { %v4621_v15 = vpop.f32.mrb[36].mxu1  ;;  %v4558_v16 = vpop.f32.mrb[37].mxu0 }
 0x205   : > { %v4559_v17 = vadd.f32 %v4558_v16, %v4557_v14  ;;  %v4622_v18 = vpop.f32.mrb[37].mxu1  ;;  %v4560_v19 = vpop.f32.mrb[38].mxu0 }
 0x206   : > { %v4623_v20 = vadd.f32 %v4622_v18, %v4621_v15  ;;  %v4624_v22 = vpop.f32.mrb[38].mxu1  ;;  %v4561_v24 = vpop.f32.mrb[39].mxu0 }
 0x207   : > { %v3334_v49 = vadd.f32 %v4559_v17, %v6221_v7  ;;  %v4562_v25 = vadd.f32 %v4561_v24, %v4560_v19  ;;  %v4625_v26 = vpop.f32.mrb[39].mxu1 }
 0x208   : > { %v4626_v27 = vadd.f32 %v4625_v26, %v4624_v22 }
 0x209   : > { %v6280_v28 = vadd.f32 %v4623_v20, %v3334_v49  ;;  %v3337_v51 = vadd.f32 %v4562_v25, %v6223_v9 }
 0x20b   : > { %v6283_v30 = vadd.f32 %v4626_v27, %v3337_v51  ;;  %v4563_v32 = vpop.f32.mrb[40].mxu0 }
 0x20c   : > { %v4627_v33 = vpop.f32.mrb[40].mxu1  ;;  %v4564_v34 = vpop.f32.mrb[41].mxu0 }
 0x20d   : > { %v4565_v35 = vadd.f32 %v4564_v34, %v4563_v32  ;;  %v4628_v36 = vpop.f32.mrb[41].mxu1  ;;  %v4566_v38 = vpop.f32.mrb[42].mxu0 }
 0x20e   : > { %v4629_v40 = vadd.f32 %v4628_v36, %v4627_v33  ;;  %v4630_v41 = vpop.f32.mrb[42].mxu1  ;;  %v4567_v42 = vpop.f32.mrb[43].mxu0 }
 0x20f   : > { %v3342_v7 = vadd.f32 %v4565_v35, %v6237_v29  ;;  %v4568_v43 = vadd.f32 %v4567_v42, %v4566_v38  ;;  %v4631_v44 = vpop.f32.mrb[43].mxu1 }
 0x210   : > { %v4632_v45 = vadd.f32 %v4631_v44, %v4630_v41 }
 0x211   : > { %v6286_v46 = vadd.f32 %v4629_v40, %v3342_v7  ;;  %v3345_v9 = vadd.f32 %v4568_v43, %v6239_v31 }
 0x213   : > { %v6289_v47 = vadd.f32 %v4632_v45, %v3345_v9  ;;  %v4569_v48 = vpop.f32.mrb[44].mxu0 }
 0x214   : > { %v4633_v50 = vpop.f32.mrb[44].mxu1  ;;  %v4570_v52 = vpop.f32.mrb[45].mxu0 }
 0x215   : > { %v4571_v56 = vadd.f32 %v4570_v52, %v4569_v48  ;;  %v4634_v58 = vpop.f32.mrb[45].mxu1  ;;  %v4572_v59 = vpop.f32.mrb[46].mxu0 }
 0x216   : > { %v4635_v60 = vadd.f32 %v4634_v58, %v4633_v50  ;;  %v4636_v61 = vpop.f32.mrb[46].mxu1  ;;  %v4573_v62 = vpop.f32.mrb[47].mxu0 }
 0x217   : > { %v3350_v29 = vadd.f32 %v4571_v56, %v6253_v53  ;;  %v4574_v63 = vadd.f32 %v4573_v62, %v4572_v59  ;;  %v4637_v0 = vpop.f32.mrb[47].mxu1 }
 0x218   : > { %v4638_v1 = vadd.f32 %v4637_v0, %v4636_v61 }
 0x219   : > { %v6292_v2 = vadd.f32 %v4635_v60, %v3350_v29  ;;  %v3353_v31 = vadd.f32 %v4574_v63, %v6255_v55 }
 0x21b   : > { %v6295_v3 = vadd.f32 %v4638_v1, %v3353_v31  ;;  %v4575_v4 = vpop.f32.mrb[48].mxu0 }
 0x21c   : > { %v4639_v6 = vpop.f32.mrb[48].mxu1  ;;  %v4576_v10 = vpop.f32.mrb[49].mxu0 }
 0x21d   : > { %v4577_v12 = vadd.f32 %v4576_v10, %v4575_v4  ;;  %v4640_v14 = vpop.f32.mrb[49].mxu1  ;;  %v4578_v15 = vpop.f32.mrb[50].mxu0 }
 0x21e   : > { %v4641_v16 = vadd.f32 %v4640_v14, %v4639_v6  ;;  %v4642_v17 = vpop.f32.mrb[50].mxu1  ;;  %v4579_v18 = vpop.f32.mrb[51].mxu0 }
 0x21f   : > { %v3358_v53 = vadd.f32 %v4577_v12, %v6257_v5  ;;  %v4580_v19 = vadd.f32 %v4579_v18, %v4578_v15  ;;  %v4643_v20 = vpop.f32.mrb[51].mxu1 }
 0x220   : > { %v4644_v22 = vadd.f32 %v4643_v20, %v4642_v17 }
 0x221   : > { %v6298_v24 = vadd.f32 %v4641_v16, %v3358_v53  ;;  %v3361_v55 = vadd.f32 %v4580_v19, %v6259_v8 }
 0x223   : > { %v6301_v49 = vadd.f32 %v4644_v22, %v3361_v55  ;;  %v4581_v25 = vpop.f32.mrb[52].mxu0 }
 0x224   : > { %v4645_v26 = vpop.f32.mrb[52].mxu1  ;;  %v4582_v27 = vpop.f32.mrb[53].mxu0 }
 0x225   : > { %v4583_v51 = vadd.f32 %v4582_v27, %v4581_v25  ;;  %v4646_v32 = vpop.f32.mrb[53].mxu1  ;;  %v4584_v33 = vpop.f32.mrb[54].mxu0 }
 0x226   : > { %v4647_v34 = vadd.f32 %v4646_v32, %v4645_v26  ;;  %v4648_v35 = vpop.f32.mrb[54].mxu1  ;;  %v4585_v36 = vpop.f32.mrb[55].mxu0 }
 0x227   : > { %v3366_v5 = vadd.f32 %v4583_v51, %v6261_v21  ;;  %v4586_v38 = vadd.f32 %v4585_v36, %v4584_v33  ;;  %v4649_v40 = vpop.f32.mrb[55].mxu1 }
 0x228   : > { %v4650_v41 = vadd.f32 %v4649_v40, %v4648_v35 }
 0x229   : > { %v6304_v42 = vadd.f32 %v4647_v34, %v3366_v5  ;;  %v3369_v8 = vadd.f32 %v4586_v38, %v6263_v23 }
 0x22b   : > { %v6307_v7 = vadd.f32 %v4650_v41, %v3369_v8  ;;  %v4587_v43 = vpop.f32.mrb[56].mxu0 }
 0x22c   : > { %v4651_v44 = vpop.f32.mrb[56].mxu1  ;;  %v4588_v45 = vpop.f32.mrb[57].mxu0 }
 0x22d   : > { %v4589_v9 = vadd.f32 %v4588_v45, %v4587_v43  ;;  %v4652_v48 = vpop.f32.mrb[57].mxu1  ;;  %v4590_v50 = vpop.f32.mrb[58].mxu0 }
 0x22e   : > { %v4653_v52 = vadd.f32 %v4652_v48, %v4651_v44  ;;  %v4654_v56 = vpop.f32.mrb[58].mxu1  ;;  %v4591_v58 = vpop.f32.mrb[59].mxu0 }
 0x22f   : > { %v3374_v21 = vadd.f32 %v4589_v9, %v6265_v37  ;;  %v4592_v59 = vadd.f32 %v4591_v58, %v4590_v50  ;;  %v4655_v60 = vpop.f32.mrb[59].mxu1 }
 0x230   : > { %v4656_v61 = vadd.f32 %v4655_v60, %v4654_v56 }
 0x231   : > { %v6310_v62 = vadd.f32 %v4653_v52, %v3374_v21  ;;  %v3377_v23 = vadd.f32 %v4592_v59, %v6267_v39 }
 0x233   : > { %v6313_v29 = vadd.f32 %v4656_v61, %v3377_v23  ;;  %v4593_v63 = vpop.f32.mrb[60].mxu0 }
 0x234   : > { %v4657_v0 = vpop.f32.mrb[60].mxu1  ;;  %v4594_v1 = vpop.f32.mrb[61].mxu0 }
 0x235   : > { %v4595_v31 = vadd.f32 %v4594_v1, %v4593_v63  ;;  %v4658_v4 = vpop.f32.mrb[61].mxu1  ;;  %v4596_v6 = vpop.f32.mrb[62].mxu0 }
 0x236   : > { %v4659_v10 = vadd.f32 %v4658_v4, %v4657_v0  ;;  %v4660_v12 = vpop.f32.mrb[62].mxu1  ;;  %v4597_v14 = vpop.f32.mrb[63].mxu0 }
 0x237   : > { %v3382_v37 = vadd.f32 %v4595_v31, %v6269_v54  ;;  %v4598_v15 = vadd.f32 %v4597_v14, %v4596_v6  ;;  %v4661_v16 = vpop.f32.mrb[63].mxu1 }
 0x238   : > { %v4662_v17 = vadd.f32 %v4661_v16, %v4660_v12 }
 0x239   : > { %v6316_v18 = vadd.f32 %v4659_v10, %v3382_v37  ;;  %v3385_v39 = vadd.f32 %v4598_v15, %v6271_v57 }
 0x23b   : > { %v6319_v53 = vadd.f32 %v4662_v17, %v3385_v39  ;;  %v4679_v19 = vpop.f32.mrb[64].mxu0 }
 0x23c   : > { %v4743_v20 = vpop.f32.mrb[64].mxu1  ;;  %v4680_v22 = vpop.f32.mrb[65].mxu0 }
 0x23d   : > { %v4681_v55 = vadd.f32 %v4680_v22, %v4679_v19  ;;  %v4744_v25 = vpop.f32.mrb[65].mxu1  ;;  %v4682_v26 = vpop.f32.mrb[66].mxu0 }
 0x23e   : > { %v4745_v27 = vadd.f32 %v4744_v25, %v4743_v20  ;;  %v4746_v51 = vpop.f32.mrb[66].mxu1  ;;  %v4683_v32 = vpop.f32.mrb[67].mxu0 }
 0x23f   : > { %v3520_v54 = vadd.f32 %v4681_v55, %v6274_v11  ;;  %v4684_v33 = vadd.f32 %v4683_v32, %v4682_v26  ;;  %v4747_v34 = vpop.f32.mrb[67].mxu1 }
 0x240   : > { %v4748_v35 = vadd.f32 %v4747_v34, %v4746_v51 }
 0x241   : > { %v6322_v36 = vadd.f32 %v4745_v27, %v3520_v54  ;;  %v3523_v57 = vadd.f32 %v4684_v33, %v6277_v13 }
 0x243   : > { %v6325_v5 = vadd.f32 %v4748_v35, %v3523_v57  ;;  %v4685_v38 = vpop.f32.mrb[68].mxu0 }
 0x244   : > { %v4749_v40 = vpop.f32.mrb[68].mxu1  ;;  %v4686_v41 = vpop.f32.mrb[69].mxu0 }
 0x245   : > { %v4687_v8 = vadd.f32 %v4686_v41, %v4685_v38  ;;  %v4750_v43 = vpop.f32.mrb[69].mxu1  ;;  %v4688_v44 = vpop.f32.mrb[70].mxu0 }
 0x246   : > { %v4751_v45 = vadd.f32 %v4750_v43, %v4749_v40  ;;  %v4752_v9 = vpop.f32.mrb[70].mxu1  ;;  %v4689_v48 = vpop.f32.mrb[71].mxu0 }
 0x247   : > { %v3528_v11 = vadd.f32 %v4687_v8, %v6280_v28  ;;  %v4690_v50 = vadd.f32 %v4689_v48, %v4688_v44  ;;  %v4753_v52 = vpop.f32.mrb[71].mxu1 }
 0x248   : > { %v4754_v56 = vadd.f32 %v4753_v52, %v4752_v9 }
 0x249   : > { %v6328_v58 = vadd.f32 %v4751_v45, %v3528_v11  ;;  %v3531_v13 = vadd.f32 %v4690_v50, %v6283_v30 }
 0x24b   : > { %v6331_v21 = vadd.f32 %v4754_v56, %v3531_v13  ;;  %v4691_v59 = vpop.f32.mrb[72].mxu0 }
 0x24c   : > { %v4755_v60 = vpop.f32.mrb[72].mxu1  ;;  %v4692_v61 = vpop.f32.mrb[73].mxu0 }
 0x24d   : > { %v4693_v23 = vadd.f32 %v4692_v61, %v4691_v59  ;;  %v4756_v63 = vpop.f32.mrb[73].mxu1  ;;  %v4694_v0 = vpop.f32.mrb[74].mxu0 }
 0x24e   : > { %v4757_v1 = vadd.f32 %v4756_v63, %v4755_v60  ;;  %v4758_v31 = vpop.f32.mrb[74].mxu1  ;;  %v4695_v4 = vpop.f32.mrb[75].mxu0 }
 0x24f   : > { %v3536_v28 = vadd.f32 %v4693_v23, %v6286_v46  ;;  %v4696_v6 = vadd.f32 %v4695_v4, %v4694_v0  ;;  %v4759_v10 = vpop.f32.mrb[75].mxu1 }
 0x250   : > { %v4760_v12 = vadd.f32 %v4759_v10, %v4758_v31 }
 0x251   : > { %v6334_v14 = vadd.f32 %v4757_v1, %v3536_v28  ;;  %v3539_v30 = vadd.f32 %v4696_v6, %v6289_v47 }
 0x253   : > { %v6337_v37 = vadd.f32 %v4760_v12, %v3539_v30  ;;  %v4697_v15 = vpop.f32.mrb[76].mxu0 }
 0x254   : > { %v4761_v16 = vpop.f32.mrb[76].mxu1  ;;  %v4698_v17 = vpop.f32.mrb[77].mxu0 }
 0x255   : > { %v4699_v39 = vadd.f32 %v4698_v17, %v4697_v15  ;;  %v4762_v19 = vpop.f32.mrb[77].mxu1  ;;  %v4700_v20 = vpop.f32.mrb[78].mxu0 }
 0x256   : > { %v4763_v22 = vadd.f32 %v4762_v19, %v4761_v16  ;;  %v4764_v55 = vpop.f32.mrb[78].mxu1  ;;  %v4701_v25 = vpop.f32.mrb[79].mxu0 }
 0x257   : > { %v3544_v46 = vadd.f32 %v4699_v39, %v6292_v2  ;;  %v4702_v26 = vadd.f32 %v4701_v25, %v4700_v20  ;;  %v4765_v27 = vpop.f32.mrb[79].mxu1 }
 0x258   : > { %v4766_v51 = vadd.f32 %v4765_v27, %v4764_v55 }
 0x259   : > { %v6340_v32 = vadd.f32 %v4763_v22, %v3544_v46  ;;  %v3547_v47 = vadd.f32 %v4702_v26, %v6295_v3 }
 0x25b   : > { %v6343_v54 = vadd.f32 %v4766_v51, %v3547_v47  ;;  %v4703_v33 = vpop.f32.mrb[80].mxu0 }
 0x25c   : > { %v4767_v34 = vpop.f32.mrb[80].mxu1  ;;  %v4704_v35 = vpop.f32.mrb[81].mxu0 }
 0x25d   : > { %v4705_v57 = vadd.f32 %v4704_v35, %v4703_v33  ;;  %v4768_v38 = vpop.f32.mrb[81].mxu1  ;;  %v4706_v40 = vpop.f32.mrb[82].mxu0 }
 0x25e   : > { %v4769_v41 = vadd.f32 %v4768_v38, %v4767_v34  ;;  %v4770_v8 = vpop.f32.mrb[82].mxu1  ;;  %v4707_v43 = vpop.f32.mrb[83].mxu0 }
 0x25f   : > { %v3552_v2 = vadd.f32 %v4705_v57, %v6298_v24  ;;  %v4708_v44 = vadd.f32 %v4707_v43, %v4706_v40  ;;  %v4771_v45 = vpop.f32.mrb[83].mxu1 }
 0x260   : > { %v4772_v9 = vadd.f32 %v4771_v45, %v4770_v8 }
 0x261   : > { %v6346_v48 = vadd.f32 %v4769_v41, %v3552_v2  ;;  %v3555_v3 = vadd.f32 %v4708_v44, %v6301_v49 }
 0x263   : > { %v6349_v11 = vadd.f32 %v4772_v9, %v3555_v3  ;;  %v4709_v50 = vpop.f32.mrb[84].mxu0 }
 0x264   : > { %v4773_v52 = vpop.f32.mrb[84].mxu1  ;;  %v4710_v56 = vpop.f32.mrb[85].mxu0 }
 0x265   : > { %v4711_v13 = vadd.f32 %v4710_v56, %v4709_v50  ;;  %v4774_v59 = vpop.f32.mrb[85].mxu1  ;;  %v4712_v60 = vpop.f32.mrb[86].mxu0 }
 0x266   : > { %v4775_v61 = vadd.f32 %v4774_v59, %v4773_v52  ;;  %v4776_v23 = vpop.f32.mrb[86].mxu1  ;;  %v4713_v63 = vpop.f32.mrb[87].mxu0 }
 0x267   : > { %v3560_v24 = vadd.f32 %v4711_v13, %v6304_v42  ;;  %v4714_v0 = vadd.f32 %v4713_v63, %v4712_v60  ;;  %v4777_v1 = vpop.f32.mrb[87].mxu1 }
 0x268   : > { %v4778_v31 = vadd.f32 %v4777_v1, %v4776_v23 }
 0x269   : > { %v6352_v4 = vadd.f32 %v4775_v61, %v3560_v24  ;;  %v3563_v49 = vadd.f32 %v4714_v0, %v6307_v7 }
 0x26b   : > { %v6355_v28 = vadd.f32 %v4778_v31, %v3563_v49  ;;  %v4715_v6 = vpop.f32.mrb[88].mxu0 }
 0x26c   : > { %v4779_v10 = vpop.f32.mrb[88].mxu1  ;;  %v4716_v12 = vpop.f32.mrb[89].mxu0 }
 0x26d   : > { %v4717_v30 = vadd.f32 %v4716_v12, %v4715_v6  ;;  %v4780_v15 = vpop.f32.mrb[89].mxu1  ;;  %v4718_v16 = vpop.f32.mrb[90].mxu0 }
 0x26e   : > { %v4781_v17 = vadd.f32 %v4780_v15, %v4779_v10  ;;  %v4782_v39 = vpop.f32.mrb[90].mxu1  ;;  %v4719_v19 = vpop.f32.mrb[91].mxu0 }
 0x26f   : > { %v3568_v42 = vadd.f32 %v4717_v30, %v6310_v62  ;;  %v4720_v20 = vadd.f32 %v4719_v19, %v4718_v16  ;;  %v4783_v22 = vpop.f32.mrb[91].mxu1 }
 0x270   : > { %v4784_v55 = vadd.f32 %v4783_v22, %v4782_v39 }
 0x271   : > { %v6358_v25 = vadd.f32 %v4781_v17, %v3568_v42  ;;  %v3571_v7 = vadd.f32 %v4720_v20, %v6313_v29 }
 0x273   : > { %v6361_v46 = vadd.f32 %v4784_v55, %v3571_v7  ;;  %v4721_v26 = vpop.f32.mrb[92].mxu0 }
 0x274   : > { %v4785_v27 = vpop.f32.mrb[92].mxu1  ;;  %v4722_v51 = vpop.f32.mrb[93].mxu0 }
 0x275   : > { %v4723_v47 = vadd.f32 %v4722_v51, %v4721_v26  ;;  %v4786_v33 = vpop.f32.mrb[93].mxu1  ;;  %v4724_v34 = vpop.f32.mrb[94].mxu0 }
 0x276   : > { %v4787_v35 = vadd.f32 %v4786_v33, %v4785_v27  ;;  %v4788_v57 = vpop.f32.mrb[94].mxu1  ;;  %v4725_v38 = vpop.f32.mrb[95].mxu0 }
 0x277   : > { %v3576_v62 = vadd.f32 %v4723_v47, %v6316_v18  ;;  %v4726_v40 = vadd.f32 %v4725_v38, %v4724_v34  ;;  %v4789_v41 = vpop.f32.mrb[95].mxu1 }
 0x278   : > { %v4790_v8 = vadd.f32 %v4789_v41, %v4788_v57 }
 0x279   : > { %v6364_v43 = vadd.f32 %v4787_v35, %v3576_v62  ;;  %v3579_v29 = vadd.f32 %v4726_v40, %v6319_v53 }
 0x27b   : > { %v6367_v2 = vadd.f32 %v4790_v8, %v3579_v29  ;;  %v4807_v44 = vpop.f32.mrb[96].mxu0 }
 0x27c   : > { %v4871_v45 = vpop.f32.mrb[96].mxu1  ;;  %v4808_v9 = vpop.f32.mrb[97].mxu0 }
 0x27d   : > { %v4809_v3 = vadd.f32 %v4808_v9, %v4807_v44  ;;  %v4872_v50 = vpop.f32.mrb[97].mxu1  ;;  %v4810_v52 = vpop.f32.mrb[98].mxu0 }
 0x27e   : > { %v4873_v56 = vadd.f32 %v4872_v50, %v4871_v45  ;;  %v4874_v13 = vpop.f32.mrb[98].mxu1  ;;  %v4811_v18 = vpop.f32.mrb[99].mxu0 }
 0x27f   : > { %v3714_v59 = vadd.f32 %v4809_v3, %v6322_v36  ;;  %v4812_v60 = vadd.f32 %v4811_v18, %v4810_v52  ;;  %v4875_v61 = vpop.f32.mrb[99].mxu1 }
 0x280   : > { %v4876_v23 = vadd.f32 %v4875_v61, %v4874_v13 }
 0x281   : > { %v3811_v63 = vadd.f32 %v4873_v56, %v3714_v59  ;;  %v3717_v53 = vadd.f32 %v4812_v60, %v6325_v5 }
 0x283   : > { %3924 = vst [vmem:[%s6373_s29] sm:$0xff] %v3811_v63  ;;  %v3814_v24 = vadd.f32 %v4876_v23, %v3717_v53  ;;  %v4813_v0 = vpop.f32.mrb[100].mxu0 }
 0x284   : > { %v4877_v1 = vpop.f32.mrb[100].mxu1  ;;  %v4814_v31 = vpop.f32.mrb[101].mxu0 }
 0x285   : > { %3925 = vst [vmem:[%s6373_s29 + $0x8] sm:$0xff] %v3814_v24  ;;  %v4815_v49 = vadd.f32 %v4814_v31, %v4813_v0  ;;  %v4878_v6 = vpop.f32.mrb[101].mxu1  ;;  %v4816_v36 = vpop.f32.mrb[102].mxu0 }
 0x286   : > { %v4879_v10 = vadd.f32 %v4878_v6, %v4877_v1  ;;  %v4880_v12 = vpop.f32.mrb[102].mxu1  ;;  %v4817_v30 = vpop.f32.mrb[103].mxu0 }
 0x287   : > { %v3722_v5 = vadd.f32 %v4815_v49, %v6328_v58  ;;  %v4818_v15 = vadd.f32 %v4817_v30, %v4816_v36  ;;  %v4881_v16 = vpop.f32.mrb[103].mxu1 }
 0x288   : > { %v4882_v17 = vadd.f32 %v4881_v16, %v4880_v12 }
 0x289   : > { %v3819_v39 = vadd.f32 %v4879_v10, %v3722_v5  ;;  %v3725_v19 = vadd.f32 %v4818_v15, %v6331_v21 }
 0x28b   : > { %3926 = vst [vmem:[%s6373_s29 + $0x10] sm:$0xff] %v3819_v39  ;;  %v3822_v42 = vadd.f32 %v4882_v17, %v3725_v19  ;;  %v4819_v20 = vpop.f32.mrb[104].mxu0 }
 0x28c   : > { %v4883_v22 = vpop.f32.mrb[104].mxu1  ;;  %v4820_v55 = vpop.f32.mrb[105].mxu0 }
 0x28d   : > { %3927 = vst [vmem:[%s6373_s29 + $0x18] sm:$0xff] %v3822_v42  ;;  %v4821_v7 = vadd.f32 %v4820_v55, %v4819_v20  ;;  %v4884_v26 = vpop.f32.mrb[105].mxu1  ;;  %v4822_v27 = vpop.f32.mrb[106].mxu0 }
 0x28e   : > { %v4885_v51 = vadd.f32 %v4884_v26, %v4883_v22  ;;  %v4886_v47 = vpop.f32.mrb[106].mxu1  ;;  %v4823_v58 = vpop.f32.mrb[107].mxu0 }
 0x28f   : > { %v3730_v33 = vadd.f32 %v4821_v7, %v6334_v14  ;;  %v4824_v34 = vadd.f32 %v4823_v58, %v4822_v27  ;;  %v4887_v35 = vpop.f32.mrb[107].mxu1 }
 0x290   : > { %v4888_v57 = vadd.f32 %v4887_v35, %v4886_v47 }
 0x291   : > { %v3827_v21 = vadd.f32 %v4885_v51, %v3730_v33  ;;  %v3733_v38 = vadd.f32 %v4824_v34, %v6337_v37 }
 0x293   : > { %3928 = vst [vmem:[%s6373_s29 + $0x20] sm:$0xff] %v3827_v21  ;;  %v3830_v62 = vadd.f32 %v4888_v57, %v3733_v38  ;;  %v4825_v40 = vpop.f32.mrb[108].mxu0 }
 0x294   : > { %v4889_v41 = vpop.f32.mrb[108].mxu1  ;;  %v4826_v8 = vpop.f32.mrb[109].mxu0 }
 0x295   : > { %3929 = vst [vmem:[%s6373_s29 + $0x28] sm:$0xff] %v3830_v62  ;;  %v4827_v29 = vadd.f32 %v4826_v8, %v4825_v40  ;;  %v4890_v44 = vpop.f32.mrb[109].mxu1  ;;  %v4828_v45 = vpop.f32.mrb[110].mxu0 }
 0x296   : > { %v4891_v9 = vadd.f32 %v4890_v44, %v4889_v41  ;;  %v4892_v3 = vpop.f32.mrb[110].mxu1  ;;  %v4829_v14 = vpop.f32.mrb[111].mxu0 }
 0x297   : > { %v3738_v50 = vadd.f32 %v4827_v29, %v6340_v32  ;;  %v4830_v52 = vadd.f32 %v4829_v14, %v4828_v45  ;;  %v4893_v56 = vpop.f32.mrb[111].mxu1 }
 0x298   : > { %v4894_v13 = vadd.f32 %v4893_v56, %v4892_v3 }
 0x299   : > { %v3835_v37 = vadd.f32 %v4891_v9, %v3738_v50  ;;  %v3741_v18 = vadd.f32 %v4830_v52, %v6343_v54 }
 0x29b   : > { %3930 = vst [vmem:[%s6373_s29 + $0x30] sm:$0xff] %v3835_v37  ;;  %v3838_v59 = vadd.f32 %v4894_v13, %v3741_v18  ;;  %v4831_v60 = vpop.f32.mrb[112].mxu0 }
 0x29c   : > { %v4895_v61 = vpop.f32.mrb[112].mxu1  ;;  %v4832_v23 = vpop.f32.mrb[113].mxu0 }
 0x29d   : > { %3931 = vst [vmem:[%s6373_s29 + $0x38] sm:$0xff] %v3838_v59  ;;  %v4833_v63 = vadd.f32 %v4832_v23, %v4831_v60  ;;  %v4896_v53 = vpop.f32.mrb[113].mxu1  ;;  %v4834_v24 = vpop.f32.mrb[114].mxu0  ;;  %v4011_v23 = vld [vmem:[%s6373_s29 + $0x8] sm:$0xff] (%p5177_p6) }
 0x29e   : > { %v4897_v0 = vadd.f32 %v4896_v53, %v4895_v61  ;;  %v4898_v1 = vpop.f32.mrb[114].mxu1  ;;  %v4835_v32 = vpop.f32.mrb[115].mxu0  ;;  %v4017_v53 = vld [vmem:[%s6373_s29 + $0x20] sm:$0xff] (%p5177_p6)  ;;  %4012 = vst [vmem:[%s3951_s3 + $0x10] sm:$0xff] (%p5177_p6), %v4011_v23 }
 0x29f   : > { %v3746_v31 = vadd.f32 %v4833_v63, %v6346_v48  ;;  %v4836_v49 = vadd.f32 %v4835_v32, %v4834_v24  ;;  %v4899_v6 = vpop.f32.mrb[115].mxu1  ;;  %v4015_v63 = vld [vmem:[%s6373_s29 + $0x18] sm:$0xff] (%p5177_p6)  ;;  %v4019_v24 = vld [vmem:[%s6373_s29 + $0x28] sm:$0xff] (%p5177_p6)  ;;  %4018 = vst [vmem:[%s3951_s3 + $0x40] sm:$0xff] (%p5177_p6), %v4017_v53 }
 0x2a0   : > { %v4900_v36 = vadd.f32 %v4899_v6, %v4898_v1  ;;  %4016 = vst [vmem:[%s3951_s3 + $0x30] sm:$0xff] (%p5177_p6), %v4015_v63  ;;  %4020 = vst [vmem:[%s3951_s3 + $0x50] sm:$0xff] (%p5177_p6), %v4019_v24 }
 0x2a1   : > { %v3843_v54 = vadd.f32 %v4897_v0, %v3746_v31  ;;  %v3749_v10 = vadd.f32 %v4836_v49, %v6349_v11 }
 0x2a2   : > { %v4021_v0 = vld [vmem:[%s6373_s29 + $0x30] sm:$0xff] (%p5177_p6) }
 0x2a3   : > { %3932 = vst [vmem:[%s6373_s29 + $0x40] sm:$0xff] %v3843_v54  ;;  %v3846_v12 = vadd.f32 %v4900_v36, %v3749_v10  ;;  %v4837_v30 = vpop.f32.mrb[116].mxu0  ;;  %4022 = vst [vmem:[%s3951_s3 + $0x60] sm:$0xff] (%p5177_p6), %v4021_v0 }
 0x2a4   : > { %v4901_v5 = vpop.f32.mrb[116].mxu1  ;;  %v4838_v15 = vpop.f32.mrb[117].mxu0  ;;  %v4023_v1 = vld [vmem:[%s6373_s29 + $0x38] sm:$0xff] (%p5177_p6) }
 0x2a5   : > { %3933 = vst [vmem:[%s6373_s29 + $0x48] sm:$0xff] %v3846_v12  ;;  %v4839_v16 = vadd.f32 %v4838_v15, %v4837_v30  ;;  %v4902_v17 = vpop.f32.mrb[117].mxu1  ;;  %v4840_v39 = vpop.f32.mrb[118].mxu0  ;;  %4024 = vst [vmem:[%s3951_s3 + $0x70] sm:$0xff] (%p5177_p6), %v4023_v1 }
 0x2a6   : > { %v4903_v19 = vadd.f32 %v4902_v17, %v4901_v5  ;;  %v4904_v42 = vpop.f32.mrb[118].mxu1  ;;  %v4841_v48 = vpop.f32.mrb[119].mxu0 }
 0x2a7   : > { %v3754_v20 = vadd.f32 %v4839_v16, %v6352_v4  ;;  %v4842_v22 = vadd.f32 %v4841_v48, %v4840_v39  ;;  %v4905_v55 = vpop.f32.mrb[119].mxu1 }
 0x2a8   : > { %v4906_v7 = vadd.f32 %v4905_v55, %v4904_v42 }
 0x2a9   : > { %v3851_v11 = vadd.f32 %v4903_v19, %v3754_v20  ;;  %v3757_v26 = vadd.f32 %v4842_v22, %v6355_v28 }
 0x2aa   : > { %v4025_v32 = vld [vmem:[%s6373_s29 + $0x40] sm:$0xff] (%p5177_p6) }
 0x2ab   : > { %3934 = vst [vmem:[%s6373_s29 + $0x50] sm:$0xff] %v3851_v11  ;;  %v3854_v27 = vadd.f32 %v4906_v7, %v3757_v26  ;;  %v4843_v51 = vpop.f32.mrb[120].mxu0  ;;  %4026 = vst [vmem:[%s3951_s3 + $0x80] sm:$0xff] (%p5177_p6), %v4025_v32 }
 0x2ac   : > { %v4907_v47 = vpop.f32.mrb[120].mxu1  ;;  %v4844_v58 = vpop.f32.mrb[121].mxu0  ;;  %v4027_v31 = vld [vmem:[%s6373_s29 + $0x48] sm:$0xff] (%p5177_p6) }
 0x2ad   : > { %3935 = vst [vmem:[%s6373_s29 + $0x58] sm:$0xff] %v3854_v27  ;;  %v4845_v33 = vadd.f32 %v4844_v58, %v4843_v51  ;;  %v4908_v34 = vpop.f32.mrb[121].mxu1  ;;  %v4846_v35 = vpop.f32.mrb[122].mxu0  ;;  %4028 = vst [vmem:[%s3951_s3 + $0x90] sm:$0xff] (%p5177_p6), %v4027_v31 }
 0x2ae   : > { %v4909_v57 = vadd.f32 %v4908_v34, %v4907_v47  ;;  %v4910_v21 = vpop.f32.mrb[122].mxu1  ;;  %v4847_v4 = vpop.f32.mrb[123].mxu0 }
 0x2af   : > { %v3762_v38 = vadd.f32 %v4845_v33, %v6358_v25  ;;  %v4848_v62 = vadd.f32 %v4847_v4, %v4846_v35  ;;  %v4911_v40 = vpop.f32.mrb[123].mxu1 }
 0x2b0   : > { %v4912_v41 = vadd.f32 %v4911_v40, %v4910_v21 }
 0x2b1   : > { %v3859_v28 = vadd.f32 %v4909_v57, %v3762_v38  ;;  %v3765_v8 = vadd.f32 %v4848_v62, %v6361_v46 }
 0x2b2   : > { %v4029_v49 = vld [vmem:[%s6373_s29 + $0x50] sm:$0xff] (%p5177_p6) }
 0x2b3   : > { %3936 = vst [vmem:[%s6373_s29 + $0x60] sm:$0xff] %v3859_v28  ;;  %v3862_v29 = vadd.f32 %v4912_v41, %v3765_v8  ;;  %v4849_v44 = vpop.f32.mrb[124].mxu0  ;;  %4030 = vst [vmem:[%s3951_s3 + $0xa0] sm:$0xff] (%p5177_p6), %v4029_v49 }
 0x2b4   : > { %v4913_v45 = vpop.f32.mrb[124].mxu1  ;;  %v4850_v9 = vpop.f32.mrb[125].mxu0  ;;  %v4031_v6 = vld [vmem:[%s6373_s29 + $0x58] sm:$0xff] (%p5177_p6) }
 0x2b5   : > { %3937 = vst [vmem:[%s6373_s29 + $0x68] sm:$0xff] %v3862_v29  ;;  %v4851_v3 = vadd.f32 %v4850_v9, %v4849_v44  ;;  %v4914_v14 = vpop.f32.mrb[125].mxu1  ;;  %v4852_v50 = vpop.f32.mrb[126].mxu0  ;;  %4032 = vst [vmem:[%s3951_s3 + $0xb0] sm:$0xff] (%p5177_p6), %v4031_v6 }
 0x2b6   : > { %v4915_v52 = vadd.f32 %v4914_v14, %v4913_v45  ;;  %v4916_v56 = vpop.f32.mrb[126].mxu1  ;;  %v4853_v25 = vpop.f32.mrb[127].mxu0 }
 0x2b7   : > { %v3770_v13 = vadd.f32 %v4851_v3, %v6364_v43  ;;  %v4854_v37 = vadd.f32 %v4853_v25, %v4852_v50  ;;  %v4917_v18 = vpop.f32.mrb[127].mxu1  ;;  %3946 = sbr.rel (!%p5177_p6) target bundleno = 710 (0x2c6), region = 81  ;;  %v4009_v43 = vld [vmem:[%s6373_s29] sm:$0xff] (%p5177_p6) }
 0x2b8   : > { %v4918_v59 = vadd.f32 %v4917_v18, %v4916_v56  ;;  %4010 = vst [vmem:[%s3951_s3] sm:$0xff] (%p5177_p6), %v4009_v43 }
 0x2b9   : > { %v3867_v46 = vadd.f32 %v4915_v52, %v3770_v13  ;;  %v3773_v60 = vadd.f32 %v4854_v37, %v6367_v2  ;;  %v4013_v2 = vld [vmem:[%s6373_s29 + $0x10] sm:$0xff] (%p5177_p6) }
 0x2ba   : > { %4014 = vst [vmem:[%s3951_s3 + $0x20] sm:$0xff] (%p5177_p6), %v4013_v2  ;;  %v4033_v36 = vld [vmem:[%s6373_s29 + $0x60] sm:$0xff] (%p5177_p6) }
 0x2bb   : > { %3938 = vst [vmem:[%s6373_s29 + $0x70] sm:$0xff] %v3867_v46  ;;  %v3870_v61 = vadd.f32 %v4918_v59, %v3773_v60  ;;  %4034 = vst [vmem:[%s3951_s3 + $0xc0] sm:$0xff] (%p5177_p6), %v4033_v36 }
 0x2bc   : > { %v4035_v54 = vld [vmem:[%s6373_s29 + $0x68] sm:$0xff] (%p5177_p6) }
 0x2bd   : > { %3939 = vst [vmem:[%s6373_s29 + $0x78] sm:$0xff] %v3870_v61  ;;  %4036 = vst [vmem:[%s3951_s3 + $0xd0] sm:$0xff] (%p5177_p6), %v4035_v54 }
 0x2c2   : > { %v4037_v10 = vld [vmem:[%s6373_s29 + $0x70] sm:$0xff] }
 0x2c3   : > { %4038 = vst [vmem:[%s3951_s3 + $0xe0] sm:$0xff] %v4037_v10 }
 0x2c4   : > { %v4039_v12 = vld [vmem:[%s6373_s29 + $0x78] sm:$0xff] }
 0x2c5   : > { %4040 = vst [vmem:[%s3951_s3 + $0xf0] sm:$0xff] %v4039_v12 }
 0x2c6 PF: > { %s12_s13 = sadd.s32 1, %s5125_s13   ;;  %s6446_s9 = smov %s5113_s10 }
 0x2c7   : > { %p9_p11 = scmp.ge.s32.totalorder %s12_s13, 4   ;;  %s6447_s10 = smov %s5182_s19 }
 0x2c8   : > { %s6448_s11 = smov %s5121_s12  ;;  %s6449_s12 = smov %s6451_s14 }
 0x2c9   :  { %11 = sbr.rel (!%p9_p11) target bundleno = 3 (0x3), region = 153 }

// kernel: ms_encoder_forward.17
= control target key start
LH: loop header
LB: loop body
LE: loop exit
PB: predicated region body
PF: predicated region fallthrough
CT: control target
= control target key end

     0   :  { %s3430_s0 = inlined_call_operand.vmem [shape: bf16[2,64,256], index: 0, kind: input, shape index: {}]   ;;  %s3431_s1 = inlined_call_operand.vmem [shape: bf16[2,64,256], index: 1, kind: input, shape index: {}]   ;;  %s3432_s2 = inlined_call_operand.vmem [shape: bf16[2,64,256], index: 2, kind: input, shape index: {}]   ;;  %s3433_s3 = inlined_call_operand.vmem [shape: bf16[2,64,256], index: 3, kind: input, shape index: {}]   ;;  %s3434_s4 = inlined_call_operand.vmem [shape: bf16[4,256,384], index: 4, kind: input, shape index: {}]   ;;  %s3435_s5 = inlined_call_operand.vmem [shape: f32[2,1,384], index: 5, kind: input, shape index: {}]   ;;  %s3436_s6 = inlined_call_operand.hbm [shape: f32[2,64,384], index: 6, kind: output, shape index: {}]  }
   0x1   :  { %3437 = sst [smem:[#allocation6_spill]] %s3430_s0 }
   0x2   :  { %11 = vsyncpa [#allocation4], 0 }
   0x3   :  { %13 = vsyncpa [#allocation4 + $0x1], 0  ;;  %s2820_s21 = smov 0   ;;  %s2822_s22 = smov 0  }
   0x4   :  { %s2824_s23 = smov 0   ;;  %s2826_s24 = smov 0  }
   0x5   :  { %s2828_s25 = smov 0   ;;  %s2830_s26 = smov 0  }
   0x6   :  { %s2832_s27 = smov 0   ;;  %s2834_s28 = smov 0  }
   0x7   :  { %s2836_s29 = smov 0   ;;  %s2838_s30 = smov 0  }
   0x8 LB: > { %s2087_s7 = sadd.s32 4294967295, %s2779_s30   ;;  %s2088_s8 = sadd.s32 4294967294, %s2779_s30   ;;  %s2779_s30 = sphi %s2838_s30, %s19_s30   ;;  %s2775_s29 = sphi %s2836_s29, %s3450_s29   ;;  %s2771_s28 = sphi %s2834_s28, %s3449_s28   ;;  %s2767_s27 = sphi %s2832_s27, %s3448_s27   ;;  %s2763_s26 = sphi %s2830_s26, %s3447_s26   ;;  %s2759_s25 = sphi %s2828_s25, %s3446_s25   ;;  %s2755_s24 = sphi %s2826_s24, %s3445_s24   ;;  %s2751_s23 = sphi %s2824_s23, %s3444_s23   ;;  %s2747_s22 = sphi %s2822_s22, %s3443_s22   ;;  %s2743_s21 = sphi %s2820_s21, %s3442_s21  }
   0x9   : > { %s28_s9 = sadd.s32 1, %s2771_s28  ;;  %s31_s10 = sadd.s32 1, %s2775_s29 }
   0xa   : > { %p29_p0 = scmp.ge.s32.totalorder %s28_s9, 3  ;;  %s142_s11 = sadd.s32 1, %s2759_s25 }
   0xb   : > { %p149_p1 = scmp.ne.s32.totalorder %s2759_s25, %s2755_s24  ;;  %p150_p2 = scmp.eq.s32.totalorder %s2779_s30, 0 }
   0xc   : > { %s3452_s9 = smov (%p29_p0, %s28_s9), 0  ;;  %s3454_s10 = smov (!%p29_p0, %s31_s10), %s2775_s29 }
   0xd   : > { %s139_s12 = ssub.s32 %s2771_s28, %s3452_s9  ;;  %p2883_p3 = por %p150_p2, %p149_p1 }
   0xe   : > { %p33_p4 = scmp.ge.s32.totalorder %s3454_s10, 2  ;;  %p140_p5 = scmp.eq.s32.totalorder %s139_s12, 0 }
   0xf   : > { %s198_s14 = sadd.s32 1, %s2751_s23  ;;  %p208_p6 = scmp.ne.s32.totalorder %s2751_s23, %s2747_s22 }
  0x10   : > { %s3456_s10 = smov (%p33_p4, %s3454_s10), 0  ;;  %p209_p7 = scmp.eq.s32.totalorder %s2087_s7, 5 }
  0x11   : > { %s2893_s15 = scalar_select %p140_p5, %s2759_s25, %s142_s11  }
  0x12   : > { %s193_s16 = ssub.s32 %s2775_s29, %s3456_s10  ;;  %p214_p8 = scmp.ne.s32.totalorder %s2747_s22, %s2743_s21 }
  0x13   : > { %s195_s17 = sor.u32 %s193_s16, %s139_s12  ;;  %p2899_p10 = por %p209_p7, %p208_p6 }
  0x14   : > { %p196_p9 = scmp.eq.s32.totalorder %s195_s17, 0  ;;  %p215_p11 = scmp.eq.s32.totalorder %s2088_s8, 5 }
  0x15   : > { %p2090_p13 = scmp.ge.s32.totalorder %s2779_s30, 6 }
  0x16   : > { %s2904_s19 = scalar_select %p196_p9, %s2751_s23, %s198_s14  }
  0x17   : > { %p2906_p12 = por %p215_p11, %p214_p8  ;;  %231 = sbr.rel (%p2090_p13) target bundleno = 119 (0x77), region = 16 }
  0x1e   : > { %266 = sbr.rel (!%p2883_p3) target bundleno = 119 (0x77), region = 36  ;;  %s268_s7 = sand.u32 (%p2883_p3), 1, %s2759_s25  }
  0x1f   : > { %s2092_s11 = sshll.u32 (%p2883_p3), %s2771_s28, 2  ;;  %s2091_s12 = sshll.u32 (%p2883_p3), %s268_s7, 9 }
  0x20   : > { %s2918_s8 = scalar_lea.vmem (%p2883_p3), %s3434_s4, %s2092_s11  ;;  %s2922_s13 = scalar_lea.vmem (%p2883_p3), [#allocation2], %s2091_s12 }
  0x21   : > { %v288_v0 = vld [vmem:[%s2918_s8] sm:$0xf] (%p2883_p3)  ;;  %v290_v1 = vld [vmem:[%s2918_s8 + $0xc] sm:$0xf] (%p2883_p3)  ;;  %v292_v2 = vld [vmem:[%s2918_s8 + $0x18] sm:$0xf] (%p2883_p3) }
  0x22   : > { %289 = vst [vmem:[%s2922_s13] sm:$0xf] (%p2883_p3), %v288_v0  ;;  %291 = vst [vmem:[%s2922_s13 + $0x4] sm:$0xf] (%p2883_p3), %v290_v1  ;;  %v294_v3 = vld [vmem:[%s2918_s8 + $0x24] sm:$0xf] (%p2883_p3) }
  0x23   : > { %v296_v4 = vld [vmem:[%s2918_s8 + $0x30] sm:$0xf] (%p2883_p3)  ;;  %293 = vst [vmem:[%s2922_s13 + $0x8] sm:$0xf] (%p2883_p3), %v292_v2  ;;  %295 = vst [vmem:[%s2922_s13 + $0xc] sm:$0xf] (%p2883_p3), %v294_v3 }
  0x24   : > { %297 = vst [vmem:[%s2922_s13 + $0x10] sm:$0xf] (%p2883_p3), %v296_v4  ;;  %v298_v5 = vld [vmem:[%s2918_s8 + $0x3c] sm:$0xf] (%p2883_p3)  ;;  %v300_v6 = vld [vmem:[%s2918_s8 + $0x48] sm:$0xf] (%p2883_p3) }
  0x25   : > { %v302_v7 = vld [vmem:[%s2918_s8 + $0x54] sm:$0xf]  ;;  %299 = vst [vmem:[%s2922_s13 + $0x14] sm:$0xf] %v298_v5  ;;  %301 = vst [vmem:[%s2922_s13 + $0x18] sm:$0xf] %v300_v6 }
  0x26   : > { %303 = vst [vmem:[%s2922_s13 + $0x1c] sm:$0xf] %v302_v7  ;;  %v304_v8 = vld [vmem:[%s2918_s8 + $0x60] sm:$0xf]  ;;  %v306_v9 = vld [vmem:[%s2918_s8 + $0x6c] sm:$0xf] }
  0x27   : > { %v308_v10 = vld [vmem:[%s2918_s8 + $0x78] sm:$0xf]  ;;  %305 = vst [vmem:[%s2922_s13 + $0x20] sm:$0xf] %v304_v8  ;;  %307 = vst [vmem:[%s2922_s13 + $0x24] sm:$0xf] %v306_v9 }
  0x28   : > { %309 = vst [vmem:[%s2922_s13 + $0x28] sm:$0xf] %v308_v10  ;;  %v310_v11 = vld [vmem:[%s2918_s8 + $0x84] sm:$0xf]  ;;  %v312_v12 = vld [vmem:[%s2918_s8 + $0x90] sm:$0xf] }
  0x29   : > { %v314_v13 = vld [vmem:[%s2918_s8 + $0x9c] sm:$0xf]  ;;  %311 = vst [vmem:[%s2922_s13 + $0x2c] sm:$0xf] %v310_v11  ;;  %313 = vst [vmem:[%s2922_s13 + $0x30] sm:$0xf] %v312_v12 }
  0x2a   : > { %315 = vst [vmem:[%s2922_s13 + $0x34] sm:$0xf] %v314_v13  ;;  %v316_v14 = vld [vmem:[%s2918_s8 + $0xa8] sm:$0xf]  ;;  %v318_v15 = vld [vmem:[%s2918_s8 + $0xb4] sm:$0xf] }
  0x2b   : > { %v320_v16 = vld [vmem:[%s2918_s8 + $0xc0] sm:$0xf]  ;;  %317 = vst [vmem:[%s2922_s13 + $0x38] sm:$0xf] %v316_v14  ;;  %319 = vst [vmem:[%s2922_s13 + $0x3c] sm:$0xf] %v318_v15 }
  0x2c   : > { %321 = vst [vmem:[%s2922_s13 + $0x40] sm:$0xf] %v320_v16  ;;  %v322_v17 = vld [vmem:[%s2918_s8 + $0xcc] sm:$0xf]  ;;  %v324_v18 = vld [vmem:[%s2918_s8 + $0xd8] sm:$0xf] }
  0x2d   : > { %v326_v19 = vld [vmem:[%s2918_s8 + $0xe4] sm:$0xf]  ;;  %323 = vst [vmem:[%s2922_s13 + $0x44] sm:$0xf] %v322_v17  ;;  %325 = vst [vmem:[%s2922_s13 + $0x48] sm:$0xf] %v324_v18 }
  0x2e   : > { %327 = vst [vmem:[%s2922_s13 + $0x4c] sm:$0xf] %v326_v19  ;;  %v328_v20 = vld [vmem:[%s2918_s8 + $0xf0] sm:$0xf]  ;;  %v330_v21 = vld [vmem:[%s2918_s8 + $0xfc] sm:$0xf] }
  0x2f   : > { %v332_v22 = vld [vmem:[%s2918_s8 + $0x108] sm:$0xf]  ;;  %329 = vst [vmem:[%s2922_s13 + $0x50] sm:$0xf] %v328_v20  ;;  %331 = vst [vmem:[%s2922_s13 + $0x54] sm:$0xf] %v330_v21 }
  0x30   : > { %333 = vst [vmem:[%s2922_s13 + $0x58] sm:$0xf] %v332_v22  ;;  %v334_v23 = vld [vmem:[%s2918_s8 + $0x114] sm:$0xf]  ;;  %v336_v24 = vld [vmem:[%s2918_s8 + $0x120] sm:$0xf] }
  0x31   : > { %v338_v25 = vld [vmem:[%s2918_s8 + $0x12c] sm:$0xf]  ;;  %335 = vst [vmem:[%s2922_s13 + $0x5c] sm:$0xf] %v334_v23  ;;  %337 = vst [vmem:[%s2922_s13 + $0x60] sm:$0xf] %v336_v24 }
  0x32   : > { %339 = vst [vmem:[%s2922_s13 + $0x64] sm:$0xf] %v338_v25  ;;  %v340_v26 = vld [vmem:[%s2918_s8 + $0x138] sm:$0xf]  ;;  %v342_v27 = vld [vmem:[%s2918_s8 + $0x144] sm:$0xf] }
  0x33   : > { %v344_v28 = vld [vmem:[%s2918_s8 + $0x150] sm:$0xf]  ;;  %341 = vst [vmem:[%s2922_s13 + $0x68] sm:$0xf] %v340_v26  ;;  %343 = vst [vmem:[%s2922_s13 + $0x6c] sm:$0xf] %v342_v27 }
  0x34   : > { %345 = vst [vmem:[%s2922_s13 + $0x70] sm:$0xf] %v344_v28  ;;  %v346_v29 = vld [vmem:[%s2918_s8 + $0x15c] sm:$0xf]  ;;  %v348_v30 = vld [vmem:[%s2918_s8 + $0x168] sm:$0xf] }
  0x35   : > { %v350_v31 = vld [vmem:[%s2918_s8 + $0x174] sm:$0xf]  ;;  %347 = vst [vmem:[%s2922_s13 + $0x74] sm:$0xf] %v346_v29  ;;  %349 = vst [vmem:[%s2922_s13 + $0x78] sm:$0xf] %v348_v30 }
  0x36   : > { %351 = vst [vmem:[%s2922_s13 + $0x7c] sm:$0xf] %v350_v31  ;;  %v352_v32 = vld [vmem:[%s2918_s8 + $0x180] sm:$0xf]  ;;  %v354_v33 = vld [vmem:[%s2918_s8 + $0x18c] sm:$0xf] }
  0x37   : > { %v356_v34 = vld [vmem:[%s2918_s8 + $0x198] sm:$0xf]  ;;  %353 = vst [vmem:[%s2922_s13 + $0x80] sm:$0xf] %v352_v32  ;;  %355 = vst [vmem:[%s2922_s13 + $0x84] sm:$0xf] %v354_v33 }
  0x38   : > { %357 = vst [vmem:[%s2922_s13 + $0x88] sm:$0xf] %v356_v34  ;;  %v358_v35 = vld [vmem:[%s2918_s8 + $0x1a4] sm:$0xf]  ;;  %v360_v36 = vld [vmem:[%s2918_s8 + $0x1b0] sm:$0xf] }
  0x39   : > { %v362_v37 = vld [vmem:[%s2918_s8 + $0x1bc] sm:$0xf]  ;;  %359 = vst [vmem:[%s2922_s13 + $0x8c] sm:$0xf] %v358_v35  ;;  %361 = vst [vmem:[%s2922_s13 + $0x90] sm:$0xf] %v360_v36 }
  0x3a   : > { %363 = vst [vmem:[%s2922_s13 + $0x94] sm:$0xf] %v362_v37  ;;  %v364_v38 = vld [vmem:[%s2918_s8 + $0x1c8] sm:$0xf]  ;;  %v366_v39 = vld [vmem:[%s2918_s8 + $0x1d4] sm:$0xf] }
  0x3b   : > { %v368_v40 = vld [vmem:[%s2918_s8 + $0x1e0] sm:$0xf]  ;;  %365 = vst [vmem:[%s2922_s13 + $0x98] sm:$0xf] %v364_v38  ;;  %367 = vst [vmem:[%s2922_s13 + $0x9c] sm:$0xf] %v366_v39 }
  0x3c   : > { %369 = vst [vmem:[%s2922_s13 + $0xa0] sm:$0xf] %v368_v40  ;;  %v370_v41 = vld [vmem:[%s2918_s8 + $0x1ec] sm:$0xf]  ;;  %v372_v42 = vld [vmem:[%s2918_s8 + $0x1f8] sm:$0xf] }
  0x3d   : > { %v374_v43 = vld [vmem:[%s2918_s8 + $0x204] sm:$0xf]  ;;  %371 = vst [vmem:[%s2922_s13 + $0xa4] sm:$0xf] %v370_v41  ;;  %373 = vst [vmem:[%s2922_s13 + $0xa8] sm:$0xf] %v372_v42 }
  0x3e   : > { %375 = vst [vmem:[%s2922_s13 + $0xac] sm:$0xf] %v374_v43  ;;  %v376_v44 = vld [vmem:[%s2918_s8 + $0x210] sm:$0xf]  ;;  %v378_v45 = vld [vmem:[%s2918_s8 + $0x21c] sm:$0xf] }
  0x3f   : > { %v380_v46 = vld [vmem:[%s2918_s8 + $0x228] sm:$0xf]  ;;  %377 = vst [vmem:[%s2922_s13 + $0xb0] sm:$0xf] %v376_v44  ;;  %379 = vst [vmem:[%s2922_s13 + $0xb4] sm:$0xf] %v378_v45 }
  0x40   : > { %381 = vst [vmem:[%s2922_s13 + $0xb8] sm:$0xf] %v380_v46  ;;  %v382_v47 = vld [vmem:[%s2918_s8 + $0x234] sm:$0xf]  ;;  %v384_v48 = vld [vmem:[%s2918_s8 + $0x240] sm:$0xf] }
  0x41   : > { %v386_v49 = vld [vmem:[%s2918_s8 + $0x24c] sm:$0xf]  ;;  %383 = vst [vmem:[%s2922_s13 + $0xbc] sm:$0xf] %v382_v47  ;;  %385 = vst [vmem:[%s2922_s13 + $0xc0] sm:$0xf] %v384_v48 }
  0x42   : > { %387 = vst [vmem:[%s2922_s13 + $0xc4] sm:$0xf] %v386_v49  ;;  %v388_v50 = vld [vmem:[%s2918_s8 + $0x258] sm:$0xf]  ;;  %v390_v51 = vld [vmem:[%s2918_s8 + $0x264] sm:$0xf] }
  0x43   : > { %v392_v52 = vld [vmem:[%s2918_s8 + $0x270] sm:$0xf]  ;;  %389 = vst [vmem:[%s2922_s13 + $0xc8] sm:$0xf] %v388_v50  ;;  %391 = vst [vmem:[%s2922_s13 + $0xcc] sm:$0xf] %v390_v51 }
  0x44   : > { %393 = vst [vmem:[%s2922_s13 + $0xd0] sm:$0xf] %v392_v52  ;;  %v394_v53 = vld [vmem:[%s2918_s8 + $0x27c] sm:$0xf]  ;;  %v396_v54 = vld [vmem:[%s2918_s8 + $0x288] sm:$0xf] }
  0x45   : > { %v398_v55 = vld [vmem:[%s2918_s8 + $0x294] sm:$0xf]  ;;  %395 = vst [vmem:[%s2922_s13 + $0xd4] sm:$0xf] %v394_v53  ;;  %397 = vst [vmem:[%s2922_s13 + $0xd8] sm:$0xf] %v396_v54 }
  0x46   : > { %399 = vst [vmem:[%s2922_s13 + $0xdc] sm:$0xf] %v398_v55  ;;  %v400_v56 = vld [vmem:[%s2918_s8 + $0x2a0] sm:$0xf]  ;;  %v402_v57 = vld [vmem:[%s2918_s8 + $0x2ac] sm:$0xf] }
  0x47   : > { %v404_v58 = vld [vmem:[%s2918_s8 + $0x2b8] sm:$0xf]  ;;  %401 = vst [vmem:[%s2922_s13 + $0xe0] sm:$0xf] %v400_v56  ;;  %403 = vst [vmem:[%s2922_s13 + $0xe4] sm:$0xf] %v402_v57 }
  0x48   : > { %405 = vst [vmem:[%s2922_s13 + $0xe8] sm:$0xf] %v404_v58  ;;  %v406_v59 = vld [vmem:[%s2918_s8 + $0x2c4] sm:$0xf]  ;;  %v408_v60 = vld [vmem:[%s2918_s8 + $0x2d0] sm:$0xf] }
  0x49   : > { %v410_v61 = vld [vmem:[%s2918_s8 + $0x2dc] sm:$0xf]  ;;  %407 = vst [vmem:[%s2922_s13 + $0xec] sm:$0xf] %v406_v59  ;;  %409 = vst [vmem:[%s2922_s13 + $0xf0] sm:$0xf] %v408_v60 }
  0x4a   : > { %411 = vst [vmem:[%s2922_s13 + $0xf4] sm:$0xf] %v410_v61  ;;  %v412_v62 = vld [vmem:[%s2918_s8 + $0x2e8] sm:$0xf]  ;;  %v414_v63 = vld [vmem:[%s2918_s8 + $0x2f4] sm:$0xf] }
  0x4b   : > { %v416_v0 = vld [vmem:[%s2918_s8 + $0x300] sm:$0xf]  ;;  %413 = vst [vmem:[%s2922_s13 + $0xf8] sm:$0xf] %v412_v62  ;;  %415 = vst [vmem:[%s2922_s13 + $0xfc] sm:$0xf] %v414_v63 }
  0x4c   : > { %417 = vst [vmem:[%s2922_s13 + $0x100] sm:$0xf] %v416_v0  ;;  %v418_v1 = vld [vmem:[%s2918_s8 + $0x30c] sm:$0xf]  ;;  %v420_v2 = vld [vmem:[%s2918_s8 + $0x318] sm:$0xf] }
  0x4d   : > { %v422_v3 = vld [vmem:[%s2918_s8 + $0x324] sm:$0xf]  ;;  %419 = vst [vmem:[%s2922_s13 + $0x104] sm:$0xf] %v418_v1  ;;  %421 = vst [vmem:[%s2922_s13 + $0x108] sm:$0xf] %v420_v2 }
  0x4e   : > { %423 = vst [vmem:[%s2922_s13 + $0x10c] sm:$0xf] %v422_v3  ;;  %v424_v4 = vld [vmem:[%s2918_s8 + $0x330] sm:$0xf]  ;;  %v426_v5 = vld [vmem:[%s2918_s8 + $0x33c] sm:$0xf] }
  0x4f   : > { %v428_v6 = vld [vmem:[%s2918_s8 + $0x348] sm:$0xf]  ;;  %425 = vst [vmem:[%s2922_s13 + $0x110] sm:$0xf] %v424_v4  ;;  %427 = vst [vmem:[%s2922_s13 + $0x114] sm:$0xf] %v426_v5 }
  0x50   : > { %429 = vst [vmem:[%s2922_s13 + $0x118] sm:$0xf] %v428_v6  ;;  %v430_v7 = vld [vmem:[%s2918_s8 + $0x354] sm:$0xf]  ;;  %v432_v8 = vld [vmem:[%s2918_s8 + $0x360] sm:$0xf] }
  0x51   : > { %v434_v9 = vld [vmem:[%s2918_s8 + $0x36c] sm:$0xf]  ;;  %431 = vst [vmem:[%s2922_s13 + $0x11c] sm:$0xf] %v430_v7  ;;  %433 = vst [vmem:[%s2922_s13 + $0x120] sm:$0xf] %v432_v8 }
  0x52   : > { %435 = vst [vmem:[%s2922_s13 + $0x124] sm:$0xf] %v434_v9  ;;  %v436_v10 = vld [vmem:[%s2918_s8 + $0x378] sm:$0xf]  ;;  %v438_v11 = vld [vmem:[%s2918_s8 + $0x384] sm:$0xf] }
  0x53   : > { %v440_v12 = vld [vmem:[%s2918_s8 + $0x390] sm:$0xf]  ;;  %437 = vst [vmem:[%s2922_s13 + $0x128] sm:$0xf] %v436_v10  ;;  %439 = vst [vmem:[%s2922_s13 + $0x12c] sm:$0xf] %v438_v11 }
  0x54   : > { %441 = vst [vmem:[%s2922_s13 + $0x130] sm:$0xf] %v440_v12  ;;  %v442_v13 = vld [vmem:[%s2918_s8 + $0x39c] sm:$0xf]  ;;  %v444_v14 = vld [vmem:[%s2918_s8 + $0x3a8] sm:$0xf] }
  0x55   : > { %v446_v15 = vld [vmem:[%s2918_s8 + $0x3b4] sm:$0xf]  ;;  %443 = vst [vmem:[%s2922_s13 + $0x134] sm:$0xf] %v442_v13  ;;  %445 = vst [vmem:[%s2922_s13 + $0x138] sm:$0xf] %v444_v14 }
  0x56   : > { %447 = vst [vmem:[%s2922_s13 + $0x13c] sm:$0xf] %v446_v15  ;;  %v448_v16 = vld [vmem:[%s2918_s8 + $0x3c0] sm:$0xf]  ;;  %v450_v17 = vld [vmem:[%s2918_s8 + $0x3cc] sm:$0xf] }
  0x57   : > { %v452_v18 = vld [vmem:[%s2918_s8 + $0x3d8] sm:$0xf]  ;;  %449 = vst [vmem:[%s2922_s13 + $0x140] sm:$0xf] %v448_v16  ;;  %451 = vst [vmem:[%s2922_s13 + $0x144] sm:$0xf] %v450_v17 }
  0x58   : > { %453 = vst [vmem:[%s2922_s13 + $0x148] sm:$0xf] %v452_v18  ;;  %v454_v19 = vld [vmem:[%s2918_s8 + $0x3e4] sm:$0xf]  ;;  %v456_v20 = vld [vmem:[%s2918_s8 + $0x3f0] sm:$0xf] }
  0x59   : > { %v458_v21 = vld [vmem:[%s2918_s8 + $0x3fc] sm:$0xf]  ;;  %455 = vst [vmem:[%s2922_s13 + $0x14c] sm:$0xf] %v454_v19  ;;  %457 = vst [vmem:[%s2922_s13 + $0x150] sm:$0xf] %v456_v20 }
  0x5a   : > { %459 = vst [vmem:[%s2922_s13 + $0x154] sm:$0xf] %v458_v21  ;;  %v460_v22 = vld [vmem:[%s2918_s8 + $0x408] sm:$0xf]  ;;  %v462_v23 = vld [vmem:[%s2918_s8 + $0x414] sm:$0xf] }
  0x5b   : > { %v464_v24 = vld [vmem:[%s2918_s8 + $0x420] sm:$0xf]  ;;  %461 = vst [vmem:[%s2922_s13 + $0x158] sm:$0xf] %v460_v22  ;;  %463 = vst [vmem:[%s2922_s13 + $0x15c] sm:$0xf] %v462_v23 }
  0x5c   : > { %465 = vst [vmem:[%s2922_s13 + $0x160] sm:$0xf] %v464_v24  ;;  %v466_v25 = vld [vmem:[%s2918_s8 + $0x42c] sm:$0xf]  ;;  %v468_v26 = vld [vmem:[%s2918_s8 + $0x438] sm:$0xf] }
  0x5d   : > { %v470_v27 = vld [vmem:[%s2918_s8 + $0x444] sm:$0xf]  ;;  %467 = vst [vmem:[%s2922_s13 + $0x164] sm:$0xf] %v466_v25  ;;  %469 = vst [vmem:[%s2922_s13 + $0x168] sm:$0xf] %v468_v26 }
  0x5e   : > { %471 = vst [vmem:[%s2922_s13 + $0x16c] sm:$0xf] %v470_v27  ;;  %v472_v28 = vld [vmem:[%s2918_s8 + $0x450] sm:$0xf]  ;;  %v474_v29 = vld [vmem:[%s2918_s8 + $0x45c] sm:$0xf] }
  0x5f   : > { %v476_v30 = vld [vmem:[%s2918_s8 + $0x468] sm:$0xf]  ;;  %473 = vst [vmem:[%s2922_s13 + $0x170] sm:$0xf] %v472_v28  ;;  %475 = vst [vmem:[%s2922_s13 + $0x174] sm:$0xf] %v474_v29 }
  0x60   : > { %477 = vst [vmem:[%s2922_s13 + $0x178] sm:$0xf] %v476_v30  ;;  %v478_v31 = vld [vmem:[%s2918_s8 + $0x474] sm:$0xf]  ;;  %v480_v32 = vld [vmem:[%s2918_s8 + $0x480] sm:$0xf] }
  0x61   : > { %v482_v33 = vld [vmem:[%s2918_s8 + $0x48c] sm:$0xf]  ;;  %479 = vst [vmem:[%s2922_s13 + $0x17c] sm:$0xf] %v478_v31  ;;  %481 = vst [vmem:[%s2922_s13 + $0x180] sm:$0xf] %v480_v32 }
  0x62   : > { %483 = vst [vmem:[%s2922_s13 + $0x184] sm:$0xf] %v482_v33  ;;  %v484_v34 = vld [vmem:[%s2918_s8 + $0x498] sm:$0xf]  ;;  %v486_v35 = vld [vmem:[%s2918_s8 + $0x4a4] sm:$0xf] }
  0x63   : > { %v488_v36 = vld [vmem:[%s2918_s8 + $0x4b0] sm:$0xf]  ;;  %485 = vst [vmem:[%s2922_s13 + $0x188] sm:$0xf] %v484_v34  ;;  %487 = vst [vmem:[%s2922_s13 + $0x18c] sm:$0xf] %v486_v35 }
  0x64   : > { %489 = vst [vmem:[%s2922_s13 + $0x190] sm:$0xf] %v488_v36  ;;  %v490_v37 = vld [vmem:[%s2918_s8 + $0x4bc] sm:$0xf]  ;;  %v492_v38 = vld [vmem:[%s2918_s8 + $0x4c8] sm:$0xf] }
  0x65   : > { %v494_v39 = vld [vmem:[%s2918_s8 + $0x4d4] sm:$0xf]  ;;  %491 = vst [vmem:[%s2922_s13 + $0x194] sm:$0xf] %v490_v37  ;;  %493 = vst [vmem:[%s2922_s13 + $0x198] sm:$0xf] %v492_v38 }
  0x66   : > { %495 = vst [vmem:[%s2922_s13 + $0x19c] sm:$0xf] %v494_v39  ;;  %v496_v40 = vld [vmem:[%s2918_s8 + $0x4e0] sm:$0xf]  ;;  %v498_v41 = vld [vmem:[%s2918_s8 + $0x4ec] sm:$0xf] }
  0x67   : > { %v500_v42 = vld [vmem:[%s2918_s8 + $0x4f8] sm:$0xf]  ;;  %497 = vst [vmem:[%s2922_s13 + $0x1a0] sm:$0xf] %v496_v40  ;;  %499 = vst [vmem:[%s2922_s13 + $0x1a4] sm:$0xf] %v498_v41 }
  0x68   : > { %501 = vst [vmem:[%s2922_s13 + $0x1a8] sm:$0xf] %v500_v42  ;;  %v502_v43 = vld [vmem:[%s2918_s8 + $0x504] sm:$0xf]  ;;  %v504_v44 = vld [vmem:[%s2918_s8 + $0x510] sm:$0xf] }
  0x69   : > { %v506_v45 = vld [vmem:[%s2918_s8 + $0x51c] sm:$0xf]  ;;  %503 = vst [vmem:[%s2922_s13 + $0x1ac] sm:$0xf] %v502_v43  ;;  %505 = vst [vmem:[%s2922_s13 + $0x1b0] sm:$0xf] %v504_v44 }
  0x6a   : > { %507 = vst [vmem:[%s2922_s13 + $0x1b4] sm:$0xf] %v506_v45  ;;  %v508_v46 = vld [vmem:[%s2918_s8 + $0x528] sm:$0xf]  ;;  %v510_v47 = vld [vmem:[%s2918_s8 + $0x534] sm:$0xf] }
  0x6b   : > { %v512_v48 = vld [vmem:[%s2918_s8 + $0x540] sm:$0xf]  ;;  %509 = vst [vmem:[%s2922_s13 + $0x1b8] sm:$0xf] %v508_v46  ;;  %511 = vst [vmem:[%s2922_s13 + $0x1bc] sm:$0xf] %v510_v47 }
  0x6c   : > { %513 = vst [vmem:[%s2922_s13 + $0x1c0] sm:$0xf] %v512_v48  ;;  %v514_v49 = vld [vmem:[%s2918_s8 + $0x54c] sm:$0xf]  ;;  %v516_v50 = vld [vmem:[%s2918_s8 + $0x558] sm:$0xf] }
  0x6d   : > { %v518_v51 = vld [vmem:[%s2918_s8 + $0x564] sm:$0xf]  ;;  %515 = vst [vmem:[%s2922_s13 + $0x1c4] sm:$0xf] %v514_v49  ;;  %517 = vst [vmem:[%s2922_s13 + $0x1c8] sm:$0xf] %v516_v50 }
  0x6e   : > { %519 = vst [vmem:[%s2922_s13 + $0x1cc] sm:$0xf] %v518_v51  ;;  %v520_v52 = vld [vmem:[%s2918_s8 + $0x570] sm:$0xf]  ;;  %v522_v53 = vld [vmem:[%s2918_s8 + $0x57c] sm:$0xf] }
  0x6f   : > { %v524_v54 = vld [vmem:[%s2918_s8 + $0x588] sm:$0xf]  ;;  %521 = vst [vmem:[%s2922_s13 + $0x1d0] sm:$0xf] %v520_v52  ;;  %523 = vst [vmem:[%s2922_s13 + $0x1d4] sm:$0xf] %v522_v53 }
  0x70   : > { %525 = vst [vmem:[%s2922_s13 + $0x1d8] sm:$0xf] %v524_v54  ;;  %v526_v55 = vld [vmem:[%s2918_s8 + $0x594] sm:$0xf]  ;;  %v528_v56 = vld [vmem:[%s2918_s8 + $0x5a0] sm:$0xf] }
  0x71   : > { %v530_v57 = vld [vmem:[%s2918_s8 + $0x5ac] sm:$0xf]  ;;  %527 = vst [vmem:[%s2922_s13 + $0x1dc] sm:$0xf] %v526_v55  ;;  %529 = vst [vmem:[%s2922_s13 + $0x1e0] sm:$0xf] %v528_v56 }
  0x72   : > { %531 = vst [vmem:[%s2922_s13 + $0x1e4] sm:$0xf] %v530_v57  ;;  %v532_v58 = vld [vmem:[%s2918_s8 + $0x5b8] sm:$0xf]  ;;  %v534_v59 = vld [vmem:[%s2918_s8 + $0x5c4] sm:$0xf] }
  0x73   : > { %v536_v60 = vld [vmem:[%s2918_s8 + $0x5d0] sm:$0xf]  ;;  %533 = vst [vmem:[%s2922_s13 + $0x1e8] sm:$0xf] %v532_v58  ;;  %535 = vst [vmem:[%s2922_s13 + $0x1ec] sm:$0xf] %v534_v59 }
  0x74   : > { %537 = vst [vmem:[%s2922_s13 + $0x1f0] sm:$0xf] %v536_v60  ;;  %v538_v61 = vld [vmem:[%s2918_s8 + $0x5dc] sm:$0xf]  ;;  %v540_v62 = vld [vmem:[%s2918_s8 + $0x5e8] sm:$0xf] }
  0x75   : > { %v542_v63 = vld [vmem:[%s2918_s8 + $0x5f4] sm:$0xf]  ;;  %539 = vst [vmem:[%s2922_s13 + $0x1f4] sm:$0xf] %v538_v61  ;;  %541 = vst [vmem:[%s2922_s13 + $0x1f8] sm:$0xf] %v540_v62 }
  0x76   : > { %543 = vst [vmem:[%s2922_s13 + $0x1fc] sm:$0xf] %v542_v63 }
  0x77 PF: > { %p2093_p0 = scmp.ge.s32.totalorder %s2779_s30, 1  ;;  %p831_p1 = scmp.lt.s32.totalorder %s2779_s30, 7 }
  0x79   : > { %p832_p2 = pnand %p2093_p0, %p831_p1 }
  0x7a   : > { %s838_s14 = sand.u32 (!%p832_p2), 1, %s2755_s24   ;;  %p894_p3 = scmp.lt.s32.totalorder (!%p832_p2), %s2767_s27, 1 }
  0x7b   : > { %835 = sbr.rel (%p832_p2) target bundleno = 454 (0x1c6), region = 81  ;;  %s2094_s7 = sshll.u32 (!%p832_p2), %s838_s14, 9 }
  0x7c   : > { %s3181_s11 = scalar_lea.vmem (!%p832_p2), [#allocation2], %s2094_s7  ;;  %s3441_s0 = sld [smem:[#allocation6_spill]] (!%p832_p2) }
  0x7d   : > { %v2557_v0 = vld [vmem:[%s3181_s11 + $0xc0] sm:$0xff] (!%p832_p2)   ;;  %v2561_v4 = vld [vmem:[%s3181_s11 + $0xc8] sm:$0xff] (!%p832_p2)   ;;  %v2565_v8 = vld [vmem:[%s3181_s11 + $0xd0] sm:$0xff] (!%p832_p2)   ;;  %p916_p4 = scmp.lt.s32.totalorder (!%p832_p2), %s2763_s26, 2  ;;  %s891_s17 = sand.u32 (!%p832_p2), 1, %s2747_s22  }
  0x7e   : > { %v2558_v1 = vld [vmem:[%s3181_s11 + $0x40] sm:$0xff] (!%p832_p2)   ;;  %2305 = vmatprep.subr.bf16.mxu0 (!%p832_p2), %v2557_v0  ;;  %v2562_v5 = vld [vmem:[%s3181_s11 + $0x48] sm:$0xff] (!%p832_p2)   ;;  %v2566_v9 = vld [vmem:[%s3181_s11 + $0x50] sm:$0xff] (!%p832_p2)  }
  0x7f   : > { %v2559_v2 = vld [vmem:[%s3181_s11 + $0x80] sm:$0xff] (!%p832_p2)   ;;  %2345 = vmatprep.subr.bf16.mxu1 (!%p832_p2), %v2558_v1  ;;  %v2563_v6 = vld [vmem:[%s3181_s11 + $0x88] sm:$0xff] (!%p832_p2)   ;;  %v2567_v10 = vld [vmem:[%s3181_s11 + $0x90] sm:$0xff] (!%p832_p2)  }
  0x80   : > { %v2560_v3 = vld [vmem:[%s3181_s11] sm:$0xff] (!%p832_p2)   ;;  %2306 = vmatpush3.bf16.msra.mxu0 (!%p832_p2), %v2559_v2  ;;  %v2564_v7 = vld [vmem:[%s3181_s11 + $0x8] sm:$0xff] (!%p832_p2)   ;;  %v2568_v11 = vld [vmem:[%s3181_s11 + $0x10] sm:$0xff] (!%p832_p2)  }
  0x81   : > { %2346 = vmatpush3.bf16.msra.mxu1 (!%p832_p2), %v2560_v3  ;;  %2307 = vmatprep.subr.bf16.mxu0 (!%p832_p2), %v2561_v4  ;;  %v2569_v12 = vld [vmem:[%s3181_s11 + $0xd8] sm:$0xff] (!%p832_p2)   ;;  %v2573_v16 = vld [vmem:[%s3181_s11 + $0xe0] sm:$0xff] (!%p832_p2)   ;;  %v2577_v20 = vld [vmem:[%s3181_s11 + $0xe8] sm:$0xff] (!%p832_p2)  }
  0x82   : > { %2347 = vmatprep.subr.bf16.mxu1 %v2562_v5  ;;  %v2570_v13 = vld [vmem:[%s3181_s11 + $0x58] sm:$0xff]   ;;  %v2574_v17 = vld [vmem:[%s3181_s11 + $0x60] sm:$0xff]   ;;  %v2578_v21 = vld [vmem:[%s3181_s11 + $0x68] sm:$0xff]   ;;  %s3208_s24 = scalar_select %p894_p3, %s2767_s27, 1 }
  0x83   : > { %v2571_v14 = vld [vmem:[%s3181_s11 + $0x98] sm:$0xff]   ;;  %v2575_v18 = vld [vmem:[%s3181_s11 + $0xa0] sm:$0xff]   ;;  %v2579_v22 = vld [vmem:[%s3181_s11 + $0xa8] sm:$0xff]  }
  0x84   : > { %2308 = vmatpush3.bf16.msra.mxu0 %v2563_v6  ;;  %v2572_v15 = vld [vmem:[%s3181_s11 + $0x18] sm:$0xff]   ;;  %v2576_v19 = vld [vmem:[%s3181_s11 + $0x20] sm:$0xff]   ;;  %v2580_v23 = vld [vmem:[%s3181_s11 + $0x28] sm:$0xff]   ;;  %s3215_s12 = sshll.u32 %s3208_s24, 6 }
  0x85   : > { %2348 = vmatpush3.bf16.msra.mxu1 %v2564_v7  ;;  %2309 = vmatprep.subr.bf16.mxu0 %v2565_v8  ;;  %v2581_v24 = vld [vmem:[%s3181_s11 + $0xf0] sm:$0xff]   ;;  %v2585_v28 = vld [vmem:[%s3181_s11 + $0xf8] sm:$0xff]   ;;  %s3224_s8 = scalar_lea.vmem %s3431_s1, %s3215_s12  ;;  %s3232_s7 = scalar_lea.vmem %s3441_s0, %s3215_s12  ;;  %v2595_v36 = vld [vmem:[%s3181_s11 + $0x140] sm:$0xff]  }
  0x86   : > { %2349 = vmatprep.subr.bf16.mxu1 %v2566_v9  ;;  %v2582_v25 = vld [vmem:[%s3181_s11 + $0x70] sm:$0xff]   ;;  %v2586_v29 = vld [vmem:[%s3181_s11 + $0x78] sm:$0xff]   ;;  %v2589_v32 = vld [vmem:[%s3224_s8] ss:$8 sps:$4 sm:$0xff]  }
  0x87   : > { %v2583_v26 = vld [vmem:[%s3181_s11 + $0xb0] sm:$0xff]   ;;  %v2587_v30 = vld [vmem:[%s3181_s11 + $0xb8] sm:$0xff]   ;;  %v2591_v33 = vld [vmem:[%s3224_s8 + $0x4] ss:$8 sps:$4 sm:$0xff]  }
  0x88   : > { %2310 = vmatpush3.bf16.msra.mxu0 %v2567_v10  ;;  %v2584_v27 = vld [vmem:[%s3181_s11 + $0x30] sm:$0xff]   ;;  %v2588_v31 = vld [vmem:[%s3181_s11 + $0x38] sm:$0xff]   ;;  %v2592_v34 = vld [vmem:[%s3232_s7] ss:$8 sps:$4 sm:$0xff]   ;;  %1171 = vmatprep.mubr.bf16.mxu0 %v2591_v33 }
  0x89   : > { %2350 = vmatpush3.bf16.msra.mxu1 %v2568_v11  ;;  %2311 = vmatprep.subr.bf16.mxu0 %v2569_v12  ;;  %v2594_v35 = vld [vmem:[%s3232_s7 + $0x4] ss:$8 sps:$4 sm:$0xff]   ;;  %v2603_v44 = vld [vmem:[%s3224_s8 + $0x14] ss:$8 sps:$4 sm:$0xff]   ;;  %v2607_v46 = vld [vmem:[%s3224_s8 + $0x10] ss:$8 sps:$4 sm:$0xff]  }
  0x8a   : > { %2351 = vmatprep.subr.bf16.mxu1 %v2570_v13  ;;  %1372 = vmatprep.mubr.bf16.mxu1 %v2594_v35  ;;  %v2596_v37 = vld [vmem:[%s3181_s11 + $0x1c0] sm:$0xff]   ;;  %v2599_v40 = vld [vmem:[%s3181_s11 + $0x148] sm:$0xff]   ;;  %v2605_v45 = vld [vmem:[%s3232_s7 + $0x14] ss:$8 sps:$4 sm:$0xff]  }
  0x8b   : > { %v2597_v38 = vld [vmem:[%s3181_s11 + $0x100] sm:$0xff]   ;;  %v2600_v41 = vld [vmem:[%s3181_s11 + $0x1c8] sm:$0xff]   ;;  %v2608_v47 = vld [vmem:[%s3232_s7 + $0x10] ss:$8 sps:$4 sm:$0xff]  }
  0x8c   : > { %2312 = vmatpush3.bf16.msra.mxu0 %v2571_v14  ;;  %v2598_v39 = vld [vmem:[%s3181_s11 + $0x180] sm:$0xff]   ;;  %v2601_v42 = vld [vmem:[%s3181_s11 + $0x108] sm:$0xff]   ;;  %v2609_v48 = vld [vmem:[%s3181_s11 + $0x150] sm:$0xff]  }
  0x8d   : > { %2352 = vmatpush3.bf16.msra.mxu1 %v2572_v15  ;;  %2313 = vmatprep.subr.bf16.mxu0 %v2573_v16  ;;  %v2602_v43 = vld [vmem:[%s3181_s11 + $0x188] sm:$0xff]   ;;  %v2610_v49 = vld [vmem:[%s3181_s11 + $0x1d0] sm:$0xff]   ;;  %v2613_v52 = vld [vmem:[%s3181_s11 + $0x158] sm:$0xff]  }
  0x8e   : > { %2353 = vmatprep.subr.bf16.mxu1 %v2574_v17  ;;  %v2611_v50 = vld [vmem:[%s3181_s11 + $0x110] sm:$0xff]   ;;  %v2614_v53 = vld [vmem:[%s3181_s11 + $0x1d8] sm:$0xff]   ;;  %v2617_v56 = vld [vmem:[%s3224_s8 + $0x24] ss:$8 sps:$4 sm:$0xff]  }
  0x8f   : > { %v2612_v51 = vld [vmem:[%s3181_s11 + $0x190] sm:$0xff]   ;;  %v2615_v54 = vld [vmem:[%s3181_s11 + $0x118] sm:$0xff]   ;;  %v2619_v57 = vld [vmem:[%s3232_s7 + $0x24] ss:$8 sps:$4 sm:$0xff]  }
  0x90   : > { %2314 = vmatpush3.bf16.msra.mxu0 %v2575_v18  ;;  %v2616_v55 = vld [vmem:[%s3181_s11 + $0x198] sm:$0xff]   ;;  %v2621_v58 = vld [vmem:[%s3224_s8 + $0x20] ss:$8 sps:$4 sm:$0xff]   ;;  %v2637_v8 = vld [vmem:[%s3181_s11 + $0x170] sm:$0xff]  }
  0x91   : > { %2354 = vmatpush3.bf16.msra.mxu1 %v2576_v19  ;;  %2315 = vmatprep.subr.bf16.mxu0 %v2577_v20  ;;  %v2622_v59 = vld [vmem:[%s3232_s7 + $0x20] ss:$8 sps:$4 sm:$0xff]   ;;  %v2631_v4 = vld [vmem:[%s3224_s8 + $0x34] ss:$8 sps:$4 sm:$0xff]   ;;  %v2635_v6 = vld [vmem:[%s3224_s8 + $0x30] ss:$8 sps:$4 sm:$0xff]   ;;  %s3284_s8 = scalar_lea.vmem %s3432_s2, %s3215_s12 }
  0x92   : > { %2355 = vmatprep.subr.bf16.mxu1 %v2578_v21  ;;  %v2623_v60 = vld [vmem:[%s3181_s11 + $0x160] sm:$0xff]   ;;  %v2627_v0 = vld [vmem:[%s3181_s11 + $0x168] sm:$0xff]   ;;  %v2633_v5 = vld [vmem:[%s3232_s7 + $0x34] ss:$8 sps:$4 sm:$0xff]  }
  0x93   : > { %v2624_v61 = vld [vmem:[%s3181_s11 + $0x1e0] sm:$0xff]   ;;  %v2628_v1 = vld [vmem:[%s3181_s11 + $0x1e8] sm:$0xff]   ;;  %v2636_v7 = vld [vmem:[%s3232_s7 + $0x30] ss:$8 sps:$4 sm:$0xff]   ;;  %s3291_s7 = scalar_lea.vmem %s3433_s3, %s3215_s12 }
  0x94   : > { %2316 = vmatpush3.bf16.msra.mxu0 %v2579_v22  ;;  %v2625_v62 = vld [vmem:[%s3181_s11 + $0x120] sm:$0xff]   ;;  %v2629_v2 = vld [vmem:[%s3181_s11 + $0x128] sm:$0xff]   ;;  %v2638_v9 = vld [vmem:[%s3181_s11 + $0x1f0] sm:$0xff]   ;;  %s917_s12 = scalar_select %p916_p4, %s2763_s26, 2 }
  0x95   : > { %2356 = vmatpush3.bf16.msra.mxu1 %v2580_v23  ;;  %2317 = vmatprep.subr.bf16.mxu0 %v2581_v24  ;;  %v2626_v63 = vld [vmem:[%s3181_s11 + $0x1a0] sm:$0xff]   ;;  %v2630_v3 = vld [vmem:[%s3181_s11 + $0x1a8] sm:$0xff]   ;;  %v2639_v10 = vld [vmem:[%s3181_s11 + $0x130] sm:$0xff]  }
  0x96   : > { %2357 = vmatprep.subr.bf16.mxu1 %v2582_v25  ;;  %v2640_v11 = vld [vmem:[%s3181_s11 + $0x1b0] sm:$0xff]   ;;  %v2641_v12 = vld [vmem:[%s3181_s11 + $0x178] sm:$0xff]   ;;  %v2645_v16 = vld [vmem:[%s3284_s8] ss:$8 sps:$4 sm:$0xff]  }
  0x97   : > { %v2642_v13 = vld [vmem:[%s3181_s11 + $0x1f8] sm:$0xff]   ;;  %v2647_v17 = vld [vmem:[%s3284_s8 + $0x4] ss:$8 sps:$4 sm:$0xff]   ;;  %v2648_v18 = vld [vmem:[%s3291_s7] ss:$8 sps:$4 sm:$0xff]  }
  0x98   : > { %2318 = vmatpush3.bf16.msra.mxu0 %v2583_v26  ;;  %v2643_v14 = vld [vmem:[%s3181_s11 + $0x138] sm:$0xff]   ;;  %v2650_v19 = vld [vmem:[%s3291_s7 + $0x4] ss:$8 sps:$4 sm:$0xff]   ;;  %v2661_v26 = vld [vmem:[%s3284_s8 + $0x20] ss:$8 sps:$4 sm:$0xff]  }
  0x99   : > { %2358 = vmatpush3.bf16.msra.mxu1 %v2584_v27  ;;  %2319 = vmatprep.subr.bf16.mxu0 %v2585_v28  ;;  %v2644_v15 = vld [vmem:[%s3181_s11 + $0x1b8] sm:$0xff]   ;;  %v2657_v23 = vld [vmem:[%s3284_s8 + $0x24] ss:$8 sps:$4 sm:$0xff]   ;;  %v2662_v28 = vld [vmem:[%s3291_s7 + $0x20] ss:$8 sps:$4 sm:$0xff]   ;;  %s2465_s11 = smul.u32 3, %s3208_s24 }
  0x9a   : > { %2359 = vmatprep.subr.bf16.mxu1 %v2586_v29  ;;  %v2651_v20 = vld [vmem:[%s3284_s8 + $0x14] ss:$8 sps:$4 sm:$0xff]   ;;  %v2655_v22 = vld [vmem:[%s3284_s8 + $0x10] ss:$8 sps:$4 sm:$0xff]   ;;  %v2659_v25 = vld [vmem:[%s3291_s7 + $0x24] ss:$8 sps:$4 sm:$0xff]  }
  0x9b   : > { %v2653_v21 = vld [vmem:[%s3291_s7 + $0x14] ss:$8 sps:$4 sm:$0xff]   ;;  %v2656_v24 = vld [vmem:[%s3291_s7 + $0x10] ss:$8 sps:$4 sm:$0xff]   ;;  %s919_s16 = sadd.s32 %s2465_s11, %s917_s12  ;;  %s2466_s11 = smul.u32 24, %s2767_s27 }
  0x9c   : > { %2320 = vmatpush3.bf16.msra.mxu0 %v2587_v30  ;;  %v2663_v27 = vld [vmem:[%s3284_s8 + $0x34] ss:$8 sps:$4 sm:$0xff]   ;;  %v2667_v30 = vld [vmem:[%s3284_s8 + $0x30] ss:$8 sps:$4 sm:$0xff]   ;;  %s920_s14 = scalar_lea.vmem %s3435_s5, %s919_s16 }
  0x9d   : > { %2360 = vmatpush3.bf16.msra.mxu1 %v2588_v31  ;;  %2385 = vmatprep.subr.bf16.mxu0 %v2595_v36  ;;  %v2665_v29 = vld [vmem:[%s3291_s7 + $0x34] ss:$8 sps:$4 sm:$0xff]   ;;  %v2668_v31 = vld [vmem:[%s3291_s7 + $0x30] ss:$8 sps:$4 sm:$0xff]   ;;  %s2095_s7 = sshll.u32 %s891_s17, 6  ;;  %s1940_s12 = sadd.s32 %s2763_s26, %s2466_s11 }
  0x9e   : > { %2425 = vmatprep.subr.bf16.mxu1 %v2596_v37  ;;  %s3337_s24 = scalar_lea.vmem [#allocation3], %s2095_s7  ;;  %s2298_s16 = sshll.u32 %s1940_s12, 7 }
  0x9f   : > { %1172 = vmatmul.mubr.bf16.vlgmr.msra.gmra.mrb[0].mxu0 %v2589_v32  ;;  %s1943_s27 = sshll.u32 %s3337_s24, 4  ;;  %s3367_s13 = scalar_lea.hbm %s3436_s6, %s2298_s16  ;;  %s3359_s27 = int_to_ptr.vmem [resolvable:$true] %s1943_s27 }
  0xa0   : > { %1373 = vmatmul.mubr.bf16.vlgmr.msra.gmra.mrb[0].mxu1 %v2592_v34  ;;  %2386 = vmatpush3.bf16.msra.mxu0 %v2597_v38  ;;  %s2669_s7 = scalar_lea.vmem %s3359_s27, 1024  ;;  %s2781_s11 = smov [#allocation3]  }
  0xa1   : > { %2426 = vmatpush3.bf16.msra.mxu1 %v2598_v39  ;;  %2387 = vmatprep.subr.bf16.mxu0 %v2599_v40  ;;  %p2670_p5 = scmp.ne.s32.totalorder %s3359_s27, %s2669_s7  ;;  %s2673_s12 = sshll.u32 %s2781_s11, 4  ;;  %s2674_s12 = int_to_ptr.vmem [resolvable:$false] %s2673_s12 }
  0xa2   : > { %2427 = vmatprep.subr.bf16.mxu1 %v2600_v41  ;;  %1179 = vmatprep.mubr.bf16.mxu0 %v2603_v44  ;;  %s2675_s0 = scalar_lea.vmem %s2674_s12, 2048  ;;  %p2676_p8 = scmp.lt.s32.totalorder %s3359_s27, %s2674_s12 }
  0xa3   : > { %1380 = vmatprep.mubr.bf16.mxu1 %v2605_v45  ;;  %p2671_p6 = pnand %p2670_p5, %p2899_p10  ;;  %p2677_p9 = scmp.lt.s32.totalorder %s2675_s0, %s2669_s7 }
  0xa4   : > { %2388 = vmatpush3.bf16.msra.mxu0 %v2601_v42 }
  0xa5   : > { %2428 = vmatpush3.bf16.msra.mxu1 %v2602_v43  ;;  %2389 = vmatprep.subr.bf16.mxu0 %v2609_v48  ;;  %p2672_p7 = pneg %p2671_p6  ;;  %p2678_p11 = por %p2677_p9, %p2676_p8 }
  0xa6   : > { %2429 = vmatprep.subr.bf16.mxu1 %v2610_v49 }
  0xa7   : > { %1180 = vmatmul.mubr.bf16.gmra.mrb[4].mxu0 %v2607_v46  ;;  %p2679_p13 = pnand %p2678_p11, %p2672_p7 }
  0xa8   : > { %1381 = vmatmul.mubr.bf16.gmra.mrb[4].mxu1 %v2608_v47  ;;  %2390 = vmatpush3.bf16.msra.mxu0 %v2611_v50 }
  0xa9   : > { %2430 = vmatpush3.bf16.msra.mxu1 %v2612_v51  ;;  %2391 = vmatprep.subr.bf16.mxu0 %v2613_v52 }
  0xaa   : > { %2431 = vmatprep.subr.bf16.mxu1 %v2614_v53  ;;  %1187 = vmatprep.mubr.bf16.mxu0 %v2617_v56 }
  0xab   : > { %1388 = vmatprep.mubr.bf16.mxu1 %v2619_v57 }
  0xac   : > { %2392 = vmatpush3.bf16.msra.mxu0 %v2615_v54 }
  0xad   : > { %2432 = vmatpush3.bf16.msra.mxu1 %v2616_v55  ;;  %2393 = vmatprep.subr.bf16.mxu0 %v2623_v60 }
  0xae   : > { %2433 = vmatprep.subr.bf16.mxu1 %v2624_v61 }
  0xaf   : > { %1188 = vmatmul.mubr.bf16.gmra.mrb[8].mxu0 %v2621_v58 }
  0xb0   : > { %1389 = vmatmul.mubr.bf16.gmra.mrb[8].mxu1 %v2622_v59  ;;  %2394 = vmatpush3.bf16.msra.mxu0 %v2625_v62 }
  0xb1   : > { %2434 = vmatpush3.bf16.msra.mxu1 %v2626_v63  ;;  %2395 = vmatprep.subr.bf16.mxu0 %v2627_v0 }
  0xb2   : > { %2435 = vmatprep.subr.bf16.mxu1 %v2628_v1  ;;  %1195 = vmatprep.mubr.bf16.mxu0 %v2631_v4 }
  0xb3   : > { %1396 = vmatprep.mubr.bf16.mxu1 %v2633_v5 }
  0xb4   : > { %2396 = vmatpush3.bf16.msra.mxu0 %v2629_v2 }
  0xb5   : > { %2436 = vmatpush3.bf16.msra.mxu1 %v2630_v3  ;;  %2397 = vmatprep.subr.bf16.mxu0 %v2637_v8 }
  0xb6   : > { %2437 = vmatprep.subr.bf16.mxu1 %v2638_v9 }
  0xb7   : > { %1196 = vmatmul.mubr.bf16.gmra.mrb[12].mxu0 %v2635_v6 }
  0xb8   : > { %1397 = vmatmul.mubr.bf16.gmra.mrb[12].mxu1 %v2636_v7  ;;  %2398 = vmatpush3.bf16.msra.mxu0 %v2639_v10 }
  0xb9   : > { %2438 = vmatpush3.bf16.msra.mxu1 %v2640_v11  ;;  %2399 = vmatprep.subr.bf16.mxu0 %v2641_v12 }
  0xba   : > { %2439 = vmatprep.subr.bf16.mxu1 %v2642_v13  ;;  %1614 = vmatprep.mubr.bf16.mxu0 %v2647_v17 }
  0xbb   : > { %1864 = vmatprep.mubr.bf16.mxu1 %v2650_v19 }
  0xbc   : > { %2400 = vmatpush3.bf16.msra.mxu0 %v2643_v14 }
  0xbd   : > { %2440 = vmatpush3.bf16.msra.mxu1 %v2644_v15 }
  0xbf   : > { %1615 = vmatmul.mubr.bf16.vlgmr.msra.gmra.mrb[16].mxu0 %v2645_v16 }
  0xc0   : > { %1865 = vmatmul.mubr.bf16.vlgmr.msra.gmra.mrb[16].mxu1 %v2648_v18  ;;  %1622 = vmatprep.mubr.bf16.mxu0 %v2651_v20 }
  0xc1   : > { %1872 = vmatprep.mubr.bf16.mxu1 %v2653_v21 }
  0xc7   : > { %1623 = vmatmul.mubr.bf16.gmra.mrb[20].mxu0 %v2655_v22 }
  0xc8   : > { %1630 = vmatprep.mubr.bf16.mxu0 %v2657_v23  ;;  %1873 = vmatmul.mubr.bf16.gmra.mrb[20].mxu1 %v2656_v24 }
  0xc9   : > { %1880 = vmatprep.mubr.bf16.mxu1 %v2659_v25 }
  0xcf   : > { %1631 = vmatmul.mubr.bf16.gmra.mrb[24].mxu0 %v2661_v26 }
  0xd0   : > { %1638 = vmatprep.mubr.bf16.mxu0 %v2663_v27  ;;  %1881 = vmatmul.mubr.bf16.gmra.mrb[24].mxu1 %v2662_v28 }
  0xd1   : > { %1888 = vmatprep.mubr.bf16.mxu1 %v2665_v29 }
  0xd7   : > { %1639 = vmatmul.mubr.bf16.gmra.mrb[28].mxu0 %v2667_v30 }
  0xd8   : > { %1889 = vmatmul.mubr.bf16.gmra.mrb[28].mxu1 %v2668_v31 }
 0x172   : > { %v2321_v32 = vpop.f32.mrb[0].mxu0 }
 0x173   : > { %v2361_v33 = vpop.f32.mrb[0].mxu1  ;;  %v2322_v34 = vpop.f32.mrb[1].mxu0 }
 0x174   : > { %v2323_v35 = vadd.f32 %v2322_v34, %v2321_v32  ;;  %v2362_v36 = vpop.f32.mrb[1].mxu1  ;;  %v2324_v37 = vpop.f32.mrb[2].mxu0 }
 0x175   : > { %v2363_v38 = vadd.f32 %v2362_v36, %v2361_v33  ;;  %v2364_v39 = vpop.f32.mrb[2].mxu1  ;;  %v2325_v40 = vpop.f32.mrb[3].mxu0 }
 0x176   : > { %v2326_v41 = vadd.f32 %v2325_v40, %v2324_v37  ;;  %v2365_v42 = vpop.f32.mrb[3].mxu1 }
 0x177   : > { %v1375_v43 = vadd.f32 %v2363_v38, %v2323_v35  ;;  %v2366_v44 = vadd.f32 %v2365_v42, %v2364_v39  ;;  %v3333_v35 = vld [vmem:[%s920_s14] ss:$0 sm:$0xff]  ;;  %s3372_s14 = scalar_lea.sflag [#allocation4], %s891_s17 }
 0x179   : > { %v3310_v45 = vadd.f32 %v2366_v44, %v2326_v41 }
 0x17a   : > { %v2327_v46 = vpop.f32.mrb[4].mxu0 }
 0x17b   : > { %v2367_v47 = vpop.f32.mrb[4].mxu1  ;;  %v2328_v48 = vpop.f32.mrb[5].mxu0 }
 0x17c   : > { %v2329_v49 = vadd.f32 %v2328_v48, %v2327_v46  ;;  %v2368_v50 = vpop.f32.mrb[5].mxu1  ;;  %v2330_v51 = vpop.f32.mrb[6].mxu0 }
 0x17d   : > { %v2369_v52 = vadd.f32 %v2368_v50, %v2367_v47  ;;  %v2370_v53 = vpop.f32.mrb[6].mxu1  ;;  %v2331_v54 = vpop.f32.mrb[7].mxu0 }
 0x17e   : > { %v2332_v55 = vadd.f32 %v2331_v54, %v2330_v51  ;;  %v2371_v56 = vpop.f32.mrb[7].mxu1 }
 0x17f   : > { %v3312_v57 = vadd.f32 %v2369_v52, %v2329_v49  ;;  %v2372_v58 = vadd.f32 %v2371_v56, %v2370_v53 }
 0x181   : > { %v3314_v59 = vadd.f32 %v2372_v58, %v2332_v55 }
 0x182   : > { %v2333_v60 = vpop.f32.mrb[8].mxu0 }
 0x183   : > { %v2373_v61 = vpop.f32.mrb[8].mxu1  ;;  %v2334_v62 = vpop.f32.mrb[9].mxu0 }
 0x184   : > { %v2335_v63 = vadd.f32 %v2334_v62, %v2333_v60  ;;  %v2374_v0 = vpop.f32.mrb[9].mxu1  ;;  %v2336_v1 = vpop.f32.mrb[10].mxu0 }
 0x185   : > { %v2375_v2 = vadd.f32 %v2374_v0, %v2373_v61  ;;  %v2376_v3 = vpop.f32.mrb[10].mxu1  ;;  %v2337_v4 = vpop.f32.mrb[11].mxu0 }
 0x186   : > { %v2338_v5 = vadd.f32 %v2337_v4, %v2336_v1  ;;  %v2377_v6 = vpop.f32.mrb[11].mxu1 }
 0x187   : > { %v3316_v7 = vadd.f32 %v2375_v2, %v2335_v63  ;;  %v2378_v8 = vadd.f32 %v2377_v6, %v2376_v3 }
 0x189   : > { %v3318_v9 = vadd.f32 %v2378_v8, %v2338_v5 }
 0x18a   : > { %v2339_v10 = vpop.f32.mrb[12].mxu0 }
 0x18b   : > { %v2379_v11 = vpop.f32.mrb[12].mxu1  ;;  %v2340_v12 = vpop.f32.mrb[13].mxu0 }
 0x18c   : > { %v2380_v13 = vpop.f32.mrb[13].mxu1  ;;  %v2341_v14 = vadd.f32 %v2340_v12, %v2339_v10  ;;  %v2342_v16 = vpop.f32.mrb[14].mxu0 }
 0x18d   : > { %v2381_v15 = vadd.f32 %v2380_v13, %v2379_v11  ;;  %v2382_v17 = vpop.f32.mrb[14].mxu1  ;;  %v2343_v18 = vpop.f32.mrb[15].mxu0 }
 0x18e   : > { %v2383_v19 = vpop.f32.mrb[15].mxu1  ;;  %v2344_v21 = vadd.f32 %v2343_v18, %v2342_v16 }
 0x18f   : > { %v3321_v20 = vadd.f32 %v2381_v15, %v2341_v14  ;;  %v2384_v22 = vadd.f32 %v2383_v19, %v2382_v17 }
 0x191   : > { %v3325_v23 = vadd.f32 %v2384_v22, %v2344_v21 }
 0x192   : > { %v2401_v24 = vpop.f32.mrb[16].mxu0 }
 0x193   : > { %v2402_v25 = vpop.f32.mrb[17].mxu0  ;;  %v2441_v26 = vpop.f32.mrb[16].mxu1 }
 0x194   : > { %v2403_v27 = vadd.f32 %v2402_v25, %v2401_v24  ;;  %v2404_v28 = vpop.f32.mrb[18].mxu0  ;;  %v2442_v29 = vpop.f32.mrb[17].mxu1 }
 0x195   : > { %v2405_v30 = vpop.f32.mrb[19].mxu0  ;;  %v2443_v32 = vadd.f32 %v2442_v29, %v2441_v26  ;;  %v2444_v33 = vpop.f32.mrb[18].mxu1 }
 0x196   : > { %v1647_v31 = vadd.f32 %v2403_v27, %v1375_v43  ;;  %v2406_v34 = vadd.f32 %v2405_v30, %v2404_v28  ;;  %v2445_v36 = vpop.f32.mrb[19].mxu1 }
 0x197   : > { %v2446_v39 = vadd.f32 %v2445_v36, %v2444_v33 }
 0x198   : > { %v1897_v37 = vadd.f32 %v2443_v32, %v1647_v31  ;;  %v1648_v38 = vadd.f32 %v2406_v34, %v3310_v45 }
 0x19a   : > { %v1912_v40 = vadd.f32 %v3333_v35, %v1897_v37  ;;  %v1898_v41 = vadd.f32 %v2446_v39, %v1648_v38  ;;  %v2407_v42 = vpop.f32.mrb[20].mxu0 }
 0x19b   : > { %v2408_v44 = vpop.f32.mrb[21].mxu0  ;;  %v2447_v46 = vpop.f32.mrb[20].mxu1 }
 0x19c   : > { %1920 = vst [vmem:[%s3337_s24] sm:$0xff] %v1912_v40  ;;  %v1913_v43 = vadd.f32 %v3333_v35, %v1898_v41  ;;  %v2409_v47 = vadd.f32 %v2408_v44, %v2407_v42  ;;  %v2410_v48 = vpop.f32.mrb[22].mxu0  ;;  %v2448_v49 = vpop.f32.mrb[21].mxu1 }
 0x19d   : > { %v2411_v50 = vpop.f32.mrb[23].mxu0  ;;  %v2449_v51 = vadd.f32 %v2448_v49, %v2447_v46  ;;  %v2450_v52 = vpop.f32.mrb[22].mxu1 }
 0x19e   : > { %1921 = vst [vmem:[%s3337_s24 + $0x8] sm:$0xff] %v1913_v43  ;;  %v1649_v45 = vadd.f32 %v2409_v47, %v3312_v57  ;;  %v2412_v53 = vadd.f32 %v2411_v50, %v2410_v48  ;;  %v2451_v54 = vpop.f32.mrb[23].mxu1 }
 0x19f   : > { %v2452_v58 = vadd.f32 %v2451_v54, %v2450_v52 }
 0x1a0   : > { %v1899_v55 = vadd.f32 %v2449_v51, %v1649_v45  ;;  %v1650_v56 = vadd.f32 %v2412_v53, %v3314_v59 }
 0x1a2   : > { %v1914_v60 = vadd.f32 %v3333_v35, %v1899_v55  ;;  %v1900_v61 = vadd.f32 %v2452_v58, %v1650_v56  ;;  %v2413_v62 = vpop.f32.mrb[24].mxu0 }
 0x1a3   : > { %v2414_v63 = vpop.f32.mrb[25].mxu0  ;;  %v2453_v1 = vpop.f32.mrb[24].mxu1 }
 0x1a4   : > { %1922 = vst [vmem:[%s3337_s24 + $0x10] sm:$0xff] %v1914_v60  ;;  %v1915_v0 = vadd.f32 %v3333_v35, %v1900_v61  ;;  %v2415_v2 = vadd.f32 %v2414_v63, %v2413_v62  ;;  %v2416_v57 = vpop.f32.mrb[26].mxu0  ;;  %v2454_v3 = vpop.f32.mrb[25].mxu1 }
 0x1a5   : > { %v2417_v4 = vpop.f32.mrb[27].mxu0  ;;  %v2455_v59 = vadd.f32 %v2454_v3, %v2453_v1  ;;  %v2456_v6 = vpop.f32.mrb[26].mxu1 }
 0x1a6   : > { %1923 = vst [vmem:[%s3337_s24 + $0x18] sm:$0xff] %v1915_v0  ;;  %v1651_v5 = vadd.f32 %v2415_v2, %v3316_v7  ;;  %v2418_v8 = vadd.f32 %v2417_v4, %v2416_v57  ;;  %v2457_v10 = vpop.f32.mrb[27].mxu1 }
 0x1a7   : > { %v2458_v13 = vadd.f32 %v2457_v10, %v2456_v6 }
 0x1a8   : > { %v1901_v11 = vadd.f32 %v2455_v59, %v1651_v5  ;;  %v1652_v12 = vadd.f32 %v2418_v8, %v3318_v9 }
 0x1aa   : > { %v1916_v14 = vadd.f32 %v3333_v35, %v1901_v11  ;;  %v1902_v15 = vadd.f32 %v2458_v13, %v1652_v12  ;;  %v2419_v16 = vpop.f32.mrb[28].mxu0 }
 0x1ab   : > { %v2420_v17 = vpop.f32.mrb[29].mxu0  ;;  %v2459_v18 = vpop.f32.mrb[28].mxu1 }
 0x1ac   : > { %1924 = vst [vmem:[%s3337_s24 + $0x20] sm:$0xff] %v1916_v14  ;;  %v1917_v7 = vadd.f32 %v3333_v35, %v1902_v15  ;;  %v2421_v19 = vadd.f32 %v2420_v17, %v2419_v16  ;;  %v2422_v21 = vpop.f32.mrb[30].mxu0  ;;  %v2460_v22 = vpop.f32.mrb[29].mxu1 }
 0x1ad   : > { %v2423_v24 = vpop.f32.mrb[31].mxu0  ;;  %v2461_v25 = vadd.f32 %v2460_v22, %v2459_v18  ;;  %v2462_v26 = vpop.f32.mrb[30].mxu1 }
 0x1ae   : > { %1925 = vst [vmem:[%s3337_s24 + $0x28] sm:$0xff] %v1917_v7  ;;  %v1653_v9 = vadd.f32 %v2421_v19, %v3321_v20  ;;  %v2424_v27 = vadd.f32 %v2423_v24, %v2422_v21  ;;  %v2463_v28 = vpop.f32.mrb[31].mxu1 }
 0x1af   : > { %v2464_v31 = vadd.f32 %v2463_v28, %v2462_v26 }
 0x1b0   : > { %v1903_v29 = vadd.f32 %v2461_v25, %v1653_v9  ;;  %v1654_v30 = vadd.f32 %v2424_v27, %v3325_v23 }
 0x1b2   : > { %v1918_v20 = vadd.f32 %v3333_v35, %v1903_v29  ;;  %v1904_v32 = vadd.f32 %v2464_v31, %v1654_v30 }
 0x1b4   : > { %1926 = vst [vmem:[%s3337_s24 + $0x30] sm:$0xff] %v1918_v20  ;;  %v1919_v33 = vadd.f32 %v3333_v35, %v1904_v32 }
 0x1b6   : > { %1927 = vst [vmem:[%s3337_s24 + $0x38] sm:$0xff] %v1919_v33 }
 0x1b7   : > { %2682 = shalt.err (!%p2679_p13)
}
 0x1b8   : > { %s2683_s17 = scalar_lea.hbm %s3367_s13, 1024  ;;  %s2687_s26 = scalar_lea.hbm %s3436_s6, 6144 }
 0x1b9   : > { %p2684_p0 = scmp.ne.s32.totalorder %s3367_s13, %s2683_s17  ;;  %p2688_p3 = scmp.lt.u32.totalorder %s3367_s13, %s3436_s6 }
 0x1ba   : > { %p2689_p4 = scmp.lt.u32.totalorder %s2687_s26, %s2683_s17  ;;  %p2691_p6 = scmp.lt.u32.totalorder %s2683_s17, %s3367_s13 }
 0x1bb   : > { %p2685_p1 = pnand %p2684_p0, %p2899_p10 }
 0x1bc   : > { %p2690_p5 = por %p2689_p4, %p2688_p3 }
 0x1bd   : > { %p2686_p2 = pneg %p2685_p1 }
 0x1be   : > { %p2692_p7 = por %p2691_p6, %p2690_p5 }
 0x1c0   : > { %p2693_p8 = pnand %p2692_p7, %p2686_p2 }
 0x1c2   : > { %2696 = shalt.err (!%p2693_p8)
}
 0x1c3   : > { %s2782_s0 = smov 128   ;;  %s2783_s7 = smov 384  }
 0x1c4   : > { %s2784_s12 = smov 8  }
 0x1c5   : > { %2467 = dma.vmem_to_hbm [thread:$0]  (%p2899_p10), %s3359_s27, 1024, %s3367_s13, %s3372_s14, %s2782_s0, %s2783_s7, %s2784_s12  }
 0x1c6 PF: > { %p2473_p9 = scmp.ge.s32.totalorder %s2779_s30, 2  ;;  %s1958_s24 = sand.u32 1, %s2743_s21  }
 0x1c7   : > { %s1959_s17 = scalar_lea.sflag [#allocation4], %s1958_s24 }
 0x1c8   : > { %p2470_p11 = pnand %p2473_p9, %p2906_p12 }
 0x1ca   : > { %2738 = dma.done.wait (!%p2470_p11), %s1959_s17, 1024  }
 0x1cb   : > { %2740 = vsyncadd (!%p2470_p11), %s1959_s17, 4294966272  ;;  %s19_s30 = sadd.s32 1, %s2779_s30   ;;  %s3442_s21 = smov %s2747_s22 }
 0x1cc   : > { %p16_p13 = scmp.ge.s32.totalorder %s19_s30, 8   ;;  %s3443_s22 = smov %s2751_s23 }
 0x1cd   : > { %s3444_s23 = smov %s2904_s19  ;;  %s3445_s24 = smov %s2759_s25 }
 0x1ce   : > { %s3446_s25 = smov %s2893_s15  ;;  %s3447_s26 = smov %s2771_s28 }
 0x1cf   : > { %s3448_s27 = smov %s2775_s29  ;;  %s3449_s28 = smov %s3452_s9 }
 0x1d0   : > { %s3450_s29 = smov %s3456_s10  ;;  %18 = sbr.rel (!%p16_p13) target bundleno = 8 (0x8), region = 143 }
 0x1d7   :  { %1964 = vsyncpa [#allocation4], 1 }
 0x1d8   :  { %1966 = vsyncpa [#allocation4 + $0x1], 1 }

</bundles_post_ra>
